<compile_context>
chip_gen: v7x
topology: tpu7x:2x2x1
jax: 0.10.0
libtpu: 0.0.40
codegen_flags: <defaults>
</compile_context>

<pallas_src>
import functools
import math

import jax
import jax.numpy as jnp
from jax import lax
from jax.experimental import pallas as pl
from jax.experimental.pallas import tpu as pltpu


def _round_up(x, m):
    return (x + m - 1) // m * m


_P1W = 18                                              # padded pooled-conv1 width (14 + 2*2)
_CONV2_OFFSETS = tuple(di * _P1W + dj for di in range(5) for dj in range(5))
_Y2_ROWS = 256                                         # conv2 rows computed (q = a*18+b <= 247)
_A2_ROWS = 336                                         # >= 256 + max tap offset (76), mult. of 8


# ----------------------------------------------------------------------------
# Kernel A: conv1 + ReLU + pool + conv2 + ReLU + pool (one image per program)
# ----------------------------------------------------------------------------

def _conv_stage_kernel(x1_ref, w1_ref, b1_ref, w2_ref, b2_ref, o_ref,
                       a2_scr, ya_scr):
    # ---- conv1: one K=25 MXU matmul per 2x2-pool window tap; pool = max of 4 ----
    w1 = w1_ref[...]
    y1 = jnp.dot(x1_ref[0, 0], w1, preferred_element_type=jnp.float32)
    for t in range(1, 4):
        y1 = jnp.maximum(
            y1, jnp.dot(x1_ref[0, t], w1, preferred_element_type=jnp.float32))
    p1 = jnp.maximum(y1 + b1_ref[...], 0.0)            # (196, 32) pooled conv1, f32

    # ---- build conv2's zero-padded flat input in VMEM (no XLA pad pass) ----
    a2_scr[...] = jnp.zeros_like(a2_scr)
    for oi in range(14):
        r0 = (oi + 2) * _P1W + 2
        a2_scr[r0:r0 + 14, :] = p1[oi * 14:(oi + 1) * 14, :]

    # ---- conv2: 25 contiguous row-shifted slab matmuls, value-accumulated f32 ----
    y2 = None
    for t, off in enumerate(_CONV2_OFFSETS):
        slab = a2_scr[off:off + _Y2_ROWS, :].astype(jnp.bfloat16)
        d = jnp.dot(slab, w2_ref[t], preferred_element_type=jnp.float32)
        y2 = d if y2 is None else y2 + d               # (256, 64)

    # ---- fused 2x2 max-pool + bias + ReLU, stored as a 448-lane row slab ----
    yb = jnp.maximum(y2[0:250, :], y2[1:251, :])        # pool width pairs
    ya = jnp.maximum(yb[0:232, :], yb[18:250, :])       # pool height pairs
    ya_scr[...] = ya                                    # 2x2 max at every q = a*18+b
    # valid pooled windows sit at q = 36*oa + 2*ob -> 7 strided row reads
    pieces = [ya_scr[pl.ds(36 * oa, 7, 2), :] for oa in range(7)]   # (7, 64) each
    out = jnp.concatenate(pieces, axis=1)               # (7, 448): [ob, oa*64 + c]
    out = jnp.maximum(out + b2_ref[...], 0.0)
    o_ref[0] = out.astype(o_ref.dtype)


def conv_stage(patches, params):
    n = patches.shape[0]
    flops = n * (2 * 4 * 196 * 25 * 32 + 2 * _Y2_ROWS * 25 * 32 * 64)
    bytes_accessed = (patches.size * 4 + 25 * 32 * 4 + 25 * 32 * 64 * 2
                      + n * 7 * 448 * 2)
    return pl.pallas_call(
        _conv_stage_kernel,
        out_shape=jax.ShapeDtypeStruct((n, 7, 448), jnp.bfloat16),
        grid=(n,),
        in_specs=[
            pl.BlockSpec((1, 4, 196, 25), lambda i: (i, 0, 0, 0)),
            pl.BlockSpec((25, 32), lambda i: (0, 0)),
            pl.BlockSpec((1, 32), lambda i: (0, 0)),
            pl.BlockSpec((25, 32, 64), lambda i: (0, 0, 0)),
            pl.BlockSpec((1, 448), lambda i: (0, 0)),
        ],
        out_specs=pl.BlockSpec((1, 7, 448), lambda i: (i, 0, 0)),
        scratch_shapes=[
            pltpu.VMEM((_A2_ROWS, 32), jnp.float32),    # padded conv2 input
            pltpu.VMEM((232, 64), jnp.float32),         # pooled-window staging
        ],
        compiler_params=pltpu.CompilerParams(dimension_semantics=("parallel",)),
        cost_estimate=pl.CostEstimate(flops=flops, transcendentals=0,
                                      bytes_accessed=bytes_accessed),
    )(patches, params['conv1_w'], params['conv1_b'],
      params['conv2_w'], params['conv2_b'])


# ----------------------------------------------------------------------------
# Kernel B: fc1 + ReLU (tiled over fc1 columns) with a fused fc2 epilogue
# ----------------------------------------------------------------------------

def _fc_kernel(feat_ref, w1_ref, b1_ref, w2_ref, b2_ref, out_ref, h_scr, *,
               nsplit):
    j = pl.program_id(0)
    h = jnp.dot(feat_ref[...], w1_ref[...], preferred_element_type=jnp.float32)
    h = jnp.maximum(h + b1_ref[...], 0.0)
    h_scr[j] = h.astype(h_scr.dtype)

    @pl.when(j == nsplit - 1)
    def _():
        logits = jnp.dot(h_scr[0], w2_ref[0], preferred_element_type=jnp.float32)
        for s in range(1, nsplit):
            logits = logits + jnp.dot(h_scr[s], w2_ref[s],
                                      preferred_element_type=jnp.float32)
        out_ref[...] = logits + b2_ref[...]


def fc_stage(feat, params, nsplit=4):
    mp, kdim = feat.shape
    csz = 1024 // nsplit
    flops = 2 * mp * kdim * 1024 + 2 * mp * 1024 * 128
    bytes_accessed = (feat.size * 2 + kdim * 1024 * 2 + 1024 * 128 * 2
                      + mp * 128 * 4)
    return pl.pallas_call(
        functools.partial(_fc_kernel, nsplit=nsplit),
        out_shape=jax.ShapeDtypeStruct((mp, 128), jnp.float32),
        grid=(nsplit,),
        in_specs=[
            pl.BlockSpec((mp, kdim), lambda j: (0, 0)),
            pl.BlockSpec((kdim, csz), lambda j: (0, j)),
            pl.BlockSpec((1, csz), lambda j: (0, j)),
            pl.BlockSpec((nsplit, csz, 128), lambda j: (0, 0, 0)),
            pl.BlockSpec((1, 128), lambda j: (0, 0)),
        ],
        out_specs=pl.BlockSpec((mp, 128), lambda j: (0, 0)),
        scratch_shapes=[pltpu.VMEM((nsplit, mp, csz), jnp.bfloat16)],
        compiler_params=pltpu.CompilerParams(dimension_semantics=("arbitrary",)),
        cost_estimate=pl.CostEstimate(flops=flops, transcendentals=0,
                                      bytes_accessed=bytes_accessed),
    )(feat, params['fc1_w'], params['fc1_b'], params['fc2_w'], params['fc2_b'])


# ----------------------------------------------------------------------------
# Parameters (synthetic, deterministic) and their kernel-ready layouts
# ----------------------------------------------------------------------------

def make_mnist_cnn_params(key):
    ks = jax.random.split(key, 8)

    def u(k, shape, fan_in):
        bound = 1.0 / math.sqrt(fan_in)
        return jax.random.uniform(k, shape, jnp.float32, -bound, bound)

    # Raw parameters in the PyTorch state_dict layouts of `mnist_CNN`.
    raw = {
        'conv1_w': u(ks[0], (32, 1, 5, 5), 1 * 25),
        'conv1_b': u(ks[1], (32,), 1 * 25),
        'conv2_w': u(ks[2], (64, 32, 5, 5), 32 * 25),
        'conv2_b': u(ks[3], (64,), 32 * 25),
        'fc1_w': u(ks[4], (1024, 64 * 7 * 7), 64 * 7 * 7),
        'fc1_b': u(ks[5], (1024,), 64 * 7 * 7),
        'fc2_w': u(ks[6], (10, 1024), 1024),
        'fc2_b': u(ks[7], (10,), 1024),
    }

    # Kernel-ready layouts, prepared ONCE at setup (no per-call transposes).
    # fc1 rows are permuted from PyTorch NCHW-flatten (c*49 + oa*7 + ob) to the
    # kernel's feature order (ob*448 + oa*64 + c).
    fc1_perm = (raw['fc1_w'].reshape(1024, 64, 7, 7)
                .transpose(3, 2, 1, 0)
                .reshape(64 * 7 * 7, 1024))
    fc2_pad = jnp.pad(raw['fc2_w'].T, ((0, 0), (0, 128 - 10)))      # (1024, 128)

    kp = {
        'conv1_w': jnp.transpose(raw['conv1_w'][:, 0], (1, 2, 0)).reshape(25, 32),
        'conv1_b': raw['conv1_b'].reshape(1, 32),
        'conv2_w': jnp.transpose(raw['conv2_w'], (2, 3, 1, 0))
                      .reshape(25, 32, 64).astype(jnp.bfloat16),
        'conv2_b': jnp.tile(raw['conv2_b'].reshape(1, 64), (1, 7)),  # (1, 448)
        'fc1_w': fc1_perm.astype(jnp.bfloat16),
        'fc1_b': raw['fc1_b'].reshape(1, 1024),
        'fc2_w': fc2_pad.reshape(4, 256, 128).astype(jnp.bfloat16),
        'fc2_b': jnp.pad(raw['fc2_b'], (0, 128 - 10)).reshape(1, 128),
    }
    return raw, kp


# ----------------------------------------------------------------------------
# Forward pass (mnist_CNN topology)
# ----------------------------------------------------------------------------

def mnist_cnn_forward(params, x_nchw):
    n = x_nchw.shape[0]
    x = x_nchw[:, 0].astype(jnp.float32)                       # (N, 28, 28)
    xp = jnp.pad(x, ((0, 0), (2, 2), (2, 2)))                  # (N, 32, 32)
    # conv1 5x5 patches (Cin == 1 so this is ~80 KB/img), grouped so each
    # 2x2-pool window tap t = (i%2)*2 + (j%2) is a separate matmul operand and
    # the pooled position s = oi*14 + oj indexes contiguous rows.
    slabs = jnp.stack([xp[:, di:di + 28, dj:dj + 28]
                       for di in range(5) for dj in range(5)], axis=-1)
    patches = (slabs.reshape(n, 14, 2, 14, 2, 25)
               .transpose(0, 2, 4, 1, 3, 5)
               .reshape(n, 4, 196, 25))
    feat = conv_stage(patches, params)                          # (N, 7, 448) bf16
    feat = feat.reshape(n, 7 * 448)
    mp = max(8, _round_up(n, 8))
    feat = jnp.pad(feat, ((0, mp - n), (0, 0)))                 # pad batch rows to 8
    logits = fc_stage(feat, params)                             # (mp, 128) f32
    return logits[:n, :10]


# Pure-JAX reference (f32, HIGHEST precision) for a numerical sanity check.
def reference_forward(raw, x_nchw):
    hi = lax.Precision.HIGHEST
    y = lax.conv_general_dilated(
        x_nchw, raw['conv1_w'], window_strides=(1, 1),
        padding=((2, 2), (2, 2)),
        dimension_numbers=('NCHW', 'OIHW', 'NCHW'), precision=hi)
    y = jax.nn.relu(y + raw['conv1_b'][None, :, None, None])
    y = lax.reduce_window(y, -jnp.inf, lax.max, (1, 1, 2, 2), (1, 1, 2, 2), 'VALID')
    y = lax.conv_general_dilated(
        y, raw['conv2_w'], window_strides=(1, 1),
        padding=((2, 2), (2, 2)),
        dimension_numbers=('NCHW', 'OIHW', 'NCHW'), precision=hi)
    y = jax.nn.relu(y + raw['conv2_b'][None, :, None, None])
    y = lax.reduce_window(y, -jnp.inf, lax.max, (1, 1, 2, 2), (1, 1, 2, 2), 'VALID')
    f = y.reshape(y.shape[0], -1)                               # PyTorch NCHW flatten
    h = jax.nn.relu(jnp.dot(f, raw['fc1_w'].T, precision=hi) + raw['fc1_b'])
    return jnp.dot(h, raw['fc2_w'].T, precision=hi) + raw['fc2_b']


if __name__ == "__main__":
    key = jax.random.PRNGKey(0)
    pkey, xkey = jax.random.split(key)
    raw, params = make_mnist_cnn_params(pkey)

    # MNIST-shaped input: (batch=2, channels=1, 28, 28); 28x28 is required by
    # fc1's 64*7*7 input features.
    x = jax.random.normal(xkey, (2, 1, 28, 28), jnp.float32)

    fwd = jax.jit(mnist_cnn_forward)
    logits = fwd(params, x)
    jax.block_until_ready(logits)

    assert logits.shape == (2, 10)
    assert bool(jnp.all(jnp.isfinite(logits)))

    # Numerical check vs. the pure-JAX f32 reference (tolerance allows the
    # bf16-operand / f32-accumulate drift of the Pallas path).
    ref = reference_forward(raw, x)
    err = float(jnp.max(jnp.abs(logits - ref)))
    tol = 0.05 * float(jnp.max(jnp.abs(ref))) + 0.05
    assert err < tol, f"mismatch vs reference: max|diff|={err:.5f} tol={tol:.5f}"

    print("KERNEL_OK")
</pallas_src>

<mosaic_0001>
module attributes {stable_mosaic.version = 11 : i64} {
  func.func @_conv_stage_kernel(%arg0: i32, %arg1: memref<1x4x196x25xf32, #tpu.memory_space<vmem>>, %arg2: memref<25x32xf32, #tpu.memory_space<vmem>>, %arg3: memref<1x32xf32, #tpu.memory_space<vmem>>, %arg4: memref<25x32x64xbf16, #tpu.memory_space<vmem>>, %arg5: memref<1x448xf32, #tpu.memory_space<vmem>>, %arg6: memref<1x7x448xbf16, #tpu.memory_space<vmem>>, %arg7: memref<336x32xf32, #tpu.memory_space<vmem>>, %arg8: memref<232x64xf32, #tpu.memory_space<vmem>>) attributes {dimension_semantics = [#tpu.dimension_semantics<parallel>], iteration_bounds = array<i64: 2>, scalar_prefetch = 0 : i64, scratch_operands = 2 : i64, tpu.core_type = #tpu.core_type<tc>, window_params = [{transform_indices = @transform_0, window_bounds = array<i64: 1, 4, 196, 25>}, {pipeline_mode = #tpu.pipeline_mode<synchronous>, transform_indices = @transform_1, window_bounds = array<i64: 25, 32>}, {pipeline_mode = #tpu.pipeline_mode<synchronous>, transform_indices = @transform_2, window_bounds = array<i64: 1, 32>}, {pipeline_mode = #tpu.pipeline_mode<synchronous>, transform_indices = @transform_3, window_bounds = array<i64: 25, 32, 64>}, {pipeline_mode = #tpu.pipeline_mode<synchronous>, transform_indices = @transform_4, window_bounds = array<i64: 1, 448>}, {transform_indices = @transform_5, window_bounds = array<i64: 1, 7, 448>}]} {
    %c0 = arith.constant 0 : index
    %c0_0 = arith.constant 0 : index
    %0 = vector.load %arg2[%c0, %c0_0] : memref<25x32xf32, #tpu.memory_space<vmem>>, vector<25x32xf32>
    %c0_1 = arith.constant 0 : index
    %c0_2 = arith.constant 0 : index
    %c0_3 = arith.constant 0 : index
    %c0_4 = arith.constant 0 : index
    %1 = vector.load %arg1[%c0_1, %c0_2, %c0_3, %c0_4] : memref<1x4x196x25xf32, #tpu.memory_space<vmem>>, vector<1x1x196x25xf32>
    %2 = vector.shape_cast %1 : vector<1x1x196x25xf32> to vector<196x25xf32>
    %cst = arith.constant dense<0.000000e+00> : vector<196x32xf32>
    %3 = tpu.matmul %2, %0, %cst {dimension_numbers = #tpu.dot_dimension_numbers<[1], [0], [0], [1], [0, 0, 1, 1], [], []>} : vector<196x25xf32>, vector<25x32xf32>, vector<196x32xf32> -> vector<196x32xf32>
    %c0_5 = arith.constant 0 : index
    %c1 = arith.constant 1 : index
    %c0_6 = arith.constant 0 : index
    %c0_7 = arith.constant 0 : index
    %4 = vector.load %arg1[%c0_5, %c1, %c0_6, %c0_7] : memref<1x4x196x25xf32, #tpu.memory_space<vmem>>, vector<1x1x196x25xf32>
    %5 = vector.shape_cast %4 : vector<1x1x196x25xf32> to vector<196x25xf32>
    %cst_8 = arith.constant dense<0.000000e+00> : vector<196x32xf32>
    %6 = tpu.matmul %5, %0, %cst_8 {dimension_numbers = #tpu.dot_dimension_numbers<[1], [0], [0], [1], [0, 0, 1, 1], [], []>} : vector<196x25xf32>, vector<25x32xf32>, vector<196x32xf32> -> vector<196x32xf32>
    %7 = arith.maximumf %3, %6 : vector<196x32xf32>
    %c0_9 = arith.constant 0 : index
    %c2 = arith.constant 2 : index
    %c0_10 = arith.constant 0 : index
    %c0_11 = arith.constant 0 : index
    %8 = vector.load %arg1[%c0_9, %c2, %c0_10, %c0_11] : memref<1x4x196x25xf32, #tpu.memory_space<vmem>>, vector<1x1x196x25xf32>
    %9 = vector.shape_cast %8 : vector<1x1x196x25xf32> to vector<196x25xf32>
    %cst_12 = arith.constant dense<0.000000e+00> : vector<196x32xf32>
    %10 = tpu.matmul %9, %0, %cst_12 {dimension_numbers = #tpu.dot_dimension_numbers<[1], [0], [0], [1], [0, 0, 1, 1], [], []>} : vector<196x25xf32>, vector<25x32xf32>, vector<196x32xf32> -> vector<196x32xf32>
    %11 = arith.maximumf %7, %10 : vector<196x32xf32>
    %c0_13 = arith.constant 0 : index
    %c3 = arith.constant 3 : index
    %c0_14 = arith.constant 0 : index
    %c0_15 = arith.constant 0 : index
    %12 = vector.load %arg1[%c0_13, %c3, %c0_14, %c0_15] : memref<1x4x196x25xf32, #tpu.memory_space<vmem>>, vector<1x1x196x25xf32>
    %13 = vector.shape_cast %12 : vector<1x1x196x25xf32> to vector<196x25xf32>
    %cst_16 = arith.constant dense<0.000000e+00> : vector<196x32xf32>
    %14 = tpu.matmul %13, %0, %cst_16 {dimension_numbers = #tpu.dot_dimension_numbers<[1], [0], [0], [1], [0, 0, 1, 1], [], []>} : vector<196x25xf32>, vector<25x32xf32>, vector<196x32xf32> -> vector<196x32xf32>
    %15 = arith.maximumf %11, %14 : vector<196x32xf32>
    %c0_17 = arith.constant 0 : index
    %c0_18 = arith.constant 0 : index
    %16 = vector.load %arg3[%c0_17, %c0_18] : memref<1x32xf32, #tpu.memory_space<vmem>>, vector<1x32xf32>
    %17 = vector.broadcast %16 : vector<1x32xf32> to vector<196x32xf32>
    %18 = arith.addf %15, %17 : vector<196x32xf32>
    %cst_19 = arith.constant 0.000000e+00 : f32
    %19 = vector.broadcast %cst_19 : f32 to vector<196x32xf32>
    %20 = arith.maximumf %18, %19 : vector<196x32xf32>
    %cst_20 = arith.constant 0.000000e+00 : f32
    %21 = vector.broadcast %cst_20 : f32 to vector<336x32xf32>
    %c0_21 = arith.constant 0 : index
    %c0_22 = arith.constant 0 : index
    %22 = vector.load %arg7[%c0_21, %c0_22] : memref<336x32xf32, #tpu.memory_space<vmem>>, vector<336x32xf32>
    tpu.vector_store %arg7[%c0_21, %c0_22], %21 {strides = array<i32>} : memref<336x32xf32, #tpu.memory_space<vmem>>, vector<336x32xf32>,
    %23 = vector.extract_strided_slice %20 {offsets = [0, 0], sizes = [14, 32], strides = [1, 1]} : vector<196x32xf32> to vector<14x32xf32>
    %c38 = arith.constant 38 : index
    %c0_23 = arith.constant 0 : index
    %24 = vector.load %arg7[%c38, %c0_23] : memref<336x32xf32, #tpu.memory_space<vmem>>, vector<14x32xf32>
    tpu.vector_store %arg7[%c38, %c0_23], %23 {strides = array<i32>} : memref<336x32xf32, #tpu.memory_space<vmem>>, vector<14x32xf32>,
    %25 = vector.extract_strided_slice %20 {offsets = [14, 0], sizes = [14, 32], strides = [1, 1]} : vector<196x32xf32> to vector<14x32xf32>
    %c56 = arith.constant 56 : index
    %c0_24 = arith.constant 0 : index
    %26 = vector.load %arg7[%c56, %c0_24] : memref<336x32xf32, #tpu.memory_space<vmem>>, vector<14x32xf32>
    tpu.vector_store %arg7[%c56, %c0_24], %25 {strides = array<i32>} : memref<336x32xf32, #tpu.memory_space<vmem>>, vector<14x32xf32>,
    %27 = vector.extract_strided_slice %20 {offsets = [28, 0], sizes = [14, 32], strides = [1, 1]} : vector<196x32xf32> to vector<14x32xf32>
    %c74 = arith.constant 74 : index
    %c0_25 = arith.constant 0 : index
    %28 = vector.load %arg7[%c74, %c0_25] : memref<336x32xf32, #tpu.memory_space<vmem>>, vector<14x32xf32>
    tpu.vector_store %arg7[%c74, %c0_25], %27 {strides = array<i32>} : memref<336x32xf32, #tpu.memory_space<vmem>>, vector<14x32xf32>,
    %29 = vector.extract_strided_slice %20 {offsets = [42, 0], sizes = [14, 32], strides = [1, 1]} : vector<196x32xf32> to vector<14x32xf32>
    %c92 = arith.constant 92 : index
    %c0_26 = arith.constant 0 : index
    %30 = vector.load %arg7[%c92, %c0_26] : memref<336x32xf32, #tpu.memory_space<vmem>>, vector<14x32xf32>
    tpu.vector_store %arg7[%c92, %c0_26], %29 {strides = array<i32>} : memref<336x32xf32, #tpu.memory_space<vmem>>, vector<14x32xf32>,
    %31 = vector.extract_strided_slice %20 {offsets = [56, 0], sizes = [14, 32], strides = [1, 1]} : vector<196x32xf32> to vector<14x32xf32>
    %c110 = arith.constant 110 : index
    %c0_27 = arith.constant 0 : index
    %32 = vector.load %arg7[%c110, %c0_27] : memref<336x32xf32, #tpu.memory_space<vmem>>, vector<14x32xf32>
    tpu.vector_store %arg7[%c110, %c0_27], %31 {strides = array<i32>} : memref<336x32xf32, #tpu.memory_space<vmem>>, vector<14x32xf32>,
    %33 = vector.extract_strided_slice %20 {offsets = [70, 0], sizes = [14, 32], strides = [1, 1]} : vector<196x32xf32> to vector<14x32xf32>
    %c128 = arith.constant 128 : index
    %c0_28 = arith.constant 0 : index
    %34 = vector.load %arg7[%c128, %c0_28] : memref<336x32xf32, #tpu.memory_space<vmem>>, vector<14x32xf32>
    tpu.vector_store %arg7[%c128, %c0_28], %33 {strides = array<i32>} : memref<336x32xf32, #tpu.memory_space<vmem>>, vector<14x32xf32>,
    %35 = vector.extract_strided_slice %20 {offsets = [84, 0], sizes = [14, 32], strides = [1, 1]} : vector<196x32xf32> to vector<14x32xf32>
    %c146 = arith.constant 146 : index
    %c0_29 = arith.constant 0 : index
    %36 = vector.load %arg7[%c146, %c0_29] : memref<336x32xf32, #tpu.memory_space<vmem>>, vector<14x32xf32>
    tpu.vector_store %arg7[%c146, %c0_29], %35 {strides = array<i32>} : memref<336x32xf32, #tpu.memory_space<vmem>>, vector<14x32xf32>,
    %37 = vector.extract_strided_slice %20 {offsets = [98, 0], sizes = [14, 32], strides = [1, 1]} : vector<196x32xf32> to vector<14x32xf32>
    %c164 = arith.constant 164 : index
    %c0_30 = arith.constant 0 : index
    %38 = vector.load %arg7[%c164, %c0_30] : memref<336x32xf32, #tpu.memory_space<vmem>>, vector<14x32xf32>
    tpu.vector_store %arg7[%c164, %c0_30], %37 {strides = array<i32>} : memref<336x32xf32, #tpu.memory_space<vmem>>, vector<14x32xf32>,
    %39 = vector.extract_strided_slice %20 {offsets = [112, 0], sizes = [14, 32], strides = [1, 1]} : vector<196x32xf32> to vector<14x32xf32>
    %c182 = arith.constant 182 : index
    %c0_31 = arith.constant 0 : index
    %40 = vector.load %arg7[%c182, %c0_31] : memref<336x32xf32, #tpu.memory_space<vmem>>, vector<14x32xf32>
    tpu.vector_store %arg7[%c182, %c0_31], %39 {strides = array<i32>} : memref<336x32xf32, #tpu.memory_space<vmem>>, vector<14x32xf32>,
    %41 = vector.extract_strided_slice %20 {offsets = [126, 0], sizes = [14, 32], strides = [1, 1]} : vector<196x32xf32> to vector<14x32xf32>
    %c200 = arith.constant 200 : index
    %c0_32 = arith.constant 0 : index
    %42 = vector.load %arg7[%c200, %c0_32] : memref<336x32xf32, #tpu.memory_space<vmem>>, vector<14x32xf32>
    tpu.vector_store %arg7[%c200, %c0_32], %41 {strides = array<i32>} : memref<336x32xf32, #tpu.memory_space<vmem>>, vector<14x32xf32>,
    %43 = vector.extract_strided_slice %20 {offsets = [140, 0], sizes = [14, 32], strides = [1, 1]} : vector<196x32xf32> to vector<14x32xf32>
    %c218 = arith.constant 218 : index
    %c0_33 = arith.constant 0 : index
    %44 = vector.load %arg7[%c218, %c0_33] : memref<336x32xf32, #tpu.memory_space<vmem>>, vector<14x32xf32>
    tpu.vector_store %arg7[%c218, %c0_33], %43 {strides = array<i32>} : memref<336x32xf32, #tpu.memory_space<vmem>>, vector<14x32xf32>,
    %45 = vector.extract_strided_slice %20 {offsets = [154, 0], sizes = [14, 32], strides = [1, 1]} : vector<196x32xf32> to vector<14x32xf32>
    %c236 = arith.constant 236 : index
    %c0_34 = arith.constant 0 : index
    %46 = vector.load %arg7[%c236, %c0_34] : memref<336x32xf32, #tpu.memory_space<vmem>>, vector<14x32xf32>
    tpu.vector_store %arg7[%c236, %c0_34], %45 {strides = array<i32>} : memref<336x32xf32, #tpu.memory_space<vmem>>, vector<14x32xf32>,
    %47 = vector.extract_strided_slice %20 {offsets = [168, 0], sizes = [14, 32], strides = [1, 1]} : vector<196x32xf32> to vector<14x32xf32>
    %c254 = arith.constant 254 : index
    %c0_35 = arith.constant 0 : index
    %48 = vector.load %arg7[%c254, %c0_35] : memref<336x32xf32, #tpu.memory_space<vmem>>, vector<14x32xf32>
    tpu.vector_store %arg7[%c254, %c0_35], %47 {strides = array<i32>} : memref<336x32xf32, #tpu.memory_space<vmem>>, vector<14x32xf32>,
    %49 = vector.extract_strided_slice %20 {offsets = [182, 0], sizes = [14, 32], strides = [1, 1]} : vector<196x32xf32> to vector<14x32xf32>
    %c272 = arith.constant 272 : index
    %c0_36 = arith.constant 0 : index
    %50 = vector.load %arg7[%c272, %c0_36] : memref<336x32xf32, #tpu.memory_space<vmem>>, vector<14x32xf32>
    tpu.vector_store %arg7[%c272, %c0_36], %49 {strides = array<i32>} : memref<336x32xf32, #tpu.memory_space<vmem>>, vector<14x32xf32>,
    %c0_37 = arith.constant 0 : index
    %c0_38 = arith.constant 0 : index
    %51 = vector.load %arg7[%c0_37, %c0_38] : memref<336x32xf32, #tpu.memory_space<vmem>>, vector<256x32xf32>
    %52 = arith.truncf %51 : vector<256x32xf32> to vector<256x32xbf16>
    %c0_39 = arith.constant 0 : index
    %c0_40 = arith.constant 0 : index
    %c0_41 = arith.constant 0 : index
    %53 = vector.load %arg4[%c0_39, %c0_40, %c0_41] : memref<25x32x64xbf16, #tpu.memory_space<vmem>>, vector<1x32x64xbf16>
    %54 = vector.shape_cast %53 : vector<1x32x64xbf16> to vector<32x64xbf16>
    %cst_42 = arith.constant dense<0.000000e+00> : vector<256x64xf32>
    %55 = tpu.matmul %52, %54, %cst_42 {dimension_numbers = #tpu.dot_dimension_numbers<[1], [0], [0], [1], [0, 0, 1, 1], [], []>} : vector<256x32xbf16>, vector<32x64xbf16>, vector<256x64xf32> -> vector<256x64xf32>
    %c1_43 = arith.constant 1 : index
    %c0_44 = arith.constant 0 : index
    %56 = vector.load %arg7[%c1_43, %c0_44] : memref<336x32xf32, #tpu.memory_space<vmem>>, vector<256x32xf32>
    %57 = arith.truncf %56 : vector<256x32xf32> to vector<256x32xbf16>
    %c1_45 = arith.constant 1 : index
    %c0_46 = arith.constant 0 : index
    %c0_47 = arith.constant 0 : index
    %58 = vector.load %arg4[%c1_45, %c0_46, %c0_47] : memref<25x32x64xbf16, #tpu.memory_space<vmem>>, vector<1x32x64xbf16>
    %59 = vector.shape_cast %58 : vector<1x32x64xbf16> to vector<32x64xbf16>
    %cst_48 = arith.constant dense<0.000000e+00> : vector<256x64xf32>
    %60 = tpu.matmul %57, %59, %cst_48 {dimension_numbers = #tpu.dot_dimension_numbers<[1], [0], [0], [1], [0, 0, 1, 1], [], []>} : vector<256x32xbf16>, vector<32x64xbf16>, vector<256x64xf32> -> vector<256x64xf32>
    %61 = arith.addf %55, %60 : vector<256x64xf32>
    %c2_49 = arith.constant 2 : index
    %c0_50 = arith.constant 0 : index
    %62 = vector.load %arg7[%c2_49, %c0_50] : memref<336x32xf32, #tpu.memory_space<vmem>>, vector<256x32xf32>
    %63 = arith.truncf %62 : vector<256x32xf32> to vector<256x32xbf16>
    %c2_51 = arith.constant 2 : index
    %c0_52 = arith.constant 0 : index
    %c0_53 = arith.constant 0 : index
    %64 = vector.load %arg4[%c2_51, %c0_52, %c0_53] : memref<25x32x64xbf16, #tpu.memory_space<vmem>>, vector<1x32x64xbf16>
    %65 = vector.shape_cast %64 : vector<1x32x64xbf16> to vector<32x64xbf16>
    %cst_54 = arith.constant dense<0.000000e+00> : vector<256x64xf32>
    %66 = tpu.matmul %63, %65, %cst_54 {dimension_numbers = #tpu.dot_dimension_numbers<[1], [0], [0], [1], [0, 0, 1, 1], [], []>} : vector<256x32xbf16>, vector<32x64xbf16>, vector<256x64xf32> -> vector<256x64xf32>
    %67 = arith.addf %61, %66 : vector<256x64xf32>
    %c3_55 = arith.constant 3 : index
    %c0_56 = arith.constant 0 : index
    %68 = vector.load %arg7[%c3_55, %c0_56] : memref<336x32xf32, #tpu.memory_space<vmem>>, vector<256x32xf32>
    %69 = arith.truncf %68 : vector<256x32xf32> to vector<256x32xbf16>
    %c3_57 = arith.constant 3 : index
    %c0_58 = arith.constant 0 : index
    %c0_59 = arith.constant 0 : index
    %70 = vector.load %arg4[%c3_57, %c0_58, %c0_59] : memref<25x32x64xbf16, #tpu.memory_space<vmem>>, vector<1x32x64xbf16>
    %71 = vector.shape_cast %70 : vector<1x32x64xbf16> to vector<32x64xbf16>
    %cst_60 = arith.constant dense<0.000000e+00> : vector<256x64xf32>
    %72 = tpu.matmul %69, %71, %cst_60 {dimension_numbers = #tpu.dot_dimension_numbers<[1], [0], [0], [1], [0, 0, 1, 1], [], []>} : vector<256x32xbf16>, vector<32x64xbf16>, vector<256x64xf32> -> vector<256x64xf32>
    %73 = arith.addf %67, %72 : vector<256x64xf32>
    %c4 = arith.constant 4 : index
    %c0_61 = arith.constant 0 : index
    %74 = vector.load %arg7[%c4, %c0_61] : memref<336x32xf32, #tpu.memory_space<vmem>>, vector<256x32xf32>
    %75 = arith.truncf %74 : vector<256x32xf32> to vector<256x32xbf16>
    %c4_62 = arith.constant 4 : index
    %c0_63 = arith.constant 0 : index
    %c0_64 = arith.constant 0 : index
    %76 = vector.load %arg4[%c4_62, %c0_63, %c0_64] : memref<25x32x64xbf16, #tpu.memory_space<vmem>>, vector<1x32x64xbf16>
    %77 = vector.shape_cast %76 : vector<1x32x64xbf16> to vector<32x64xbf16>
    %cst_65 = arith.constant dense<0.000000e+00> : vector<256x64xf32>
    %78 = tpu.matmul %75, %77, %cst_65 {dimension_numbers = #tpu.dot_dimension_numbers<[1], [0], [0], [1], [0, 0, 1, 1], [], []>} : vector<256x32xbf16>, vector<32x64xbf16>, vector<256x64xf32> -> vector<256x64xf32>
    %79 = arith.addf %73, %78 : vector<256x64xf32>
    %c18 = arith.constant 18 : index
    %c0_66 = arith.constant 0 : index
    %80 = vector.load %arg7[%c18, %c0_66] : memref<336x32xf32, #tpu.memory_space<vmem>>, vector<256x32xf32>
    %81 = arith.truncf %80 : vector<256x32xf32> to vector<256x32xbf16>
    %c5 = arith.constant 5 : index
    %c0_67 = arith.constant 0 : index
    %c0_68 = arith.constant 0 : index
    %82 = vector.load %arg4[%c5, %c0_67, %c0_68] : memref<25x32x64xbf16, #tpu.memory_space<vmem>>, vector<1x32x64xbf16>
    %83 = vector.shape_cast %82 : vector<1x32x64xbf16> to vector<32x64xbf16>
    %cst_69 = arith.constant dense<0.000000e+00> : vector<256x64xf32>
    %84 = tpu.matmul %81, %83, %cst_69 {dimension_numbers = #tpu.dot_dimension_numbers<[1], [0], [0], [1], [0, 0, 1, 1], [], []>} : vector<256x32xbf16>, vector<32x64xbf16>, vector<256x64xf32> -> vector<256x64xf32>
    %85 = arith.addf %79, %84 : vector<256x64xf32>
    %c19 = arith.constant 19 : index
    %c0_70 = arith.constant 0 : index
    %86 = vector.load %arg7[%c19, %c0_70] : memref<336x32xf32, #tpu.memory_space<vmem>>, vector<256x32xf32>
    %87 = arith.truncf %86 : vector<256x32xf32> to vector<256x32xbf16>
    %c6 = arith.constant 6 : index
    %c0_71 = arith.constant 0 : index
    %c0_72 = arith.constant 0 : index
    %88 = vector.load %arg4[%c6, %c0_71, %c0_72] : memref<25x32x64xbf16, #tpu.memory_space<vmem>>, vector<1x32x64xbf16>
    %89 = vector.shape_cast %88 : vector<1x32x64xbf16> to vector<32x64xbf16>
    %cst_73 = arith.constant dense<0.000000e+00> : vector<256x64xf32>
    %90 = tpu.matmul %87, %89, %cst_73 {dimension_numbers = #tpu.dot_dimension_numbers<[1], [0], [0], [1], [0, 0, 1, 1], [], []>} : vector<256x32xbf16>, vector<32x64xbf16>, vector<256x64xf32> -> vector<256x64xf32>
    %91 = arith.addf %85, %90 : vector<256x64xf32>
    %c20 = arith.constant 20 : index
    %c0_74 = arith.constant 0 : index
    %92 = vector.load %arg7[%c20, %c0_74] : memref<336x32xf32, #tpu.memory_space<vmem>>, vector<256x32xf32>
    %93 = arith.truncf %92 : vector<256x32xf32> to vector<256x32xbf16>
    %c7 = arith.constant 7 : index
    %c0_75 = arith.constant 0 : index
    %c0_76 = arith.constant 0 : index
    %94 = vector.load %arg4[%c7, %c0_75, %c0_76] : memref<25x32x64xbf16, #tpu.memory_space<vmem>>, vector<1x32x64xbf16>
    %95 = vector.shape_cast %94 : vector<1x32x64xbf16> to vector<32x64xbf16>
    %cst_77 = arith.constant dense<0.000000e+00> : vector<256x64xf32>
    %96 = tpu.matmul %93, %95, %cst_77 {dimension_numbers = #tpu.dot_dimension_numbers<[1], [0], [0], [1], [0, 0, 1, 1], [], []>} : vector<256x32xbf16>, vector<32x64xbf16>, vector<256x64xf32> -> vector<256x64xf32>
    %97 = arith.addf %91, %96 : vector<256x64xf32>
    %c21 = arith.constant 21 : index
    %c0_78 = arith.constant 0 : index
    %98 = vector.load %arg7[%c21, %c0_78] : memref<336x32xf32, #tpu.memory_space<vmem>>, vector<256x32xf32>
    %99 = arith.truncf %98 : vector<256x32xf32> to vector<256x32xbf16>
    %c8 = arith.constant 8 : index
    %c0_79 = arith.constant 0 : index
    %c0_80 = arith.constant 0 : index
    %100 = vector.load %arg4[%c8, %c0_79, %c0_80] : memref<25x32x64xbf16, #tpu.memory_space<vmem>>, vector<1x32x64xbf16>
    %101 = vector.shape_cast %100 : vector<1x32x64xbf16> to vector<32x64xbf16>
    %cst_81 = arith.constant dense<0.000000e+00> : vector<256x64xf32>
    %102 = tpu.matmul %99, %101, %cst_81 {dimension_numbers = #tpu.dot_dimension_numbers<[1], [0], [0], [1], [0, 0, 1, 1], [], []>} : vector<256x32xbf16>, vector<32x64xbf16>, vector<256x64xf32> -> vector<256x64xf32>
    %103 = arith.addf %97, %102 : vector<256x64xf32>
    %c22 = arith.constant 22 : index
    %c0_82 = arith.constant 0 : index
    %104 = vector.load %arg7[%c22, %c0_82] : memref<336x32xf32, #tpu.memory_space<vmem>>, vector<256x32xf32>
    %105 = arith.truncf %104 : vector<256x32xf32> to vector<256x32xbf16>
    %c9 = arith.constant 9 : index
    %c0_83 = arith.constant 0 : index
    %c0_84 = arith.constant 0 : index
    %106 = vector.load %arg4[%c9, %c0_83, %c0_84] : memref<25x32x64xbf16, #tpu.memory_space<vmem>>, vector<1x32x64xbf16>
    %107 = vector.shape_cast %106 : vector<1x32x64xbf16> to vector<32x64xbf16>
    %cst_85 = arith.constant dense<0.000000e+00> : vector<256x64xf32>
    %108 = tpu.matmul %105, %107, %cst_85 {dimension_numbers = #tpu.dot_dimension_numbers<[1], [0], [0], [1], [0, 0, 1, 1], [], []>} : vector<256x32xbf16>, vector<32x64xbf16>, vector<256x64xf32> -> vector<256x64xf32>
    %109 = arith.addf %103, %108 : vector<256x64xf32>
    %c36 = arith.constant 36 : index
    %c0_86 = arith.constant 0 : index
    %110 = vector.load %arg7[%c36, %c0_86] : memref<336x32xf32, #tpu.memory_space<vmem>>, vector<256x32xf32>
    %111 = arith.truncf %110 : vector<256x32xf32> to vector<256x32xbf16>
    %c10 = arith.constant 10 : index
    %c0_87 = arith.constant 0 : index
    %c0_88 = arith.constant 0 : index
    %112 = vector.load %arg4[%c10, %c0_87, %c0_88] : memref<25x32x64xbf16, #tpu.memory_space<vmem>>, vector<1x32x64xbf16>
    %113 = vector.shape_cast %112 : vector<1x32x64xbf16> to vector<32x64xbf16>
    %cst_89 = arith.constant dense<0.000000e+00> : vector<256x64xf32>
    %114 = tpu.matmul %111, %113, %cst_89 {dimension_numbers = #tpu.dot_dimension_numbers<[1], [0], [0], [1], [0, 0, 1, 1], [], []>} : vector<256x32xbf16>, vector<32x64xbf16>, vector<256x64xf32> -> vector<256x64xf32>
    %115 = arith.addf %109, %114 : vector<256x64xf32>
    %c37 = arith.constant 37 : index
    %c0_90 = arith.constant 0 : index
    %116 = vector.load %arg7[%c37, %c0_90] : memref<336x32xf32, #tpu.memory_space<vmem>>, vector<256x32xf32>
    %117 = arith.truncf %116 : vector<256x32xf32> to vector<256x32xbf16>
    %c11 = arith.constant 11 : index
    %c0_91 = arith.constant 0 : index
    %c0_92 = arith.constant 0 : index
    %118 = vector.load %arg4[%c11, %c0_91, %c0_92] : memref<25x32x64xbf16, #tpu.memory_space<vmem>>, vector<1x32x64xbf16>
    %119 = vector.shape_cast %118 : vector<1x32x64xbf16> to vector<32x64xbf16>
    %cst_93 = arith.constant dense<0.000000e+00> : vector<256x64xf32>
    %120 = tpu.matmul %117, %119, %cst_93 {dimension_numbers = #tpu.dot_dimension_numbers<[1], [0], [0], [1], [0, 0, 1, 1], [], []>} : vector<256x32xbf16>, vector<32x64xbf16>, vector<256x64xf32> -> vector<256x64xf32>
    %121 = arith.addf %115, %120 : vector<256x64xf32>
    %c38_94 = arith.constant 38 : index
    %c0_95 = arith.constant 0 : index
    %122 = vector.load %arg7[%c38_94, %c0_95] : memref<336x32xf32, #tpu.memory_space<vmem>>, vector<256x32xf32>
    %123 = arith.truncf %122 : vector<256x32xf32> to vector<256x32xbf16>
    %c12 = arith.constant 12 : index
    %c0_96 = arith.constant 0 : index
    %c0_97 = arith.constant 0 : index
    %124 = vector.load %arg4[%c12, %c0_96, %c0_97] : memref<25x32x64xbf16, #tpu.memory_space<vmem>>, vector<1x32x64xbf16>
    %125 = vector.shape_cast %124 : vector<1x32x64xbf16> to vector<32x64xbf16>
    %cst_98 = arith.constant dense<0.000000e+00> : vector<256x64xf32>
    %126 = tpu.matmul %123, %125, %cst_98 {dimension_numbers = #tpu.dot_dimension_numbers<[1], [0], [0], [1], [0, 0, 1, 1], [], []>} : vector<256x32xbf16>, vector<32x64xbf16>, vector<256x64xf32> -> vector<256x64xf32>
    %127 = arith.addf %121, %126 : vector<256x64xf32>
    %c39 = arith.constant 39 : index
    %c0_99 = arith.constant 0 : index
    %128 = vector.load %arg7[%c39, %c0_99] : memref<336x32xf32, #tpu.memory_space<vmem>>, vector<256x32xf32>
    %129 = arith.truncf %128 : vector<256x32xf32> to vector<256x32xbf16>
    %c13 = arith.constant 13 : index
    %c0_100 = arith.constant 0 : index
    %c0_101 = arith.constant 0 : index
    %130 = vector.load %arg4[%c13, %c0_100, %c0_101] : memref<25x32x64xbf16, #tpu.memory_space<vmem>>, vector<1x32x64xbf16>
    %131 = vector.shape_cast %130 : vector<1x32x64xbf16> to vector<32x64xbf16>
    %cst_102 = arith.constant dense<0.000000e+00> : vector<256x64xf32>
    %132 = tpu.matmul %129, %131, %cst_102 {dimension_numbers = #tpu.dot_dimension_numbers<[1], [0], [0], [1], [0, 0, 1, 1], [], []>} : vector<256x32xbf16>, vector<32x64xbf16>, vector<256x64xf32> -> vector<256x64xf32>
    %133 = arith.addf %127, %132 : vector<256x64xf32>
    %c40 = arith.constant 40 : index
    %c0_103 = arith.constant 0 : index
    %134 = vector.load %arg7[%c40, %c0_103] : memref<336x32xf32, #tpu.memory_space<vmem>>, vector<256x32xf32>
    %135 = arith.truncf %134 : vector<256x32xf32> to vector<256x32xbf16>
    %c14 = arith.constant 14 : index
    %c0_104 = arith.constant 0 : index
    %c0_105 = arith.constant 0 : index
    %136 = vector.load %arg4[%c14, %c0_104, %c0_105] : memref<25x32x64xbf16, #tpu.memory_space<vmem>>, vector<1x32x64xbf16>
    %137 = vector.shape_cast %136 : vector<1x32x64xbf16> to vector<32x64xbf16>
    %cst_106 = arith.constant dense<0.000000e+00> : vector<256x64xf32>
    %138 = tpu.matmul %135, %137, %cst_106 {dimension_numbers = #tpu.dot_dimension_numbers<[1], [0], [0], [1], [0, 0, 1, 1], [], []>} : vector<256x32xbf16>, vector<32x64xbf16>, vector<256x64xf32> -> vector<256x64xf32>
    %139 = arith.addf %133, %138 : vector<256x64xf32>
    %c54 = arith.constant 54 : index
    %c0_107 = arith.constant 0 : index
    %140 = vector.load %arg7[%c54, %c0_107] : memref<336x32xf32, #tpu.memory_space<vmem>>, vector<256x32xf32>
    %141 = arith.truncf %140 : vector<256x32xf32> to vector<256x32xbf16>
    %c15 = arith.constant 15 : index
    %c0_108 = arith.constant 0 : index
    %c0_109 = arith.constant 0 : index
    %142 = vector.load %arg4[%c15, %c0_108, %c0_109] : memref<25x32x64xbf16, #tpu.memory_space<vmem>>, vector<1x32x64xbf16>
    %143 = vector.shape_cast %142 : vector<1x32x64xbf16> to vector<32x64xbf16>
    %cst_110 = arith.constant dense<0.000000e+00> : vector<256x64xf32>
    %144 = tpu.matmul %141, %143, %cst_110 {dimension_numbers = #tpu.dot_dimension_numbers<[1], [0], [0], [1], [0, 0, 1, 1], [], []>} : vector<256x32xbf16>, vector<32x64xbf16>, vector<256x64xf32> -> vector<256x64xf32>
    %145 = arith.addf %139, %144 : vector<256x64xf32>
    %c55 = arith.constant 55 : index
    %c0_111 = arith.constant 0 : index
    %146 = vector.load %arg7[%c55, %c0_111] : memref<336x32xf32, #tpu.memory_space<vmem>>, vector<256x32xf32>
    %147 = arith.truncf %146 : vector<256x32xf32> to vector<256x32xbf16>
    %c16 = arith.constant 16 : index
    %c0_112 = arith.constant 0 : index
    %c0_113 = arith.constant 0 : index
    %148 = vector.load %arg4[%c16, %c0_112, %c0_113] : memref<25x32x64xbf16, #tpu.memory_space<vmem>>, vector<1x32x64xbf16>
    %149 = vector.shape_cast %148 : vector<1x32x64xbf16> to vector<32x64xbf16>
    %cst_114 = arith.constant dense<0.000000e+00> : vector<256x64xf32>
    %150 = tpu.matmul %147, %149, %cst_114 {dimension_numbers = #tpu.dot_dimension_numbers<[1], [0], [0], [1], [0, 0, 1, 1], [], []>} : vector<256x32xbf16>, vector<32x64xbf16>, vector<256x64xf32> -> vector<256x64xf32>
    %151 = arith.addf %145, %150 : vector<256x64xf32>
    %c56_115 = arith.constant 56 : index
    %c0_116 = arith.constant 0 : index
    %152 = vector.load %arg7[%c56_115, %c0_116] : memref<336x32xf32, #tpu.memory_space<vmem>>, vector<256x32xf32>
    %153 = arith.truncf %152 : vector<256x32xf32> to vector<256x32xbf16>
    %c17 = arith.constant 17 : index
    %c0_117 = arith.constant 0 : index
    %c0_118 = arith.constant 0 : index
    %154 = vector.load %arg4[%c17, %c0_117, %c0_118] : memref<25x32x64xbf16, #tpu.memory_space<vmem>>, vector<1x32x64xbf16>
    %155 = vector.shape_cast %154 : vector<1x32x64xbf16> to vector<32x64xbf16>
    %cst_119 = arith.constant dense<0.000000e+00> : vector<256x64xf32>
    %156 = tpu.matmul %153, %155, %cst_119 {dimension_numbers = #tpu.dot_dimension_numbers<[1], [0], [0], [1], [0, 0, 1, 1], [], []>} : vector<256x32xbf16>, vector<32x64xbf16>, vector<256x64xf32> -> vector<256x64xf32>
    %157 = arith.addf %151, %156 : vector<256x64xf32>
    %c57 = arith.constant 57 : index
    %c0_120 = arith.constant 0 : index
    %158 = vector.load %arg7[%c57, %c0_120] : memref<336x32xf32, #tpu.memory_space<vmem>>, vector<256x32xf32>
    %159 = arith.truncf %158 : vector<256x32xf32> to vector<256x32xbf16>
    %c18_121 = arith.constant 18 : index
    %c0_122 = arith.constant 0 : index
    %c0_123 = arith.constant 0 : index
    %160 = vector.load %arg4[%c18_121, %c0_122, %c0_123] : memref<25x32x64xbf16, #tpu.memory_space<vmem>>, vector<1x32x64xbf16>
    %161 = vector.shape_cast %160 : vector<1x32x64xbf16> to vector<32x64xbf16>
    %cst_124 = arith.constant dense<0.000000e+00> : vector<256x64xf32>
    %162 = tpu.matmul %159, %161, %cst_124 {dimension_numbers = #tpu.dot_dimension_numbers<[1], [0], [0], [1], [0, 0, 1, 1], [], []>} : vector<256x32xbf16>, vector<32x64xbf16>, vector<256x64xf32> -> vector<256x64xf32>
    %163 = arith.addf %157, %162 : vector<256x64xf32>
    %c58 = arith.constant 58 : index
    %c0_125 = arith.constant 0 : index
    %164 = vector.load %arg7[%c58, %c0_125] : memref<336x32xf32, #tpu.memory_space<vmem>>, vector<256x32xf32>
    %165 = arith.truncf %164 : vector<256x32xf32> to vector<256x32xbf16>
    %c19_126 = arith.constant 19 : index
    %c0_127 = arith.constant 0 : index
    %c0_128 = arith.constant 0 : index
    %166 = vector.load %arg4[%c19_126, %c0_127, %c0_128] : memref<25x32x64xbf16, #tpu.memory_space<vmem>>, vector<1x32x64xbf16>
    %167 = vector.shape_cast %166 : vector<1x32x64xbf16> to vector<32x64xbf16>
    %cst_129 = arith.constant dense<0.000000e+00> : vector<256x64xf32>
    %168 = tpu.matmul %165, %167, %cst_129 {dimension_numbers = #tpu.dot_dimension_numbers<[1], [0], [0], [1], [0, 0, 1, 1], [], []>} : vector<256x32xbf16>, vector<32x64xbf16>, vector<256x64xf32> -> vector<256x64xf32>
    %169 = arith.addf %163, %168 : vector<256x64xf32>
    %c72 = arith.constant 72 : index
    %c0_130 = arith.constant 0 : index
    %170 = vector.load %arg7[%c72, %c0_130] : memref<336x32xf32, #tpu.memory_space<vmem>>, vector<256x32xf32>
    %171 = arith.truncf %170 : vector<256x32xf32> to vector<256x32xbf16>
    %c20_131 = arith.constant 20 : index
    %c0_132 = arith.constant 0 : index
    %c0_133 = arith.constant 0 : index
    %172 = vector.load %arg4[%c20_131, %c0_132, %c0_133] : memref<25x32x64xbf16, #tpu.memory_space<vmem>>, vector<1x32x64xbf16>
    %173 = vector.shape_cast %172 : vector<1x32x64xbf16> to vector<32x64xbf16>
    %cst_134 = arith.constant dense<0.000000e+00> : vector<256x64xf32>
    %174 = tpu.matmul %171, %173, %cst_134 {dimension_numbers = #tpu.dot_dimension_numbers<[1], [0], [0], [1], [0, 0, 1, 1], [], []>} : vector<256x32xbf16>, vector<32x64xbf16>, vector<256x64xf32> -> vector<256x64xf32>
    %175 = arith.addf %169, %174 : vector<256x64xf32>
    %c73 = arith.constant 73 : index
    %c0_135 = arith.constant 0 : index
    %176 = vector.load %arg7[%c73, %c0_135] : memref<336x32xf32, #tpu.memory_space<vmem>>, vector<256x32xf32>
    %177 = arith.truncf %176 : vector<256x32xf32> to vector<256x32xbf16>
    %c21_136 = arith.constant 21 : index
    %c0_137 = arith.constant 0 : index
    %c0_138 = arith.constant 0 : index
    %178 = vector.load %arg4[%c21_136, %c0_137, %c0_138] : memref<25x32x64xbf16, #tpu.memory_space<vmem>>, vector<1x32x64xbf16>
    %179 = vector.shape_cast %178 : vector<1x32x64xbf16> to vector<32x64xbf16>
    %cst_139 = arith.constant dense<0.000000e+00> : vector<256x64xf32>
    %180 = tpu.matmul %177, %179, %cst_139 {dimension_numbers = #tpu.dot_dimension_numbers<[1], [0], [0], [1], [0, 0, 1, 1], [], []>} : vector<256x32xbf16>, vector<32x64xbf16>, vector<256x64xf32> -> vector<256x64xf32>
    %181 = arith.addf %175, %180 : vector<256x64xf32>
    %c74_140 = arith.constant 74 : index
    %c0_141 = arith.constant 0 : index
    %182 = vector.load %arg7[%c74_140, %c0_141] : memref<336x32xf32, #tpu.memory_space<vmem>>, vector<256x32xf32>
    %183 = arith.truncf %182 : vector<256x32xf32> to vector<256x32xbf16>
    %c22_142 = arith.constant 22 : index
    %c0_143 = arith.constant 0 : index
    %c0_144 = arith.constant 0 : index
    %184 = vector.load %arg4[%c22_142, %c0_143, %c0_144] : memref<25x32x64xbf16, #tpu.memory_space<vmem>>, vector<1x32x64xbf16>
    %185 = vector.shape_cast %184 : vector<1x32x64xbf16> to vector<32x64xbf16>
    %cst_145 = arith.constant dense<0.000000e+00> : vector<256x64xf32>
    %186 = tpu.matmul %183, %185, %cst_145 {dimension_numbers = #tpu.dot_dimension_numbers<[1], [0], [0], [1], [0, 0, 1, 1], [], []>} : vector<256x32xbf16>, vector<32x64xbf16>, vector<256x64xf32> -> vector<256x64xf32>
    %187 = arith.addf %181, %186 : vector<256x64xf32>
    %c75 = arith.constant 75 : index
    %c0_146 = arith.constant 0 : index
    %188 = vector.load %arg7[%c75, %c0_146] : memref<336x32xf32, #tpu.memory_space<vmem>>, vector<256x32xf32>
    %189 = arith.truncf %188 : vector<256x32xf32> to vector<256x32xbf16>
    %c23 = arith.constant 23 : index
    %c0_147 = arith.constant 0 : index
    %c0_148 = arith.constant 0 : index
    %190 = vector.load %arg4[%c23, %c0_147, %c0_148] : memref<25x32x64xbf16, #tpu.memory_space<vmem>>, vector<1x32x64xbf16>
    %191 = vector.shape_cast %190 : vector<1x32x64xbf16> to vector<32x64xbf16>
    %cst_149 = arith.constant dense<0.000000e+00> : vector<256x64xf32>
    %192 = tpu.matmul %189, %191, %cst_149 {dimension_numbers = #tpu.dot_dimension_numbers<[1], [0], [0], [1], [0, 0, 1, 1], [], []>} : vector<256x32xbf16>, vector<32x64xbf16>, vector<256x64xf32> -> vector<256x64xf32>
    %193 = arith.addf %187, %192 : vector<256x64xf32>
    %c76 = arith.constant 76 : index
    %c0_150 = arith.constant 0 : index
    %194 = vector.load %arg7[%c76, %c0_150] : memref<336x32xf32, #tpu.memory_space<vmem>>, vector<256x32xf32>
    %195 = arith.truncf %194 : vector<256x32xf32> to vector<256x32xbf16>
    %c24 = arith.constant 24 : index
    %c0_151 = arith.constant 0 : index
    %c0_152 = arith.constant 0 : index
    %196 = vector.load %arg4[%c24, %c0_151, %c0_152] : memref<25x32x64xbf16, #tpu.memory_space<vmem>>, vector<1x32x64xbf16>
    %197 = vector.shape_cast %196 : vector<1x32x64xbf16> to vector<32x64xbf16>
    %cst_153 = arith.constant dense<0.000000e+00> : vector<256x64xf32>
    %198 = tpu.matmul %195, %197, %cst_153 {dimension_numbers = #tpu.dot_dimension_numbers<[1], [0], [0], [1], [0, 0, 1, 1], [], []>} : vector<256x32xbf16>, vector<32x64xbf16>, vector<256x64xf32> -> vector<256x64xf32>
    %199 = arith.addf %193, %198 : vector<256x64xf32>
    %200 = vector.extract_strided_slice %199 {offsets = [0, 0], sizes = [250, 64], strides = [1, 1]} : vector<256x64xf32> to vector<250x64xf32>
    %201 = vector.extract_strided_slice %199 {offsets = [1, 0], sizes = [250, 64], strides = [1, 1]} : vector<256x64xf32> to vector<250x64xf32>
    %202 = arith.maximumf %200, %201 : vector<250x64xf32>
    %203 = vector.extract_strided_slice %202 {offsets = [0, 0], sizes = [232, 64], strides = [1, 1]} : vector<250x64xf32> to vector<232x64xf32>
    %204 = vector.extract_strided_slice %202 {offsets = [18, 0], sizes = [232, 64], strides = [1, 1]} : vector<250x64xf32> to vector<232x64xf32>
    %205 = arith.maximumf %203, %204 : vector<232x64xf32>
    %c0_154 = arith.constant 0 : index
    %c0_155 = arith.constant 0 : index
    %206 = vector.load %arg8[%c0_154, %c0_155] : memref<232x64xf32, #tpu.memory_space<vmem>>, vector<232x64xf32>
    tpu.vector_store %arg8[%c0_154, %c0_155], %205 {strides = array<i32>} : memref<232x64xf32, #tpu.memory_space<vmem>>, vector<232x64xf32>,
    %c0_156 = arith.constant 0 : index
    %c0_157 = arith.constant 0 : index
    %207 = tpu.strided_load %arg8[%c0_156, %c0_157] {strides = array<i32: 2, 1>} : memref<232x64xf32, #tpu.memory_space<vmem>>, vector<7x64xf32>
    %c36_158 = arith.constant 36 : index
    %c0_159 = arith.constant 0 : index
    %208 = tpu.strided_load %arg8[%c36_158, %c0_159] {strides = array<i32: 2, 1>} : memref<232x64xf32, #tpu.memory_space<vmem>>, vector<7x64xf32>
    %c72_160 = arith.constant 72 : index
    %c0_161 = arith.constant 0 : index
    %209 = tpu.strided_load %arg8[%c72_160, %c0_161] {strides = array<i32: 2, 1>} : memref<232x64xf32, #tpu.memory_space<vmem>>, vector<7x64xf32>
    %c108 = arith.constant 108 : index
    %c0_162 = arith.constant 0 : index
    %210 = tpu.strided_load %arg8[%c108, %c0_162] {strides = array<i32: 2, 1>} : memref<232x64xf32, #tpu.memory_space<vmem>>, vector<7x64xf32>
    %c144 = arith.constant 144 : index
    %c0_163 = arith.constant 0 : index
    %211 = tpu.strided_load %arg8[%c144, %c0_163] {strides = array<i32: 2, 1>} : memref<232x64xf32, #tpu.memory_space<vmem>>, vector<7x64xf32>
    %c180 = arith.constant 180 : index
    %c0_164 = arith.constant 0 : index
    %212 = tpu.strided_load %arg8[%c180, %c0_164] {strides = array<i32: 2, 1>} : memref<232x64xf32, #tpu.memory_space<vmem>>, vector<7x64xf32>
    %c216 = arith.constant 216 : index
    %c0_165 = arith.constant 0 : index
    %213 = tpu.strided_load %arg8[%c216, %c0_165] {strides = array<i32: 2, 1>} : memref<232x64xf32, #tpu.memory_space<vmem>>, vector<7x64xf32>
    %214 = tpu.concatenate %207, %208, %209, %210, %211, %212, %213 in 1 : vector<7x64xf32>, vector<7x64xf32>, vector<7x64xf32>, vector<7x64xf32>, vector<7x64xf32>, vector<7x64xf32>, vector<7x64xf32> -> vector<7x448xf32>
    %c0_166 = arith.constant 0 : index
    %c0_167 = arith.constant 0 : index
    %215 = vector.load %arg5[%c0_166, %c0_167] : memref<1x448xf32, #tpu.memory_space<vmem>>, vector<1x448xf32>
    %216 = vector.broadcast %215 : vector<1x448xf32> to vector<7x448xf32>
    %217 = arith.addf %214, %216 : vector<7x448xf32>
    %cst_168 = arith.constant 0.000000e+00 : f32
    %218 = vector.broadcast %cst_168 : f32 to vector<7x448xf32>
    %219 = arith.maximumf %217, %218 : vector<7x448xf32>
    %220 = arith.truncf %219 : vector<7x448xf32> to vector<7x448xbf16>
    %c0_169 = arith.constant 0 : index
    %c0_170 = arith.constant 0 : index
    %c0_171 = arith.constant 0 : index
    %221 = vector.load %arg6[%c0_169, %c0_170, %c0_171] : memref<1x7x448xbf16, #tpu.memory_space<vmem>>, vector<1x7x448xbf16>
    %222 = vector.shape_cast %221 : vector<1x7x448xbf16> to vector<7x448xbf16>
    %223 = vector.shape_cast %220 : vector<7x448xbf16> to vector<1x7x448xbf16>
    tpu.vector_store %arg6[%c0_169, %c0_170, %c0_171], %223 {strides = array<i32>} : memref<1x7x448xbf16, #tpu.memory_space<vmem>>, vector<1x7x448xbf16>,
    return
  }
  func.func @transform_0(%arg0: i32) -> (i32, i32, i32, i32) {
    %c0_i32 = arith.constant 0 : i32
    %c0_i32_0 = arith.constant 0 : i32
    %c0_i32_1 = arith.constant 0 : i32
    %c0_i32_2 = arith.constant 0 : i32
    return %arg0, %c0_i32, %c0_i32_0, %c0_i32_1 : i32, i32, i32, i32
  }
  func.func @transform_1(%arg0: i32) -> (i32, i32) {
    %c0_i32 = arith.constant 0 : i32
    %c0_i32_0 = arith.constant 0 : i32
    %c0_i32_1 = arith.constant 0 : i32
    return %c0_i32, %c0_i32_0 : i32, i32
  }
  func.func @transform_2(%arg0: i32) -> (i32, i32) {
    %c0_i32 = arith.constant 0 : i32
    %c0_i32_0 = arith.constant 0 : i32
    %c0_i32_1 = arith.constant 0 : i32
    return %c0_i32, %c0_i32_0 : i32, i32
  }
  func.func @transform_3(%arg0: i32) -> (i32, i32, i32) {
    %c0_i32 = arith.constant 0 : i32
    %c0_i32_0 = arith.constant 0 : i32
    %c0_i32_1 = arith.constant 0 : i32
    %c0_i32_2 = arith.constant 0 : i32
    return %c0_i32, %c0_i32_0, %c0_i32_1 : i32, i32, i32
  }
  func.func @transform_4(%arg0: i32) -> (i32, i32) {
    %c0_i32 = arith.constant 0 : i32
    %c0_i32_0 = arith.constant 0 : i32
    %c0_i32_1 = arith.constant 0 : i32
    return %c0_i32, %c0_i32_0 : i32, i32
  }
  func.func @transform_5(%arg0: i32) -> (i32, i32, i32) {
    %c0_i32 = arith.constant 0 : i32
    %c0_i32_0 = arith.constant 0 : i32
    %c0_i32_1 = arith.constant 0 : i32
    return %arg0, %c0_i32, %c0_i32_0 : i32, i32, i32
  }
}

module attributes {stable_mosaic.version = 11 : i64} {
  func.func @_fc_kernel(%arg0: i32, %arg1: memref<8x3136xbf16, #tpu.memory_space<vmem>>, %arg2: memref<3136x256xbf16, #tpu.memory_space<vmem>>, %arg3: memref<1x256xf32, #tpu.memory_space<vmem>>, %arg4: memref<4x256x128xbf16, #tpu.memory_space<vmem>>, %arg5: memref<1x128xf32, #tpu.memory_space<vmem>>, %arg6: memref<8x128xf32, #tpu.memory_space<vmem>>, %arg7: memref<4x8x256xbf16, #tpu.memory_space<vmem>>) attributes {dimension_semantics = [#tpu.dimension_semantics<arbitrary>], iteration_bounds = array<i64: 4>, scalar_prefetch = 0 : i64, scratch_operands = 1 : i64, tpu.core_type = #tpu.core_type<tc>, window_params = [{pipeline_mode = #tpu.pipeline_mode<synchronous>, transform_indices = @transform_0, window_bounds = array<i64: 8, 3136>}, {transform_indices = @transform_1, window_bounds = array<i64: 3136, 256>}, {transform_indices = @transform_2, window_bounds = array<i64: 1, 256>}, {pipeline_mode = #tpu.pipeline_mode<synchronous>, transform_indices = @transform_3, window_bounds = array<i64: 4, 256, 128>}, {pipeline_mode = #tpu.pipeline_mode<synchronous>, transform_indices = @transform_4, window_bounds = array<i64: 1, 128>}, {pipeline_mode = #tpu.pipeline_mode<synchronous>, transform_indices = @transform_5, window_bounds = array<i64: 8, 128>}]} {
    %c0 = arith.constant 0 : index
    %c0_0 = arith.constant 0 : index
    %0 = vector.load %arg1[%c0, %c0_0] : memref<8x3136xbf16, #tpu.memory_space<vmem>>, vector<8x3136xbf16>
    %c0_1 = arith.constant 0 : index
    %c0_2 = arith.constant 0 : index
    %1 = vector.load %arg2[%c0_1, %c0_2] : memref<3136x256xbf16, #tpu.memory_space<vmem>>, vector<3136x256xbf16>
    %cst = arith.constant dense<0.000000e+00> : vector<8x256xf32>
    %2 = tpu.matmul %0, %1, %cst {dimension_numbers = #tpu.dot_dimension_numbers<[1], [0], [0], [1], [0, 0, 1, 1], [], []>} : vector<8x3136xbf16>, vector<3136x256xbf16>, vector<8x256xf32> -> vector<8x256xf32>
    %c0_3 = arith.constant 0 : index
    %c0_4 = arith.constant 0 : index
    %3 = vector.load %arg3[%c0_3, %c0_4] : memref<1x256xf32, #tpu.memory_space<vmem>>, vector<1x256xf32>
    %4 = vector.broadcast %3 : vector<1x256xf32> to vector<8x256xf32>
    %5 = arith.addf %2, %4 : vector<8x256xf32>
    %cst_5 = arith.constant 0.000000e+00 : f32
    %6 = vector.broadcast %cst_5 : f32 to vector<8x256xf32>
    %7 = arith.maximumf %5, %6 : vector<8x256xf32>
    %8 = arith.truncf %7 : vector<8x256xf32> to vector<8x256xbf16>
    %9 = arith.index_cast %arg0 : i32 to index
    %c0_6 = arith.constant 0 : index
    %c0_7 = arith.constant 0 : index
    %10 = vector.load %arg7[%9, %c0_6, %c0_7] : memref<4x8x256xbf16, #tpu.memory_space<vmem>>, vector<1x8x256xbf16>
    %11 = vector.shape_cast %10 : vector<1x8x256xbf16> to vector<8x256xbf16>
    %12 = vector.shape_cast %8 : vector<8x256xbf16> to vector<1x8x256xbf16>
    tpu.vector_store %arg7[%9, %c0_6, %c0_7], %12 {strides = array<i32>} : memref<4x8x256xbf16, #tpu.memory_space<vmem>>, vector<1x8x256xbf16>,
    %c3_i32 = arith.constant 3 : i32
    %13 = arith.cmpi eq, %arg0, %c3_i32 : i32
    %14 = arith.extui %13 : i1 to i32
    %c0_i32 = arith.constant 0 : i32
    %15 = arith.cmpi ne, %14, %c0_i32 : i32
    scf.if %15 {
      %c0_8 = arith.constant 0 : index
      %c0_9 = arith.constant 0 : index
      %c0_10 = arith.constant 0 : index
      %16 = vector.load %arg7[%c0_8, %c0_9, %c0_10] : memref<4x8x256xbf16, #tpu.memory_space<vmem>>, vector<1x8x256xbf16>
      %17 = vector.shape_cast %16 : vector<1x8x256xbf16> to vector<8x256xbf16>
      %c0_11 = arith.constant 0 : index
      %c0_12 = arith.constant 0 : index
      %c0_13 = arith.constant 0 : index
      %18 = vector.load %arg4[%c0_11, %c0_12, %c0_13] : memref<4x256x128xbf16, #tpu.memory_space<vmem>>, vector<1x256x128xbf16>
      %19 = vector.shape_cast %18 : vector<1x256x128xbf16> to vector<256x128xbf16>
      %cst_14 = arith.constant dense<0.000000e+00> : vector<8x128xf32>
      %20 = tpu.matmul %17, %19, %cst_14 {dimension_numbers = #tpu.dot_dimension_numbers<[1], [0], [0], [1], [0, 0, 1, 1], [], []>} : vector<8x256xbf16>, vector<256x128xbf16>, vector<8x128xf32> -> vector<8x128xf32>
      %c1 = arith.constant 1 : index
      %c0_15 = arith.constant 0 : index
      %c0_16 = arith.constant 0 : index
      %21 = vector.load %arg7[%c1, %c0_15, %c0_16] : memref<4x8x256xbf16, #tpu.memory_space<vmem>>, vector<1x8x256xbf16>
      %22 = vector.shape_cast %21 : vector<1x8x256xbf16> to vector<8x256xbf16>
      %c1_17 = arith.constant 1 : index
      %c0_18 = arith.constant 0 : index
      %c0_19 = arith.constant 0 : index
      %23 = vector.load %arg4[%c1_17, %c0_18, %c0_19] : memref<4x256x128xbf16, #tpu.memory_space<vmem>>, vector<1x256x128xbf16>
      %24 = vector.shape_cast %23 : vector<1x256x128xbf16> to vector<256x128xbf16>
      %cst_20 = arith.constant dense<0.000000e+00> : vector<8x128xf32>
      %25 = tpu.matmul %22, %24, %cst_20 {dimension_numbers = #tpu.dot_dimension_numbers<[1], [0], [0], [1], [0, 0, 1, 1], [], []>} : vector<8x256xbf16>, vector<256x128xbf16>, vector<8x128xf32> -> vector<8x128xf32>
      %26 = arith.addf %20, %25 : vector<8x128xf32>
      %c2 = arith.constant 2 : index
      %c0_21 = arith.constant 0 : index
      %c0_22 = arith.constant 0 : index
      %27 = vector.load %arg7[%c2, %c0_21, %c0_22] : memref<4x8x256xbf16, #tpu.memory_space<vmem>>, vector<1x8x256xbf16>
      %28 = vector.shape_cast %27 : vector<1x8x256xbf16> to vector<8x256xbf16>
      %c2_23 = arith.constant 2 : index
      %c0_24 = arith.constant 0 : index
      %c0_25 = arith.constant 0 : index
      %29 = vector.load %arg4[%c2_23, %c0_24, %c0_25] : memref<4x256x128xbf16, #tpu.memory_space<vmem>>, vector<1x256x128xbf16>
      %30 = vector.shape_cast %29 : vector<1x256x128xbf16> to vector<256x128xbf16>
      %cst_26 = arith.constant dense<0.000000e+00> : vector<8x128xf32>
      %31 = tpu.matmul %28, %30, %cst_26 {dimension_numbers = #tpu.dot_dimension_numbers<[1], [0], [0], [1], [0, 0, 1, 1], [], []>} : vector<8x256xbf16>, vector<256x128xbf16>, vector<8x128xf32> -> vector<8x128xf32>
      %32 = arith.addf %26, %31 : vector<8x128xf32>
      %c3 = arith.constant 3 : index
      %c0_27 = arith.constant 0 : index
      %c0_28 = arith.constant 0 : index
      %33 = vector.load %arg7[%c3, %c0_27, %c0_28] : memref<4x8x256xbf16, #tpu.memory_space<vmem>>, vector<1x8x256xbf16>
      %34 = vector.shape_cast %33 : vector<1x8x256xbf16> to vector<8x256xbf16>
      %c3_29 = arith.constant 3 : index
      %c0_30 = arith.constant 0 : index
      %c0_31 = arith.constant 0 : index
      %35 = vector.load %arg4[%c3_29, %c0_30, %c0_31] : memref<4x256x128xbf16, #tpu.memory_space<vmem>>, vector<1x256x128xbf16>
      %36 = vector.shape_cast %35 : vector<1x256x128xbf16> to vector<256x128xbf16>
      %cst_32 = arith.constant dense<0.000000e+00> : vector<8x128xf32>
      %37 = tpu.matmul %34, %36, %cst_32 {dimension_numbers = #tpu.dot_dimension_numbers<[1], [0], [0], [1], [0, 0, 1, 1], [], []>} : vector<8x256xbf16>, vector<256x128xbf16>, vector<8x128xf32> -> vector<8x128xf32>
      %38 = arith.addf %32, %37 : vector<8x128xf32>
      %c0_33 = arith.constant 0 : index
      %c0_34 = arith.constant 0 : index
      %39 = vector.load %arg5[%c0_33, %c0_34] : memref<1x128xf32, #tpu.memory_space<vmem>>, vector<1x128xf32>
      %40 = vector.broadcast %39 : vector<1x128xf32> to vector<8x128xf32>
      %41 = arith.addf %38, %40 : vector<8x128xf32>
      %c0_35 = arith.constant 0 : index
      %c0_36 = arith.constant 0 : index
      %42 = vector.load %arg6[%c0_35, %c0_36] : memref<8x128xf32, #tpu.memory_space<vmem>>, vector<8x128xf32>
      tpu.vector_store %arg6[%c0_35, %c0_36], %41 {strides = array<i32>} : memref<8x128xf32, #tpu.memory_space<vmem>>, vector<8x128xf32>,
    } else {
    }
    return
  }
  func.func @transform_0(%arg0: i32) -> (i32, i32) {
    %c0_i32 = arith.constant 0 : i32
    %c0_i32_0 = arith.constant 0 : i32
    %c0_i32_1 = arith.constant 0 : i32
    return %c0_i32, %c0_i32_0 : i32, i32
  }
  func.func @transform_1(%arg0: i32) -> (i32, i32) {
    %c0_i32 = arith.constant 0 : i32
    %c0_i32_0 = arith.constant 0 : i32
    return %c0_i32, %arg0 : i32, i32
  }
  func.func @transform_2(%arg0: i32) -> (i32, i32) {
    %c0_i32 = arith.constant 0 : i32
    %c0_i32_0 = arith.constant 0 : i32
    return %c0_i32, %arg0 : i32, i32
  }
  func.func @transform_3(%arg0: i32) -> (i32, i32, i32) {
    %c0_i32 = arith.constant 0 : i32
    %c0_i32_0 = arith.constant 0 : i32
    %c0_i32_1 = arith.constant 0 : i32
    %c0_i32_2 = arith.constant 0 : i32
    return %c0_i32, %c0_i32_0, %c0_i32_1 : i32, i32, i32
  }
  func.func @transform_4(%arg0: i32) -> (i32, i32) {
    %c0_i32 = arith.constant 0 : i32
    %c0_i32_0 = arith.constant 0 : i32
    %c0_i32_1 = arith.constant 0 : i32
    return %c0_i32, %c0_i32_0 : i32, i32
  }
  func.func @transform_5(%arg0: i32) -> (i32, i32) {
    %c0_i32 = arith.constant 0 : i32
    %c0_i32_0 = arith.constant 0 : i32
    %c0_i32_1 = arith.constant 0 : i32
    return %c0_i32, %c0_i32_0 : i32, i32
  }
}

</mosaic_0001>

<bundles_post_ra>
// kernel: mnist_cnn_forward.3
= control target key start
LH: loop header
LB: loop body
LE: loop exit
PB: predicated region body
PF: predicated region fallthrough
CT: control target
= control target key end

     0   :  { %s7121_s18 = smov 0   ;;  %s7123_s19 = smov 0   ;;  %s8667_s0 = inlined_call_operand.vmem [shape: bf16[8,3136], index: 0, kind: input, shape index: {}]   ;;  %s8668_s1 = inlined_call_operand.vmem [shape: bf16[3136,1024], index: 1, kind: input, shape index: {}]   ;;  %s8669_s2 = inlined_call_operand.vmem [shape: f32[1,1024], index: 2, kind: input, shape index: {}]   ;;  %s8670_s3 = inlined_call_operand.vmem [shape: bf16[4,256,128], index: 3, kind: input, shape index: {}]   ;;  %s8671_s4 = inlined_call_operand.vmem [shape: f32[1,128], index: 4, kind: input, shape index: {}]   ;;  %s8672_s5 = inlined_call_operand.vmem [shape: f32[8,128], index: 5, kind: output, shape index: {}]  }
   0x1   :  { %s7125_s20 = smov 0  }
   0x2 LB: > { %s7137_s21 = sadd.s32 4294967295, %s7088_s20   ;;  %s7140_s22 = sadd.s32 1, %s7088_s20   ;;  %s7088_s20 = sphi %s7125_s20, %s8675_s20   ;;  %s7084_s19 = sphi %s7123_s19, %s8674_s19   ;;  %s7080_s18 = sphi %s7121_s18, %s8673_s18  }
   0x3   : > { %s40_s23 = ssub.s32 %s7088_s20, %s7140_s22  ;;  %s43_s24 = sadd.s32 1, %s7084_s19 }
   0x4   : > { %p41_p0 = scmp.eq.s32.totalorder %s40_s23, 0  ;;  %p50_p1 = scmp.ne.s32.totalorder %s7084_s19, %s7080_s18 }
   0x5   : > { %p51_p2 = scmp.eq.s32.totalorder %s7088_s20, 0  ;;  %p5617_p4 = scmp.ge.s32.totalorder %s7088_s20, 4 }
   0x6   : > { %s7149_s25 = scalar_select %p41_p0, %s7084_s19, %s43_s24  }
   0x7   : > { %p52_p3 = por %p51_p2, %p50_p1  ;;  %174 = sbr.rel (%p5617_p4) target bundleno = 410 (0x19a), region = 28 }
   0xe   : > { %177 = sbr.rel (!%p52_p3) target bundleno = 410 (0x19a), region = 32  ;;  %s179_s26 = sand.u32 (%p52_p3), 1, %s7084_s19  }
   0xf   : > { %s6215_s27 = sshll.u32 (%p52_p3), %s7088_s20, 3  ;;  %s6354_s28 = smul.u32 (%p52_p3), 3136, %s179_s26 }
  0x10   : > { %s7157_s6 = scalar_lea.vmem (%p52_p3), %s8668_s1, %s6215_s27 }
  0x11   : > { %v994_v0 = vld [vmem:[%s7157_s6] sm:$0xff] (%p52_p3)  ;;  %s7165_s7 = scalar_lea.vmem (%p52_p3), [#allocation3], %s6354_s28 }
  0x12   : > { %v996_v1 = vld [vmem:[%s7157_s6 + $0x20] sm:$0xff] (%p52_p3)  ;;  %995 = vst [vmem:[%s7165_s7] sm:$0xff] (%p52_p3), %v994_v0 }
  0x13   : > { %v998_v2 = vld [vmem:[%s7157_s6 + $0x40] sm:$0xff] (%p52_p3)  ;;  %997 = vst [vmem:[%s7165_s7 + $0x8] sm:$0xff] (%p52_p3), %v996_v1 }
  0x14   : > { %v1000_v3 = vld [vmem:[%s7157_s6 + $0x60] sm:$0xff] (%p52_p3)  ;;  %999 = vst [vmem:[%s7165_s7 + $0x10] sm:$0xff] (%p52_p3), %v998_v2 }
  0x15   : > { %v1002_v4 = vld [vmem:[%s7157_s6 + $0x80] sm:$0xff]  ;;  %1001 = vst [vmem:[%s7165_s7 + $0x18] sm:$0xff] %v1000_v3 }
  0x16   : > { %v1004_v5 = vld [vmem:[%s7157_s6 + $0xa0] sm:$0xff]  ;;  %1003 = vst [vmem:[%s7165_s7 + $0x20] sm:$0xff] %v1002_v4 }
  0x17   : > { %1005 = vst [vmem:[%s7165_s7 + $0x28] sm:$0xff] %v1004_v5  ;;  %v1006_v6 = vld [vmem:[%s7157_s6 + $0xc0] sm:$0xff] }
  0x18   : > { %v1008_v7 = vld [vmem:[%s7157_s6 + $0xe0] sm:$0xff]  ;;  %1007 = vst [vmem:[%s7165_s7 + $0x30] sm:$0xff] %v1006_v6 }
  0x19   : > { %v1010_v8 = vld [vmem:[%s7157_s6 + $0x100] sm:$0xff]  ;;  %1009 = vst [vmem:[%s7165_s7 + $0x38] sm:$0xff] %v1008_v7 }
  0x1a   : > { %1011 = vst [vmem:[%s7165_s7 + $0x40] sm:$0xff] %v1010_v8  ;;  %v1012_v9 = vld [vmem:[%s7157_s6 + $0x120] sm:$0xff] }
  0x1b   : > { %v1014_v10 = vld [vmem:[%s7157_s6 + $0x140] sm:$0xff]  ;;  %1013 = vst [vmem:[%s7165_s7 + $0x48] sm:$0xff] %v1012_v9 }
  0x1c   : > { %v1016_v11 = vld [vmem:[%s7157_s6 + $0x160] sm:$0xff]  ;;  %1015 = vst [vmem:[%s7165_s7 + $0x50] sm:$0xff] %v1014_v10 }
  0x1d   : > { %1017 = vst [vmem:[%s7165_s7 + $0x58] sm:$0xff] %v1016_v11  ;;  %v1018_v12 = vld [vmem:[%s7157_s6 + $0x180] sm:$0xff] }
  0x1e   : > { %v1020_v13 = vld [vmem:[%s7157_s6 + $0x1a0] sm:$0xff]  ;;  %1019 = vst [vmem:[%s7165_s7 + $0x60] sm:$0xff] %v1018_v12 }
  0x1f   : > { %v1022_v14 = vld [vmem:[%s7157_s6 + $0x1c0] sm:$0xff]  ;;  %1021 = vst [vmem:[%s7165_s7 + $0x68] sm:$0xff] %v1020_v13 }
  0x20   : > { %1023 = vst [vmem:[%s7165_s7 + $0x70] sm:$0xff] %v1022_v14  ;;  %v1024_v15 = vld [vmem:[%s7157_s6 + $0x1e0] sm:$0xff] }
  0x21   : > { %v1026_v16 = vld [vmem:[%s7157_s6 + $0x200] sm:$0xff]  ;;  %1025 = vst [vmem:[%s7165_s7 + $0x78] sm:$0xff] %v1024_v15 }
  0x22   : > { %v1028_v17 = vld [vmem:[%s7157_s6 + $0x220] sm:$0xff]  ;;  %1027 = vst [vmem:[%s7165_s7 + $0x80] sm:$0xff] %v1026_v16 }
  0x23   : > { %1029 = vst [vmem:[%s7165_s7 + $0x88] sm:$0xff] %v1028_v17  ;;  %v1030_v18 = vld [vmem:[%s7157_s6 + $0x240] sm:$0xff] }
  0x24   : > { %v1032_v19 = vld [vmem:[%s7157_s6 + $0x260] sm:$0xff]  ;;  %1031 = vst [vmem:[%s7165_s7 + $0x90] sm:$0xff] %v1030_v18 }
  0x25   : > { %v1034_v20 = vld [vmem:[%s7157_s6 + $0x280] sm:$0xff]  ;;  %1033 = vst [vmem:[%s7165_s7 + $0x98] sm:$0xff] %v1032_v19 }
  0x26   : > { %1035 = vst [vmem:[%s7165_s7 + $0xa0] sm:$0xff] %v1034_v20  ;;  %v1036_v21 = vld [vmem:[%s7157_s6 + $0x2a0] sm:$0xff] }
  0x27   : > { %v1038_v22 = vld [vmem:[%s7157_s6 + $0x2c0] sm:$0xff]  ;;  %1037 = vst [vmem:[%s7165_s7 + $0xa8] sm:$0xff] %v1036_v21 }
  0x28   : > { %v1040_v23 = vld [vmem:[%s7157_s6 + $0x2e0] sm:$0xff]  ;;  %1039 = vst [vmem:[%s7165_s7 + $0xb0] sm:$0xff] %v1038_v22 }
  0x29   : > { %1041 = vst [vmem:[%s7165_s7 + $0xb8] sm:$0xff] %v1040_v23  ;;  %v1042_v24 = vld [vmem:[%s7157_s6 + $0x300] sm:$0xff] }
  0x2a   : > { %v1044_v25 = vld [vmem:[%s7157_s6 + $0x320] sm:$0xff]  ;;  %1043 = vst [vmem:[%s7165_s7 + $0xc0] sm:$0xff] %v1042_v24 }
  0x2b   : > { %v1046_v26 = vld [vmem:[%s7157_s6 + $0x340] sm:$0xff]  ;;  %1045 = vst [vmem:[%s7165_s7 + $0xc8] sm:$0xff] %v1044_v25 }
  0x2c   : > { %1047 = vst [vmem:[%s7165_s7 + $0xd0] sm:$0xff] %v1046_v26  ;;  %v1048_v27 = vld [vmem:[%s7157_s6 + $0x360] sm:$0xff] }
  0x2d   : > { %v1050_v28 = vld [vmem:[%s7157_s6 + $0x380] sm:$0xff]  ;;  %1049 = vst [vmem:[%s7165_s7 + $0xd8] sm:$0xff] %v1048_v27 }
  0x2e   : > { %v1052_v29 = vld [vmem:[%s7157_s6 + $0x3a0] sm:$0xff]  ;;  %1051 = vst [vmem:[%s7165_s7 + $0xe0] sm:$0xff] %v1050_v28 }
  0x2f   : > { %1053 = vst [vmem:[%s7165_s7 + $0xe8] sm:$0xff] %v1052_v29  ;;  %v1054_v30 = vld [vmem:[%s7157_s6 + $0x3c0] sm:$0xff] }
  0x30   : > { %v1056_v31 = vld [vmem:[%s7157_s6 + $0x3e0] sm:$0xff]  ;;  %1055 = vst [vmem:[%s7165_s7 + $0xf0] sm:$0xff] %v1054_v30 }
  0x31   : > { %v1058_v32 = vld [vmem:[%s7157_s6 + $0x400] sm:$0xff]  ;;  %1057 = vst [vmem:[%s7165_s7 + $0xf8] sm:$0xff] %v1056_v31 }
  0x32   : > { %1059 = vst [vmem:[%s7165_s7 + $0x100] sm:$0xff] %v1058_v32  ;;  %v1060_v33 = vld [vmem:[%s7157_s6 + $0x420] sm:$0xff] }
  0x33   : > { %v1062_v34 = vld [vmem:[%s7157_s6 + $0x440] sm:$0xff]  ;;  %1061 = vst [vmem:[%s7165_s7 + $0x108] sm:$0xff] %v1060_v33 }
  0x34   : > { %v1064_v35 = vld [vmem:[%s7157_s6 + $0x460] sm:$0xff]  ;;  %1063 = vst [vmem:[%s7165_s7 + $0x110] sm:$0xff] %v1062_v34 }
  0x35   : > { %1065 = vst [vmem:[%s7165_s7 + $0x118] sm:$0xff] %v1064_v35  ;;  %v1066_v36 = vld [vmem:[%s7157_s6 + $0x480] sm:$0xff] }
  0x36   : > { %v1068_v37 = vld [vmem:[%s7157_s6 + $0x4a0] sm:$0xff]  ;;  %1067 = vst [vmem:[%s7165_s7 + $0x120] sm:$0xff] %v1066_v36 }
  0x37   : > { %v1070_v38 = vld [vmem:[%s7157_s6 + $0x4c0] sm:$0xff]  ;;  %1069 = vst [vmem:[%s7165_s7 + $0x128] sm:$0xff] %v1068_v37 }
  0x38   : > { %1071 = vst [vmem:[%s7165_s7 + $0x130] sm:$0xff] %v1070_v38  ;;  %v1072_v39 = vld [vmem:[%s7157_s6 + $0x4e0] sm:$0xff] }
  0x39   : > { %v1074_v40 = vld [vmem:[%s7157_s6 + $0x500] sm:$0xff]  ;;  %1073 = vst [vmem:[%s7165_s7 + $0x138] sm:$0xff] %v1072_v39 }
  0x3a   : > { %v1076_v41 = vld [vmem:[%s7157_s6 + $0x520] sm:$0xff]  ;;  %1075 = vst [vmem:[%s7165_s7 + $0x140] sm:$0xff] %v1074_v40 }
  0x3b   : > { %1077 = vst [vmem:[%s7165_s7 + $0x148] sm:$0xff] %v1076_v41  ;;  %v1078_v42 = vld [vmem:[%s7157_s6 + $0x540] sm:$0xff] }
  0x3c   : > { %v1080_v43 = vld [vmem:[%s7157_s6 + $0x560] sm:$0xff]  ;;  %1079 = vst [vmem:[%s7165_s7 + $0x150] sm:$0xff] %v1078_v42 }
  0x3d   : > { %v1082_v44 = vld [vmem:[%s7157_s6 + $0x580] sm:$0xff]  ;;  %1081 = vst [vmem:[%s7165_s7 + $0x158] sm:$0xff] %v1080_v43 }
  0x3e   : > { %1083 = vst [vmem:[%s7165_s7 + $0x160] sm:$0xff] %v1082_v44  ;;  %v1084_v45 = vld [vmem:[%s7157_s6 + $0x5a0] sm:$0xff] }
  0x3f   : > { %v1086_v46 = vld [vmem:[%s7157_s6 + $0x5c0] sm:$0xff]  ;;  %1085 = vst [vmem:[%s7165_s7 + $0x168] sm:$0xff] %v1084_v45 }
  0x40   : > { %v1088_v47 = vld [vmem:[%s7157_s6 + $0x5e0] sm:$0xff]  ;;  %1087 = vst [vmem:[%s7165_s7 + $0x170] sm:$0xff] %v1086_v46 }
  0x41   : > { %1089 = vst [vmem:[%s7165_s7 + $0x178] sm:$0xff] %v1088_v47  ;;  %v1090_v48 = vld [vmem:[%s7157_s6 + $0x600] sm:$0xff] }
  0x42   : > { %v1092_v49 = vld [vmem:[%s7157_s6 + $0x620] sm:$0xff]  ;;  %1091 = vst [vmem:[%s7165_s7 + $0x180] sm:$0xff] %v1090_v48 }
  0x43   : > { %v1094_v50 = vld [vmem:[%s7157_s6 + $0x640] sm:$0xff]  ;;  %1093 = vst [vmem:[%s7165_s7 + $0x188] sm:$0xff] %v1092_v49 }
  0x44   : > { %1095 = vst [vmem:[%s7165_s7 + $0x190] sm:$0xff] %v1094_v50  ;;  %v1096_v51 = vld [vmem:[%s7157_s6 + $0x660] sm:$0xff] }
  0x45   : > { %v1098_v52 = vld [vmem:[%s7157_s6 + $0x680] sm:$0xff]  ;;  %1097 = vst [vmem:[%s7165_s7 + $0x198] sm:$0xff] %v1096_v51 }
  0x46   : > { %v1100_v53 = vld [vmem:[%s7157_s6 + $0x6a0] sm:$0xff]  ;;  %1099 = vst [vmem:[%s7165_s7 + $0x1a0] sm:$0xff] %v1098_v52 }
  0x47   : > { %1101 = vst [vmem:[%s7165_s7 + $0x1a8] sm:$0xff] %v1100_v53  ;;  %v1102_v54 = vld [vmem:[%s7157_s6 + $0x6c0] sm:$0xff] }
  0x48   : > { %v1104_v55 = vld [vmem:[%s7157_s6 + $0x6e0] sm:$0xff]  ;;  %1103 = vst [vmem:[%s7165_s7 + $0x1b0] sm:$0xff] %v1102_v54 }
  0x49   : > { %v1106_v56 = vld [vmem:[%s7157_s6 + $0x700] sm:$0xff]  ;;  %1105 = vst [vmem:[%s7165_s7 + $0x1b8] sm:$0xff] %v1104_v55 }
  0x4a   : > { %1107 = vst [vmem:[%s7165_s7 + $0x1c0] sm:$0xff] %v1106_v56  ;;  %v1108_v57 = vld [vmem:[%s7157_s6 + $0x720] sm:$0xff] }
  0x4b   : > { %v1110_v58 = vld [vmem:[%s7157_s6 + $0x740] sm:$0xff]  ;;  %1109 = vst [vmem:[%s7165_s7 + $0x1c8] sm:$0xff] %v1108_v57 }
  0x4c   : > { %v1112_v59 = vld [vmem:[%s7157_s6 + $0x760] sm:$0xff]  ;;  %1111 = vst [vmem:[%s7165_s7 + $0x1d0] sm:$0xff] %v1110_v58 }
  0x4d   : > { %1113 = vst [vmem:[%s7165_s7 + $0x1d8] sm:$0xff] %v1112_v59  ;;  %v1114_v60 = vld [vmem:[%s7157_s6 + $0x780] sm:$0xff] }
  0x4e   : > { %v1116_v61 = vld [vmem:[%s7157_s6 + $0x7a0] sm:$0xff]  ;;  %1115 = vst [vmem:[%s7165_s7 + $0x1e0] sm:$0xff] %v1114_v60 }
  0x4f   : > { %v1118_v62 = vld [vmem:[%s7157_s6 + $0x7c0] sm:$0xff]  ;;  %1117 = vst [vmem:[%s7165_s7 + $0x1e8] sm:$0xff] %v1116_v61 }
  0x50   : > { %1119 = vst [vmem:[%s7165_s7 + $0x1f0] sm:$0xff] %v1118_v62  ;;  %v1120_v63 = vld [vmem:[%s7157_s6 + $0x7e0] sm:$0xff] }
  0x51   : > { %v1122_v0 = vld [vmem:[%s7157_s6 + $0x800] sm:$0xff]  ;;  %1121 = vst [vmem:[%s7165_s7 + $0x1f8] sm:$0xff] %v1120_v63 }
  0x52   : > { %v1124_v1 = vld [vmem:[%s7157_s6 + $0x820] sm:$0xff]  ;;  %1123 = vst [vmem:[%s7165_s7 + $0x200] sm:$0xff] %v1122_v0 }
  0x53   : > { %1125 = vst [vmem:[%s7165_s7 + $0x208] sm:$0xff] %v1124_v1  ;;  %v1126_v2 = vld [vmem:[%s7157_s6 + $0x840] sm:$0xff] }
  0x54   : > { %v1128_v3 = vld [vmem:[%s7157_s6 + $0x860] sm:$0xff]  ;;  %1127 = vst [vmem:[%s7165_s7 + $0x210] sm:$0xff] %v1126_v2 }
  0x55   : > { %v1130_v4 = vld [vmem:[%s7157_s6 + $0x880] sm:$0xff]  ;;  %1129 = vst [vmem:[%s7165_s7 + $0x218] sm:$0xff] %v1128_v3 }
  0x56   : > { %1131 = vst [vmem:[%s7165_s7 + $0x220] sm:$0xff] %v1130_v4  ;;  %v1132_v5 = vld [vmem:[%s7157_s6 + $0x8a0] sm:$0xff] }
  0x57   : > { %v1134_v6 = vld [vmem:[%s7157_s6 + $0x8c0] sm:$0xff]  ;;  %1133 = vst [vmem:[%s7165_s7 + $0x228] sm:$0xff] %v1132_v5 }
  0x58   : > { %v1136_v7 = vld [vmem:[%s7157_s6 + $0x8e0] sm:$0xff]  ;;  %1135 = vst [vmem:[%s7165_s7 + $0x230] sm:$0xff] %v1134_v6 }
  0x59   : > { %1137 = vst [vmem:[%s7165_s7 + $0x238] sm:$0xff] %v1136_v7  ;;  %v1138_v8 = vld [vmem:[%s7157_s6 + $0x900] sm:$0xff] }
  0x5a   : > { %v1140_v9 = vld [vmem:[%s7157_s6 + $0x920] sm:$0xff]  ;;  %1139 = vst [vmem:[%s7165_s7 + $0x240] sm:$0xff] %v1138_v8 }
  0x5b   : > { %v1142_v10 = vld [vmem:[%s7157_s6 + $0x940] sm:$0xff]  ;;  %1141 = vst [vmem:[%s7165_s7 + $0x248] sm:$0xff] %v1140_v9 }
  0x5c   : > { %1143 = vst [vmem:[%s7165_s7 + $0x250] sm:$0xff] %v1142_v10  ;;  %v1144_v11 = vld [vmem:[%s7157_s6 + $0x960] sm:$0xff] }
  0x5d   : > { %v1146_v12 = vld [vmem:[%s7157_s6 + $0x980] sm:$0xff]  ;;  %1145 = vst [vmem:[%s7165_s7 + $0x258] sm:$0xff] %v1144_v11 }
  0x5e   : > { %v1148_v13 = vld [vmem:[%s7157_s6 + $0x9a0] sm:$0xff]  ;;  %1147 = vst [vmem:[%s7165_s7 + $0x260] sm:$0xff] %v1146_v12 }
  0x5f   : > { %1149 = vst [vmem:[%s7165_s7 + $0x268] sm:$0xff] %v1148_v13  ;;  %v1150_v14 = vld [vmem:[%s7157_s6 + $0x9c0] sm:$0xff] }
  0x60   : > { %v1152_v15 = vld [vmem:[%s7157_s6 + $0x9e0] sm:$0xff]  ;;  %1151 = vst [vmem:[%s7165_s7 + $0x270] sm:$0xff] %v1150_v14 }
  0x61   : > { %v1154_v16 = vld [vmem:[%s7157_s6 + $0xa00] sm:$0xff]  ;;  %1153 = vst [vmem:[%s7165_s7 + $0x278] sm:$0xff] %v1152_v15 }
  0x62   : > { %1155 = vst [vmem:[%s7165_s7 + $0x280] sm:$0xff] %v1154_v16  ;;  %v1156_v17 = vld [vmem:[%s7157_s6 + $0xa20] sm:$0xff] }
  0x63   : > { %v1158_v18 = vld [vmem:[%s7157_s6 + $0xa40] sm:$0xff]  ;;  %1157 = vst [vmem:[%s7165_s7 + $0x288] sm:$0xff] %v1156_v17 }
  0x64   : > { %v1160_v19 = vld [vmem:[%s7157_s6 + $0xa60] sm:$0xff]  ;;  %1159 = vst [vmem:[%s7165_s7 + $0x290] sm:$0xff] %v1158_v18 }
  0x65   : > { %1161 = vst [vmem:[%s7165_s7 + $0x298] sm:$0xff] %v1160_v19  ;;  %v1162_v20 = vld [vmem:[%s7157_s6 + $0xa80] sm:$0xff] }
  0x66   : > { %v1164_v21 = vld [vmem:[%s7157_s6 + $0xaa0] sm:$0xff]  ;;  %1163 = vst [vmem:[%s7165_s7 + $0x2a0] sm:$0xff] %v1162_v20 }
  0x67   : > { %v1166_v22 = vld [vmem:[%s7157_s6 + $0xac0] sm:$0xff]  ;;  %1165 = vst [vmem:[%s7165_s7 + $0x2a8] sm:$0xff] %v1164_v21 }
  0x68   : > { %1167 = vst [vmem:[%s7165_s7 + $0x2b0] sm:$0xff] %v1166_v22  ;;  %v1168_v23 = vld [vmem:[%s7157_s6 + $0xae0] sm:$0xff] }
  0x69   : > { %v1170_v24 = vld [vmem:[%s7157_s6 + $0xb00] sm:$0xff]  ;;  %1169 = vst [vmem:[%s7165_s7 + $0x2b8] sm:$0xff] %v1168_v23 }
  0x6a   : > { %v1172_v25 = vld [vmem:[%s7157_s6 + $0xb20] sm:$0xff]  ;;  %1171 = vst [vmem:[%s7165_s7 + $0x2c0] sm:$0xff] %v1170_v24 }
  0x6b   : > { %1173 = vst [vmem:[%s7165_s7 + $0x2c8] sm:$0xff] %v1172_v25  ;;  %v1174_v26 = vld [vmem:[%s7157_s6 + $0xb40] sm:$0xff] }
  0x6c   : > { %v1176_v27 = vld [vmem:[%s7157_s6 + $0xb60] sm:$0xff]  ;;  %1175 = vst [vmem:[%s7165_s7 + $0x2d0] sm:$0xff] %v1174_v26 }
  0x6d   : > { %v1178_v28 = vld [vmem:[%s7157_s6 + $0xb80] sm:$0xff]  ;;  %1177 = vst [vmem:[%s7165_s7 + $0x2d8] sm:$0xff] %v1176_v27 }
  0x6e   : > { %1179 = vst [vmem:[%s7165_s7 + $0x2e0] sm:$0xff] %v1178_v28  ;;  %v1180_v29 = vld [vmem:[%s7157_s6 + $0xba0] sm:$0xff] }
  0x6f   : > { %v1182_v30 = vld [vmem:[%s7157_s6 + $0xbc0] sm:$0xff]  ;;  %1181 = vst [vmem:[%s7165_s7 + $0x2e8] sm:$0xff] %v1180_v29 }
  0x70   : > { %v1184_v31 = vld [vmem:[%s7157_s6 + $0xbe0] sm:$0xff]  ;;  %1183 = vst [vmem:[%s7165_s7 + $0x2f0] sm:$0xff] %v1182_v30 }
  0x71   : > { %1185 = vst [vmem:[%s7165_s7 + $0x2f8] sm:$0xff] %v1184_v31  ;;  %v1186_v32 = vld [vmem:[%s7157_s6 + $0xc00] sm:$0xff] }
  0x72   : > { %v1188_v33 = vld [vmem:[%s7157_s6 + $0xc20] sm:$0xff]  ;;  %1187 = vst [vmem:[%s7165_s7 + $0x300] sm:$0xff] %v1186_v32 }
  0x73   : > { %v1190_v34 = vld [vmem:[%s7157_s6 + $0xc40] sm:$0xff]  ;;  %1189 = vst [vmem:[%s7165_s7 + $0x308] sm:$0xff] %v1188_v33 }
  0x74   : > { %1191 = vst [vmem:[%s7165_s7 + $0x310] sm:$0xff] %v1190_v34  ;;  %v1192_v35 = vld [vmem:[%s7157_s6 + $0xc60] sm:$0xff] }
  0x75   : > { %v1194_v36 = vld [vmem:[%s7157_s6 + $0xc80] sm:$0xff]  ;;  %1193 = vst [vmem:[%s7165_s7 + $0x318] sm:$0xff] %v1192_v35 }
  0x76   : > { %v1196_v37 = vld [vmem:[%s7157_s6 + $0xca0] sm:$0xff]  ;;  %1195 = vst [vmem:[%s7165_s7 + $0x320] sm:$0xff] %v1194_v36 }
  0x77   : > { %1197 = vst [vmem:[%s7165_s7 + $0x328] sm:$0xff] %v1196_v37  ;;  %v1198_v38 = vld [vmem:[%s7157_s6 + $0xcc0] sm:$0xff] }
  0x78   : > { %v1200_v39 = vld [vmem:[%s7157_s6 + $0xce0] sm:$0xff]  ;;  %1199 = vst [vmem:[%s7165_s7 + $0x330] sm:$0xff] %v1198_v38 }
  0x79   : > { %v1202_v40 = vld [vmem:[%s7157_s6 + $0xd00] sm:$0xff]  ;;  %1201 = vst [vmem:[%s7165_s7 + $0x338] sm:$0xff] %v1200_v39 }
  0x7a   : > { %1203 = vst [vmem:[%s7165_s7 + $0x340] sm:$0xff] %v1202_v40  ;;  %v1204_v41 = vld [vmem:[%s7157_s6 + $0xd20] sm:$0xff] }
  0x7b   : > { %v1206_v42 = vld [vmem:[%s7157_s6 + $0xd40] sm:$0xff]  ;;  %1205 = vst [vmem:[%s7165_s7 + $0x348] sm:$0xff] %v1204_v41 }
  0x7c   : > { %v1208_v43 = vld [vmem:[%s7157_s6 + $0xd60] sm:$0xff]  ;;  %1207 = vst [vmem:[%s7165_s7 + $0x350] sm:$0xff] %v1206_v42 }
  0x7d   : > { %1209 = vst [vmem:[%s7165_s7 + $0x358] sm:$0xff] %v1208_v43  ;;  %v1210_v44 = vld [vmem:[%s7157_s6 + $0xd80] sm:$0xff] }
  0x7e   : > { %v1212_v45 = vld [vmem:[%s7157_s6 + $0xda0] sm:$0xff]  ;;  %1211 = vst [vmem:[%s7165_s7 + $0x360] sm:$0xff] %v1210_v44 }
  0x7f   : > { %v1214_v46 = vld [vmem:[%s7157_s6 + $0xdc0] sm:$0xff]  ;;  %1213 = vst [vmem:[%s7165_s7 + $0x368] sm:$0xff] %v1212_v45 }
  0x80   : > { %1215 = vst [vmem:[%s7165_s7 + $0x370] sm:$0xff] %v1214_v46  ;;  %v1216_v47 = vld [vmem:[%s7157_s6 + $0xde0] sm:$0xff] }
  0x81   : > { %v1218_v48 = vld [vmem:[%s7157_s6 + $0xe00] sm:$0xff]  ;;  %1217 = vst [vmem:[%s7165_s7 + $0x378] sm:$0xff] %v1216_v47 }
  0x82   : > { %v1220_v49 = vld [vmem:[%s7157_s6 + $0xe20] sm:$0xff]  ;;  %1219 = vst [vmem:[%s7165_s7 + $0x380] sm:$0xff] %v1218_v48 }
  0x83   : > { %1221 = vst [vmem:[%s7165_s7 + $0x388] sm:$0xff] %v1220_v49  ;;  %v1222_v50 = vld [vmem:[%s7157_s6 + $0xe40] sm:$0xff] }
  0x84   : > { %v1224_v51 = vld [vmem:[%s7157_s6 + $0xe60] sm:$0xff]  ;;  %1223 = vst [vmem:[%s7165_s7 + $0x390] sm:$0xff] %v1222_v50 }
  0x85   : > { %v1226_v52 = vld [vmem:[%s7157_s6 + $0xe80] sm:$0xff]  ;;  %1225 = vst [vmem:[%s7165_s7 + $0x398] sm:$0xff] %v1224_v51 }
  0x86   : > { %1227 = vst [vmem:[%s7165_s7 + $0x3a0] sm:$0xff] %v1226_v52  ;;  %v1228_v53 = vld [vmem:[%s7157_s6 + $0xea0] sm:$0xff] }
  0x87   : > { %v1230_v54 = vld [vmem:[%s7157_s6 + $0xec0] sm:$0xff]  ;;  %1229 = vst [vmem:[%s7165_s7 + $0x3a8] sm:$0xff] %v1228_v53 }
  0x88   : > { %v1232_v55 = vld [vmem:[%s7157_s6 + $0xee0] sm:$0xff]  ;;  %1231 = vst [vmem:[%s7165_s7 + $0x3b0] sm:$0xff] %v1230_v54 }
  0x89   : > { %1233 = vst [vmem:[%s7165_s7 + $0x3b8] sm:$0xff] %v1232_v55  ;;  %v1234_v56 = vld [vmem:[%s7157_s6 + $0xf00] sm:$0xff] }
  0x8a   : > { %v1236_v57 = vld [vmem:[%s7157_s6 + $0xf20] sm:$0xff]  ;;  %1235 = vst [vmem:[%s7165_s7 + $0x3c0] sm:$0xff] %v1234_v56 }
  0x8b   : > { %v1238_v58 = vld [vmem:[%s7157_s6 + $0xf40] sm:$0xff]  ;;  %1237 = vst [vmem:[%s7165_s7 + $0x3c8] sm:$0xff] %v1236_v57 }
  0x8c   : > { %1239 = vst [vmem:[%s7165_s7 + $0x3d0] sm:$0xff] %v1238_v58  ;;  %v1240_v59 = vld [vmem:[%s7157_s6 + $0xf60] sm:$0xff] }
  0x8d   : > { %v1242_v60 = vld [vmem:[%s7157_s6 + $0xf80] sm:$0xff]  ;;  %1241 = vst [vmem:[%s7165_s7 + $0x3d8] sm:$0xff] %v1240_v59 }
  0x8e   : > { %v1244_v61 = vld [vmem:[%s7157_s6 + $0xfa0] sm:$0xff]  ;;  %1243 = vst [vmem:[%s7165_s7 + $0x3e0] sm:$0xff] %v1242_v60 }
  0x8f   : > { %1245 = vst [vmem:[%s7165_s7 + $0x3e8] sm:$0xff] %v1244_v61  ;;  %v1246_v62 = vld [vmem:[%s7157_s6 + $0xfc0] sm:$0xff] }
  0x90   : > { %v1248_v63 = vld [vmem:[%s7157_s6 + $0xfe0] sm:$0xff]  ;;  %1247 = vst [vmem:[%s7165_s7 + $0x3f0] sm:$0xff] %v1246_v62 }
  0x91   : > { %v1250_v0 = vld [vmem:[%s7157_s6 + $0x1000] sm:$0xff]  ;;  %1249 = vst [vmem:[%s7165_s7 + $0x3f8] sm:$0xff] %v1248_v63 }
  0x92   : > { %1251 = vst [vmem:[%s7165_s7 + $0x400] sm:$0xff] %v1250_v0  ;;  %v1252_v1 = vld [vmem:[%s7157_s6 + $0x1020] sm:$0xff] }
  0x93   : > { %v1254_v2 = vld [vmem:[%s7157_s6 + $0x1040] sm:$0xff]  ;;  %1253 = vst [vmem:[%s7165_s7 + $0x408] sm:$0xff] %v1252_v1 }
  0x94   : > { %v1256_v3 = vld [vmem:[%s7157_s6 + $0x1060] sm:$0xff]  ;;  %1255 = vst [vmem:[%s7165_s7 + $0x410] sm:$0xff] %v1254_v2 }
  0x95   : > { %1257 = vst [vmem:[%s7165_s7 + $0x418] sm:$0xff] %v1256_v3  ;;  %v1258_v4 = vld [vmem:[%s7157_s6 + $0x1080] sm:$0xff] }
  0x96   : > { %v1260_v5 = vld [vmem:[%s7157_s6 + $0x10a0] sm:$0xff]  ;;  %1259 = vst [vmem:[%s7165_s7 + $0x420] sm:$0xff] %v1258_v4 }
  0x97   : > { %v1262_v6 = vld [vmem:[%s7157_s6 + $0x10c0] sm:$0xff]  ;;  %1261 = vst [vmem:[%s7165_s7 + $0x428] sm:$0xff] %v1260_v5 }
  0x98   : > { %1263 = vst [vmem:[%s7165_s7 + $0x430] sm:$0xff] %v1262_v6  ;;  %v1264_v7 = vld [vmem:[%s7157_s6 + $0x10e0] sm:$0xff] }
  0x99   : > { %v1266_v8 = vld [vmem:[%s7157_s6 + $0x1100] sm:$0xff]  ;;  %1265 = vst [vmem:[%s7165_s7 + $0x438] sm:$0xff] %v1264_v7 }
  0x9a   : > { %v1268_v9 = vld [vmem:[%s7157_s6 + $0x1120] sm:$0xff]  ;;  %1267 = vst [vmem:[%s7165_s7 + $0x440] sm:$0xff] %v1266_v8 }
  0x9b   : > { %1269 = vst [vmem:[%s7165_s7 + $0x448] sm:$0xff] %v1268_v9  ;;  %v1270_v10 = vld [vmem:[%s7157_s6 + $0x1140] sm:$0xff] }
  0x9c   : > { %v1272_v11 = vld [vmem:[%s7157_s6 + $0x1160] sm:$0xff]  ;;  %1271 = vst [vmem:[%s7165_s7 + $0x450] sm:$0xff] %v1270_v10 }
  0x9d   : > { %v1274_v12 = vld [vmem:[%s7157_s6 + $0x1180] sm:$0xff]  ;;  %1273 = vst [vmem:[%s7165_s7 + $0x458] sm:$0xff] %v1272_v11 }
  0x9e   : > { %1275 = vst [vmem:[%s7165_s7 + $0x460] sm:$0xff] %v1274_v12  ;;  %v1276_v13 = vld [vmem:[%s7157_s6 + $0x11a0] sm:$0xff] }
  0x9f   : > { %v1278_v14 = vld [vmem:[%s7157_s6 + $0x11c0] sm:$0xff]  ;;  %1277 = vst [vmem:[%s7165_s7 + $0x468] sm:$0xff] %v1276_v13 }
  0xa0   : > { %v1280_v15 = vld [vmem:[%s7157_s6 + $0x11e0] sm:$0xff]  ;;  %1279 = vst [vmem:[%s7165_s7 + $0x470] sm:$0xff] %v1278_v14 }
  0xa1   : > { %1281 = vst [vmem:[%s7165_s7 + $0x478] sm:$0xff] %v1280_v15  ;;  %v1282_v16 = vld [vmem:[%s7157_s6 + $0x1200] sm:$0xff] }
  0xa2   : > { %v1284_v17 = vld [vmem:[%s7157_s6 + $0x1220] sm:$0xff]  ;;  %1283 = vst [vmem:[%s7165_s7 + $0x480] sm:$0xff] %v1282_v16 }
  0xa3   : > { %v1286_v18 = vld [vmem:[%s7157_s6 + $0x1240] sm:$0xff]  ;;  %1285 = vst [vmem:[%s7165_s7 + $0x488] sm:$0xff] %v1284_v17 }
  0xa4   : > { %1287 = vst [vmem:[%s7165_s7 + $0x490] sm:$0xff] %v1286_v18  ;;  %v1288_v19 = vld [vmem:[%s7157_s6 + $0x1260] sm:$0xff] }
  0xa5   : > { %v1290_v20 = vld [vmem:[%s7157_s6 + $0x1280] sm:$0xff]  ;;  %1289 = vst [vmem:[%s7165_s7 + $0x498] sm:$0xff] %v1288_v19 }
  0xa6   : > { %v1292_v21 = vld [vmem:[%s7157_s6 + $0x12a0] sm:$0xff]  ;;  %1291 = vst [vmem:[%s7165_s7 + $0x4a0] sm:$0xff] %v1290_v20 }
  0xa7   : > { %1293 = vst [vmem:[%s7165_s7 + $0x4a8] sm:$0xff] %v1292_v21  ;;  %v1294_v22 = vld [vmem:[%s7157_s6 + $0x12c0] sm:$0xff] }
  0xa8   : > { %v1296_v23 = vld [vmem:[%s7157_s6 + $0x12e0] sm:$0xff]  ;;  %1295 = vst [vmem:[%s7165_s7 + $0x4b0] sm:$0xff] %v1294_v22 }
  0xa9   : > { %v1298_v24 = vld [vmem:[%s7157_s6 + $0x1300] sm:$0xff]  ;;  %1297 = vst [vmem:[%s7165_s7 + $0x4b8] sm:$0xff] %v1296_v23 }
  0xaa   : > { %1299 = vst [vmem:[%s7165_s7 + $0x4c0] sm:$0xff] %v1298_v24  ;;  %v1300_v25 = vld [vmem:[%s7157_s6 + $0x1320] sm:$0xff] }
  0xab   : > { %v1302_v26 = vld [vmem:[%s7157_s6 + $0x1340] sm:$0xff]  ;;  %1301 = vst [vmem:[%s7165_s7 + $0x4c8] sm:$0xff] %v1300_v25 }
  0xac   : > { %v1304_v27 = vld [vmem:[%s7157_s6 + $0x1360] sm:$0xff]  ;;  %1303 = vst [vmem:[%s7165_s7 + $0x4d0] sm:$0xff] %v1302_v26 }
  0xad   : > { %1305 = vst [vmem:[%s7165_s7 + $0x4d8] sm:$0xff] %v1304_v27  ;;  %v1306_v28 = vld [vmem:[%s7157_s6 + $0x1380] sm:$0xff] }
  0xae   : > { %v1308_v29 = vld [vmem:[%s7157_s6 + $0x13a0] sm:$0xff]  ;;  %1307 = vst [vmem:[%s7165_s7 + $0x4e0] sm:$0xff] %v1306_v28 }
  0xaf   : > { %v1310_v30 = vld [vmem:[%s7157_s6 + $0x13c0] sm:$0xff]  ;;  %1309 = vst [vmem:[%s7165_s7 + $0x4e8] sm:$0xff] %v1308_v29 }
  0xb0   : > { %1311 = vst [vmem:[%s7165_s7 + $0x4f0] sm:$0xff] %v1310_v30  ;;  %v1312_v31 = vld [vmem:[%s7157_s6 + $0x13e0] sm:$0xff] }
  0xb1   : > { %v1314_v32 = vld [vmem:[%s7157_s6 + $0x1400] sm:$0xff]  ;;  %1313 = vst [vmem:[%s7165_s7 + $0x4f8] sm:$0xff] %v1312_v31 }
  0xb2   : > { %v1316_v33 = vld [vmem:[%s7157_s6 + $0x1420] sm:$0xff]  ;;  %1315 = vst [vmem:[%s7165_s7 + $0x500] sm:$0xff] %v1314_v32 }
  0xb3   : > { %1317 = vst [vmem:[%s7165_s7 + $0x508] sm:$0xff] %v1316_v33  ;;  %v1318_v34 = vld [vmem:[%s7157_s6 + $0x1440] sm:$0xff] }
  0xb4   : > { %v1320_v35 = vld [vmem:[%s7157_s6 + $0x1460] sm:$0xff]  ;;  %1319 = vst [vmem:[%s7165_s7 + $0x510] sm:$0xff] %v1318_v34 }
  0xb5   : > { %v1322_v36 = vld [vmem:[%s7157_s6 + $0x1480] sm:$0xff]  ;;  %1321 = vst [vmem:[%s7165_s7 + $0x518] sm:$0xff] %v1320_v35 }
  0xb6   : > { %1323 = vst [vmem:[%s7165_s7 + $0x520] sm:$0xff] %v1322_v36  ;;  %v1324_v37 = vld [vmem:[%s7157_s6 + $0x14a0] sm:$0xff] }
  0xb7   : > { %v1326_v38 = vld [vmem:[%s7157_s6 + $0x14c0] sm:$0xff]  ;;  %1325 = vst [vmem:[%s7165_s7 + $0x528] sm:$0xff] %v1324_v37 }
  0xb8   : > { %v1328_v39 = vld [vmem:[%s7157_s6 + $0x14e0] sm:$0xff]  ;;  %1327 = vst [vmem:[%s7165_s7 + $0x530] sm:$0xff] %v1326_v38 }
  0xb9   : > { %1329 = vst [vmem:[%s7165_s7 + $0x538] sm:$0xff] %v1328_v39  ;;  %v1330_v40 = vld [vmem:[%s7157_s6 + $0x1500] sm:$0xff] }
  0xba   : > { %v1332_v41 = vld [vmem:[%s7157_s6 + $0x1520] sm:$0xff]  ;;  %1331 = vst [vmem:[%s7165_s7 + $0x540] sm:$0xff] %v1330_v40 }
  0xbb   : > { %v1334_v42 = vld [vmem:[%s7157_s6 + $0x1540] sm:$0xff]  ;;  %1333 = vst [vmem:[%s7165_s7 + $0x548] sm:$0xff] %v1332_v41 }
  0xbc   : > { %1335 = vst [vmem:[%s7165_s7 + $0x550] sm:$0xff] %v1334_v42  ;;  %v1336_v43 = vld [vmem:[%s7157_s6 + $0x1560] sm:$0xff] }
  0xbd   : > { %v1338_v44 = vld [vmem:[%s7157_s6 + $0x1580] sm:$0xff]  ;;  %1337 = vst [vmem:[%s7165_s7 + $0x558] sm:$0xff] %v1336_v43 }
  0xbe   : > { %v1340_v45 = vld [vmem:[%s7157_s6 + $0x15a0] sm:$0xff]  ;;  %1339 = vst [vmem:[%s7165_s7 + $0x560] sm:$0xff] %v1338_v44 }
  0xbf   : > { %1341 = vst [vmem:[%s7165_s7 + $0x568] sm:$0xff] %v1340_v45  ;;  %v1342_v46 = vld [vmem:[%s7157_s6 + $0x15c0] sm:$0xff] }
  0xc0   : > { %v1344_v47 = vld [vmem:[%s7157_s6 + $0x15e0] sm:$0xff]  ;;  %1343 = vst [vmem:[%s7165_s7 + $0x570] sm:$0xff] %v1342_v46 }
  0xc1   : > { %v1346_v48 = vld [vmem:[%s7157_s6 + $0x1600] sm:$0xff]  ;;  %1345 = vst [vmem:[%s7165_s7 + $0x578] sm:$0xff] %v1344_v47 }
  0xc2   : > { %1347 = vst [vmem:[%s7165_s7 + $0x580] sm:$0xff] %v1346_v48  ;;  %v1348_v49 = vld [vmem:[%s7157_s6 + $0x1620] sm:$0xff] }
  0xc3   : > { %v1350_v50 = vld [vmem:[%s7157_s6 + $0x1640] sm:$0xff]  ;;  %1349 = vst [vmem:[%s7165_s7 + $0x588] sm:$0xff] %v1348_v49 }
  0xc4   : > { %v1352_v51 = vld [vmem:[%s7157_s6 + $0x1660] sm:$0xff]  ;;  %1351 = vst [vmem:[%s7165_s7 + $0x590] sm:$0xff] %v1350_v50 }
  0xc5   : > { %1353 = vst [vmem:[%s7165_s7 + $0x598] sm:$0xff] %v1352_v51  ;;  %v1354_v52 = vld [vmem:[%s7157_s6 + $0x1680] sm:$0xff] }
  0xc6   : > { %v1356_v53 = vld [vmem:[%s7157_s6 + $0x16a0] sm:$0xff]  ;;  %1355 = vst [vmem:[%s7165_s7 + $0x5a0] sm:$0xff] %v1354_v52 }
  0xc7   : > { %v1358_v54 = vld [vmem:[%s7157_s6 + $0x16c0] sm:$0xff]  ;;  %1357 = vst [vmem:[%s7165_s7 + $0x5a8] sm:$0xff] %v1356_v53 }
  0xc8   : > { %1359 = vst [vmem:[%s7165_s7 + $0x5b0] sm:$0xff] %v1358_v54  ;;  %v1360_v55 = vld [vmem:[%s7157_s6 + $0x16e0] sm:$0xff] }
  0xc9   : > { %v1362_v56 = vld [vmem:[%s7157_s6 + $0x1700] sm:$0xff]  ;;  %1361 = vst [vmem:[%s7165_s7 + $0x5b8] sm:$0xff] %v1360_v55 }
  0xca   : > { %v1364_v57 = vld [vmem:[%s7157_s6 + $0x1720] sm:$0xff]  ;;  %1363 = vst [vmem:[%s7165_s7 + $0x5c0] sm:$0xff] %v1362_v56 }
  0xcb   : > { %1365 = vst [vmem:[%s7165_s7 + $0x5c8] sm:$0xff] %v1364_v57  ;;  %v1366_v58 = vld [vmem:[%s7157_s6 + $0x1740] sm:$0xff] }
  0xcc   : > { %v1368_v59 = vld [vmem:[%s7157_s6 + $0x1760] sm:$0xff]  ;;  %1367 = vst [vmem:[%s7165_s7 + $0x5d0] sm:$0xff] %v1366_v58 }
  0xcd   : > { %v1370_v60 = vld [vmem:[%s7157_s6 + $0x1780] sm:$0xff]  ;;  %1369 = vst [vmem:[%s7165_s7 + $0x5d8] sm:$0xff] %v1368_v59 }
  0xce   : > { %1371 = vst [vmem:[%s7165_s7 + $0x5e0] sm:$0xff] %v1370_v60  ;;  %v1372_v61 = vld [vmem:[%s7157_s6 + $0x17a0] sm:$0xff] }
  0xcf   : > { %v1374_v62 = vld [vmem:[%s7157_s6 + $0x17c0] sm:$0xff]  ;;  %1373 = vst [vmem:[%s7165_s7 + $0x5e8] sm:$0xff] %v1372_v61 }
  0xd0   : > { %v1376_v63 = vld [vmem:[%s7157_s6 + $0x17e0] sm:$0xff]  ;;  %1375 = vst [vmem:[%s7165_s7 + $0x5f0] sm:$0xff] %v1374_v62 }
  0xd1   : > { %1377 = vst [vmem:[%s7165_s7 + $0x5f8] sm:$0xff] %v1376_v63  ;;  %v1378_v0 = vld [vmem:[%s7157_s6 + $0x1800] sm:$0xff] }
  0xd2   : > { %v1380_v1 = vld [vmem:[%s7157_s6 + $0x1820] sm:$0xff]  ;;  %1379 = vst [vmem:[%s7165_s7 + $0x600] sm:$0xff] %v1378_v0 }
  0xd3   : > { %v1382_v2 = vld [vmem:[%s7157_s6 + $0x1840] sm:$0xff]  ;;  %1381 = vst [vmem:[%s7165_s7 + $0x608] sm:$0xff] %v1380_v1 }
  0xd4   : > { %1383 = vst [vmem:[%s7165_s7 + $0x610] sm:$0xff] %v1382_v2  ;;  %v1384_v3 = vld [vmem:[%s7157_s6 + $0x1860] sm:$0xff] }
  0xd5   : > { %v1386_v4 = vld [vmem:[%s7157_s6 + $0x1880] sm:$0xff]  ;;  %1385 = vst [vmem:[%s7165_s7 + $0x618] sm:$0xff] %v1384_v3 }
  0xd6   : > { %v1388_v5 = vld [vmem:[%s7157_s6 + $0x18a0] sm:$0xff]  ;;  %1387 = vst [vmem:[%s7165_s7 + $0x620] sm:$0xff] %v1386_v4 }
  0xd7   : > { %1389 = vst [vmem:[%s7165_s7 + $0x628] sm:$0xff] %v1388_v5  ;;  %v1390_v6 = vld [vmem:[%s7157_s6 + $0x18c0] sm:$0xff] }
  0xd8   : > { %v1392_v7 = vld [vmem:[%s7157_s6 + $0x18e0] sm:$0xff]  ;;  %1391 = vst [vmem:[%s7165_s7 + $0x630] sm:$0xff] %v1390_v6 }
  0xd9   : > { %v1394_v8 = vld [vmem:[%s7157_s6 + $0x1900] sm:$0xff]  ;;  %1393 = vst [vmem:[%s7165_s7 + $0x638] sm:$0xff] %v1392_v7 }
  0xda   : > { %1395 = vst [vmem:[%s7165_s7 + $0x640] sm:$0xff] %v1394_v8  ;;  %v1396_v9 = vld [vmem:[%s7157_s6 + $0x1920] sm:$0xff] }
  0xdb   : > { %v1398_v10 = vld [vmem:[%s7157_s6 + $0x1940] sm:$0xff]  ;;  %1397 = vst [vmem:[%s7165_s7 + $0x648] sm:$0xff] %v1396_v9 }
  0xdc   : > { %v1400_v11 = vld [vmem:[%s7157_s6 + $0x1960] sm:$0xff]  ;;  %1399 = vst [vmem:[%s7165_s7 + $0x650] sm:$0xff] %v1398_v10 }
  0xdd   : > { %1401 = vst [vmem:[%s7165_s7 + $0x658] sm:$0xff] %v1400_v11  ;;  %v1402_v12 = vld [vmem:[%s7157_s6 + $0x1980] sm:$0xff] }
  0xde   : > { %v1404_v13 = vld [vmem:[%s7157_s6 + $0x19a0] sm:$0xff]  ;;  %1403 = vst [vmem:[%s7165_s7 + $0x660] sm:$0xff] %v1402_v12 }
  0xdf   : > { %v1406_v14 = vld [vmem:[%s7157_s6 + $0x19c0] sm:$0xff]  ;;  %1405 = vst [vmem:[%s7165_s7 + $0x668] sm:$0xff] %v1404_v13 }
  0xe0   : > { %1407 = vst [vmem:[%s7165_s7 + $0x670] sm:$0xff] %v1406_v14  ;;  %v1408_v15 = vld [vmem:[%s7157_s6 + $0x19e0] sm:$0xff] }
  0xe1   : > { %v1410_v16 = vld [vmem:[%s7157_s6 + $0x1a00] sm:$0xff]  ;;  %1409 = vst [vmem:[%s7165_s7 + $0x678] sm:$0xff] %v1408_v15 }
  0xe2   : > { %v1412_v17 = vld [vmem:[%s7157_s6 + $0x1a20] sm:$0xff]  ;;  %1411 = vst [vmem:[%s7165_s7 + $0x680] sm:$0xff] %v1410_v16 }
  0xe3   : > { %1413 = vst [vmem:[%s7165_s7 + $0x688] sm:$0xff] %v1412_v17  ;;  %v1414_v18 = vld [vmem:[%s7157_s6 + $0x1a40] sm:$0xff] }
  0xe4   : > { %v1416_v19 = vld [vmem:[%s7157_s6 + $0x1a60] sm:$0xff]  ;;  %1415 = vst [vmem:[%s7165_s7 + $0x690] sm:$0xff] %v1414_v18 }
  0xe5   : > { %v1418_v20 = vld [vmem:[%s7157_s6 + $0x1a80] sm:$0xff]  ;;  %1417 = vst [vmem:[%s7165_s7 + $0x698] sm:$0xff] %v1416_v19 }
  0xe6   : > { %1419 = vst [vmem:[%s7165_s7 + $0x6a0] sm:$0xff] %v1418_v20  ;;  %v1420_v21 = vld [vmem:[%s7157_s6 + $0x1aa0] sm:$0xff] }
  0xe7   : > { %v1422_v22 = vld [vmem:[%s7157_s6 + $0x1ac0] sm:$0xff]  ;;  %1421 = vst [vmem:[%s7165_s7 + $0x6a8] sm:$0xff] %v1420_v21 }
  0xe8   : > { %v1424_v23 = vld [vmem:[%s7157_s6 + $0x1ae0] sm:$0xff]  ;;  %1423 = vst [vmem:[%s7165_s7 + $0x6b0] sm:$0xff] %v1422_v22 }
  0xe9   : > { %1425 = vst [vmem:[%s7165_s7 + $0x6b8] sm:$0xff] %v1424_v23  ;;  %v1426_v24 = vld [vmem:[%s7157_s6 + $0x1b00] sm:$0xff] }
  0xea   : > { %v1428_v25 = vld [vmem:[%s7157_s6 + $0x1b20] sm:$0xff]  ;;  %1427 = vst [vmem:[%s7165_s7 + $0x6c0] sm:$0xff] %v1426_v24 }
  0xeb   : > { %v1430_v26 = vld [vmem:[%s7157_s6 + $0x1b40] sm:$0xff]  ;;  %1429 = vst [vmem:[%s7165_s7 + $0x6c8] sm:$0xff] %v1428_v25 }
  0xec   : > { %1431 = vst [vmem:[%s7165_s7 + $0x6d0] sm:$0xff] %v1430_v26  ;;  %v1432_v27 = vld [vmem:[%s7157_s6 + $0x1b60] sm:$0xff] }
  0xed   : > { %v1434_v28 = vld [vmem:[%s7157_s6 + $0x1b80] sm:$0xff]  ;;  %1433 = vst [vmem:[%s7165_s7 + $0x6d8] sm:$0xff] %v1432_v27 }
  0xee   : > { %v1436_v29 = vld [vmem:[%s7157_s6 + $0x1ba0] sm:$0xff]  ;;  %1435 = vst [vmem:[%s7165_s7 + $0x6e0] sm:$0xff] %v1434_v28 }
  0xef   : > { %1437 = vst [vmem:[%s7165_s7 + $0x6e8] sm:$0xff] %v1436_v29  ;;  %v1438_v30 = vld [vmem:[%s7157_s6 + $0x1bc0] sm:$0xff] }
  0xf0   : > { %v1440_v31 = vld [vmem:[%s7157_s6 + $0x1be0] sm:$0xff]  ;;  %1439 = vst [vmem:[%s7165_s7 + $0x6f0] sm:$0xff] %v1438_v30 }
  0xf1   : > { %v1442_v32 = vld [vmem:[%s7157_s6 + $0x1c00] sm:$0xff]  ;;  %1441 = vst [vmem:[%s7165_s7 + $0x6f8] sm:$0xff] %v1440_v31 }
  0xf2   : > { %1443 = vst [vmem:[%s7165_s7 + $0x700] sm:$0xff] %v1442_v32  ;;  %v1444_v33 = vld [vmem:[%s7157_s6 + $0x1c20] sm:$0xff] }
  0xf3   : > { %v1446_v34 = vld [vmem:[%s7157_s6 + $0x1c40] sm:$0xff]  ;;  %1445 = vst [vmem:[%s7165_s7 + $0x708] sm:$0xff] %v1444_v33 }
  0xf4   : > { %v1448_v35 = vld [vmem:[%s7157_s6 + $0x1c60] sm:$0xff]  ;;  %1447 = vst [vmem:[%s7165_s7 + $0x710] sm:$0xff] %v1446_v34 }
  0xf5   : > { %1449 = vst [vmem:[%s7165_s7 + $0x718] sm:$0xff] %v1448_v35  ;;  %v1450_v36 = vld [vmem:[%s7157_s6 + $0x1c80] sm:$0xff] }
  0xf6   : > { %v1452_v37 = vld [vmem:[%s7157_s6 + $0x1ca0] sm:$0xff]  ;;  %1451 = vst [vmem:[%s7165_s7 + $0x720] sm:$0xff] %v1450_v36 }
  0xf7   : > { %v1454_v38 = vld [vmem:[%s7157_s6 + $0x1cc0] sm:$0xff]  ;;  %1453 = vst [vmem:[%s7165_s7 + $0x728] sm:$0xff] %v1452_v37 }
  0xf8   : > { %1455 = vst [vmem:[%s7165_s7 + $0x730] sm:$0xff] %v1454_v38  ;;  %v1456_v39 = vld [vmem:[%s7157_s6 + $0x1ce0] sm:$0xff] }
  0xf9   : > { %v1458_v40 = vld [vmem:[%s7157_s6 + $0x1d00] sm:$0xff]  ;;  %1457 = vst [vmem:[%s7165_s7 + $0x738] sm:$0xff] %v1456_v39 }
  0xfa   : > { %v1460_v41 = vld [vmem:[%s7157_s6 + $0x1d20] sm:$0xff]  ;;  %1459 = vst [vmem:[%s7165_s7 + $0x740] sm:$0xff] %v1458_v40 }
  0xfb   : > { %1461 = vst [vmem:[%s7165_s7 + $0x748] sm:$0xff] %v1460_v41  ;;  %v1462_v42 = vld [vmem:[%s7157_s6 + $0x1d40] sm:$0xff] }
  0xfc   : > { %v1464_v43 = vld [vmem:[%s7157_s6 + $0x1d60] sm:$0xff]  ;;  %1463 = vst [vmem:[%s7165_s7 + $0x750] sm:$0xff] %v1462_v42 }
  0xfd   : > { %v1466_v44 = vld [vmem:[%s7157_s6 + $0x1d80] sm:$0xff]  ;;  %1465 = vst [vmem:[%s7165_s7 + $0x758] sm:$0xff] %v1464_v43 }
  0xfe   : > { %1467 = vst [vmem:[%s7165_s7 + $0x760] sm:$0xff] %v1466_v44  ;;  %v1468_v45 = vld [vmem:[%s7157_s6 + $0x1da0] sm:$0xff] }
  0xff   : > { %v1470_v46 = vld [vmem:[%s7157_s6 + $0x1dc0] sm:$0xff]  ;;  %1469 = vst [vmem:[%s7165_s7 + $0x768] sm:$0xff] %v1468_v45 }
 0x100   : > { %v1472_v47 = vld [vmem:[%s7157_s6 + $0x1de0] sm:$0xff]  ;;  %1471 = vst [vmem:[%s7165_s7 + $0x770] sm:$0xff] %v1470_v46 }
 0x101   : > { %1473 = vst [vmem:[%s7165_s7 + $0x778] sm:$0xff] %v1472_v47  ;;  %v1474_v48 = vld [vmem:[%s7157_s6 + $0x1e00] sm:$0xff] }
 0x102   : > { %v1476_v49 = vld [vmem:[%s7157_s6 + $0x1e20] sm:$0xff]  ;;  %1475 = vst [vmem:[%s7165_s7 + $0x780] sm:$0xff] %v1474_v48 }
 0x103   : > { %v1478_v50 = vld [vmem:[%s7157_s6 + $0x1e40] sm:$0xff]  ;;  %1477 = vst [vmem:[%s7165_s7 + $0x788] sm:$0xff] %v1476_v49 }
 0x104   : > { %1479 = vst [vmem:[%s7165_s7 + $0x790] sm:$0xff] %v1478_v50  ;;  %v1480_v51 = vld [vmem:[%s7157_s6 + $0x1e60] sm:$0xff] }
 0x105   : > { %v1482_v52 = vld [vmem:[%s7157_s6 + $0x1e80] sm:$0xff]  ;;  %1481 = vst [vmem:[%s7165_s7 + $0x798] sm:$0xff] %v1480_v51 }
 0x106   : > { %v1484_v53 = vld [vmem:[%s7157_s6 + $0x1ea0] sm:$0xff]  ;;  %1483 = vst [vmem:[%s7165_s7 + $0x7a0] sm:$0xff] %v1482_v52 }
 0x107   : > { %1485 = vst [vmem:[%s7165_s7 + $0x7a8] sm:$0xff] %v1484_v53  ;;  %v1486_v54 = vld [vmem:[%s7157_s6 + $0x1ec0] sm:$0xff] }
 0x108   : > { %v1488_v55 = vld [vmem:[%s7157_s6 + $0x1ee0] sm:$0xff]  ;;  %1487 = vst [vmem:[%s7165_s7 + $0x7b0] sm:$0xff] %v1486_v54 }
 0x109   : > { %v1490_v56 = vld [vmem:[%s7157_s6 + $0x1f00] sm:$0xff]  ;;  %1489 = vst [vmem:[%s7165_s7 + $0x7b8] sm:$0xff] %v1488_v55 }
 0x10a   : > { %1491 = vst [vmem:[%s7165_s7 + $0x7c0] sm:$0xff] %v1490_v56  ;;  %v1492_v57 = vld [vmem:[%s7157_s6 + $0x1f20] sm:$0xff] }
 0x10b   : > { %v1494_v58 = vld [vmem:[%s7157_s6 + $0x1f40] sm:$0xff]  ;;  %1493 = vst [vmem:[%s7165_s7 + $0x7c8] sm:$0xff] %v1492_v57 }
 0x10c   : > { %v1496_v59 = vld [vmem:[%s7157_s6 + $0x1f60] sm:$0xff]  ;;  %1495 = vst [vmem:[%s7165_s7 + $0x7d0] sm:$0xff] %v1494_v58 }
 0x10d   : > { %1497 = vst [vmem:[%s7165_s7 + $0x7d8] sm:$0xff] %v1496_v59  ;;  %v1498_v60 = vld [vmem:[%s7157_s6 + $0x1f80] sm:$0xff] }
 0x10e   : > { %v1500_v61 = vld [vmem:[%s7157_s6 + $0x1fa0] sm:$0xff]  ;;  %1499 = vst [vmem:[%s7165_s7 + $0x7e0] sm:$0xff] %v1498_v60 }
 0x10f   : > { %v1502_v62 = vld [vmem:[%s7157_s6 + $0x1fc0] sm:$0xff]  ;;  %1501 = vst [vmem:[%s7165_s7 + $0x7e8] sm:$0xff] %v1500_v61 }
 0x110   : > { %1503 = vst [vmem:[%s7165_s7 + $0x7f0] sm:$0xff] %v1502_v62  ;;  %v1504_v63 = vld [vmem:[%s7157_s6 + $0x1fe0] sm:$0xff] }
 0x111   : > { %v1506_v0 = vld [vmem:[%s7157_s6 + $0x2000] sm:$0xff]  ;;  %1505 = vst [vmem:[%s7165_s7 + $0x7f8] sm:$0xff] %v1504_v63 }
 0x112   : > { %v1508_v1 = vld [vmem:[%s7157_s6 + $0x2020] sm:$0xff]  ;;  %1507 = vst [vmem:[%s7165_s7 + $0x800] sm:$0xff] %v1506_v0 }
 0x113   : > { %1509 = vst [vmem:[%s7165_s7 + $0x808] sm:$0xff] %v1508_v1  ;;  %v1510_v2 = vld [vmem:[%s7157_s6 + $0x2040] sm:$0xff] }
 0x114   : > { %v1512_v3 = vld [vmem:[%s7157_s6 + $0x2060] sm:$0xff]  ;;  %1511 = vst [vmem:[%s7165_s7 + $0x810] sm:$0xff] %v1510_v2 }
 0x115   : > { %v1514_v4 = vld [vmem:[%s7157_s6 + $0x2080] sm:$0xff]  ;;  %1513 = vst [vmem:[%s7165_s7 + $0x818] sm:$0xff] %v1512_v3 }
 0x116   : > { %1515 = vst [vmem:[%s7165_s7 + $0x820] sm:$0xff] %v1514_v4  ;;  %v1516_v5 = vld [vmem:[%s7157_s6 + $0x20a0] sm:$0xff] }
 0x117   : > { %v1518_v6 = vld [vmem:[%s7157_s6 + $0x20c0] sm:$0xff]  ;;  %1517 = vst [vmem:[%s7165_s7 + $0x828] sm:$0xff] %v1516_v5 }
 0x118   : > { %v1520_v7 = vld [vmem:[%s7157_s6 + $0x20e0] sm:$0xff]  ;;  %1519 = vst [vmem:[%s7165_s7 + $0x830] sm:$0xff] %v1518_v6 }
 0x119   : > { %1521 = vst [vmem:[%s7165_s7 + $0x838] sm:$0xff] %v1520_v7  ;;  %v1522_v8 = vld [vmem:[%s7157_s6 + $0x2100] sm:$0xff] }
 0x11a   : > { %v1524_v9 = vld [vmem:[%s7157_s6 + $0x2120] sm:$0xff]  ;;  %1523 = vst [vmem:[%s7165_s7 + $0x840] sm:$0xff] %v1522_v8 }
 0x11b   : > { %v1526_v10 = vld [vmem:[%s7157_s6 + $0x2140] sm:$0xff]  ;;  %1525 = vst [vmem:[%s7165_s7 + $0x848] sm:$0xff] %v1524_v9 }
 0x11c   : > { %1527 = vst [vmem:[%s7165_s7 + $0x850] sm:$0xff] %v1526_v10  ;;  %v1528_v11 = vld [vmem:[%s7157_s6 + $0x2160] sm:$0xff] }
 0x11d   : > { %v1530_v12 = vld [vmem:[%s7157_s6 + $0x2180] sm:$0xff]  ;;  %1529 = vst [vmem:[%s7165_s7 + $0x858] sm:$0xff] %v1528_v11 }
 0x11e   : > { %v1532_v13 = vld [vmem:[%s7157_s6 + $0x21a0] sm:$0xff]  ;;  %1531 = vst [vmem:[%s7165_s7 + $0x860] sm:$0xff] %v1530_v12 }
 0x11f   : > { %1533 = vst [vmem:[%s7165_s7 + $0x868] sm:$0xff] %v1532_v13  ;;  %v1534_v14 = vld [vmem:[%s7157_s6 + $0x21c0] sm:$0xff] }
 0x120   : > { %v1536_v15 = vld [vmem:[%s7157_s6 + $0x21e0] sm:$0xff]  ;;  %1535 = vst [vmem:[%s7165_s7 + $0x870] sm:$0xff] %v1534_v14 }
 0x121   : > { %v1538_v16 = vld [vmem:[%s7157_s6 + $0x2200] sm:$0xff]  ;;  %1537 = vst [vmem:[%s7165_s7 + $0x878] sm:$0xff] %v1536_v15 }
 0x122   : > { %1539 = vst [vmem:[%s7165_s7 + $0x880] sm:$0xff] %v1538_v16  ;;  %v1540_v17 = vld [vmem:[%s7157_s6 + $0x2220] sm:$0xff] }
 0x123   : > { %v1542_v18 = vld [vmem:[%s7157_s6 + $0x2240] sm:$0xff]  ;;  %1541 = vst [vmem:[%s7165_s7 + $0x888] sm:$0xff] %v1540_v17 }
 0x124   : > { %v1544_v19 = vld [vmem:[%s7157_s6 + $0x2260] sm:$0xff]  ;;  %1543 = vst [vmem:[%s7165_s7 + $0x890] sm:$0xff] %v1542_v18 }
 0x125   : > { %1545 = vst [vmem:[%s7165_s7 + $0x898] sm:$0xff] %v1544_v19  ;;  %v1546_v20 = vld [vmem:[%s7157_s6 + $0x2280] sm:$0xff] }
 0x126   : > { %v1548_v21 = vld [vmem:[%s7157_s6 + $0x22a0] sm:$0xff]  ;;  %1547 = vst [vmem:[%s7165_s7 + $0x8a0] sm:$0xff] %v1546_v20 }
 0x127   : > { %v1550_v22 = vld [vmem:[%s7157_s6 + $0x22c0] sm:$0xff]  ;;  %1549 = vst [vmem:[%s7165_s7 + $0x8a8] sm:$0xff] %v1548_v21 }
 0x128   : > { %1551 = vst [vmem:[%s7165_s7 + $0x8b0] sm:$0xff] %v1550_v22  ;;  %v1552_v23 = vld [vmem:[%s7157_s6 + $0x22e0] sm:$0xff] }
 0x129   : > { %v1554_v24 = vld [vmem:[%s7157_s6 + $0x2300] sm:$0xff]  ;;  %1553 = vst [vmem:[%s7165_s7 + $0x8b8] sm:$0xff] %v1552_v23 }
 0x12a   : > { %v1556_v25 = vld [vmem:[%s7157_s6 + $0x2320] sm:$0xff]  ;;  %1555 = vst [vmem:[%s7165_s7 + $0x8c0] sm:$0xff] %v1554_v24 }
 0x12b   : > { %1557 = vst [vmem:[%s7165_s7 + $0x8c8] sm:$0xff] %v1556_v25  ;;  %v1558_v26 = vld [vmem:[%s7157_s6 + $0x2340] sm:$0xff] }
 0x12c   : > { %v1560_v27 = vld [vmem:[%s7157_s6 + $0x2360] sm:$0xff]  ;;  %1559 = vst [vmem:[%s7165_s7 + $0x8d0] sm:$0xff] %v1558_v26 }
 0x12d   : > { %v1562_v28 = vld [vmem:[%s7157_s6 + $0x2380] sm:$0xff]  ;;  %1561 = vst [vmem:[%s7165_s7 + $0x8d8] sm:$0xff] %v1560_v27 }
 0x12e   : > { %1563 = vst [vmem:[%s7165_s7 + $0x8e0] sm:$0xff] %v1562_v28  ;;  %v1564_v29 = vld [vmem:[%s7157_s6 + $0x23a0] sm:$0xff] }
 0x12f   : > { %v1566_v30 = vld [vmem:[%s7157_s6 + $0x23c0] sm:$0xff]  ;;  %1565 = vst [vmem:[%s7165_s7 + $0x8e8] sm:$0xff] %v1564_v29 }
 0x130   : > { %v1568_v31 = vld [vmem:[%s7157_s6 + $0x23e0] sm:$0xff]  ;;  %1567 = vst [vmem:[%s7165_s7 + $0x8f0] sm:$0xff] %v1566_v30 }
 0x131   : > { %1569 = vst [vmem:[%s7165_s7 + $0x8f8] sm:$0xff] %v1568_v31  ;;  %v1570_v32 = vld [vmem:[%s7157_s6 + $0x2400] sm:$0xff] }
 0x132   : > { %v1572_v33 = vld [vmem:[%s7157_s6 + $0x2420] sm:$0xff]  ;;  %1571 = vst [vmem:[%s7165_s7 + $0x900] sm:$0xff] %v1570_v32 }
 0x133   : > { %v1574_v34 = vld [vmem:[%s7157_s6 + $0x2440] sm:$0xff]  ;;  %1573 = vst [vmem:[%s7165_s7 + $0x908] sm:$0xff] %v1572_v33 }
 0x134   : > { %1575 = vst [vmem:[%s7165_s7 + $0x910] sm:$0xff] %v1574_v34  ;;  %v1576_v35 = vld [vmem:[%s7157_s6 + $0x2460] sm:$0xff] }
 0x135   : > { %v1578_v36 = vld [vmem:[%s7157_s6 + $0x2480] sm:$0xff]  ;;  %1577 = vst [vmem:[%s7165_s7 + $0x918] sm:$0xff] %v1576_v35 }
 0x136   : > { %v1580_v37 = vld [vmem:[%s7157_s6 + $0x24a0] sm:$0xff]  ;;  %1579 = vst [vmem:[%s7165_s7 + $0x920] sm:$0xff] %v1578_v36 }
 0x137   : > { %1581 = vst [vmem:[%s7165_s7 + $0x928] sm:$0xff] %v1580_v37  ;;  %v1582_v38 = vld [vmem:[%s7157_s6 + $0x24c0] sm:$0xff] }
 0x138   : > { %v1584_v39 = vld [vmem:[%s7157_s6 + $0x24e0] sm:$0xff]  ;;  %1583 = vst [vmem:[%s7165_s7 + $0x930] sm:$0xff] %v1582_v38 }
 0x139   : > { %v1586_v40 = vld [vmem:[%s7157_s6 + $0x2500] sm:$0xff]  ;;  %1585 = vst [vmem:[%s7165_s7 + $0x938] sm:$0xff] %v1584_v39 }
 0x13a   : > { %1587 = vst [vmem:[%s7165_s7 + $0x940] sm:$0xff] %v1586_v40  ;;  %v1588_v41 = vld [vmem:[%s7157_s6 + $0x2520] sm:$0xff] }
 0x13b   : > { %v1590_v42 = vld [vmem:[%s7157_s6 + $0x2540] sm:$0xff]  ;;  %1589 = vst [vmem:[%s7165_s7 + $0x948] sm:$0xff] %v1588_v41 }
 0x13c   : > { %v1592_v43 = vld [vmem:[%s7157_s6 + $0x2560] sm:$0xff]  ;;  %1591 = vst [vmem:[%s7165_s7 + $0x950] sm:$0xff] %v1590_v42 }
 0x13d   : > { %1593 = vst [vmem:[%s7165_s7 + $0x958] sm:$0xff] %v1592_v43  ;;  %v1594_v44 = vld [vmem:[%s7157_s6 + $0x2580] sm:$0xff] }
 0x13e   : > { %v1596_v45 = vld [vmem:[%s7157_s6 + $0x25a0] sm:$0xff]  ;;  %1595 = vst [vmem:[%s7165_s7 + $0x960] sm:$0xff] %v1594_v44 }
 0x13f   : > { %v1598_v46 = vld [vmem:[%s7157_s6 + $0x25c0] sm:$0xff]  ;;  %1597 = vst [vmem:[%s7165_s7 + $0x968] sm:$0xff] %v1596_v45 }
 0x140   : > { %1599 = vst [vmem:[%s7165_s7 + $0x970] sm:$0xff] %v1598_v46  ;;  %v1600_v47 = vld [vmem:[%s7157_s6 + $0x25e0] sm:$0xff] }
 0x141   : > { %v1602_v48 = vld [vmem:[%s7157_s6 + $0x2600] sm:$0xff]  ;;  %1601 = vst [vmem:[%s7165_s7 + $0x978] sm:$0xff] %v1600_v47 }
 0x142   : > { %v1604_v49 = vld [vmem:[%s7157_s6 + $0x2620] sm:$0xff]  ;;  %1603 = vst [vmem:[%s7165_s7 + $0x980] sm:$0xff] %v1602_v48 }
 0x143   : > { %1605 = vst [vmem:[%s7165_s7 + $0x988] sm:$0xff] %v1604_v49  ;;  %v1606_v50 = vld [vmem:[%s7157_s6 + $0x2640] sm:$0xff] }
 0x144   : > { %v1608_v51 = vld [vmem:[%s7157_s6 + $0x2660] sm:$0xff]  ;;  %1607 = vst [vmem:[%s7165_s7 + $0x990] sm:$0xff] %v1606_v50 }
 0x145   : > { %v1610_v52 = vld [vmem:[%s7157_s6 + $0x2680] sm:$0xff]  ;;  %1609 = vst [vmem:[%s7165_s7 + $0x998] sm:$0xff] %v1608_v51 }
 0x146   : > { %1611 = vst [vmem:[%s7165_s7 + $0x9a0] sm:$0xff] %v1610_v52  ;;  %v1612_v53 = vld [vmem:[%s7157_s6 + $0x26a0] sm:$0xff] }
 0x147   : > { %v1614_v54 = vld [vmem:[%s7157_s6 + $0x26c0] sm:$0xff]  ;;  %1613 = vst [vmem:[%s7165_s7 + $0x9a8] sm:$0xff] %v1612_v53 }
 0x148   : > { %v1616_v55 = vld [vmem:[%s7157_s6 + $0x26e0] sm:$0xff]  ;;  %1615 = vst [vmem:[%s7165_s7 + $0x9b0] sm:$0xff] %v1614_v54 }
 0x149   : > { %1617 = vst [vmem:[%s7165_s7 + $0x9b8] sm:$0xff] %v1616_v55  ;;  %v1618_v56 = vld [vmem:[%s7157_s6 + $0x2700] sm:$0xff] }
 0x14a   : > { %v1620_v57 = vld [vmem:[%s7157_s6 + $0x2720] sm:$0xff]  ;;  %1619 = vst [vmem:[%s7165_s7 + $0x9c0] sm:$0xff] %v1618_v56 }
 0x14b   : > { %v1622_v58 = vld [vmem:[%s7157_s6 + $0x2740] sm:$0xff]  ;;  %1621 = vst [vmem:[%s7165_s7 + $0x9c8] sm:$0xff] %v1620_v57 }
 0x14c   : > { %1623 = vst [vmem:[%s7165_s7 + $0x9d0] sm:$0xff] %v1622_v58  ;;  %v1624_v59 = vld [vmem:[%s7157_s6 + $0x2760] sm:$0xff] }
 0x14d   : > { %v1626_v60 = vld [vmem:[%s7157_s6 + $0x2780] sm:$0xff]  ;;  %1625 = vst [vmem:[%s7165_s7 + $0x9d8] sm:$0xff] %v1624_v59 }
 0x14e   : > { %v1628_v61 = vld [vmem:[%s7157_s6 + $0x27a0] sm:$0xff]  ;;  %1627 = vst [vmem:[%s7165_s7 + $0x9e0] sm:$0xff] %v1626_v60 }
 0x14f   : > { %1629 = vst [vmem:[%s7165_s7 + $0x9e8] sm:$0xff] %v1628_v61  ;;  %v1630_v62 = vld [vmem:[%s7157_s6 + $0x27c0] sm:$0xff] }
 0x150   : > { %v1632_v63 = vld [vmem:[%s7157_s6 + $0x27e0] sm:$0xff]  ;;  %1631 = vst [vmem:[%s7165_s7 + $0x9f0] sm:$0xff] %v1630_v62 }
 0x151   : > { %v1634_v0 = vld [vmem:[%s7157_s6 + $0x2800] sm:$0xff]  ;;  %1633 = vst [vmem:[%s7165_s7 + $0x9f8] sm:$0xff] %v1632_v63 }
 0x152   : > { %1635 = vst [vmem:[%s7165_s7 + $0xa00] sm:$0xff] %v1634_v0  ;;  %v1636_v1 = vld [vmem:[%s7157_s6 + $0x2820] sm:$0xff] }
 0x153   : > { %v1638_v2 = vld [vmem:[%s7157_s6 + $0x2840] sm:$0xff]  ;;  %1637 = vst [vmem:[%s7165_s7 + $0xa08] sm:$0xff] %v1636_v1 }
 0x154   : > { %v1640_v3 = vld [vmem:[%s7157_s6 + $0x2860] sm:$0xff]  ;;  %1639 = vst [vmem:[%s7165_s7 + $0xa10] sm:$0xff] %v1638_v2 }
 0x155   : > { %1641 = vst [vmem:[%s7165_s7 + $0xa18] sm:$0xff] %v1640_v3  ;;  %v1642_v4 = vld [vmem:[%s7157_s6 + $0x2880] sm:$0xff] }
 0x156   : > { %v1644_v5 = vld [vmem:[%s7157_s6 + $0x28a0] sm:$0xff]  ;;  %1643 = vst [vmem:[%s7165_s7 + $0xa20] sm:$0xff] %v1642_v4 }
 0x157   : > { %v1646_v6 = vld [vmem:[%s7157_s6 + $0x28c0] sm:$0xff]  ;;  %1645 = vst [vmem:[%s7165_s7 + $0xa28] sm:$0xff] %v1644_v5 }
 0x158   : > { %1647 = vst [vmem:[%s7165_s7 + $0xa30] sm:$0xff] %v1646_v6  ;;  %v1648_v7 = vld [vmem:[%s7157_s6 + $0x28e0] sm:$0xff] }
 0x159   : > { %v1650_v8 = vld [vmem:[%s7157_s6 + $0x2900] sm:$0xff]  ;;  %1649 = vst [vmem:[%s7165_s7 + $0xa38] sm:$0xff] %v1648_v7 }
 0x15a   : > { %v1652_v9 = vld [vmem:[%s7157_s6 + $0x2920] sm:$0xff]  ;;  %1651 = vst [vmem:[%s7165_s7 + $0xa40] sm:$0xff] %v1650_v8 }
 0x15b   : > { %1653 = vst [vmem:[%s7165_s7 + $0xa48] sm:$0xff] %v1652_v9  ;;  %v1654_v10 = vld [vmem:[%s7157_s6 + $0x2940] sm:$0xff] }
 0x15c   : > { %v1656_v11 = vld [vmem:[%s7157_s6 + $0x2960] sm:$0xff]  ;;  %1655 = vst [vmem:[%s7165_s7 + $0xa50] sm:$0xff] %v1654_v10 }
 0x15d   : > { %v1658_v12 = vld [vmem:[%s7157_s6 + $0x2980] sm:$0xff]  ;;  %1657 = vst [vmem:[%s7165_s7 + $0xa58] sm:$0xff] %v1656_v11 }
 0x15e   : > { %1659 = vst [vmem:[%s7165_s7 + $0xa60] sm:$0xff] %v1658_v12  ;;  %v1660_v13 = vld [vmem:[%s7157_s6 + $0x29a0] sm:$0xff] }
 0x15f   : > { %v1662_v14 = vld [vmem:[%s7157_s6 + $0x29c0] sm:$0xff]  ;;  %1661 = vst [vmem:[%s7165_s7 + $0xa68] sm:$0xff] %v1660_v13 }
 0x160   : > { %v1664_v15 = vld [vmem:[%s7157_s6 + $0x29e0] sm:$0xff]  ;;  %1663 = vst [vmem:[%s7165_s7 + $0xa70] sm:$0xff] %v1662_v14 }
 0x161   : > { %1665 = vst [vmem:[%s7165_s7 + $0xa78] sm:$0xff] %v1664_v15  ;;  %v1666_v16 = vld [vmem:[%s7157_s6 + $0x2a00] sm:$0xff] }
 0x162   : > { %v1668_v17 = vld [vmem:[%s7157_s6 + $0x2a20] sm:$0xff]  ;;  %1667 = vst [vmem:[%s7165_s7 + $0xa80] sm:$0xff] %v1666_v16 }
 0x163   : > { %v1670_v18 = vld [vmem:[%s7157_s6 + $0x2a40] sm:$0xff]  ;;  %1669 = vst [vmem:[%s7165_s7 + $0xa88] sm:$0xff] %v1668_v17 }
 0x164   : > { %1671 = vst [vmem:[%s7165_s7 + $0xa90] sm:$0xff] %v1670_v18  ;;  %v1672_v19 = vld [vmem:[%s7157_s6 + $0x2a60] sm:$0xff] }
 0x165   : > { %v1674_v20 = vld [vmem:[%s7157_s6 + $0x2a80] sm:$0xff]  ;;  %1673 = vst [vmem:[%s7165_s7 + $0xa98] sm:$0xff] %v1672_v19 }
 0x166   : > { %v1676_v21 = vld [vmem:[%s7157_s6 + $0x2aa0] sm:$0xff]  ;;  %1675 = vst [vmem:[%s7165_s7 + $0xaa0] sm:$0xff] %v1674_v20 }
 0x167   : > { %1677 = vst [vmem:[%s7165_s7 + $0xaa8] sm:$0xff] %v1676_v21  ;;  %v1678_v22 = vld [vmem:[%s7157_s6 + $0x2ac0] sm:$0xff] }
 0x168   : > { %v1680_v23 = vld [vmem:[%s7157_s6 + $0x2ae0] sm:$0xff]  ;;  %1679 = vst [vmem:[%s7165_s7 + $0xab0] sm:$0xff] %v1678_v22 }
 0x169   : > { %v1682_v24 = vld [vmem:[%s7157_s6 + $0x2b00] sm:$0xff]  ;;  %1681 = vst [vmem:[%s7165_s7 + $0xab8] sm:$0xff] %v1680_v23 }
 0x16a   : > { %1683 = vst [vmem:[%s7165_s7 + $0xac0] sm:$0xff] %v1682_v24  ;;  %v1684_v25 = vld [vmem:[%s7157_s6 + $0x2b20] sm:$0xff] }
 0x16b   : > { %v1686_v26 = vld [vmem:[%s7157_s6 + $0x2b40] sm:$0xff]  ;;  %1685 = vst [vmem:[%s7165_s7 + $0xac8] sm:$0xff] %v1684_v25 }
 0x16c   : > { %v1688_v27 = vld [vmem:[%s7157_s6 + $0x2b60] sm:$0xff]  ;;  %1687 = vst [vmem:[%s7165_s7 + $0xad0] sm:$0xff] %v1686_v26 }
 0x16d   : > { %1689 = vst [vmem:[%s7165_s7 + $0xad8] sm:$0xff] %v1688_v27  ;;  %v1690_v28 = vld [vmem:[%s7157_s6 + $0x2b80] sm:$0xff] }
 0x16e   : > { %v1692_v29 = vld [vmem:[%s7157_s6 + $0x2ba0] sm:$0xff]  ;;  %1691 = vst [vmem:[%s7165_s7 + $0xae0] sm:$0xff] %v1690_v28 }
 0x16f   : > { %v1694_v30 = vld [vmem:[%s7157_s6 + $0x2bc0] sm:$0xff]  ;;  %1693 = vst [vmem:[%s7165_s7 + $0xae8] sm:$0xff] %v1692_v29 }
 0x170   : > { %1695 = vst [vmem:[%s7165_s7 + $0xaf0] sm:$0xff] %v1694_v30  ;;  %v1696_v31 = vld [vmem:[%s7157_s6 + $0x2be0] sm:$0xff] }
 0x171   : > { %v1698_v32 = vld [vmem:[%s7157_s6 + $0x2c00] sm:$0xff]  ;;  %1697 = vst [vmem:[%s7165_s7 + $0xaf8] sm:$0xff] %v1696_v31 }
 0x172   : > { %v1700_v33 = vld [vmem:[%s7157_s6 + $0x2c20] sm:$0xff]  ;;  %1699 = vst [vmem:[%s7165_s7 + $0xb00] sm:$0xff] %v1698_v32 }
 0x173   : > { %1701 = vst [vmem:[%s7165_s7 + $0xb08] sm:$0xff] %v1700_v33  ;;  %v1702_v34 = vld [vmem:[%s7157_s6 + $0x2c40] sm:$0xff] }
 0x174   : > { %v1704_v35 = vld [vmem:[%s7157_s6 + $0x2c60] sm:$0xff]  ;;  %1703 = vst [vmem:[%s7165_s7 + $0xb10] sm:$0xff] %v1702_v34 }
 0x175   : > { %v1706_v36 = vld [vmem:[%s7157_s6 + $0x2c80] sm:$0xff]  ;;  %1705 = vst [vmem:[%s7165_s7 + $0xb18] sm:$0xff] %v1704_v35 }
 0x176   : > { %1707 = vst [vmem:[%s7165_s7 + $0xb20] sm:$0xff] %v1706_v36  ;;  %v1708_v37 = vld [vmem:[%s7157_s6 + $0x2ca0] sm:$0xff] }
 0x177   : > { %v1710_v38 = vld [vmem:[%s7157_s6 + $0x2cc0] sm:$0xff]  ;;  %1709 = vst [vmem:[%s7165_s7 + $0xb28] sm:$0xff] %v1708_v37 }
 0x178   : > { %v1712_v39 = vld [vmem:[%s7157_s6 + $0x2ce0] sm:$0xff]  ;;  %1711 = vst [vmem:[%s7165_s7 + $0xb30] sm:$0xff] %v1710_v38 }
 0x179   : > { %1713 = vst [vmem:[%s7165_s7 + $0xb38] sm:$0xff] %v1712_v39  ;;  %v1714_v40 = vld [vmem:[%s7157_s6 + $0x2d00] sm:$0xff] }
 0x17a   : > { %v1716_v41 = vld [vmem:[%s7157_s6 + $0x2d20] sm:$0xff]  ;;  %1715 = vst [vmem:[%s7165_s7 + $0xb40] sm:$0xff] %v1714_v40 }
 0x17b   : > { %v1718_v42 = vld [vmem:[%s7157_s6 + $0x2d40] sm:$0xff]  ;;  %1717 = vst [vmem:[%s7165_s7 + $0xb48] sm:$0xff] %v1716_v41 }
 0x17c   : > { %1719 = vst [vmem:[%s7165_s7 + $0xb50] sm:$0xff] %v1718_v42  ;;  %v1720_v43 = vld [vmem:[%s7157_s6 + $0x2d60] sm:$0xff] }
 0x17d   : > { %v1722_v44 = vld [vmem:[%s7157_s6 + $0x2d80] sm:$0xff]  ;;  %1721 = vst [vmem:[%s7165_s7 + $0xb58] sm:$0xff] %v1720_v43 }
 0x17e   : > { %v1724_v45 = vld [vmem:[%s7157_s6 + $0x2da0] sm:$0xff]  ;;  %1723 = vst [vmem:[%s7165_s7 + $0xb60] sm:$0xff] %v1722_v44 }
 0x17f   : > { %1725 = vst [vmem:[%s7165_s7 + $0xb68] sm:$0xff] %v1724_v45  ;;  %v1726_v46 = vld [vmem:[%s7157_s6 + $0x2dc0] sm:$0xff] }
 0x180   : > { %v1728_v47 = vld [vmem:[%s7157_s6 + $0x2de0] sm:$0xff]  ;;  %1727 = vst [vmem:[%s7165_s7 + $0xb70] sm:$0xff] %v1726_v46 }
 0x181   : > { %v1730_v48 = vld [vmem:[%s7157_s6 + $0x2e00] sm:$0xff]  ;;  %1729 = vst [vmem:[%s7165_s7 + $0xb78] sm:$0xff] %v1728_v47 }
 0x182   : > { %1731 = vst [vmem:[%s7165_s7 + $0xb80] sm:$0xff] %v1730_v48  ;;  %v1732_v49 = vld [vmem:[%s7157_s6 + $0x2e20] sm:$0xff] }
 0x183   : > { %v1734_v50 = vld [vmem:[%s7157_s6 + $0x2e40] sm:$0xff]  ;;  %1733 = vst [vmem:[%s7165_s7 + $0xb88] sm:$0xff] %v1732_v49 }
 0x184   : > { %v1736_v51 = vld [vmem:[%s7157_s6 + $0x2e60] sm:$0xff]  ;;  %1735 = vst [vmem:[%s7165_s7 + $0xb90] sm:$0xff] %v1734_v50 }
 0x185   : > { %1737 = vst [vmem:[%s7165_s7 + $0xb98] sm:$0xff] %v1736_v51  ;;  %v1738_v52 = vld [vmem:[%s7157_s6 + $0x2e80] sm:$0xff] }
 0x186   : > { %v1740_v53 = vld [vmem:[%s7157_s6 + $0x2ea0] sm:$0xff]  ;;  %1739 = vst [vmem:[%s7165_s7 + $0xba0] sm:$0xff] %v1738_v52 }
 0x187   : > { %v1742_v54 = vld [vmem:[%s7157_s6 + $0x2ec0] sm:$0xff]  ;;  %1741 = vst [vmem:[%s7165_s7 + $0xba8] sm:$0xff] %v1740_v53 }
 0x188   : > { %1743 = vst [vmem:[%s7165_s7 + $0xbb0] sm:$0xff] %v1742_v54  ;;  %v1744_v55 = vld [vmem:[%s7157_s6 + $0x2ee0] sm:$0xff] }
 0x189   : > { %v1746_v56 = vld [vmem:[%s7157_s6 + $0x2f00] sm:$0xff]  ;;  %1745 = vst [vmem:[%s7165_s7 + $0xbb8] sm:$0xff] %v1744_v55 }
 0x18a   : > { %v1748_v57 = vld [vmem:[%s7157_s6 + $0x2f20] sm:$0xff]  ;;  %1747 = vst [vmem:[%s7165_s7 + $0xbc0] sm:$0xff] %v1746_v56 }
 0x18b   : > { %1749 = vst [vmem:[%s7165_s7 + $0xbc8] sm:$0xff] %v1748_v57  ;;  %v1750_v58 = vld [vmem:[%s7157_s6 + $0x2f40] sm:$0xff] }
 0x18c   : > { %v1752_v59 = vld [vmem:[%s7157_s6 + $0x2f60] sm:$0xff]  ;;  %1751 = vst [vmem:[%s7165_s7 + $0xbd0] sm:$0xff] %v1750_v58 }
 0x18d   : > { %v1754_v60 = vld [vmem:[%s7157_s6 + $0x2f80] sm:$0xff]  ;;  %1753 = vst [vmem:[%s7165_s7 + $0xbd8] sm:$0xff] %v1752_v59 }
 0x18e   : > { %1755 = vst [vmem:[%s7165_s7 + $0xbe0] sm:$0xff] %v1754_v60  ;;  %v1756_v61 = vld [vmem:[%s7157_s6 + $0x2fa0] sm:$0xff] }
 0x18f   : > { %v1758_v62 = vld [vmem:[%s7157_s6 + $0x2fc0] sm:$0xff]  ;;  %1757 = vst [vmem:[%s7165_s7 + $0xbe8] sm:$0xff] %v1756_v61 }
 0x190   : > { %v1760_v63 = vld [vmem:[%s7157_s6 + $0x2fe0] sm:$0xff]  ;;  %1759 = vst [vmem:[%s7165_s7 + $0xbf0] sm:$0xff] %v1758_v62 }
 0x191   : > { %1761 = vst [vmem:[%s7165_s7 + $0xbf8] sm:$0xff] %v1760_v63  ;;  %v1762_v0 = vld [vmem:[%s7157_s6 + $0x3000] sm:$0xff] }
 0x192   : > { %v1764_v1 = vld [vmem:[%s7157_s6 + $0x3020] sm:$0xff]  ;;  %1763 = vst [vmem:[%s7165_s7 + $0xc00] sm:$0xff] %v1762_v0 }
 0x193   : > { %v1766_v2 = vld [vmem:[%s7157_s6 + $0x3040] sm:$0xff]  ;;  %1765 = vst [vmem:[%s7165_s7 + $0xc08] sm:$0xff] %v1764_v1 }
 0x194   : > { %1767 = vst [vmem:[%s7165_s7 + $0xc10] sm:$0xff] %v1766_v2  ;;  %v1768_v3 = vld [vmem:[%s7157_s6 + $0x3060] sm:$0xff] }
 0x195   : > { %v1770_v4 = vld [vmem:[%s7157_s6 + $0x3080] sm:$0xff]  ;;  %1769 = vst [vmem:[%s7165_s7 + $0xc18] sm:$0xff] %v1768_v3 }
 0x196   : > { %v1772_v5 = vld [vmem:[%s7157_s6 + $0x30a0] sm:$0xff]  ;;  %1771 = vst [vmem:[%s7165_s7 + $0xc20] sm:$0xff] %v1770_v4 }
 0x197   : > { %1773 = vst [vmem:[%s7165_s7 + $0xc28] sm:$0xff] %v1772_v5  ;;  %v1774_v6 = vld [vmem:[%s7157_s6 + $0x30c0] sm:$0xff] }
 0x198   : > { %v1776_v7 = vld [vmem:[%s7157_s6 + $0x30e0] sm:$0xff]  ;;  %1775 = vst [vmem:[%s7165_s7 + $0xc30] sm:$0xff] %v1774_v6 }
 0x199   : > { %1777 = vst [vmem:[%s7165_s7 + $0xc38] sm:$0xff] %v1776_v7 }
 0x19a PF: > { %p5620_p5 = scmp.ge.s32.totalorder %s7088_s20, 1  ;;  %p1790_p6 = scmp.lt.s32.totalorder %s7088_s20, 5 }
 0x19c   : > { %p1791_p7 = pnand %p5620_p5, %p1790_p6 }
 0x19d   : > { %s1797_s8 = sand.u32 (!%p1791_p7), 1, %s7080_s18   ;;  %v7951_v8 = vld [vmem:[%s8667_s0] sm:$0xff] (!%p1791_p7)  ;;  %v7956_v9 = vld [vmem:[%s8667_s0 + $0x30] sm:$0xff] (!%p1791_p7)  ;;  %vm4294_vm0 = vcmask (!%p1791_p7), 523264   ;;  %s5621_s17 = sshll.u32 (!%p1791_p7), %s7137_s21, 1 }
 0x19e   : > { %1794 = sbr.rel (%p1791_p7) target bundleno = 1304 (0x518), region = 74  ;;  %v5623_v10 = vcombine.high (!%p1791_p7), %v7951_v8, %v7951_v8  ;;  %v5635_v11 = vcombine.high (!%p1791_p7), %v7956_v9, %v7956_v9  ;;  %p1825_p8 = scmp.lt.s32.totalorder (!%p1791_p7), %s5621_s17, 7 }
 0x19f   : > { %s6355_s13 = smul.u32 (!%p1791_p7), 3136, %s1797_s8  ;;  %s6217_s23 = sshll.u32 (!%p1791_p7), %s7137_s21, 3 }
 0x1a0   : > { %4330 = vmatprep.mubr.bf16.mxu1 (!%p1791_p7), %v5623_v10  ;;  %4576 = vmatprep.mubr.bf16.mxu0 (!%p1791_p7), %v5635_v11  ;;  %s4843_s24 = scalar_lea.vmem (!%p1791_p7), [#allocation2], %s6217_s23  ;;  %p6043_p9 = scmp.ne.s32.totalorder (!%p1791_p7), %s7137_s21, 3 }
 0x1a1   : > { %s7962_s14 = scalar_lea.vmem (!%p1791_p7), [#allocation3], %s6355_s13 }
 0x1a2   : > { %v6381_v12 = vld [vmem:[%s7962_s14 + $0x4] ss:$8 sps:$4 sm:$0xff] (!%p1791_p7)   ;;  %v6385_v14 = vld [vmem:[%s7962_s14] ss:$8 sps:$4 sm:$0xff] (!%p1791_p7)   ;;  %v6387_v16 = vld [vmem:[%s7962_s14 + $0x14] ss:$8 sps:$4 sm:$0xff] (!%p1791_p7)  }
 0x1a3   : > { %v6383_v13 = vld [vmem:[%s7962_s14 + $0x604] ss:$8 sps:$4 sm:$0xff] (!%p1791_p7)   ;;  %4298 = vmatprep.subr.bf16.mxu1 (!%p1791_p7), %v6381_v12  ;;  %v6386_v15 = vld [vmem:[%s7962_s14 + $0x600] ss:$8 sps:$4 sm:$0xff] (!%p1791_p7)   ;;  %v6389_v17 = vld [vmem:[%s7962_s14 + $0x614] ss:$8 sps:$4 sm:$0xff] (!%p1791_p7)  }
 0x1a4   : > { %4544 = vmatprep.subr.bf16.mxu0 (!%p1791_p7), %v6383_v13  ;;  %4299 = vmatpush1.bf16.msra.mxu1 (!%p1791_p7), %v6385_v14  ;;  %v6391_v18 = vld [vmem:[%s7962_s14 + $0x10] ss:$8 sps:$4 sm:$0xff] (!%p1791_p7)   ;;  %v6393_v20 = vld [vmem:[%s7962_s14 + $0x24] ss:$8 sps:$4 sm:$0xff] (!%p1791_p7)   ;;  %v6397_v22 = vld [vmem:[%s7962_s14 + $0x20] ss:$8 sps:$4 sm:$0xff] (!%p1791_p7)  }
 0x1a5   : > { %4545 = vmatpush1.bf16.msra.mxu0 %v6386_v15  ;;  %4300 = vmatprep.subr.bf16.mxu1 %v6387_v16  ;;  %v6392_v19 = vld [vmem:[%s7962_s14 + $0x610] ss:$8 sps:$4 sm:$0xff]   ;;  %v6395_v21 = vld [vmem:[%s7962_s14 + $0x624] ss:$8 sps:$4 sm:$0xff]   ;;  %v6398_v23 = vld [vmem:[%s7962_s14 + $0x620] ss:$8 sps:$4 sm:$0xff]   ;;  %v5622_v16 = vcombine.low %v7951_v8, %v7951_v8 }
 0x1a6   : > { %4546 = vmatprep.subr.bf16.mxu0 %v6389_v17  ;;  %v6399_v24 = vld [vmem:[%s7962_s14 + $0x34] ss:$8 sps:$4 sm:$0xff]   ;;  %v6403_v26 = vld [vmem:[%s7962_s14 + $0x30] ss:$8 sps:$4 sm:$0xff]   ;;  %v6405_v28 = vld [vmem:[%s7962_s14 + $0x44] ss:$8 sps:$4 sm:$0xff]  }
 0x1a7   : > { %v6401_v25 = vld [vmem:[%s7962_s14 + $0x634] ss:$8 sps:$4 sm:$0xff]   ;;  %v6404_v27 = vld [vmem:[%s7962_s14 + $0x630] ss:$8 sps:$4 sm:$0xff]   ;;  %v6407_v29 = vld [vmem:[%s7962_s14 + $0x644] ss:$8 sps:$4 sm:$0xff]  }
 0x1a8   : > { %4301 = vmatpush1.bf16.msra.mxu1 %v6391_v18  ;;  %v6409_v30 = vld [vmem:[%s7962_s14 + $0x40] ss:$8 sps:$4 sm:$0xff]   ;;  %v6411_v32 = vld [vmem:[%s7962_s14 + $0x54] ss:$8 sps:$4 sm:$0xff]   ;;  %v6415_v34 = vld [vmem:[%s7962_s14 + $0x50] ss:$8 sps:$4 sm:$0xff]   ;;  %v5634_v18 = vcombine.low %v7956_v9, %v7956_v9 }
 0x1a9   : > { %4547 = vmatpush1.bf16.msra.mxu0 %v6392_v19  ;;  %4302 = vmatprep.subr.bf16.mxu1 %v6393_v20  ;;  %v6410_v31 = vld [vmem:[%s7962_s14 + $0x640] ss:$8 sps:$4 sm:$0xff]   ;;  %v6413_v33 = vld [vmem:[%s7962_s14 + $0x654] ss:$8 sps:$4 sm:$0xff]   ;;  %v6416_v35 = vld [vmem:[%s7962_s14 + $0x650] ss:$8 sps:$4 sm:$0xff]  }
 0x1aa   : > { %4548 = vmatprep.subr.bf16.mxu0 %v6395_v21  ;;  %v6417_v36 = vld [vmem:[%s7962_s14 + $0x64] ss:$8 sps:$4 sm:$0xff]   ;;  %v6421_v38 = vld [vmem:[%s7962_s14 + $0x60] ss:$8 sps:$4 sm:$0xff]   ;;  %v6423_v40 = vld [vmem:[%s7962_s14 + $0x74] ss:$8 sps:$4 sm:$0xff]  }
 0x1ab   : > { %v6419_v37 = vld [vmem:[%s7962_s14 + $0x664] ss:$8 sps:$4 sm:$0xff]   ;;  %v6422_v39 = vld [vmem:[%s7962_s14 + $0x660] ss:$8 sps:$4 sm:$0xff]   ;;  %v6425_v41 = vld [vmem:[%s7962_s14 + $0x674] ss:$8 sps:$4 sm:$0xff]  }
 0x1ac   : > { %4303 = vmatpush1.bf16.msra.mxu1 %v6397_v22  ;;  %v6427_v42 = vld [vmem:[%s7962_s14 + $0x70] ss:$8 sps:$4 sm:$0xff]   ;;  %v6429_v44 = vld [vmem:[%s7962_s14 + $0x84] ss:$8 sps:$4 sm:$0xff]   ;;  %v6433_v46 = vld [vmem:[%s7962_s14 + $0x80] ss:$8 sps:$4 sm:$0xff]  }
 0x1ad   : > { %4549 = vmatpush1.bf16.msra.mxu0 %v6398_v23  ;;  %4304 = vmatprep.subr.bf16.mxu1 %v6399_v24  ;;  %v6428_v43 = vld [vmem:[%s7962_s14 + $0x670] ss:$8 sps:$4 sm:$0xff]   ;;  %v6431_v45 = vld [vmem:[%s7962_s14 + $0x684] ss:$8 sps:$4 sm:$0xff]   ;;  %v6434_v47 = vld [vmem:[%s7962_s14 + $0x680] ss:$8 sps:$4 sm:$0xff]  }
 0x1ae   : > { %4550 = vmatprep.subr.bf16.mxu0 %v6401_v25  ;;  %v6435_v48 = vld [vmem:[%s7962_s14 + $0x94] ss:$8 sps:$4 sm:$0xff]   ;;  %v6439_v50 = vld [vmem:[%s7962_s14 + $0x90] ss:$8 sps:$4 sm:$0xff]   ;;  %v6441_v52 = vld [vmem:[%s7962_s14 + $0xa4] ss:$8 sps:$4 sm:$0xff]  }
 0x1af   : > { %v6437_v49 = vld [vmem:[%s7962_s14 + $0x694] ss:$8 sps:$4 sm:$0xff]   ;;  %v6440_v51 = vld [vmem:[%s7962_s14 + $0x690] ss:$8 sps:$4 sm:$0xff]   ;;  %v6443_v53 = vld [vmem:[%s7962_s14 + $0x6a4] ss:$8 sps:$4 sm:$0xff]  }
 0x1b0   : > { %4305 = vmatpush1.bf16.msra.mxu1 %v6403_v26  ;;  %v6445_v54 = vld [vmem:[%s7962_s14 + $0xa0] ss:$8 sps:$4 sm:$0xff]   ;;  %v6447_v56 = vld [vmem:[%s7962_s14 + $0xb4] ss:$8 sps:$4 sm:$0xff]   ;;  %v6451_v58 = vld [vmem:[%s7962_s14 + $0xb0] ss:$8 sps:$4 sm:$0xff]  }
 0x1b1   : > { %4551 = vmatpush1.bf16.msra.mxu0 %v6404_v27  ;;  %4306 = vmatprep.subr.bf16.mxu1 %v6405_v28  ;;  %v6446_v55 = vld [vmem:[%s7962_s14 + $0x6a0] ss:$8 sps:$4 sm:$0xff]   ;;  %v6449_v57 = vld [vmem:[%s7962_s14 + $0x6b4] ss:$8 sps:$4 sm:$0xff]   ;;  %v6452_v59 = vld [vmem:[%s7962_s14 + $0x6b0] ss:$8 sps:$4 sm:$0xff]  }
 0x1b2   : > { %4552 = vmatprep.subr.bf16.mxu0 %v6407_v29  ;;  %v6453_v60 = vld [vmem:[%s7962_s14 + $0xc4] ss:$8 sps:$4 sm:$0xff]   ;;  %v6457_v62 = vld [vmem:[%s7962_s14 + $0xc0] ss:$8 sps:$4 sm:$0xff]   ;;  %v6459_v0 = vld [vmem:[%s7962_s14 + $0xd4] ss:$8 sps:$4 sm:$0xff]  }
 0x1b3   : > { %v6455_v61 = vld [vmem:[%s7962_s14 + $0x6c4] ss:$8 sps:$4 sm:$0xff]   ;;  %v6458_v63 = vld [vmem:[%s7962_s14 + $0x6c0] ss:$8 sps:$4 sm:$0xff]   ;;  %v6461_v1 = vld [vmem:[%s7962_s14 + $0x6d4] ss:$8 sps:$4 sm:$0xff]  }
 0x1b4   : > { %4307 = vmatpush1.bf16.msra.mxu1 %v6409_v30  ;;  %v6463_v2 = vld [vmem:[%s7962_s14 + $0xd0] ss:$8 sps:$4 sm:$0xff]   ;;  %v6465_v4 = vld [vmem:[%s7962_s14 + $0xe4] ss:$8 sps:$4 sm:$0xff]   ;;  %v6469_v6 = vld [vmem:[%s7962_s14 + $0xe0] ss:$8 sps:$4 sm:$0xff]  }
 0x1b5   : > { %4553 = vmatpush1.bf16.msra.mxu0 %v6410_v31  ;;  %4308 = vmatprep.subr.bf16.mxu1 %v6411_v32  ;;  %v6464_v3 = vld [vmem:[%s7962_s14 + $0x6d0] ss:$8 sps:$4 sm:$0xff]   ;;  %v6467_v5 = vld [vmem:[%s7962_s14 + $0x6e4] ss:$8 sps:$4 sm:$0xff]   ;;  %v6470_v7 = vld [vmem:[%s7962_s14 + $0x6e0] ss:$8 sps:$4 sm:$0xff]  }
 0x1b6   : > { %4554 = vmatprep.subr.bf16.mxu0 %v6413_v33  ;;  %v6471_v10 = vld [vmem:[%s7962_s14 + $0xf4] ss:$8 sps:$4 sm:$0xff]   ;;  %v6475_v12 = vld [vmem:[%s7962_s14 + $0xf0] ss:$8 sps:$4 sm:$0xff]   ;;  %v6481_v14 = vld [vmem:[%s7962_s14 + $0x104] ss:$8 sps:$4 sm:$0xff]  }
 0x1b7   : > { %v6473_v11 = vld [vmem:[%s7962_s14 + $0x6f4] ss:$8 sps:$4 sm:$0xff]   ;;  %v6476_v13 = vld [vmem:[%s7962_s14 + $0x6f0] ss:$8 sps:$4 sm:$0xff]   ;;  %v6486_v15 = vld [vmem:[%s7962_s14 + $0x704] ss:$8 sps:$4 sm:$0xff]  }
 0x1b8   : > { %4309 = vmatpush1.bf16.msra.mxu1 %v6415_v34  ;;  %v6479_v17 = vld [vmem:[%s7962_s14 + $0x100] ss:$8 sps:$4 sm:$0xff]   ;;  %v6489_v20 = vld [vmem:[%s7962_s14 + $0x114] ss:$8 sps:$4 sm:$0xff]   ;;  %v6487_v8 = vld [vmem:[%s7962_s14 + $0x110] ss:$8 sps:$4 sm:$0xff]  }
 0x1b9   : > { %4555 = vmatpush1.bf16.msra.mxu0 %v6416_v35  ;;  %4310 = vmatprep.subr.bf16.mxu1 %v6417_v36  ;;  %v6484_v19 = vld [vmem:[%s7962_s14 + $0x700] ss:$8 sps:$4 sm:$0xff]   ;;  %v6492_v21 = vld [vmem:[%s7962_s14 + $0x714] ss:$8 sps:$4 sm:$0xff]   ;;  %v6490_v22 = vld [vmem:[%s7962_s14 + $0x710] ss:$8 sps:$4 sm:$0xff]  }
 0x1ba   : > { %4556 = vmatprep.subr.bf16.mxu0 %v6419_v37  ;;  %v6495_v9 = vld [vmem:[%s7962_s14 + $0x124] ss:$8 sps:$4 sm:$0xff]   ;;  %v6493_v24 = vld [vmem:[%s7962_s14 + $0x120] ss:$8 sps:$4 sm:$0xff]   ;;  %v6501_v26 = vld [vmem:[%s7962_s14 + $0x134] ss:$8 sps:$4 sm:$0xff]  }
 0x1bb   : > { %v6498_v23 = vld [vmem:[%s7962_s14 + $0x724] ss:$8 sps:$4 sm:$0xff]   ;;  %v6496_v25 = vld [vmem:[%s7962_s14 + $0x720] ss:$8 sps:$4 sm:$0xff]   ;;  %v6504_v27 = vld [vmem:[%s7962_s14 + $0x734] ss:$8 sps:$4 sm:$0xff]  }
 0x1bc   : > { %4311 = vmatpush1.bf16.msra.mxu1 %v6421_v38  ;;  %v6499_v28 = vld [vmem:[%s7962_s14 + $0x130] ss:$8 sps:$4 sm:$0xff]   ;;  %v6507_v30 = vld [vmem:[%s7962_s14 + $0x144] ss:$8 sps:$4 sm:$0xff]   ;;  %v6505_v32 = vld [vmem:[%s7962_s14 + $0x140] ss:$8 sps:$4 sm:$0xff]  }
 0x1bd   : > { %4557 = vmatpush1.bf16.msra.mxu0 %v6422_v39  ;;  %4312 = vmatprep.subr.bf16.mxu1 %v6423_v40  ;;  %v6502_v29 = vld [vmem:[%s7962_s14 + $0x730] ss:$8 sps:$4 sm:$0xff]   ;;  %v6510_v31 = vld [vmem:[%s7962_s14 + $0x744] ss:$8 sps:$4 sm:$0xff]   ;;  %v6508_v33 = vld [vmem:[%s7962_s14 + $0x740] ss:$8 sps:$4 sm:$0xff]  }
 0x1be   : > { %4558 = vmatprep.subr.bf16.mxu0 %v6425_v41  ;;  %v6513_v34 = vld [vmem:[%s7962_s14 + $0x154] ss:$8 sps:$4 sm:$0xff]   ;;  %v6511_v36 = vld [vmem:[%s7962_s14 + $0x150] ss:$8 sps:$4 sm:$0xff]   ;;  %v6519_v38 = vld [vmem:[%s7962_s14 + $0x164] ss:$8 sps:$4 sm:$0xff]  }
 0x1bf   : > { %v6516_v35 = vld [vmem:[%s7962_s14 + $0x754] ss:$8 sps:$4 sm:$0xff]   ;;  %v6514_v37 = vld [vmem:[%s7962_s14 + $0x750] ss:$8 sps:$4 sm:$0xff]   ;;  %v6522_v39 = vld [vmem:[%s7962_s14 + $0x764] ss:$8 sps:$4 sm:$0xff]  }
 0x1c0   : > { %4313 = vmatpush1.bf16.msra.mxu1 %v6427_v42  ;;  %v8061_v40 = vld [vmem:[%s8667_s0 + $0x8] sm:$0xff]  ;;  %v8068_v42 = vld [vmem:[%s8667_s0 + $0x38] sm:$0xff]  ;;  %s8677_s17 = smov (!%p1825_p8, %s5621_s17), 7 }
 0x1c1   : > { %4559 = vmatpush1.bf16.msra.mxu0 %v6428_v43  ;;  %4314 = vmatprep.subr.bf16.mxu1 %v6429_v44  ;;  %v5625_v41 = vcombine.high %v8061_v40, %v8061_v40  ;;  %v6517_v43 = vld [vmem:[%s7962_s14 + $0x160] ss:$8 sps:$4 sm:$0xff]   ;;  %s1827_s20 = scalar_lea.vmem %s8669_s2, %s8677_s17 }
 0x1c2   : > { %4560 = vmatprep.subr.bf16.mxu0 %v6431_v45  ;;  %v6520_v44 = vld [vmem:[%s7962_s14 + $0x760] ss:$8 sps:$4 sm:$0xff]   ;;  %v5637_v45 = vcombine.high %v8068_v42, %v8068_v42 }
 0x1c4   : > { %4315 = vmatpush1.bf16.msra.mxu1 %v6433_v46  ;;  %v6525_v46 = vld [vmem:[%s7962_s14 + $0x174] ss:$8 sps:$4 sm:$0xff]  }
 0x1c5   : > { %4561 = vmatpush1.bf16.msra.mxu0 %v6434_v47  ;;  %4316 = vmatprep.subr.bf16.mxu1 %v6435_v48  ;;  %v6528_v47 = vld [vmem:[%s7962_s14 + $0x774] ss:$8 sps:$4 sm:$0xff]   ;;  %v6523_v48 = vld [vmem:[%s7962_s14 + $0x170] ss:$8 sps:$4 sm:$0xff]  }
 0x1c6   : > { %4562 = vmatprep.subr.bf16.mxu0 %v6437_v49  ;;  %v6526_v49 = vld [vmem:[%s7962_s14 + $0x770] ss:$8 sps:$4 sm:$0xff]  }
 0x1c8   : > { %4317 = vmatpush1.bf16.msra.mxu1 %v6439_v50  ;;  %v6531_v50 = vld [vmem:[%s7962_s14 + $0x184] ss:$8 sps:$4 sm:$0xff]  }
 0x1c9   : > { %4563 = vmatpush1.bf16.msra.mxu0 %v6440_v51  ;;  %4318 = vmatprep.subr.bf16.mxu1 %v6441_v52  ;;  %v6534_v51 = vld [vmem:[%s7962_s14 + $0x784] ss:$8 sps:$4 sm:$0xff]   ;;  %v6529_v52 = vld [vmem:[%s7962_s14 + $0x180] ss:$8 sps:$4 sm:$0xff]  }
 0x1ca   : > { %4564 = vmatprep.subr.bf16.mxu0 %v6443_v53  ;;  %v6532_v53 = vld [vmem:[%s7962_s14 + $0x780] ss:$8 sps:$4 sm:$0xff]  }
 0x1cc   : > { %4319 = vmatpush1.bf16.msra.mxu1 %v6445_v54  ;;  %v6537_v54 = vld [vmem:[%s7962_s14 + $0x194] ss:$8 sps:$4 sm:$0xff]  }
 0x1cd   : > { %4565 = vmatpush1.bf16.msra.mxu0 %v6446_v55  ;;  %4320 = vmatprep.subr.bf16.mxu1 %v6447_v56  ;;  %v6540_v55 = vld [vmem:[%s7962_s14 + $0x794] ss:$8 sps:$4 sm:$0xff]   ;;  %v6535_v56 = vld [vmem:[%s7962_s14 + $0x190] ss:$8 sps:$4 sm:$0xff]  }
 0x1ce   : > { %4566 = vmatprep.subr.bf16.mxu0 %v6449_v57  ;;  %v6538_v57 = vld [vmem:[%s7962_s14 + $0x790] ss:$8 sps:$4 sm:$0xff]  }
 0x1d0   : > { %4321 = vmatpush1.bf16.msra.mxu1 %v6451_v58  ;;  %v6543_v58 = vld [vmem:[%s7962_s14 + $0x1a4] ss:$8 sps:$4 sm:$0xff]  }
 0x1d1   : > { %4567 = vmatpush1.bf16.msra.mxu0 %v6452_v59  ;;  %4322 = vmatprep.subr.bf16.mxu1 %v6453_v60  ;;  %v6546_v59 = vld [vmem:[%s7962_s14 + $0x7a4] ss:$8 sps:$4 sm:$0xff]   ;;  %v6541_v60 = vld [vmem:[%s7962_s14 + $0x1a0] ss:$8 sps:$4 sm:$0xff]  }
 0x1d2   : > { %4568 = vmatprep.subr.bf16.mxu0 %v6455_v61  ;;  %v6544_v61 = vld [vmem:[%s7962_s14 + $0x7a0] ss:$8 sps:$4 sm:$0xff]  }
 0x1d4   : > { %4323 = vmatpush1.bf16.msra.mxu1 %v6457_v62  ;;  %v6549_v62 = vld [vmem:[%s7962_s14 + $0x1b4] ss:$8 sps:$4 sm:$0xff]  }
 0x1d5   : > { %4569 = vmatpush1.bf16.msra.mxu0 %v6458_v63  ;;  %4324 = vmatprep.subr.bf16.mxu1 %v6459_v0  ;;  %v6552_v63 = vld [vmem:[%s7962_s14 + $0x7b4] ss:$8 sps:$4 sm:$0xff]   ;;  %v6547_v0 = vld [vmem:[%s7962_s14 + $0x1b0] ss:$8 sps:$4 sm:$0xff]  }
 0x1d6   : > { %4570 = vmatprep.subr.bf16.mxu0 %v6461_v1  ;;  %v6550_v1 = vld [vmem:[%s7962_s14 + $0x7b0] ss:$8 sps:$4 sm:$0xff]  }
 0x1d8   : > { %4325 = vmatpush1.bf16.msra.mxu1 %v6463_v2  ;;  %v6555_v2 = vld [vmem:[%s7962_s14 + $0x1c4] ss:$8 sps:$4 sm:$0xff]  }
 0x1d9   : > { %4571 = vmatpush1.bf16.msra.mxu0 %v6464_v3  ;;  %4326 = vmatprep.subr.bf16.mxu1 %v6465_v4  ;;  %v6558_v3 = vld [vmem:[%s7962_s14 + $0x7c4] ss:$8 sps:$4 sm:$0xff]   ;;  %v6553_v4 = vld [vmem:[%s7962_s14 + $0x1c0] ss:$8 sps:$4 sm:$0xff]  }
 0x1da   : > { %4572 = vmatprep.subr.bf16.mxu0 %v6467_v5  ;;  %v6556_v5 = vld [vmem:[%s7962_s14 + $0x7c0] ss:$8 sps:$4 sm:$0xff]  }
 0x1dc   : > { %4327 = vmatpush1.bf16.msra.mxu1 %v6469_v6  ;;  %v6561_v6 = vld [vmem:[%s7962_s14 + $0x1d4] ss:$8 sps:$4 sm:$0xff]  }
 0x1dd   : > { %4573 = vmatpush1.bf16.msra.mxu0 %v6470_v7  ;;  %4328 = vmatprep.subr.bf16.mxu1 %v6471_v10  ;;  %v6564_v7 = vld [vmem:[%s7962_s14 + $0x7d4] ss:$8 sps:$4 sm:$0xff]   ;;  %v6559_v10 = vld [vmem:[%s7962_s14 + $0x1d0] ss:$8 sps:$4 sm:$0xff]  }
 0x1de   : > { %4574 = vmatprep.subr.bf16.mxu0 %v6473_v11  ;;  %v6562_v11 = vld [vmem:[%s7962_s14 + $0x7d0] ss:$8 sps:$4 sm:$0xff]  }
 0x1e0   : > { %4329 = vmatpush1.bf16.msra.mxu1 %v6475_v12  ;;  %v6567_v12 = vld [vmem:[%s7962_s14 + $0x1e4] ss:$8 sps:$4 sm:$0xff]  }
 0x1e1   : > { %4575 = vmatpush1.bf16.msra.mxu0 %v6476_v13  ;;  %4339 = vmatprep.subr.bf16.mxu1 %v6481_v14  ;;  %v6570_v13 = vld [vmem:[%s7962_s14 + $0x7e4] ss:$8 sps:$4 sm:$0xff]   ;;  %v6565_v14 = vld [vmem:[%s7962_s14 + $0x1e0] ss:$8 sps:$4 sm:$0xff]  }
 0x1e2   : > { %4585 = vmatprep.subr.bf16.mxu0 %v6486_v15  ;;  %v6568_v15 = vld [vmem:[%s7962_s14 + $0x7e0] ss:$8 sps:$4 sm:$0xff]  }
 0x1e3   : > { %4331 = vmatmul.mubr.bf16.vlgmr.msra.gmra.mrb[0].mxu1 %v5622_v16  ;;  %v6573_v16 = vld [vmem:[%s7962_s14 + $0x1f4] ss:$8 sps:$4 sm:$0xff]  }
 0x1e4   : > { %4577 = vmatmul.mubr.bf16.vlgmr.msra.gmra.mrb[0].mxu0 %v5634_v18  ;;  %4340 = vmatpush1.bf16.msra.mxu1 %v6479_v17  ;;  %v6576_v17 = vld [vmem:[%s7962_s14 + $0x7f4] ss:$8 sps:$4 sm:$0xff]   ;;  %v6571_v18 = vld [vmem:[%s7962_s14 + $0x1f0] ss:$8 sps:$4 sm:$0xff]  }
 0x1e5   : > { %4586 = vmatpush1.bf16.msra.mxu0 %v6484_v19  ;;  %4341 = vmatprep.subr.bf16.mxu1 %v6489_v20  ;;  %v6574_v19 = vld [vmem:[%s7962_s14 + $0x7f0] ss:$8 sps:$4 sm:$0xff]   ;;  %v6581_v20 = vld [vmem:[%s7962_s14 + $0x204] ss:$8 sps:$4 sm:$0xff]  }
 0x1e6   : > { %4587 = vmatprep.subr.bf16.mxu0 %v6492_v21  ;;  %4371 = vmatprep.mubr.bf16.mxu1 %v5625_v41  ;;  %v6586_v21 = vld [vmem:[%s7962_s14 + $0x804] ss:$8 sps:$4 sm:$0xff]  }
 0x1e7   : > { %4617 = vmatprep.mubr.bf16.mxu0 %v5637_v45  ;;  %v6610_v41 = vld [vmem:[%s7962_s14 + $0x844] ss:$8 sps:$4 sm:$0xff]   ;;  %v6616_v45 = vld [vmem:[%s7962_s14 + $0x854] ss:$8 sps:$4 sm:$0xff]  }
 0x1e8   : > { %4342 = vmatpush1.bf16.msra.mxu1 %v6487_v8  ;;  %v5624_v8 = vcombine.low %v8061_v40, %v8061_v40  ;;  %v6607_v40 = vld [vmem:[%s7962_s14 + $0x244] ss:$8 sps:$4 sm:$0xff]  }
 0x1e9   : > { %4588 = vmatpush1.bf16.msra.mxu0 %v6490_v22  ;;  %4343 = vmatprep.subr.bf16.mxu1 %v6495_v9  ;;  %v6579_v22 = vld [vmem:[%s7962_s14 + $0x200] ss:$8 sps:$4 sm:$0xff]   ;;  %v5636_v9 = vcombine.low %v8068_v42, %v8068_v42 }
 0x1ea   : > { %4589 = vmatprep.subr.bf16.mxu0 %v6498_v23  ;;  %v6584_v23 = vld [vmem:[%s7962_s14 + $0x800] ss:$8 sps:$4 sm:$0xff]  }
 0x1eb   : > { %v6605_v42 = vld [vmem:[%s7962_s14 + $0x240] ss:$8 sps:$4 sm:$0xff]  }
 0x1ec   : > { %4344 = vmatpush1.bf16.msra.mxu1 %v6493_v24  ;;  %v6589_v24 = vld [vmem:[%s7962_s14 + $0x214] ss:$8 sps:$4 sm:$0xff]  }
 0x1ed   : > { %4590 = vmatpush1.bf16.msra.mxu0 %v6496_v25  ;;  %4345 = vmatprep.subr.bf16.mxu1 %v6501_v26  ;;  %v8122_v25 = vld [vmem:[%s8667_s0 + $0x10] sm:$0xff] }
 0x1ee   : > { %4591 = vmatprep.subr.bf16.mxu0 %v6504_v27  ;;  %v6592_v26 = vld [vmem:[%s7962_s14 + $0x814] ss:$8 sps:$4 sm:$0xff]   ;;  %v5627_v27 = vcombine.high %v8122_v25, %v8122_v25 }
 0x1f0   : > { %4346 = vmatpush1.bf16.msra.mxu1 %v6499_v28  ;;  %v8130_v28 = vld [vmem:[%s8667_s0 + $0x40] sm:$0xff] }
 0x1f1   : > { %4592 = vmatpush1.bf16.msra.mxu0 %v6502_v29  ;;  %4347 = vmatprep.subr.bf16.mxu1 %v6507_v30  ;;  %v6587_v29 = vld [vmem:[%s7962_s14 + $0x210] ss:$8 sps:$4 sm:$0xff]  }
 0x1f2   : > { %4593 = vmatprep.subr.bf16.mxu0 %v6510_v31  ;;  %v6590_v30 = vld [vmem:[%s7962_s14 + $0x810] ss:$8 sps:$4 sm:$0xff]   ;;  %v5639_v31 = vcombine.high %v8130_v28, %v8130_v28 }
 0x1f4   : > { %4348 = vmatpush1.bf16.msra.mxu1 %v6505_v32  ;;  %v6595_v32 = vld [vmem:[%s7962_s14 + $0x224] ss:$8 sps:$4 sm:$0xff]  }
 0x1f5   : > { %4594 = vmatpush1.bf16.msra.mxu0 %v6508_v33  ;;  %4349 = vmatprep.subr.bf16.mxu1 %v6513_v34  ;;  %v6598_v33 = vld [vmem:[%s7962_s14 + $0x824] ss:$8 sps:$4 sm:$0xff]   ;;  %v6593_v34 = vld [vmem:[%s7962_s14 + $0x220] ss:$8 sps:$4 sm:$0xff]  }
 0x1f6   : > { %4595 = vmatprep.subr.bf16.mxu0 %v6516_v35  ;;  %v6596_v35 = vld [vmem:[%s7962_s14 + $0x820] ss:$8 sps:$4 sm:$0xff]  }
 0x1f8   : > { %4350 = vmatpush1.bf16.msra.mxu1 %v6511_v36  ;;  %v6601_v36 = vld [vmem:[%s7962_s14 + $0x234] ss:$8 sps:$4 sm:$0xff]  }
 0x1f9   : > { %4596 = vmatpush1.bf16.msra.mxu0 %v6514_v37  ;;  %4351 = vmatprep.subr.bf16.mxu1 %v6519_v38  ;;  %v6604_v37 = vld [vmem:[%s7962_s14 + $0x834] ss:$8 sps:$4 sm:$0xff]   ;;  %v6599_v38 = vld [vmem:[%s7962_s14 + $0x230] ss:$8 sps:$4 sm:$0xff]  }
 0x1fa   : > { %4597 = vmatprep.subr.bf16.mxu0 %v6522_v39  ;;  %v6602_v39 = vld [vmem:[%s7962_s14 + $0x830] ss:$8 sps:$4 sm:$0xff]  }
 0x1fc   : > { %4352 = vmatpush1.bf16.msra.mxu1 %v6517_v43  ;;  %v6608_v43 = vld [vmem:[%s7962_s14 + $0x840] ss:$8 sps:$4 sm:$0xff]  }
 0x1fd   : > { %4598 = vmatpush1.bf16.msra.mxu0 %v6520_v44  ;;  %4353 = vmatprep.subr.bf16.mxu1 %v6525_v46  ;;  %v6613_v44 = vld [vmem:[%s7962_s14 + $0x254] ss:$8 sps:$4 sm:$0xff]   ;;  %v6611_v46 = vld [vmem:[%s7962_s14 + $0x250] ss:$8 sps:$4 sm:$0xff]  }
 0x1fe   : > { %4599 = vmatprep.subr.bf16.mxu0 %v6528_v47  ;;  %v6614_v47 = vld [vmem:[%s7962_s14 + $0x850] ss:$8 sps:$4 sm:$0xff]  }
 0x200   : > { %4354 = vmatpush1.bf16.msra.mxu1 %v6523_v48  ;;  %v6619_v48 = vld [vmem:[%s7962_s14 + $0x264] ss:$8 sps:$4 sm:$0xff]  }
 0x201   : > { %4600 = vmatpush1.bf16.msra.mxu0 %v6526_v49  ;;  %4355 = vmatprep.subr.bf16.mxu1 %v6531_v50  ;;  %v6622_v49 = vld [vmem:[%s7962_s14 + $0x864] ss:$8 sps:$4 sm:$0xff]   ;;  %v6617_v50 = vld [vmem:[%s7962_s14 + $0x260] ss:$8 sps:$4 sm:$0xff]  }
 0x202   : > { %4601 = vmatprep.subr.bf16.mxu0 %v6534_v51  ;;  %v6620_v51 = vld [vmem:[%s7962_s14 + $0x860] ss:$8 sps:$4 sm:$0xff]  }
 0x204   : > { %4356 = vmatpush1.bf16.msra.mxu1 %v6529_v52  ;;  %v6625_v52 = vld [vmem:[%s7962_s14 + $0x274] ss:$8 sps:$4 sm:$0xff]  }
 0x205   : > { %4602 = vmatpush1.bf16.msra.mxu0 %v6532_v53  ;;  %4357 = vmatprep.subr.bf16.mxu1 %v6537_v54  ;;  %v6628_v53 = vld [vmem:[%s7962_s14 + $0x874] ss:$8 sps:$4 sm:$0xff]   ;;  %v6623_v54 = vld [vmem:[%s7962_s14 + $0x270] ss:$8 sps:$4 sm:$0xff]  }
 0x206   : > { %4603 = vmatprep.subr.bf16.mxu0 %v6540_v55  ;;  %v6626_v55 = vld [vmem:[%s7962_s14 + $0x870] ss:$8 sps:$4 sm:$0xff]  }
 0x208   : > { %4358 = vmatpush1.bf16.msra.mxu1 %v6535_v56  ;;  %v6631_v56 = vld [vmem:[%s7962_s14 + $0x284] ss:$8 sps:$4 sm:$0xff]  }
 0x209   : > { %4604 = vmatpush1.bf16.msra.mxu0 %v6538_v57  ;;  %4359 = vmatprep.subr.bf16.mxu1 %v6543_v58  ;;  %v6634_v57 = vld [vmem:[%s7962_s14 + $0x884] ss:$8 sps:$4 sm:$0xff]   ;;  %v6629_v58 = vld [vmem:[%s7962_s14 + $0x280] ss:$8 sps:$4 sm:$0xff]  }
 0x20a   : > { %4605 = vmatprep.subr.bf16.mxu0 %v6546_v59  ;;  %v6632_v59 = vld [vmem:[%s7962_s14 + $0x880] ss:$8 sps:$4 sm:$0xff]  }
 0x20c   : > { %4360 = vmatpush1.bf16.msra.mxu1 %v6541_v60  ;;  %v6637_v60 = vld [vmem:[%s7962_s14 + $0x294] ss:$8 sps:$4 sm:$0xff]  }
 0x20d   : > { %4606 = vmatpush1.bf16.msra.mxu0 %v6544_v61  ;;  %4361 = vmatprep.subr.bf16.mxu1 %v6549_v62  ;;  %v6640_v61 = vld [vmem:[%s7962_s14 + $0x894] ss:$8 sps:$4 sm:$0xff]   ;;  %v6635_v62 = vld [vmem:[%s7962_s14 + $0x290] ss:$8 sps:$4 sm:$0xff]  }
 0x20e   : > { %4607 = vmatprep.subr.bf16.mxu0 %v6552_v63  ;;  %v6638_v63 = vld [vmem:[%s7962_s14 + $0x890] ss:$8 sps:$4 sm:$0xff]  }
 0x210   : > { %4362 = vmatpush1.bf16.msra.mxu1 %v6547_v0  ;;  %v6643_v0 = vld [vmem:[%s7962_s14 + $0x2a4] ss:$8 sps:$4 sm:$0xff]  }
 0x211   : > { %4608 = vmatpush1.bf16.msra.mxu0 %v6550_v1  ;;  %4363 = vmatprep.subr.bf16.mxu1 %v6555_v2  ;;  %v6646_v1 = vld [vmem:[%s7962_s14 + $0x8a4] ss:$8 sps:$4 sm:$0xff]   ;;  %v6641_v2 = vld [vmem:[%s7962_s14 + $0x2a0] ss:$8 sps:$4 sm:$0xff]  }
 0x212   : > { %4609 = vmatprep.subr.bf16.mxu0 %v6558_v3  ;;  %v6644_v3 = vld [vmem:[%s7962_s14 + $0x8a0] ss:$8 sps:$4 sm:$0xff]  }
 0x214   : > { %4364 = vmatpush1.bf16.msra.mxu1 %v6553_v4  ;;  %v6649_v4 = vld [vmem:[%s7962_s14 + $0x2b4] ss:$8 sps:$4 sm:$0xff]  }
 0x215   : > { %4610 = vmatpush1.bf16.msra.mxu0 %v6556_v5  ;;  %4365 = vmatprep.subr.bf16.mxu1 %v6561_v6  ;;  %v6652_v5 = vld [vmem:[%s7962_s14 + $0x8b4] ss:$8 sps:$4 sm:$0xff]   ;;  %v6647_v6 = vld [vmem:[%s7962_s14 + $0x2b0] ss:$8 sps:$4 sm:$0xff]  }
 0x216   : > { %4611 = vmatprep.subr.bf16.mxu0 %v6564_v7  ;;  %v6650_v7 = vld [vmem:[%s7962_s14 + $0x8b0] ss:$8 sps:$4 sm:$0xff]  }
 0x218   : > { %4366 = vmatpush1.bf16.msra.mxu1 %v6559_v10  ;;  %v6655_v10 = vld [vmem:[%s7962_s14 + $0x2c4] ss:$8 sps:$4 sm:$0xff]  }
 0x219   : > { %4612 = vmatpush1.bf16.msra.mxu0 %v6562_v11  ;;  %4367 = vmatprep.subr.bf16.mxu1 %v6567_v12  ;;  %v6658_v11 = vld [vmem:[%s7962_s14 + $0x8c4] ss:$8 sps:$4 sm:$0xff]   ;;  %v6653_v12 = vld [vmem:[%s7962_s14 + $0x2c0] ss:$8 sps:$4 sm:$0xff]  }
 0x21a   : > { %4613 = vmatprep.subr.bf16.mxu0 %v6570_v13  ;;  %v6656_v13 = vld [vmem:[%s7962_s14 + $0x8c0] ss:$8 sps:$4 sm:$0xff]  }
 0x21c   : > { %4368 = vmatpush1.bf16.msra.mxu1 %v6565_v14  ;;  %v6661_v14 = vld [vmem:[%s7962_s14 + $0x2d4] ss:$8 sps:$4 sm:$0xff]  }
 0x21d   : > { %4614 = vmatpush1.bf16.msra.mxu0 %v6568_v15  ;;  %4369 = vmatprep.subr.bf16.mxu1 %v6573_v16  ;;  %v6664_v15 = vld [vmem:[%s7962_s14 + $0x8d4] ss:$8 sps:$4 sm:$0xff]   ;;  %v6659_v16 = vld [vmem:[%s7962_s14 + $0x2d0] ss:$8 sps:$4 sm:$0xff]  }
 0x21e   : > { %4615 = vmatprep.subr.bf16.mxu0 %v6576_v17  ;;  %v6662_v17 = vld [vmem:[%s7962_s14 + $0x8d0] ss:$8 sps:$4 sm:$0xff]  }
 0x220   : > { %4370 = vmatpush1.bf16.msra.mxu1 %v6571_v18  ;;  %v6667_v18 = vld [vmem:[%s7962_s14 + $0x2e4] ss:$8 sps:$4 sm:$0xff]  }
 0x221   : > { %4616 = vmatpush1.bf16.msra.mxu0 %v6574_v19  ;;  %4380 = vmatprep.subr.bf16.mxu1 %v6581_v20  ;;  %v6670_v19 = vld [vmem:[%s7962_s14 + $0x8e4] ss:$8 sps:$4 sm:$0xff]   ;;  %v6665_v20 = vld [vmem:[%s7962_s14 + $0x2e0] ss:$8 sps:$4 sm:$0xff]  }
 0x222   : > { %4626 = vmatprep.subr.bf16.mxu0 %v6586_v21  ;;  %v6668_v21 = vld [vmem:[%s7962_s14 + $0x8e0] ss:$8 sps:$4 sm:$0xff]  }
 0x223   : > { %4372 = vmatmul.mubr.bf16.vlgmr.msra.gmra.mrb[0].mxu1 %v5624_v8  ;;  %v6673_v8 = vld [vmem:[%s7962_s14 + $0x2f4] ss:$8 sps:$4 sm:$0xff]  }
 0x224   : > { %4618 = vmatmul.mubr.bf16.vlgmr.msra.gmra.mrb[0].mxu0 %v5636_v9  ;;  %4381 = vmatpush1.bf16.msra.mxu1 %v6579_v22  ;;  %v6676_v22 = vld [vmem:[%s7962_s14 + $0x8f4] ss:$8 sps:$4 sm:$0xff]   ;;  %v6671_v9 = vld [vmem:[%s7962_s14 + $0x2f0] ss:$8 sps:$4 sm:$0xff]  }
 0x225   : > { %4627 = vmatpush1.bf16.msra.mxu0 %v6584_v23  ;;  %4382 = vmatprep.subr.bf16.mxu1 %v6589_v24  ;;  %v6674_v23 = vld [vmem:[%s7962_s14 + $0x8f0] ss:$8 sps:$4 sm:$0xff]   ;;  %v6681_v24 = vld [vmem:[%s7962_s14 + $0x304] ss:$8 sps:$4 sm:$0xff]  }
 0x226   : > { %4628 = vmatprep.subr.bf16.mxu0 %v6592_v26  ;;  %4412 = vmatprep.mubr.bf16.mxu1 %v5627_v27  ;;  %v6686_v26 = vld [vmem:[%s7962_s14 + $0x904] ss:$8 sps:$4 sm:$0xff]   ;;  %v8197_v27 = vld [vmem:[%s8667_s0 + $0x18] sm:$0xff] }
 0x227   : > { %4658 = vmatprep.mubr.bf16.mxu0 %v5639_v31  ;;  %v8206_v31 = vld [vmem:[%s8667_s0 + $0x48] sm:$0xff] }
 0x228   : > { %4383 = vmatpush1.bf16.msra.mxu1 %v6587_v29  ;;  %v5626_v29 = vcombine.low %v8122_v25, %v8122_v25  ;;  %v6692_v25 = vld [vmem:[%s7962_s14 + $0x914] ss:$8 sps:$4 sm:$0xff]  }
 0x229   : > { %4629 = vmatpush1.bf16.msra.mxu0 %v6590_v30  ;;  %4384 = vmatprep.subr.bf16.mxu1 %v6595_v32  ;;  %v5638_v30 = vcombine.low %v8130_v28, %v8130_v28  ;;  %v6679_v32 = vld [vmem:[%s7962_s14 + $0x300] ss:$8 sps:$4 sm:$0xff]   ;;  %v5629_v28 = vcombine.high %v8197_v27, %v8197_v27 }
 0x22a   : > { %4630 = vmatprep.subr.bf16.mxu0 %v6598_v33  ;;  %v6684_v33 = vld [vmem:[%s7962_s14 + $0x900] ss:$8 sps:$4 sm:$0xff]  }
 0x22c   : > { %4385 = vmatpush1.bf16.msra.mxu1 %v6593_v34  ;;  %v6689_v34 = vld [vmem:[%s7962_s14 + $0x314] ss:$8 sps:$4 sm:$0xff]  }
 0x22d   : > { %4631 = vmatpush1.bf16.msra.mxu0 %v6596_v35  ;;  %4386 = vmatprep.subr.bf16.mxu1 %v6601_v36  ;;  %v5641_v35 = vcombine.high %v8206_v31, %v8206_v31  ;;  %v6687_v36 = vld [vmem:[%s7962_s14 + $0x310] ss:$8 sps:$4 sm:$0xff]  }
 0x22e   : > { %4632 = vmatprep.subr.bf16.mxu0 %v6604_v37  ;;  %v6690_v37 = vld [vmem:[%s7962_s14 + $0x910] ss:$8 sps:$4 sm:$0xff]  }
 0x230   : > { %4387 = vmatpush1.bf16.msra.mxu1 %v6599_v38  ;;  %v6695_v38 = vld [vmem:[%s7962_s14 + $0x324] ss:$8 sps:$4 sm:$0xff]  }
 0x231   : > { %4633 = vmatpush1.bf16.msra.mxu0 %v6602_v39  ;;  %4388 = vmatprep.subr.bf16.mxu1 %v6607_v40  ;;  %v6698_v39 = vld [vmem:[%s7962_s14 + $0x924] ss:$8 sps:$4 sm:$0xff]   ;;  %v6693_v40 = vld [vmem:[%s7962_s14 + $0x320] ss:$8 sps:$4 sm:$0xff]  }
 0x232   : > { %4634 = vmatprep.subr.bf16.mxu0 %v6610_v41  ;;  %v6696_v41 = vld [vmem:[%s7962_s14 + $0x920] ss:$8 sps:$4 sm:$0xff]  }
 0x234   : > { %4389 = vmatpush1.bf16.msra.mxu1 %v6605_v42  ;;  %v6701_v42 = vld [vmem:[%s7962_s14 + $0x334] ss:$8 sps:$4 sm:$0xff]  }
 0x235   : > { %4635 = vmatpush1.bf16.msra.mxu0 %v6608_v43  ;;  %4390 = vmatprep.subr.bf16.mxu1 %v6613_v44  ;;  %v6704_v43 = vld [vmem:[%s7962_s14 + $0x934] ss:$8 sps:$4 sm:$0xff]   ;;  %v6699_v44 = vld [vmem:[%s7962_s14 + $0x330] ss:$8 sps:$4 sm:$0xff]  }
 0x236   : > { %4636 = vmatprep.subr.bf16.mxu0 %v6616_v45  ;;  %v6702_v45 = vld [vmem:[%s7962_s14 + $0x930] ss:$8 sps:$4 sm:$0xff]  }
 0x238   : > { %4391 = vmatpush1.bf16.msra.mxu1 %v6611_v46  ;;  %v6707_v46 = vld [vmem:[%s7962_s14 + $0x344] ss:$8 sps:$4 sm:$0xff]  }
 0x239   : > { %4637 = vmatpush1.bf16.msra.mxu0 %v6614_v47  ;;  %4392 = vmatprep.subr.bf16.mxu1 %v6619_v48  ;;  %v6710_v47 = vld [vmem:[%s7962_s14 + $0x944] ss:$8 sps:$4 sm:$0xff]   ;;  %v6705_v48 = vld [vmem:[%s7962_s14 + $0x340] ss:$8 sps:$4 sm:$0xff]  }
 0x23a   : > { %4638 = vmatprep.subr.bf16.mxu0 %v6622_v49  ;;  %v6708_v49 = vld [vmem:[%s7962_s14 + $0x940] ss:$8 sps:$4 sm:$0xff]  }
 0x23c   : > { %4393 = vmatpush1.bf16.msra.mxu1 %v6617_v50  ;;  %v6713_v50 = vld [vmem:[%s7962_s14 + $0x354] ss:$8 sps:$4 sm:$0xff]  }
 0x23d   : > { %4639 = vmatpush1.bf16.msra.mxu0 %v6620_v51  ;;  %4394 = vmatprep.subr.bf16.mxu1 %v6625_v52  ;;  %v6716_v51 = vld [vmem:[%s7962_s14 + $0x954] ss:$8 sps:$4 sm:$0xff]   ;;  %v6711_v52 = vld [vmem:[%s7962_s14 + $0x350] ss:$8 sps:$4 sm:$0xff]  }
 0x23e   : > { %4640 = vmatprep.subr.bf16.mxu0 %v6628_v53  ;;  %v6714_v53 = vld [vmem:[%s7962_s14 + $0x950] ss:$8 sps:$4 sm:$0xff]  }
 0x240   : > { %4395 = vmatpush1.bf16.msra.mxu1 %v6623_v54  ;;  %v6719_v54 = vld [vmem:[%s7962_s14 + $0x364] ss:$8 sps:$4 sm:$0xff]  }
 0x241   : > { %4641 = vmatpush1.bf16.msra.mxu0 %v6626_v55  ;;  %4396 = vmatprep.subr.bf16.mxu1 %v6631_v56  ;;  %v6722_v55 = vld [vmem:[%s7962_s14 + $0x964] ss:$8 sps:$4 sm:$0xff]   ;;  %v6717_v56 = vld [vmem:[%s7962_s14 + $0x360] ss:$8 sps:$4 sm:$0xff]  }
 0x242   : > { %4642 = vmatprep.subr.bf16.mxu0 %v6634_v57  ;;  %v6720_v57 = vld [vmem:[%s7962_s14 + $0x960] ss:$8 sps:$4 sm:$0xff]  }
 0x244   : > { %4397 = vmatpush1.bf16.msra.mxu1 %v6629_v58  ;;  %v6725_v58 = vld [vmem:[%s7962_s14 + $0x374] ss:$8 sps:$4 sm:$0xff]  }
 0x245   : > { %4643 = vmatpush1.bf16.msra.mxu0 %v6632_v59  ;;  %4398 = vmatprep.subr.bf16.mxu1 %v6637_v60  ;;  %v6728_v59 = vld [vmem:[%s7962_s14 + $0x974] ss:$8 sps:$4 sm:$0xff]   ;;  %v6723_v60 = vld [vmem:[%s7962_s14 + $0x370] ss:$8 sps:$4 sm:$0xff]  }
 0x246   : > { %4644 = vmatprep.subr.bf16.mxu0 %v6640_v61  ;;  %v6726_v61 = vld [vmem:[%s7962_s14 + $0x970] ss:$8 sps:$4 sm:$0xff]  }
 0x248   : > { %4399 = vmatpush1.bf16.msra.mxu1 %v6635_v62  ;;  %v6731_v62 = vld [vmem:[%s7962_s14 + $0x384] ss:$8 sps:$4 sm:$0xff]  }
 0x249   : > { %4645 = vmatpush1.bf16.msra.mxu0 %v6638_v63  ;;  %4400 = vmatprep.subr.bf16.mxu1 %v6643_v0  ;;  %v6734_v63 = vld [vmem:[%s7962_s14 + $0x984] ss:$8 sps:$4 sm:$0xff]   ;;  %v6729_v0 = vld [vmem:[%s7962_s14 + $0x380] ss:$8 sps:$4 sm:$0xff]  }
 0x24a   : > { %4646 = vmatprep.subr.bf16.mxu0 %v6646_v1  ;;  %v6732_v1 = vld [vmem:[%s7962_s14 + $0x980] ss:$8 sps:$4 sm:$0xff]  }
 0x24c   : > { %4401 = vmatpush1.bf16.msra.mxu1 %v6641_v2  ;;  %v6737_v2 = vld [vmem:[%s7962_s14 + $0x394] ss:$8 sps:$4 sm:$0xff]  }
 0x24d   : > { %4647 = vmatpush1.bf16.msra.mxu0 %v6644_v3  ;;  %4402 = vmatprep.subr.bf16.mxu1 %v6649_v4  ;;  %v6740_v3 = vld [vmem:[%s7962_s14 + $0x994] ss:$8 sps:$4 sm:$0xff]   ;;  %v6735_v4 = vld [vmem:[%s7962_s14 + $0x390] ss:$8 sps:$4 sm:$0xff]  }
 0x24e   : > { %4648 = vmatprep.subr.bf16.mxu0 %v6652_v5  ;;  %v6738_v5 = vld [vmem:[%s7962_s14 + $0x990] ss:$8 sps:$4 sm:$0xff]  }
 0x250   : > { %4403 = vmatpush1.bf16.msra.mxu1 %v6647_v6  ;;  %v6743_v6 = vld [vmem:[%s7962_s14 + $0x3a4] ss:$8 sps:$4 sm:$0xff]  }
 0x251   : > { %4649 = vmatpush1.bf16.msra.mxu0 %v6650_v7  ;;  %4404 = vmatprep.subr.bf16.mxu1 %v6655_v10  ;;  %v6746_v7 = vld [vmem:[%s7962_s14 + $0x9a4] ss:$8 sps:$4 sm:$0xff]   ;;  %v6741_v10 = vld [vmem:[%s7962_s14 + $0x3a0] ss:$8 sps:$4 sm:$0xff]  }
 0x252   : > { %4650 = vmatprep.subr.bf16.mxu0 %v6658_v11  ;;  %v6744_v11 = vld [vmem:[%s7962_s14 + $0x9a0] ss:$8 sps:$4 sm:$0xff]  }
 0x254   : > { %4405 = vmatpush1.bf16.msra.mxu1 %v6653_v12  ;;  %v6749_v12 = vld [vmem:[%s7962_s14 + $0x3b4] ss:$8 sps:$4 sm:$0xff]  }
 0x255   : > { %4651 = vmatpush1.bf16.msra.mxu0 %v6656_v13  ;;  %4406 = vmatprep.subr.bf16.mxu1 %v6661_v14  ;;  %v6752_v13 = vld [vmem:[%s7962_s14 + $0x9b4] ss:$8 sps:$4 sm:$0xff]   ;;  %v6747_v14 = vld [vmem:[%s7962_s14 + $0x3b0] ss:$8 sps:$4 sm:$0xff]  }
 0x256   : > { %4652 = vmatprep.subr.bf16.mxu0 %v6664_v15  ;;  %v6750_v15 = vld [vmem:[%s7962_s14 + $0x9b0] ss:$8 sps:$4 sm:$0xff]  }
 0x258   : > { %4407 = vmatpush1.bf16.msra.mxu1 %v6659_v16  ;;  %v6755_v16 = vld [vmem:[%s7962_s14 + $0x3c4] ss:$8 sps:$4 sm:$0xff]  }
 0x259   : > { %4653 = vmatpush1.bf16.msra.mxu0 %v6662_v17  ;;  %4408 = vmatprep.subr.bf16.mxu1 %v6667_v18  ;;  %v6758_v17 = vld [vmem:[%s7962_s14 + $0x9c4] ss:$8 sps:$4 sm:$0xff]   ;;  %v6753_v18 = vld [vmem:[%s7962_s14 + $0x3c0] ss:$8 sps:$4 sm:$0xff]  }
 0x25a   : > { %4654 = vmatprep.subr.bf16.mxu0 %v6670_v19  ;;  %v6756_v19 = vld [vmem:[%s7962_s14 + $0x9c0] ss:$8 sps:$4 sm:$0xff]  }
 0x25c   : > { %4409 = vmatpush1.bf16.msra.mxu1 %v6665_v20  ;;  %v6761_v20 = vld [vmem:[%s7962_s14 + $0x3d4] ss:$8 sps:$4 sm:$0xff]  }
 0x25d   : > { %4655 = vmatpush1.bf16.msra.mxu0 %v6668_v21  ;;  %4410 = vmatprep.subr.bf16.mxu1 %v6673_v8  ;;  %v6764_v21 = vld [vmem:[%s7962_s14 + $0x9d4] ss:$8 sps:$4 sm:$0xff]   ;;  %v6759_v8 = vld [vmem:[%s7962_s14 + $0x3d0] ss:$8 sps:$4 sm:$0xff]  }
 0x25e   : > { %4656 = vmatprep.subr.bf16.mxu0 %v6676_v22  ;;  %v6762_v22 = vld [vmem:[%s7962_s14 + $0x9d0] ss:$8 sps:$4 sm:$0xff]  }
 0x260   : > { %4411 = vmatpush1.bf16.msra.mxu1 %v6671_v9  ;;  %v6767_v9 = vld [vmem:[%s7962_s14 + $0x3e4] ss:$8 sps:$4 sm:$0xff]  }
 0x261   : > { %4657 = vmatpush1.bf16.msra.mxu0 %v6674_v23  ;;  %4421 = vmatprep.subr.bf16.mxu1 %v6681_v24  ;;  %v6770_v23 = vld [vmem:[%s7962_s14 + $0x9e4] ss:$8 sps:$4 sm:$0xff]   ;;  %v6765_v24 = vld [vmem:[%s7962_s14 + $0x3e0] ss:$8 sps:$4 sm:$0xff]  }
 0x262   : > { %4667 = vmatprep.subr.bf16.mxu0 %v6686_v26  ;;  %v6768_v26 = vld [vmem:[%s7962_s14 + $0x9e0] ss:$8 sps:$4 sm:$0xff]  }
 0x263   : > { %4413 = vmatmul.mubr.bf16.vlgmr.msra.gmra.mrb[0].mxu1 %v5626_v29  ;;  %v6773_v29 = vld [vmem:[%s7962_s14 + $0x3f4] ss:$8 sps:$4 sm:$0xff]  }
 0x264   : > { %4659 = vmatmul.mubr.bf16.vlgmr.msra.gmra.mrb[0].mxu0 %v5638_v30  ;;  %4422 = vmatpush1.bf16.msra.mxu1 %v6679_v32  ;;  %v6776_v30 = vld [vmem:[%s7962_s14 + $0x9f4] ss:$8 sps:$4 sm:$0xff]   ;;  %v6771_v32 = vld [vmem:[%s7962_s14 + $0x3f0] ss:$8 sps:$4 sm:$0xff]  }
 0x265   : > { %4668 = vmatpush1.bf16.msra.mxu0 %v6684_v33  ;;  %4423 = vmatprep.subr.bf16.mxu1 %v6689_v34  ;;  %v6774_v33 = vld [vmem:[%s7962_s14 + $0x9f0] ss:$8 sps:$4 sm:$0xff]   ;;  %v6781_v34 = vld [vmem:[%s7962_s14 + $0x404] ss:$8 sps:$4 sm:$0xff]  }
 0x266   : > { %4669 = vmatprep.subr.bf16.mxu0 %v6692_v25  ;;  %4453 = vmatprep.mubr.bf16.mxu1 %v5629_v28  ;;  %v6786_v25 = vld [vmem:[%s7962_s14 + $0xa04] ss:$8 sps:$4 sm:$0xff]   ;;  %v6779_v28 = vld [vmem:[%s7962_s14 + $0x400] ss:$8 sps:$4 sm:$0xff]  }
 0x267   : > { %4699 = vmatprep.mubr.bf16.mxu0 %v5641_v35  ;;  %v6784_v35 = vld [vmem:[%s7962_s14 + $0xa00] ss:$8 sps:$4 sm:$0xff]  }
 0x268   : > { %4424 = vmatpush1.bf16.msra.mxu1 %v6687_v36  ;;  %v5628_v36 = vcombine.low %v8197_v27, %v8197_v27  ;;  %v6789_v27 = vld [vmem:[%s7962_s14 + $0x414] ss:$8 sps:$4 sm:$0xff]  }
 0x269   : > { %4670 = vmatpush1.bf16.msra.mxu0 %v6690_v37  ;;  %4425 = vmatprep.subr.bf16.mxu1 %v6695_v38  ;;  %v5640_v37 = vcombine.low %v8206_v31, %v8206_v31  ;;  %v8285_v38 = vld [vmem:[%s8667_s0 + $0x20] sm:$0xff] }
 0x26a   : > { %4671 = vmatprep.subr.bf16.mxu0 %v6698_v39  ;;  %v8290_v39 = vld [vmem:[%s8667_s0 + $0x50] sm:$0xff]  ;;  %v5631_v31 = vcombine.high %v8285_v38, %v8285_v38 }
 0x26c   : > { %4426 = vmatpush1.bf16.msra.mxu1 %v6693_v40  ;;  %v6792_v40 = vld [vmem:[%s7962_s14 + $0xa14] ss:$8 sps:$4 sm:$0xff]  }
 0x26d   : > { %4672 = vmatpush1.bf16.msra.mxu0 %v6696_v41  ;;  %4427 = vmatprep.subr.bf16.mxu1 %v6701_v42  ;;  %v5643_v41 = vcombine.high %v8290_v39, %v8290_v39  ;;  %v6787_v42 = vld [vmem:[%s7962_s14 + $0x410] ss:$8 sps:$4 sm:$0xff]  }
 0x26e   : > { %4673 = vmatprep.subr.bf16.mxu0 %v6704_v43  ;;  %v6790_v43 = vld [vmem:[%s7962_s14 + $0xa10] ss:$8 sps:$4 sm:$0xff]  }
 0x270   : > { %4428 = vmatpush1.bf16.msra.mxu1 %v6699_v44  ;;  %v6795_v44 = vld [vmem:[%s7962_s14 + $0x424] ss:$8 sps:$4 sm:$0xff]  }
 0x271   : > { %4674 = vmatpush1.bf16.msra.mxu0 %v6702_v45  ;;  %4429 = vmatprep.subr.bf16.mxu1 %v6707_v46  ;;  %v6798_v45 = vld [vmem:[%s7962_s14 + $0xa24] ss:$8 sps:$4 sm:$0xff]   ;;  %v6793_v46 = vld [vmem:[%s7962_s14 + $0x420] ss:$8 sps:$4 sm:$0xff]  }
 0x272   : > { %4675 = vmatprep.subr.bf16.mxu0 %v6710_v47  ;;  %v6796_v47 = vld [vmem:[%s7962_s14 + $0xa20] ss:$8 sps:$4 sm:$0xff]  }
 0x274   : > { %4430 = vmatpush1.bf16.msra.mxu1 %v6705_v48  ;;  %v6801_v48 = vld [vmem:[%s7962_s14 + $0x434] ss:$8 sps:$4 sm:$0xff]  }
 0x275   : > { %4676 = vmatpush1.bf16.msra.mxu0 %v6708_v49  ;;  %4431 = vmatprep.subr.bf16.mxu1 %v6713_v50  ;;  %v6804_v49 = vld [vmem:[%s7962_s14 + $0xa34] ss:$8 sps:$4 sm:$0xff]   ;;  %v6799_v50 = vld [vmem:[%s7962_s14 + $0x430] ss:$8 sps:$4 sm:$0xff]  }
 0x276   : > { %4677 = vmatprep.subr.bf16.mxu0 %v6716_v51  ;;  %v6802_v51 = vld [vmem:[%s7962_s14 + $0xa30] ss:$8 sps:$4 sm:$0xff]  }
 0x278   : > { %4432 = vmatpush1.bf16.msra.mxu1 %v6711_v52  ;;  %v6807_v52 = vld [vmem:[%s7962_s14 + $0x444] ss:$8 sps:$4 sm:$0xff]  }
 0x279   : > { %4678 = vmatpush1.bf16.msra.mxu0 %v6714_v53  ;;  %4433 = vmatprep.subr.bf16.mxu1 %v6719_v54  ;;  %v6810_v53 = vld [vmem:[%s7962_s14 + $0xa44] ss:$8 sps:$4 sm:$0xff]   ;;  %v6805_v54 = vld [vmem:[%s7962_s14 + $0x440] ss:$8 sps:$4 sm:$0xff]  }
 0x27a   : > { %4679 = vmatprep.subr.bf16.mxu0 %v6722_v55  ;;  %v6808_v55 = vld [vmem:[%s7962_s14 + $0xa40] ss:$8 sps:$4 sm:$0xff]  }
 0x27c   : > { %4434 = vmatpush1.bf16.msra.mxu1 %v6717_v56  ;;  %v6813_v56 = vld [vmem:[%s7962_s14 + $0x454] ss:$8 sps:$4 sm:$0xff]  }
 0x27d   : > { %4680 = vmatpush1.bf16.msra.mxu0 %v6720_v57  ;;  %4435 = vmatprep.subr.bf16.mxu1 %v6725_v58  ;;  %v6816_v57 = vld [vmem:[%s7962_s14 + $0xa54] ss:$8 sps:$4 sm:$0xff]   ;;  %v6811_v58 = vld [vmem:[%s7962_s14 + $0x450] ss:$8 sps:$4 sm:$0xff]  }
 0x27e   : > { %4681 = vmatprep.subr.bf16.mxu0 %v6728_v59  ;;  %v6814_v59 = vld [vmem:[%s7962_s14 + $0xa50] ss:$8 sps:$4 sm:$0xff]  }
 0x280   : > { %4436 = vmatpush1.bf16.msra.mxu1 %v6723_v60  ;;  %v6819_v60 = vld [vmem:[%s7962_s14 + $0x464] ss:$8 sps:$4 sm:$0xff]  }
 0x281   : > { %4682 = vmatpush1.bf16.msra.mxu0 %v6726_v61  ;;  %4437 = vmatprep.subr.bf16.mxu1 %v6731_v62  ;;  %v6822_v61 = vld [vmem:[%s7962_s14 + $0xa64] ss:$8 sps:$4 sm:$0xff]   ;;  %v6817_v62 = vld [vmem:[%s7962_s14 + $0x460] ss:$8 sps:$4 sm:$0xff]  }
 0x282   : > { %4683 = vmatprep.subr.bf16.mxu0 %v6734_v63  ;;  %v6820_v63 = vld [vmem:[%s7962_s14 + $0xa60] ss:$8 sps:$4 sm:$0xff]  }
 0x284   : > { %4438 = vmatpush1.bf16.msra.mxu1 %v6729_v0  ;;  %v6825_v0 = vld [vmem:[%s7962_s14 + $0x474] ss:$8 sps:$4 sm:$0xff]  }
 0x285   : > { %4684 = vmatpush1.bf16.msra.mxu0 %v6732_v1  ;;  %4439 = vmatprep.subr.bf16.mxu1 %v6737_v2  ;;  %v6828_v1 = vld [vmem:[%s7962_s14 + $0xa74] ss:$8 sps:$4 sm:$0xff]   ;;  %v6823_v2 = vld [vmem:[%s7962_s14 + $0x470] ss:$8 sps:$4 sm:$0xff]  }
 0x286   : > { %4685 = vmatprep.subr.bf16.mxu0 %v6740_v3  ;;  %v6826_v3 = vld [vmem:[%s7962_s14 + $0xa70] ss:$8 sps:$4 sm:$0xff]  }
 0x288   : > { %4440 = vmatpush1.bf16.msra.mxu1 %v6735_v4  ;;  %v6831_v4 = vld [vmem:[%s7962_s14 + $0x484] ss:$8 sps:$4 sm:$0xff]  }
 0x289   : > { %4686 = vmatpush1.bf16.msra.mxu0 %v6738_v5  ;;  %4441 = vmatprep.subr.bf16.mxu1 %v6743_v6  ;;  %v6834_v5 = vld [vmem:[%s7962_s14 + $0xa84] ss:$8 sps:$4 sm:$0xff]   ;;  %v6829_v6 = vld [vmem:[%s7962_s14 + $0x480] ss:$8 sps:$4 sm:$0xff]  }
 0x28a   : > { %4687 = vmatprep.subr.bf16.mxu0 %v6746_v7  ;;  %v6832_v7 = vld [vmem:[%s7962_s14 + $0xa80] ss:$8 sps:$4 sm:$0xff]  }
 0x28c   : > { %4442 = vmatpush1.bf16.msra.mxu1 %v6741_v10  ;;  %v6837_v10 = vld [vmem:[%s7962_s14 + $0x494] ss:$8 sps:$4 sm:$0xff]  }
 0x28d   : > { %4688 = vmatpush1.bf16.msra.mxu0 %v6744_v11  ;;  %4443 = vmatprep.subr.bf16.mxu1 %v6749_v12  ;;  %v6840_v11 = vld [vmem:[%s7962_s14 + $0xa94] ss:$8 sps:$4 sm:$0xff]   ;;  %v6835_v12 = vld [vmem:[%s7962_s14 + $0x490] ss:$8 sps:$4 sm:$0xff]  }
 0x28e   : > { %4689 = vmatprep.subr.bf16.mxu0 %v6752_v13  ;;  %v6838_v13 = vld [vmem:[%s7962_s14 + $0xa90] ss:$8 sps:$4 sm:$0xff]  }
 0x290   : > { %4444 = vmatpush1.bf16.msra.mxu1 %v6747_v14  ;;  %v6843_v14 = vld [vmem:[%s7962_s14 + $0x4a4] ss:$8 sps:$4 sm:$0xff]  }
 0x291   : > { %4690 = vmatpush1.bf16.msra.mxu0 %v6750_v15  ;;  %4445 = vmatprep.subr.bf16.mxu1 %v6755_v16  ;;  %v6846_v15 = vld [vmem:[%s7962_s14 + $0xaa4] ss:$8 sps:$4 sm:$0xff]   ;;  %v6841_v16 = vld [vmem:[%s7962_s14 + $0x4a0] ss:$8 sps:$4 sm:$0xff]  }
 0x292   : > { %4691 = vmatprep.subr.bf16.mxu0 %v6758_v17  ;;  %v6844_v17 = vld [vmem:[%s7962_s14 + $0xaa0] ss:$8 sps:$4 sm:$0xff]  }
 0x294   : > { %4446 = vmatpush1.bf16.msra.mxu1 %v6753_v18  ;;  %v6849_v18 = vld [vmem:[%s7962_s14 + $0x4b4] ss:$8 sps:$4 sm:$0xff]  }
 0x295   : > { %4692 = vmatpush1.bf16.msra.mxu0 %v6756_v19  ;;  %4447 = vmatprep.subr.bf16.mxu1 %v6761_v20  ;;  %v6852_v19 = vld [vmem:[%s7962_s14 + $0xab4] ss:$8 sps:$4 sm:$0xff]   ;;  %v6847_v20 = vld [vmem:[%s7962_s14 + $0x4b0] ss:$8 sps:$4 sm:$0xff]  }
 0x296   : > { %4693 = vmatprep.subr.bf16.mxu0 %v6764_v21  ;;  %v6850_v21 = vld [vmem:[%s7962_s14 + $0xab0] ss:$8 sps:$4 sm:$0xff]  }
 0x298   : > { %4448 = vmatpush1.bf16.msra.mxu1 %v6759_v8  ;;  %v6855_v8 = vld [vmem:[%s7962_s14 + $0x4c4] ss:$8 sps:$4 sm:$0xff]  }
 0x299   : > { %4694 = vmatpush1.bf16.msra.mxu0 %v6762_v22  ;;  %4449 = vmatprep.subr.bf16.mxu1 %v6767_v9  ;;  %v6858_v22 = vld [vmem:[%s7962_s14 + $0xac4] ss:$8 sps:$4 sm:$0xff]   ;;  %v6853_v9 = vld [vmem:[%s7962_s14 + $0x4c0] ss:$8 sps:$4 sm:$0xff]  }
 0x29a   : > { %4695 = vmatprep.subr.bf16.mxu0 %v6770_v23  ;;  %v6856_v23 = vld [vmem:[%s7962_s14 + $0xac0] ss:$8 sps:$4 sm:$0xff]  }
 0x29c   : > { %4450 = vmatpush1.bf16.msra.mxu1 %v6765_v24  ;;  %v6861_v24 = vld [vmem:[%s7962_s14 + $0x4d4] ss:$8 sps:$4 sm:$0xff]  }
 0x29d   : > { %4696 = vmatpush1.bf16.msra.mxu0 %v6768_v26  ;;  %4451 = vmatprep.subr.bf16.mxu1 %v6773_v29  ;;  %v6864_v26 = vld [vmem:[%s7962_s14 + $0xad4] ss:$8 sps:$4 sm:$0xff]   ;;  %v6859_v29 = vld [vmem:[%s7962_s14 + $0x4d0] ss:$8 sps:$4 sm:$0xff]  }
 0x29e   : > { %4697 = vmatprep.subr.bf16.mxu0 %v6776_v30  ;;  %v6862_v30 = vld [vmem:[%s7962_s14 + $0xad0] ss:$8 sps:$4 sm:$0xff]  }
 0x2a0   : > { %4452 = vmatpush1.bf16.msra.mxu1 %v6771_v32  ;;  %v6867_v32 = vld [vmem:[%s7962_s14 + $0x4e4] ss:$8 sps:$4 sm:$0xff]  }
 0x2a1   : > { %4698 = vmatpush1.bf16.msra.mxu0 %v6774_v33  ;;  %4462 = vmatprep.subr.bf16.mxu1 %v6781_v34  ;;  %v6870_v33 = vld [vmem:[%s7962_s14 + $0xae4] ss:$8 sps:$4 sm:$0xff]   ;;  %v6865_v34 = vld [vmem:[%s7962_s14 + $0x4e0] ss:$8 sps:$4 sm:$0xff]  }
 0x2a2   : > { %4708 = vmatprep.subr.bf16.mxu0 %v6786_v25  ;;  %v6868_v25 = vld [vmem:[%s7962_s14 + $0xae0] ss:$8 sps:$4 sm:$0xff]  }
 0x2a3   : > { %4454 = vmatmul.mubr.bf16.vlgmr.msra.gmra.mrb[0].mxu1 %v5628_v36  ;;  %v6871_v36 = vld [vmem:[%s7962_s14 + $0x4f0] ss:$8 sps:$4 sm:$0xff]  }
 0x2a4   : > { %4700 = vmatmul.mubr.bf16.vlgmr.msra.gmra.mrb[0].mxu0 %v5640_v37  ;;  %4463 = vmatpush1.bf16.msra.mxu1 %v6779_v28  ;;  %v6873_v28 = vld [vmem:[%s7962_s14 + $0x4f4] ss:$8 sps:$4 sm:$0xff]   ;;  %v6874_v37 = vld [vmem:[%s7962_s14 + $0xaf0] ss:$8 sps:$4 sm:$0xff]  }
 0x2a5   : > { %4709 = vmatpush1.bf16.msra.mxu0 %v6784_v35  ;;  %4464 = vmatprep.subr.bf16.mxu1 %v6789_v27  ;;  %v6876_v35 = vld [vmem:[%s7962_s14 + $0xaf4] ss:$8 sps:$4 sm:$0xff]   ;;  %v6881_v27 = vld [vmem:[%s7962_s14 + $0x504] ss:$8 sps:$4 sm:$0xff]  }
 0x2a6   : > { %4710 = vmatprep.subr.bf16.mxu0 %v6792_v40  ;;  %4494 = vmatprep.mubr.bf16.mxu1 %v5631_v31  ;;  %v6886_v40 = vld [vmem:[%s7962_s14 + $0xb04] ss:$8 sps:$4 sm:$0xff]   ;;  %v5630_v31 = vcombine.low %v8285_v38, %v8285_v38  ;;  %v6884_v38 = vld [vmem:[%s7962_s14 + $0xb00] ss:$8 sps:$4 sm:$0xff]  }
 0x2a7   : > { %4740 = vmatprep.mubr.bf16.mxu0 %v5643_v41  ;;  %v5642_v41 = vcombine.low %v8290_v39, %v8290_v39  ;;  %v6889_v39 = vld [vmem:[%s7962_s14 + $0x514] ss:$8 sps:$4 sm:$0xff]  }
 0x2a8   : > { %4465 = vmatpush1.bf16.msra.mxu1 %v6787_v42  ;;  %v8365_v42 = vld [vmem:[%s8667_s0 + $0x28] sm:$0xff] }
 0x2a9   : > { %4711 = vmatpush1.bf16.msra.mxu0 %v6790_v43  ;;  %4466 = vmatprep.subr.bf16.mxu1 %v6795_v44  ;;  %v8370_v43 = vld [vmem:[%s8667_s0 + $0x58] sm:$0xff]  ;;  %v6879_v44 = vld [vmem:[%s7962_s14 + $0x500] ss:$8 sps:$4 sm:$0xff]  }
 0x2aa   : > { %4712 = vmatprep.subr.bf16.mxu0 %v6798_v45  ;;  %v6892_v45 = vld [vmem:[%s7962_s14 + $0xb14] ss:$8 sps:$4 sm:$0xff]  }
 0x2ac   : > { %4467 = vmatpush1.bf16.msra.mxu1 %v6793_v46  ;;  %v5633_v46 = vcombine.high %v8365_v42, %v8365_v42 }
 0x2ad   : > { %4713 = vmatpush1.bf16.msra.mxu0 %v6796_v47  ;;  %4468 = vmatprep.subr.bf16.mxu1 %v6801_v48  ;;  %v5645_v47 = vcombine.high %v8370_v43, %v8370_v43  ;;  %v6887_v48 = vld [vmem:[%s7962_s14 + $0x510] ss:$8 sps:$4 sm:$0xff]  }
 0x2ae   : > { %4714 = vmatprep.subr.bf16.mxu0 %v6804_v49  ;;  %v6890_v49 = vld [vmem:[%s7962_s14 + $0xb10] ss:$8 sps:$4 sm:$0xff]  }
 0x2b0   : > { %4469 = vmatpush1.bf16.msra.mxu1 %v6799_v50  ;;  %v6895_v50 = vld [vmem:[%s7962_s14 + $0x524] ss:$8 sps:$4 sm:$0xff]  }
 0x2b1   : > { %4715 = vmatpush1.bf16.msra.mxu0 %v6802_v51  ;;  %4470 = vmatprep.subr.bf16.mxu1 %v6807_v52  ;;  %v6898_v51 = vld [vmem:[%s7962_s14 + $0xb24] ss:$8 sps:$4 sm:$0xff]   ;;  %v6893_v52 = vld [vmem:[%s7962_s14 + $0x520] ss:$8 sps:$4 sm:$0xff]  }
 0x2b2   : > { %4716 = vmatprep.subr.bf16.mxu0 %v6810_v53  ;;  %v6896_v53 = vld [vmem:[%s7962_s14 + $0xb20] ss:$8 sps:$4 sm:$0xff]  }
 0x2b4   : > { %4471 = vmatpush1.bf16.msra.mxu1 %v6805_v54  ;;  %v6901_v54 = vld [vmem:[%s7962_s14 + $0x534] ss:$8 sps:$4 sm:$0xff]  }
 0x2b5   : > { %4717 = vmatpush1.bf16.msra.mxu0 %v6808_v55  ;;  %4472 = vmatprep.subr.bf16.mxu1 %v6813_v56  ;;  %v6904_v55 = vld [vmem:[%s7962_s14 + $0xb34] ss:$8 sps:$4 sm:$0xff]   ;;  %v6899_v56 = vld [vmem:[%s7962_s14 + $0x530] ss:$8 sps:$4 sm:$0xff]  }
 0x2b6   : > { %4718 = vmatprep.subr.bf16.mxu0 %v6816_v57  ;;  %v6902_v57 = vld [vmem:[%s7962_s14 + $0xb30] ss:$8 sps:$4 sm:$0xff]  }
 0x2b8   : > { %4473 = vmatpush1.bf16.msra.mxu1 %v6811_v58  ;;  %v6907_v58 = vld [vmem:[%s7962_s14 + $0x544] ss:$8 sps:$4 sm:$0xff]  }
 0x2b9   : > { %4719 = vmatpush1.bf16.msra.mxu0 %v6814_v59  ;;  %4474 = vmatprep.subr.bf16.mxu1 %v6819_v60  ;;  %v6910_v59 = vld [vmem:[%s7962_s14 + $0xb44] ss:$8 sps:$4 sm:$0xff]   ;;  %v6905_v60 = vld [vmem:[%s7962_s14 + $0x540] ss:$8 sps:$4 sm:$0xff]  }
 0x2ba   : > { %4720 = vmatprep.subr.bf16.mxu0 %v6822_v61  ;;  %v6908_v61 = vld [vmem:[%s7962_s14 + $0xb40] ss:$8 sps:$4 sm:$0xff]  }
 0x2bc   : > { %4475 = vmatpush1.bf16.msra.mxu1 %v6817_v62  ;;  %v6913_v62 = vld [vmem:[%s7962_s14 + $0x554] ss:$8 sps:$4 sm:$0xff]  }
 0x2bd   : > { %4721 = vmatpush1.bf16.msra.mxu0 %v6820_v63  ;;  %4476 = vmatprep.subr.bf16.mxu1 %v6825_v0  ;;  %v6916_v63 = vld [vmem:[%s7962_s14 + $0xb54] ss:$8 sps:$4 sm:$0xff]   ;;  %v6911_v0 = vld [vmem:[%s7962_s14 + $0x550] ss:$8 sps:$4 sm:$0xff]  }
 0x2be   : > { %4722 = vmatprep.subr.bf16.mxu0 %v6828_v1  ;;  %v6914_v1 = vld [vmem:[%s7962_s14 + $0xb50] ss:$8 sps:$4 sm:$0xff]  }
 0x2c0   : > { %4477 = vmatpush1.bf16.msra.mxu1 %v6823_v2  ;;  %v6919_v2 = vld [vmem:[%s7962_s14 + $0x564] ss:$8 sps:$4 sm:$0xff]  }
 0x2c1   : > { %4723 = vmatpush1.bf16.msra.mxu0 %v6826_v3  ;;  %4478 = vmatprep.subr.bf16.mxu1 %v6831_v4  ;;  %v6922_v3 = vld [vmem:[%s7962_s14 + $0xb64] ss:$8 sps:$4 sm:$0xff]   ;;  %v6917_v4 = vld [vmem:[%s7962_s14 + $0x560] ss:$8 sps:$4 sm:$0xff]  }
 0x2c2   : > { %4724 = vmatprep.subr.bf16.mxu0 %v6834_v5  ;;  %v6920_v5 = vld [vmem:[%s7962_s14 + $0xb60] ss:$8 sps:$4 sm:$0xff]  }
 0x2c4   : > { %4479 = vmatpush1.bf16.msra.mxu1 %v6829_v6  ;;  %v6925_v6 = vld [vmem:[%s7962_s14 + $0x574] ss:$8 sps:$4 sm:$0xff]  }
 0x2c5   : > { %4725 = vmatpush1.bf16.msra.mxu0 %v6832_v7  ;;  %4480 = vmatprep.subr.bf16.mxu1 %v6837_v10  ;;  %v6928_v7 = vld [vmem:[%s7962_s14 + $0xb74] ss:$8 sps:$4 sm:$0xff]   ;;  %v6923_v10 = vld [vmem:[%s7962_s14 + $0x570] ss:$8 sps:$4 sm:$0xff]  }
 0x2c6   : > { %4726 = vmatprep.subr.bf16.mxu0 %v6840_v11  ;;  %v6926_v11 = vld [vmem:[%s7962_s14 + $0xb70] ss:$8 sps:$4 sm:$0xff]  }
 0x2c8   : > { %4481 = vmatpush1.bf16.msra.mxu1 %v6835_v12  ;;  %v6931_v12 = vld [vmem:[%s7962_s14 + $0x584] ss:$8 sps:$4 sm:$0xff]  }
 0x2c9   : > { %4727 = vmatpush1.bf16.msra.mxu0 %v6838_v13  ;;  %4482 = vmatprep.subr.bf16.mxu1 %v6843_v14  ;;  %v6934_v13 = vld [vmem:[%s7962_s14 + $0xb84] ss:$8 sps:$4 sm:$0xff]   ;;  %v6929_v14 = vld [vmem:[%s7962_s14 + $0x580] ss:$8 sps:$4 sm:$0xff]  }
 0x2ca   : > { %4728 = vmatprep.subr.bf16.mxu0 %v6846_v15  ;;  %v6932_v15 = vld [vmem:[%s7962_s14 + $0xb80] ss:$8 sps:$4 sm:$0xff]  }
 0x2cc   : > { %4483 = vmatpush1.bf16.msra.mxu1 %v6841_v16  ;;  %v6937_v16 = vld [vmem:[%s7962_s14 + $0x594] ss:$8 sps:$4 sm:$0xff]  }
 0x2cd   : > { %4729 = vmatpush1.bf16.msra.mxu0 %v6844_v17  ;;  %4484 = vmatprep.subr.bf16.mxu1 %v6849_v18  ;;  %v6940_v17 = vld [vmem:[%s7962_s14 + $0xb94] ss:$8 sps:$4 sm:$0xff]   ;;  %v6935_v18 = vld [vmem:[%s7962_s14 + $0x590] ss:$8 sps:$4 sm:$0xff]  }
 0x2ce   : > { %4730 = vmatprep.subr.bf16.mxu0 %v6852_v19  ;;  %v6938_v19 = vld [vmem:[%s7962_s14 + $0xb90] ss:$8 sps:$4 sm:$0xff]  }
 0x2d0   : > { %4485 = vmatpush1.bf16.msra.mxu1 %v6847_v20  ;;  %v6943_v20 = vld [vmem:[%s7962_s14 + $0x5a4] ss:$8 sps:$4 sm:$0xff]  }
 0x2d1   : > { %4731 = vmatpush1.bf16.msra.mxu0 %v6850_v21  ;;  %4486 = vmatprep.subr.bf16.mxu1 %v6855_v8  ;;  %v6946_v21 = vld [vmem:[%s7962_s14 + $0xba4] ss:$8 sps:$4 sm:$0xff]   ;;  %v6941_v8 = vld [vmem:[%s7962_s14 + $0x5a0] ss:$8 sps:$4 sm:$0xff]  }
 0x2d2   : > { %4732 = vmatprep.subr.bf16.mxu0 %v6858_v22  ;;  %v6944_v22 = vld [vmem:[%s7962_s14 + $0xba0] ss:$8 sps:$4 sm:$0xff]  }
 0x2d4   : > { %4487 = vmatpush1.bf16.msra.mxu1 %v6853_v9  ;;  %v6949_v9 = vld [vmem:[%s7962_s14 + $0x5b4] ss:$8 sps:$4 sm:$0xff]  }
 0x2d5   : > { %4733 = vmatpush1.bf16.msra.mxu0 %v6856_v23  ;;  %4488 = vmatprep.subr.bf16.mxu1 %v6861_v24  ;;  %v6952_v23 = vld [vmem:[%s7962_s14 + $0xbb4] ss:$8 sps:$4 sm:$0xff]   ;;  %v6947_v24 = vld [vmem:[%s7962_s14 + $0x5b0] ss:$8 sps:$4 sm:$0xff]  }
 0x2d6   : > { %4734 = vmatprep.subr.bf16.mxu0 %v6864_v26  ;;  %v6950_v26 = vld [vmem:[%s7962_s14 + $0xbb0] ss:$8 sps:$4 sm:$0xff]  }
 0x2d8   : > { %4489 = vmatpush1.bf16.msra.mxu1 %v6859_v29  ;;  %v6955_v29 = vld [vmem:[%s7962_s14 + $0x5c4] ss:$8 sps:$4 sm:$0xff]  }
 0x2d9   : > { %4735 = vmatpush1.bf16.msra.mxu0 %v6862_v30  ;;  %4490 = vmatprep.subr.bf16.mxu1 %v6867_v32  ;;  %v6958_v30 = vld [vmem:[%s7962_s14 + $0xbc4] ss:$8 sps:$4 sm:$0xff]   ;;  %v6953_v32 = vld [vmem:[%s7962_s14 + $0x5c0] ss:$8 sps:$4 sm:$0xff]  }
 0x2da   : > { %4736 = vmatprep.subr.bf16.mxu0 %v6870_v33  ;;  %v6956_v33 = vld [vmem:[%s7962_s14 + $0xbc0] ss:$8 sps:$4 sm:$0xff]  }
 0x2dc   : > { %4491 = vmatpush1.bf16.msra.mxu1 %v6865_v34  ;;  %v6961_v34 = vld [vmem:[%s7962_s14 + $0x5d4] ss:$8 sps:$4 sm:$0xff]  }
 0x2dd   : > { %4737 = vmatpush1.bf16.msra.mxu0 %v6868_v25  ;;  %4492 = vmatprep.subr.bf16.mxu1 %v6873_v28  ;;  %v6964_v25 = vld [vmem:[%s7962_s14 + $0xbd4] ss:$8 sps:$4 sm:$0xff]   ;;  %v6959_v28 = vld [vmem:[%s7962_s14 + $0x5d0] ss:$8 sps:$4 sm:$0xff]  }
 0x2de   : > { %4738 = vmatprep.subr.bf16.mxu0 %v6876_v35  ;;  %v6962_v35 = vld [vmem:[%s7962_s14 + $0xbd0] ss:$8 sps:$4 sm:$0xff]  }
 0x2e0   : > { %4493 = vmatpush1.bf16.msra.mxu1 %v6871_v36  ;;  %v6967_v36 = vld [vmem:[%s7962_s14 + $0x5e4] ss:$8 sps:$4 sm:$0xff]  }
 0x2e1   : > { %4739 = vmatpush1.bf16.msra.mxu0 %v6874_v37  ;;  %4503 = vmatprep.subr.bf16.mxu1 %v6881_v27  ;;  %v6970_v37 = vld [vmem:[%s7962_s14 + $0xbe4] ss:$8 sps:$4 sm:$0xff]   ;;  %v6965_v27 = vld [vmem:[%s7962_s14 + $0x5e0] ss:$8 sps:$4 sm:$0xff]  }
 0x2e2   : > { %4749 = vmatprep.subr.bf16.mxu0 %v6886_v40  ;;  %v6968_v40 = vld [vmem:[%s7962_s14 + $0xbe0] ss:$8 sps:$4 sm:$0xff]  }
 0x2e3   : > { %4495 = vmatmul.mubr.bf16.vlgmr.msra.gmra.mrb[0].mxu1 %v5630_v31  ;;  %v6973_v31 = vld [vmem:[%s7962_s14 + $0x5f4] ss:$8 sps:$4 sm:$0xff]  }
 0x2e4   : > { %4741 = vmatmul.mubr.bf16.vlgmr.msra.gmra.mrb[0].mxu0 %v5642_v41  ;;  %4504 = vmatpush1.bf16.msra.mxu1 %v6879_v44  ;;  %v6976_v41 = vld [vmem:[%s7962_s14 + $0xbf4] ss:$8 sps:$4 sm:$0xff]   ;;  %v6971_v44 = vld [vmem:[%s7962_s14 + $0x5f0] ss:$8 sps:$4 sm:$0xff]  }
 0x2e5   : > { %4750 = vmatpush1.bf16.msra.mxu0 %v6884_v38  ;;  %4505 = vmatprep.subr.bf16.mxu1 %v6889_v39  ;;  %v6974_v38 = vld [vmem:[%s7962_s14 + $0xbf0] ss:$8 sps:$4 sm:$0xff]   ;;  %v6983_v39 = vld [vmem:[%s7962_s14 + $0xc04] ss:$8 sps:$4 sm:$0xff]  }
 0x2e6   : > { %4751 = vmatprep.subr.bf16.mxu0 %v6892_v45  ;;  %4535 = vmatprep.mubr.bf16.mxu1 %v5633_v46  ;;  %v5632_v45 = vcombine.low %v8365_v42, %v8365_v42  ;;  %v5644_v46 = vcombine.low %v8370_v43, %v8370_v43  ;;  %v6989_v42 = vld [vmem:[%s7962_s14 + $0xc24] ss:$8 sps:$4 sm:$0xff]   ;;  %v6992_v43 = vld [vmem:[%s7962_s14 + $0xc34] ss:$8 sps:$4 sm:$0xff]  }
 0x2e7   : > { %4781 = vmatprep.mubr.bf16.mxu0 %v5645_v47  ;;  %v6981_v47 = vld [vmem:[%s7962_s14 + $0xc00] ss:$8 sps:$4 sm:$0xff]  }
 0x2e8   : > { %4506 = vmatpush1.bf16.msra.mxu1 %v6887_v48  ;;  %v6986_v48 = vld [vmem:[%s7962_s14 + $0xc14] ss:$8 sps:$4 sm:$0xff]  }
 0x2e9   : > { %4752 = vmatpush1.bf16.msra.mxu0 %v6890_v49  ;;  %4507 = vmatprep.subr.bf16.mxu1 %v6895_v50  ;;  %v6984_v49 = vld [vmem:[%s7962_s14 + $0xc10] ss:$8 sps:$4 sm:$0xff]   ;;  %v7090_v50 = vmov 0  }
 0x2ea   : > { %4753 = vmatprep.subr.bf16.mxu0 %v6898_v51  ;;  %v6987_v51 = vld [vmem:[%s7962_s14 + $0xc20] ss:$8 sps:$4 sm:$0xff]  }
 0x2ec   : > { %4508 = vmatpush1.bf16.msra.mxu1 %v6893_v52  ;;  %v6990_v52 = vld [vmem:[%s7962_s14 + $0xc30] ss:$8 sps:$4 sm:$0xff]  }
 0x2ed   : > { %4754 = vmatpush1.bf16.msra.mxu0 %v6896_v53  ;;  %4509 = vmatprep.subr.bf16.mxu1 %v6901_v54  ;;  %v6993_v53 = vld [vmem:[%s8667_s0 + $0x60] ss:$0 sps:$4 sm:$0xff]   ;;  %v2237_v54 = vlaneseq }
 0x2ee   : > { %4755 = vmatprep.subr.bf16.mxu0 %v6904_v55 }
 0x2f0   : > { %4510 = vmatpush1.bf16.msra.mxu1 %v6899_v56 }
 0x2f1   : > { %4756 = vmatpush1.bf16.msra.mxu0 %v6902_v57  ;;  %4511 = vmatprep.subr.bf16.mxu1 %v6907_v58  ;;  %v2238_v58 = vshrl.u32 %v2237_v54, 7  ;;  %v7034_v54 = vld [vmem:[%s8670_s3 + $0x148] sm:$0xff] (!%p6043_p9)  }
 0x2f2   : > { %4757 = vmatprep.subr.bf16.mxu0 %v6910_v59 }
 0x2f4   : > { %4512 = vmatpush1.bf16.msra.mxu1 %v6905_v60  ;;  %v2239_v60 = vsub.s32 0, %v2238_v58 }
 0x2f5   : > { %4758 = vmatpush1.bf16.msra.mxu0 %v6908_v61  ;;  %4513 = vmatprep.subr.bf16.mxu1 %v6913_v62  ;;  %v2235_v61 = vld [vmem:[%s1827_s20] sm:$0x3]  ;;  %v2243_v62 = vsub.s32 1, %v2238_v58  ;;  %v7038_v58 = vld [vmem:[%s8670_s3 + $0x150] sm:$0xff] (!%p6043_p9)  }
 0x2f6   : > { %4759 = vmatprep.subr.bf16.mxu0 %v6916_v63  ;;  %v2240_v63 = vrot.slane %v2235_v61, %v2239_v60  ;;  %v7040_v60 = vld [vmem:[%s8670_s3 + $0x110] sm:$0xff] (!%p6043_p9)  }
 0x2f8   : > { %4514 = vmatpush1.bf16.msra.mxu1 %v6911_v0  ;;  %v2244_v0 = vrot.slane %v2235_v61, %v2243_v62  ;;  %v7041_v61 = vld [vmem:[%s8670_s3 + $0x190] sm:$0xff] (!%p6043_p9)   ;;  %v7042_v62 = vld [vmem:[%s8670_s3 + $0x158] sm:$0xff] (!%p6043_p9)  }
 0x2f9   : > { %4760 = vmatpush1.bf16.msra.mxu0 %v6914_v1  ;;  %4515 = vmatprep.subr.bf16.mxu1 %v6919_v2 }
 0x2fa   : > { %4761 = vmatprep.subr.bf16.mxu0 %v6922_v3 }
 0x2fc   : > { %4516 = vmatpush1.bf16.msra.mxu1 %v6917_v4 }
 0x2fd   : > { %4762 = vmatpush1.bf16.msra.mxu0 %v6920_v5  ;;  %4517 = vmatprep.subr.bf16.mxu1 %v6925_v6 }
 0x2fe   : > { %4763 = vmatprep.subr.bf16.mxu0 %v6928_v7 }
 0x300   : > { %4518 = vmatpush1.bf16.msra.mxu1 %v6923_v10 }
 0x301   : > { %4764 = vmatpush1.bf16.msra.mxu0 %v6926_v11  ;;  %4519 = vmatprep.subr.bf16.mxu1 %v6931_v12 }
 0x302   : > { %4765 = vmatprep.subr.bf16.mxu0 %v6934_v13 }
 0x304   : > { %4520 = vmatpush1.bf16.msra.mxu1 %v6929_v14  ;;  %v6994_v14 = vld [vmem:[%s8670_s3 + $0xc0] sm:$0xff] (!%p6043_p9)  }
 0x305   : > { %4766 = vmatpush1.bf16.msra.mxu0 %v6932_v15  ;;  %4521 = vmatprep.subr.bf16.mxu1 %v6937_v16  ;;  %v6995_v15 = vld [vmem:[%s8670_s3 + $0x40] sm:$0xff] (!%p6043_p9)  }
 0x306   : > { %4767 = vmatprep.subr.bf16.mxu0 %v6940_v17  ;;  %v6996_v16 = vld [vmem:[%s8670_s3 + $0x80] sm:$0xff] (!%p6043_p9)  }
 0x307   : > { %v6997_v17 = vld [vmem:[%s8670_s3] sm:$0xff] (!%p6043_p9)  }
 0x308   : > { %4522 = vmatpush1.bf16.msra.mxu1 %v6935_v18  ;;  %v6998_v18 = vld [vmem:[%s8670_s3 + $0xc8] sm:$0xff] (!%p6043_p9)  }
 0x309   : > { %4768 = vmatpush1.bf16.msra.mxu0 %v6938_v19  ;;  %4523 = vmatprep.subr.bf16.mxu1 %v6943_v20  ;;  %v6999_v19 = vld [vmem:[%s8670_s3 + $0x48] sm:$0xff] (!%p6043_p9)  }
 0x30a   : > { %4769 = vmatprep.subr.bf16.mxu0 %v6946_v21  ;;  %v7000_v20 = vld [vmem:[%s8670_s3 + $0x88] sm:$0xff] (!%p6043_p9)  }
 0x30b   : > { %v7001_v21 = vld [vmem:[%s8670_s3 + $0x8] sm:$0xff] (!%p6043_p9)  }
 0x30c   : > { %4524 = vmatpush1.bf16.msra.mxu1 %v6941_v8  ;;  %v7002_v8 = vld [vmem:[%s8670_s3 + $0xd0] sm:$0xff] (!%p6043_p9)  }
 0x30d   : > { %4770 = vmatpush1.bf16.msra.mxu0 %v6944_v22  ;;  %4525 = vmatprep.subr.bf16.mxu1 %v6949_v9  ;;  %v7003_v22 = vld [vmem:[%s8670_s3 + $0x50] sm:$0xff] (!%p6043_p9)  }
 0x30e   : > { %4771 = vmatprep.subr.bf16.mxu0 %v6952_v23  ;;  %v7004_v9 = vld [vmem:[%s8670_s3 + $0x90] sm:$0xff] (!%p6043_p9)  }
 0x30f   : > { %v7005_v23 = vld [vmem:[%s8670_s3 + $0x10] sm:$0xff] (!%p6043_p9)  }
 0x310   : > { %4526 = vmatpush1.bf16.msra.mxu1 %v6947_v24  ;;  %v7006_v24 = vld [vmem:[%s8670_s3 + $0xd8] sm:$0xff] (!%p6043_p9)  }
 0x311   : > { %4772 = vmatpush1.bf16.msra.mxu0 %v6950_v26  ;;  %4527 = vmatprep.subr.bf16.mxu1 %v6955_v29  ;;  %v7007_v26 = vld [vmem:[%s8670_s3 + $0x58] sm:$0xff] (!%p6043_p9)  }
 0x312   : > { %4773 = vmatprep.subr.bf16.mxu0 %v6958_v30  ;;  %v7008_v29 = vld [vmem:[%s8670_s3 + $0x98] sm:$0xff] (!%p6043_p9)  }
 0x313   : > { %v7009_v30 = vld [vmem:[%s8670_s3 + $0x18] sm:$0xff] (!%p6043_p9)  }
 0x314   : > { %4528 = vmatpush1.bf16.msra.mxu1 %v6953_v32  ;;  %v7010_v32 = vld [vmem:[%s8670_s3 + $0xe0] sm:$0xff] (!%p6043_p9)  }
 0x315   : > { %4774 = vmatpush1.bf16.msra.mxu0 %v6956_v33  ;;  %4529 = vmatprep.subr.bf16.mxu1 %v6961_v34  ;;  %v7011_v33 = vld [vmem:[%s8670_s3 + $0x60] sm:$0xff] (!%p6043_p9)  }
 0x316   : > { %4775 = vmatprep.subr.bf16.mxu0 %v6964_v25  ;;  %v7012_v34 = vld [vmem:[%s8670_s3 + $0xa0] sm:$0xff] (!%p6043_p9)  }
 0x317   : > { %v7013_v25 = vld [vmem:[%s8670_s3 + $0x20] sm:$0xff] (!%p6043_p9)  }
 0x318   : > { %4530 = vmatpush1.bf16.msra.mxu1 %v6959_v28  ;;  %v7014_v28 = vld [vmem:[%s8670_s3 + $0xe8] sm:$0xff] (!%p6043_p9)  }
 0x319   : > { %4776 = vmatpush1.bf16.msra.mxu0 %v6962_v35  ;;  %4531 = vmatprep.subr.bf16.mxu1 %v6967_v36  ;;  %v7015_v35 = vld [vmem:[%s8670_s3 + $0x68] sm:$0xff] (!%p6043_p9)  }
 0x31a   : > { %4777 = vmatprep.subr.bf16.mxu0 %v6970_v37  ;;  %v7016_v36 = vld [vmem:[%s8670_s3 + $0xa8] sm:$0xff] (!%p6043_p9)  }
 0x31b   : > { %v7017_v37 = vld [vmem:[%s8670_s3 + $0x28] sm:$0xff] (!%p6043_p9)  }
 0x31c   : > { %4532 = vmatpush1.bf16.msra.mxu1 %v6965_v27  ;;  %v7018_v27 = vld [vmem:[%s8670_s3 + $0xf0] sm:$0xff] (!%p6043_p9)  }
 0x31d   : > { %4778 = vmatpush1.bf16.msra.mxu0 %v6968_v40  ;;  %4533 = vmatprep.subr.bf16.mxu1 %v6973_v31  ;;  %v7019_v40 = vld [vmem:[%s8670_s3 + $0x70] sm:$0xff] (!%p6043_p9)  }
 0x31e   : > { %4779 = vmatprep.subr.bf16.mxu0 %v6976_v41  ;;  %v7020_v31 = vld [vmem:[%s8670_s3 + $0xb0] sm:$0xff] (!%p6043_p9)  }
 0x31f   : > { %v7021_v41 = vld [vmem:[%s8670_s3 + $0x30] sm:$0xff] (!%p6043_p9)  }
 0x320   : > { %4534 = vmatpush1.bf16.msra.mxu1 %v6971_v44  ;;  %v7022_v44 = vld [vmem:[%s8670_s3 + $0xf8] sm:$0xff] (!%p6043_p9)  }
 0x321   : > { %4780 = vmatpush1.bf16.msra.mxu0 %v6974_v38  ;;  %6240 = vmatprep.subr.bf16.mxu1 (!%p6043_p9), %v6995_v15  ;;  %v7023_v38 = vld [vmem:[%s8670_s3 + $0x78] sm:$0xff] (!%p6043_p9)   ;;  %v7057_v15 = vld [vmem:[%s8670_s3 + $0x1b0] sm:$0xff] (!%p6043_p9)  }
 0x322   : > { %4790 = vmatprep.subr.bf16.mxu0 %v6983_v39  ;;  %v7024_v39 = vld [vmem:[%s8670_s3 + $0xb8] sm:$0xff] (!%p6043_p9)  }
 0x323   : > { %4536 = vmatmul.mubr.bf16.vlgmr.msra.gmra.mrb[0].mxu1 %v5632_v45  ;;  %v7025_v45 = vld [vmem:[%s8670_s3 + $0x38] sm:$0xff] (!%p6043_p9)  }
 0x324   : > { %4782 = vmatmul.mubr.bf16.vlgmr.msra.gmra.mrb[0].mxu0 %v5644_v46  ;;  %6241 = vmatpush3.bf16.msra.mxu1 (!%p6043_p9), %v6997_v17  ;;  %v7059_v17 = vld [vmem:[%s8670_s3 + $0x1f8] sm:$0xff] (!%p6043_p9)  }
 0x325   : > { %4791 = vmatpush1.bf16.msra.mxu0 %v6981_v47  ;;  %4822 = vmatprep.mubr.bf16.mxu0 %v7090_v50 }
 0x326   : > { %4792 = vmatprep.subr.bf16.mxu0 %v6986_v48  ;;  %6242 = vmatprep.subr.bf16.mxu1 (!%p6043_p9), %v6999_v19  ;;  %v7061_v19 = vld [vmem:[%s8670_s3 + $0x1b8] sm:$0xff] (!%p6043_p9)  }
 0x328   : > { %6243 = vmatpush3.bf16.msra.mxu1 (!%p6043_p9), %v7001_v21 }
 0x329   : > { %4793 = vmatpush1.bf16.msra.mxu0 %v6984_v49  ;;  %6244 = vmatprep.subr.bf16.mxu1 (!%p6043_p9), %v7003_v22 }
 0x32a   : > { %4794 = vmatprep.subr.bf16.mxu0 %v6989_v42 }
 0x32c   : > { %6245 = vmatpush3.bf16.msra.mxu1 (!%p6043_p9), %v7005_v23 }
 0x32d   : > { %4795 = vmatpush1.bf16.msra.mxu0 %v6987_v51  ;;  %6246 = vmatprep.subr.bf16.mxu1 (!%p6043_p9), %v7007_v26  ;;  %v7030_v51 = vld [vmem:[%s8670_s3 + $0x140] sm:$0xff] (!%p6043_p9)  }
 0x32e   : > { %4796 = vmatprep.subr.bf16.mxu0 %v6992_v43  ;;  %v7031_v43 = vld [vmem:[%s8670_s3 + $0x1c0] sm:$0xff] (!%p6043_p9)  }
 0x330   : > { %6247 = vmatpush3.bf16.msra.mxu1 (!%p6043_p9), %v7009_v30 }
 0x331   : > { %4797 = vmatpush1.bf16.msra.mxu0 %v6990_v52  ;;  %6248 = vmatprep.subr.bf16.mxu1 (!%p6043_p9), %v7011_v33  ;;  %v7032_v52 = vld [vmem:[%s8670_s3 + $0x100] sm:$0xff] (!%p6043_p9)  }
 0x332   : > { %6218 = vmatprep.subr.bf16.mxu0 (!%p6043_p9), %v6994_v14  ;;  %v7056_v14 = vld [vmem:[%s8670_s3 + $0x130] sm:$0xff] (!%p6043_p9)  }
 0x334   : > { %6039 = vmatmul.mubr.msk.bf16.vlgmr.msra.gmra.mrb[0].mxu0 %vm4294_vm0, %v6993_v53  ;;  %6249 = vmatpush3.bf16.msra.mxu1 (!%p6043_p9), %v7013_v25  ;;  %v7033_v53 = vld [vmem:[%s8670_s3 + $0x180] sm:$0xff] (!%p6043_p9)  }
 0x335   : > { %6219 = vmatpush3.bf16.msra.mxu0 (!%p6043_p9), %v6996_v16  ;;  %6250 = vmatprep.subr.bf16.mxu1 (!%p6043_p9), %v7015_v35  ;;  %v7058_v16 = vld [vmem:[%s8670_s3 + $0x178] sm:$0xff] (!%p6043_p9)  }
 0x336   : > { %6220 = vmatprep.subr.bf16.mxu0 (!%p6043_p9), %v6998_v18  ;;  %v7060_v18 = vld [vmem:[%s8670_s3 + $0x138] sm:$0xff] (!%p6043_p9)  }
 0x338   : > { %6251 = vmatpush3.bf16.msra.mxu1 (!%p6043_p9), %v7017_v37 }
 0x339   : > { %6221 = vmatpush3.bf16.msra.mxu0 (!%p6043_p9), %v7000_v20  ;;  %6252 = vmatprep.subr.bf16.mxu1 (!%p6043_p9), %v7019_v40 }
 0x33a   : > { %6222 = vmatprep.subr.bf16.mxu0 (!%p6043_p9), %v7002_v8 }
 0x33c   : > { %6253 = vmatpush3.bf16.msra.mxu1 (!%p6043_p9), %v7021_v41 }
 0x33d   : > { %6223 = vmatpush3.bf16.msra.mxu0 (!%p6043_p9), %v7004_v9  ;;  %6254 = vmatprep.subr.bf16.mxu1 (!%p6043_p9), %v7023_v38 }
 0x33e   : > { %6224 = vmatprep.subr.bf16.mxu0 (!%p6043_p9), %v7006_v24 }
 0x340   : > { %6255 = vmatpush3.bf16.msra.mxu1 (!%p6043_p9), %v7025_v45 }
 0x341   : > { %6225 = vmatpush3.bf16.msra.mxu0 (!%p6043_p9), %v7008_v29  ;;  %6284 = vmatprep.subr.bf16.mxu1 (!%p6043_p9), %v7031_v43 }
 0x342   : > { %6226 = vmatprep.subr.bf16.mxu0 (!%p6043_p9), %v7010_v32 }
 0x345   : > { %6227 = vmatpush3.bf16.msra.mxu0 (!%p6043_p9), %v7012_v34 }
 0x346   : > { %6228 = vmatprep.subr.bf16.mxu0 (!%p6043_p9), %v7014_v28 }
 0x349   : > { %6229 = vmatpush3.bf16.msra.mxu0 (!%p6043_p9), %v7016_v36 }
 0x34a   : > { %6230 = vmatprep.subr.bf16.mxu0 (!%p6043_p9), %v7018_v27 }
 0x34d   : > { %6231 = vmatpush3.bf16.msra.mxu0 (!%p6043_p9), %v7020_v31 }
 0x34e   : > { %6232 = vmatprep.subr.bf16.mxu0 (!%p6043_p9), %v7022_v44 }
 0x351   : > { %6233 = vmatpush3.bf16.msra.mxu0 (!%p6043_p9), %v7024_v39 }
 0x352   : > { %6262 = vmatprep.subr.bf16.mxu0 (!%p6043_p9), %v7030_v51 }
 0x3f6   : > { %v4537_v55 = vpop.f32.mrb[0].mxu1 }
 0x3f7   : > { %v4539_v56 = vpop.f32.mrb[1].mxu1  ;;  %v6306_v1 = vadd.f32 %v4537_v55, %v2240_v63  ;;  %v7035_v55 = vld [vmem:[%s8670_s3 + $0x1c8] sm:$0xff] (!%p6043_p9)   ;;  %v7043_v63 = vld [vmem:[%s8670_s3 + $0x1d8] sm:$0xff] (!%p6043_p9)  }
 0x3f8   : > { %v4541_v57 = vpop.f32.mrb[2].mxu1  ;;  %v6308_v2 = vadd.f32 %v4539_v56, %v2244_v0  ;;  %v7036_v56 = vld [vmem:[%s8670_s3 + $0x108] sm:$0xff] (!%p6043_p9)   ;;  %v7044_v0 = vld [vmem:[%s8670_s3 + $0x118] sm:$0xff] (!%p6043_p9)  }
 0x3f9   : > { %v4542_v59 = vpop.f32.mrb[3].mxu1  ;;  %v7037_v57 = vld [vmem:[%s8670_s3 + $0x188] sm:$0xff] (!%p6043_p9)  }
 0x3fa   : > { %v7039_v59 = vld [vmem:[%s8670_s3 + $0x1d0] sm:$0xff] (!%p6043_p9)  }
 0x407   : > { %v4824_v3 = vpop.f32.mrb[0].mxu0 }
 0x408   : > { %v6307_v4 = vadd.f32 %v6306_v1, %v4824_v3  ;;  %v4826_v5 = vpop.f32.mrb[1].mxu0  ;;  %v7045_v1 = vld [vmem:[%s8670_s3 + $0x198] sm:$0xff] (!%p6043_p9)   ;;  %v7047_v3 = vld [vmem:[%s8670_s3 + $0x1e0] sm:$0xff] (!%p6043_p9)  }
 0x409   : > { %v6309_v6 = vadd.f32 %v6308_v2, %v4826_v5  ;;  %v4828_v7 = vpop.f32.mrb[2].mxu0  ;;  %4848 = sbr.rel (%p6043_p9) target bundleno = 1304 (0x518), region = 82  ;;  %v7046_v2 = vld [vmem:[%s8670_s3 + $0x160] sm:$0xff] (!%p6043_p9)  }
 0x40a   : > { %v4831_v10 = vmax.f32 %v6307_v4, 0.0  ;;  %v4829_v11 = vpop.f32.mrb[3].mxu0  ;;  %v7048_v4 = vld [vmem:[%s8670_s3 + $0x120] sm:$0xff] (!%p6043_p9)   ;;  %v7051_v7 = vld [vmem:[%s8670_s3 + $0x1e8] sm:$0xff] (!%p6043_p9)  }
 0x40b   : > { %v4832_v12 = vmax.f32 %v6309_v6, 0.0  ;;  %v7049_v5 = vld [vmem:[%s8670_s3 + $0x1a0] sm:$0xff] (!%p6043_p9)   ;;  %v7050_v6 = vld [vmem:[%s8670_s3 + $0x168] sm:$0xff] (!%p6043_p9)  }
 0x40c   : > { %v7053_v11 = vld [vmem:[%s8670_s3 + $0x1a8] sm:$0xff] (!%p6043_p9)  }
 0x40d   : > { %v6216_v13 = vpack.c.bf16 %v4832_v12, %v4831_v10  ;;  %v7052_v10 = vld [vmem:[%s8670_s3 + $0x128] sm:$0xff] (!%p6043_p9)   ;;  %v7054_v12 = vld [vmem:[%s8670_s3 + $0x170] sm:$0xff] (!%p6043_p9)  }
 0x40f   : > { %4844 = vst [vmem:[%s4843_s24] sm:$0xff] %v6216_v13  ;;  %v7055_v13 = vld [vmem:[%s8670_s3 + $0x1f0] sm:$0xff] (!%p6043_p9)  }
 0x416   : > { %v4883_v46 = vld [vmem:[#allocation2 + $0x8] sm:$0xff]  ;;  %v4849_v47 = vld [vmem:[#allocation2] sm:$0xff]  ;;  %v5204_v20 = vld [vmem:[#allocation2 + $0x10] sm:$0xff] }
 0x417   : > { %v6076_v48 = vcombine.low %v4883_v46, %v4883_v46  ;;  %v6077_v49 = vcombine.high %v4883_v46, %v4883_v46  ;;  %v6094_v50 = vcombine.low %v4849_v47, %v4849_v47  ;;  %v6095_v42 = vcombine.high %v4849_v47, %v4849_v47  ;;  %v5383_v22 = vld [vmem:[#allocation2 + $0x18] sm:$0xff] }
 0x418   : > { %v6144_v21 = vcombine.low %v5204_v20, %v5204_v20  ;;  %v6145_v8 = vcombine.high %v5204_v20, %v5204_v20  ;;  %v6194_v9 = vcombine.low %v5383_v22, %v5383_v22  ;;  %v6195_v23 = vcombine.high %v5383_v22, %v5383_v22 }
 0x419   : > { %5052 = vmatprep.mubr.bf16.mxu0 %v6077_v49  ;;  %5195 = vmatprep.mubr.bf16.mxu1 %v6095_v42 }
 0x41a   : > { %5053 = vmatmul.mubr.bf16.vlgmr.msra.gmra.mrb[0].mxu0 %v6076_v48  ;;  %5196 = vmatmul.mubr.bf16.vlgmr.msra.gmra.mrb[0].mxu1 %v6094_v50  ;;  %v6212_v48 = vld [vmem:[%s8671_s4] ss:$0 sm:$0xff] }
 0x41b   : > { %6263 = vmatpush3.bf16.msra.mxu0 %v7032_v52  ;;  %6285 = vmatpush3.bf16.msra.mxu1 %v7033_v53 }
 0x41c   : > { %6264 = vmatprep.subr.bf16.mxu0 %v7034_v54  ;;  %6286 = vmatprep.subr.bf16.mxu1 %v7035_v55 }
 0x41d   : > { %5373 = vmatprep.mubr.bf16.mxu0 %v6145_v8  ;;  %5552 = vmatprep.mubr.bf16.mxu1 %v6195_v23 }
 0x41f   : > { %6265 = vmatpush3.bf16.msra.mxu0 %v7036_v56  ;;  %6287 = vmatpush3.bf16.msra.mxu1 %v7037_v57 }
 0x420   : > { %6266 = vmatprep.subr.bf16.mxu0 %v7038_v58  ;;  %6288 = vmatprep.subr.bf16.mxu1 %v7039_v59 }
 0x423   : > { %6267 = vmatpush3.bf16.msra.mxu0 %v7040_v60  ;;  %6289 = vmatpush3.bf16.msra.mxu1 %v7041_v61 }
 0x424   : > { %6268 = vmatprep.subr.bf16.mxu0 %v7042_v62  ;;  %6290 = vmatprep.subr.bf16.mxu1 %v7043_v63 }
 0x427   : > { %6269 = vmatpush3.bf16.msra.mxu0 %v7044_v0  ;;  %6291 = vmatpush3.bf16.msra.mxu1 %v7045_v1 }
 0x428   : > { %6270 = vmatprep.subr.bf16.mxu0 %v7046_v2  ;;  %6292 = vmatprep.subr.bf16.mxu1 %v7047_v3 }
 0x42b   : > { %6271 = vmatpush3.bf16.msra.mxu0 %v7048_v4  ;;  %6293 = vmatpush3.bf16.msra.mxu1 %v7049_v5 }
 0x42c   : > { %6272 = vmatprep.subr.bf16.mxu0 %v7050_v6  ;;  %6294 = vmatprep.subr.bf16.mxu1 %v7051_v7 }
 0x42f   : > { %6273 = vmatpush3.bf16.msra.mxu0 %v7052_v10  ;;  %6295 = vmatpush3.bf16.msra.mxu1 %v7053_v11 }
 0x430   : > { %6274 = vmatprep.subr.bf16.mxu0 %v7054_v12  ;;  %6296 = vmatprep.subr.bf16.mxu1 %v7055_v13 }
 0x433   : > { %6275 = vmatpush3.bf16.msra.mxu0 %v7056_v14  ;;  %6297 = vmatpush3.bf16.msra.mxu1 %v7057_v15 }
 0x434   : > { %6276 = vmatprep.subr.bf16.mxu0 %v7058_v16  ;;  %6298 = vmatprep.subr.bf16.mxu1 %v7059_v17 }
 0x437   : > { %6277 = vmatpush3.bf16.msra.mxu0 %v7060_v18  ;;  %6299 = vmatpush3.bf16.msra.mxu1 %v7061_v19 }
 0x43a   : > { %5374 = vmatmul.mubr.bf16.vlgmr.msra.gmra.mrb[4].mxu0 %v6144_v21  ;;  %5553 = vmatmul.mubr.bf16.vlgmr.msra.gmra.mrb[4].mxu1 %v6194_v9 }
 0x4ed   : > { %v6234_v24 = vpop.f32.mrb[0].mxu0  ;;  %v6256_v26 = vpop.f32.mrb[0].mxu1 }
 0x4ee   : > { %v6235_v29 = vpop.f32.mrb[1].mxu0  ;;  %v6257_v30 = vpop.f32.mrb[1].mxu1 }
 0x4ef   : > { %v6236_v32 = vadd.f32 %v6235_v29, %v6234_v24  ;;  %v6258_v33 = vadd.f32 %v6257_v30, %v6256_v26  ;;  %v6237_v34 = vpop.f32.mrb[2].mxu0  ;;  %v6259_v25 = vpop.f32.mrb[2].mxu1 }
 0x4f0   : > { %v6238_v28 = vpop.f32.mrb[3].mxu0  ;;  %v6260_v35 = vpop.f32.mrb[3].mxu1 }
 0x4f1   : > { %v5198_v36 = vadd.f32 %v6258_v33, %v6236_v32 }
 0x50d   : > { %v6278_v37 = vpop.f32.mrb[4].mxu0  ;;  %v6300_v27 = vpop.f32.mrb[4].mxu1 }
 0x50e   : > { %v6279_v40 = vpop.f32.mrb[5].mxu0  ;;  %v6301_v31 = vpop.f32.mrb[5].mxu1 }
 0x50f   : > { %v6280_v41 = vadd.f32 %v6279_v40, %v6278_v37  ;;  %v6302_v44 = vadd.f32 %v6301_v31, %v6300_v27  ;;  %v6281_v38 = vpop.f32.mrb[6].mxu0  ;;  %v6303_v39 = vpop.f32.mrb[6].mxu1 }
 0x510   : > { %v6282_v45 = vpop.f32.mrb[7].mxu0  ;;  %v6304_v46 = vpop.f32.mrb[7].mxu1 }
 0x511   : > { %v5381_v47 = vadd.f32 %v6280_v41, %v5198_v36 }
 0x513   : > { %v5560_v49 = vadd.f32 %v6302_v44, %v5381_v47 }
 0x515   : > { %v5568_v50 = vadd.f32 %v6212_v48, %v5560_v49 }
 0x517   : > { %5569 = vst [vmem:[%s8672_s5] sm:$0xff] %v5568_v50 }
 0x518 PF: > { %p12_p10 = scmp.ge.s32.totalorder %s7140_s22, 6   ;;  %s8673_s18 = smov %s7084_s19 }
 0x519   : > { %s8674_s19 = smov %s7149_s25  ;;  %s8675_s20 = smov %s7140_s22 }
 0x51a   :  { %14 = sbr.rel (!%p12_p10) target bundleno = 2 (0x2), region = 123 }

// kernel: mnist_cnn_forward.2
= control target key start
LH: loop header
LB: loop body
LE: loop exit
PB: predicated region body
PF: predicated region fallthrough
CT: control target
= control target key end

     0   :  { %s13130_s18 = smov 0   ;;  %s15509_s0 = inlined_call_operand.vmem [shape: f32[2,4,196,25], index: 0, kind: input, shape index: {}]   ;;  %s15510_s1 = inlined_call_operand.vmem [shape: f32[25,32], index: 1, kind: input, shape index: {}]   ;;  %s15511_s2 = inlined_call_operand.vmem [shape: f32[1,32], index: 2, kind: input, shape index: {}]   ;;  %s15512_s3 = inlined_call_operand.vmem [shape: bf16[25,32,64], index: 3, kind: input, shape index: {}]   ;;  %s15513_s4 = inlined_call_operand.vmem [shape: f32[1,448], index: 4, kind: input, shape index: {}]   ;;  %s15514_s5 = inlined_call_operand.vmem [shape: bf16[2,7,448], index: 5, kind: output, shape index: {}]  }
   0x1 LB: > { %s9682_s19 = sadd.s32 4294967295, %s13093_s18   ;;  %p9686_p0 = scmp.ge.s32.totalorder %s13093_s18, 1  ;;  %s13093_s18 = sphi %s13130_s18, %s15_s18  }
   0x2   : > { %p187_p1 = scmp.lt.s32.totalorder %s13093_s18, 3 }
   0x4   : > { %p188_p2 = pnand %p9686_p0, %p187_p1 }
   0x6   : > { %191 = sbr.rel (%p188_p2) target bundleno = 1921 (0x781), region = 40 }
   0xd   : > { %v226_v0 = vld [vmem:[%s15510_s1] sm:$0xff]  ;;  %v227_v1 = vld [vmem:[%s15510_s1 + $0x8] sm:$0xff]  ;;  %v228_v2 = vld [vmem:[%s15510_s1 + $0x10] sm:$0xff]  ;;  %vm331_vm0 = vcmask 1040384   ;;  %v13095_v3 = vmov 0.0|0.0   ;;  %p215_p3 = scmp.lt.s32.totalorder %s9682_s19, 1 }
   0xe   : > { %12221 = vmatprep.subr.bf16.mxu1 %v13095_v3  ;;  %v13148_v4 = vpack.c.bf16 %v227_v1, %v226_v0  ;;  %v229_v5 = vld [vmem:[%s15510_s1 + $0x18] sm:$0x1]  ;;  %vm13096_vm1 = vmmov 0   ;;  %v13097_v6 = vmov 0.0   ;;  %vm13098_vm2 = vmmov 1   ;;  %s13099_s23 = smov 64  }
   0xf   : > { %10997 = vmatprep.mubr.msk.f32.mxu1 %vm13096_vm1, %v13097_v6  ;;  %v13156_v7 = vpack.c.bf16 %v229_v5, %v228_v2  ;;  %vm13158_vm3 = vmpackc.low %vm331_vm0, %vm13098_vm2  ;;  %s15653_s19 = smov (!%p215_p3, %s9682_s19), 1  ;;  %vm255_vm4 = vcmask 203776   ;;  %vm1530_vm5 = vcmask 261120   ;;  %vm1574_vm6 = vcmask 259072  }
  0x10   : > { %12223 = vmatpush3.bf16.msra.mxu1 %v13148_v4  ;;  %s13021_s28 = smul.u32 800, %s15653_s19  ;;  %1535 = vst.msk [vmem:[#allocation2 + $0x20] sm:$0xff] %vm1530_vm5, %v13097_v6  ;;  %1536 = vst.msk [vmem:[#allocation2 + $0x28] sm:$0xff] %vm1530_vm5, %v13097_v6  ;;  %vm1576_vm7 = vcmask 261126   ;;  %vm1579_vm8 = vcmask 257024   ;;  %vm1581_vm9 = vcmask 261124  }
  0x11   : > { %12224 = vmatprep.subr.bf16.mxu1 %v13095_v3  ;;  %1531 = vst.msk [vmem:[#allocation2] sm:$0xff] %vm1530_vm5, %v13097_v6  ;;  %1532 = vst.msk [vmem:[#allocation2 + $0x8] sm:$0xff] %vm1530_vm5, %v13097_v6  ;;  %vm1584_vm10 = vcmask 254976   ;;  %vm1586_vm11 = vcmask 261122   ;;  %vm9231_vm12 = vcmask 1046528   ;;  %vm9389_vm13 = vcmask 1045504  }
  0x12   : > { %s13172_s6 = scalar_lea.vmem %s15509_s0, %s13021_s28  ;;  %1533 = vst.msk [vmem:[#allocation2 + $0x10] sm:$0xff] %vm1530_vm5, %v13097_v6  ;;  %1534 = vst.msk [vmem:[#allocation2 + $0x18] sm:$0xff] %vm1530_vm5, %v13097_v6  ;;  %vm9507_vm14 = vcmask 523264   ;;  %vm9611_vm15 = vcmask 1043456   ;;  %vm9612_vm0 = vsmask.f32 3328 }
  0x13   : > { %v230_v9 = vld [vmem:[%s13172_s6] sm:$0xff]  ;;  %v231_v10 = vld [vmem:[%s13172_s6 + $0x8] sm:$0xff]  ;;  %v232_v11 = vld [vmem:[%s13172_s6 + $0x10] sm:$0xff]  ;;  %1537 = vst.msk [vmem:[#allocation2 + $0x30] sm:$0xff] %vm1530_vm5, %v13097_v6  ;;  %s10420_s26 = sshll.u32 %s15653_s19, 4 }
  0x14   : > { %12227 = vmatpush3.bf16.msk.msra.mxu1 %vm13158_vm3, %v13156_v7  ;;  %v233_v12 = vld [vmem:[%s13172_s6 + $0x18] sm:$0xff]  ;;  %v234_v13 = vld [vmem:[%s13172_s6 + $0x20] sm:$0xff]  ;;  %v235_v14 = vld [vmem:[%s13172_s6 + $0x28] sm:$0xff]  ;;  %1538 = vst.msk [vmem:[#allocation2 + $0x38] sm:$0xff] %vm1530_vm5, %v13097_v6  ;;  %vm9615_vm2 = vsmask.f32 7424  ;;  %s224_s29 = scalar_lea.vmem %s15514_s5, %s10420_s26 }
  0x15   : > { %12228 = vmatprep.subr.bf16.mxu1 %v13095_v3  ;;  %v236_v15 = vld [vmem:[%s13172_s6 + $0x30] sm:$0xff]  ;;  %v237_v16 = vld [vmem:[%s13172_s6 + $0x38] sm:$0xff]  ;;  %v238_v17 = vld [vmem:[%s13172_s6 + $0x40] sm:$0xff]  ;;  %1539 = vst.msk [vmem:[#allocation2 + $0x40] sm:$0xff] %vm1530_vm5, %v13097_v6 }
  0x16   : > { %v239_v18 = vld [vmem:[%s13172_s6 + $0x48] sm:$0xff]  ;;  %v240_v19 = vld [vmem:[%s13172_s6 + $0x50] sm:$0xff]  ;;  %v241_v20 = vld [vmem:[%s13172_s6 + $0x58] sm:$0xff]  ;;  %1540 = vst.msk [vmem:[#allocation2 + $0x48] sm:$0xff] %vm1530_vm5, %v13097_v6 }
  0x17   : > { %10998 = vmatmul.mubr.msk.f32.vlgmr.msra.gmra.mrb[0].mxu1 %vm255_vm4, %v230_v9  ;;  %v242_v21 = vld [vmem:[%s13172_s6 + $0x60] sm:$0xff]  ;;  %v243_v22 = vld [vmem:[%s13172_s6 + $0x68] sm:$0xff]  ;;  %v244_v23 = vld [vmem:[%s13172_s6 + $0x70] sm:$0xff]  ;;  %1541 = vst.msk [vmem:[#allocation2 + $0x50] sm:$0xff] %vm1530_vm5, %v13097_v6 }
  0x18   : > { %12230 = vmatpush3.bf16.msra.mxu1 %v13148_v4  ;;  %11000 = vmatprep.mubr.msk.f32.mxu1 %vm13096_vm1, %v13097_v6  ;;  %v245_v24 = vld [vmem:[%s13172_s6 + $0x78] sm:$0xff]  ;;  %v246_v25 = vld [vmem:[%s13172_s6 + $0x80] sm:$0xff]  ;;  %v247_v26 = vld [vmem:[%s13172_s6 + $0x88] sm:$0xff]  ;;  %1542 = vst.msk [vmem:[#allocation2 + $0x58] sm:$0xff] %vm1530_vm5, %v13097_v6 }
  0x19   : > { %12231 = vmatprep.subr.bf16.mxu1 %v13095_v3  ;;  %v248_v27 = vld [vmem:[%s13172_s6 + $0x90] sm:$0xff]  ;;  %v249_v28 = vld [vmem:[%s13172_s6 + $0x98] sm:$0xff]  ;;  %v250_v29 = vld [vmem:[%s13172_s6 + $0xa0] sm:$0xff]  ;;  %1543 = vst.msk [vmem:[#allocation2 + $0x60] sm:$0xff] %vm1530_vm5, %v13097_v6 }
  0x1a   : > { %v251_v30 = vld [vmem:[%s13172_s6 + $0xa8] sm:$0xff]  ;;  %v252_v31 = vld [vmem:[%s13172_s6 + $0xb0] sm:$0xff]  ;;  %v253_v32 = vld [vmem:[%s13172_s6 + $0xb8] sm:$0xff]  ;;  %1544 = vst.msk [vmem:[#allocation2 + $0x68] sm:$0xff] %vm1530_vm5, %v13097_v6 }
  0x1b   : > { %11001 = vmatmul.mubr.msk.f32.gmra.mrb[2].mxu1 %vm255_vm4, %v231_v10  ;;  %v254_v33 = vld [vmem:[%s13172_s6 + $0xc0] sm:$0xf]  ;;  %v9716_v34 = vld [vmem:[%s13172_s6 + $0xc8] sm:$0xff]  ;;  %v9717_v35 = vld [vmem:[%s13172_s6 + $0xd0] sm:$0xff]  ;;  %1545 = vst.msk [vmem:[#allocation2 + $0x70] sm:$0xff] %vm1530_vm5, %v13097_v6 }
  0x1c   : > { %11003 = vmatprep.mubr.msk.f32.mxu1 %vm13096_vm1, %v13097_v6  ;;  %12234 = vmatpush3.bf16.msk.msra.mxu1 %vm13158_vm3, %v13156_v7  ;;  %v9718_v36 = vld [vmem:[%s13172_s6 + $0xd8] sm:$0xff]  ;;  %v9719_v37 = vld [vmem:[%s13172_s6 + $0xe0] sm:$0xff]  ;;  %v9720_v38 = vld [vmem:[%s13172_s6 + $0xe8] sm:$0xff]  ;;  %1546 = vst.msk [vmem:[#allocation2 + $0x78] sm:$0xff] %vm1530_vm5, %v13097_v6 }
  0x1d   : > { %12235 = vmatprep.subr.bf16.mxu1 %v13095_v3  ;;  %v9721_v39 = vld [vmem:[%s13172_s6 + $0xf0] sm:$0xff]  ;;  %v9722_v40 = vld [vmem:[%s13172_s6 + $0xf8] sm:$0xff]  ;;  %v9723_v41 = vld [vmem:[%s13172_s6 + $0x100] sm:$0xff]  ;;  %1547 = vst.msk [vmem:[#allocation2 + $0x80] sm:$0xff] %vm1530_vm5, %v13097_v6 }
  0x1e   : > { %v9724_v42 = vld [vmem:[%s13172_s6 + $0x108] sm:$0xff]  ;;  %v9725_v43 = vld [vmem:[%s13172_s6 + $0x110] sm:$0xff]  ;;  %v9726_v44 = vld [vmem:[%s13172_s6 + $0x118] sm:$0xff]  ;;  %1548 = vst.msk [vmem:[#allocation2 + $0x88] sm:$0xff] %vm1530_vm5, %v13097_v6 }
  0x1f   : > { %11004 = vmatmul.mubr.msk.f32.gmra.mrb[4].mxu1 %vm255_vm4, %v232_v11  ;;  %v9727_v45 = vld [vmem:[%s13172_s6 + $0x120] sm:$0xff]  ;;  %v9728_v46 = vld [vmem:[%s13172_s6 + $0x128] sm:$0xff]  ;;  %v9729_v47 = vld [vmem:[%s13172_s6 + $0x130] sm:$0xff]  ;;  %1549 = vst.msk [vmem:[#allocation2 + $0x90] sm:$0xff] %vm1530_vm5, %v13097_v6 }
  0x20   : > { %11006 = vmatprep.mubr.msk.f32.mxu1 %vm13096_vm1, %v13097_v6  ;;  %v9730_v48 = vld [vmem:[%s13172_s6 + $0x138] sm:$0xff]  ;;  %v9731_v49 = vld [vmem:[%s13172_s6 + $0x140] sm:$0xff]  ;;  %v9732_v50 = vld [vmem:[%s13172_s6 + $0x148] sm:$0xff]  ;;  %1550 = vst.msk [vmem:[#allocation2 + $0x98] sm:$0xff] %vm1530_vm5, %v13097_v6 }
  0x21   : > { %v9733_v51 = vld [vmem:[%s13172_s6 + $0x150] sm:$0xff]  ;;  %v9734_v52 = vld [vmem:[%s13172_s6 + $0x158] sm:$0xff]  ;;  %v9735_v53 = vld [vmem:[%s13172_s6 + $0x160] sm:$0xff]  ;;  %1551 = vst.msk [vmem:[#allocation2 + $0xa0] sm:$0xff] %vm1530_vm5, %v13097_v6 }
  0x22   : > { %v9736_v54 = vld [vmem:[%s13172_s6 + $0x168] sm:$0xff]  ;;  %v9737_v55 = vld [vmem:[%s13172_s6 + $0x170] sm:$0xff]  ;;  %v9738_v56 = vld [vmem:[%s13172_s6 + $0x178] sm:$0xff]  ;;  %1552 = vst.msk [vmem:[#allocation2 + $0xa8] sm:$0xff] %vm1530_vm5, %v13097_v6 }
  0x23   : > { %11007 = vmatmul.mubr.msk.f32.gmra.mrb[6].mxu1 %vm255_vm4, %v233_v12  ;;  %v9739_v57 = vld [vmem:[%s13172_s6 + $0x180] sm:$0xff]  ;;  %v9740_v58 = vld [vmem:[%s13172_s6 + $0x188] sm:$0xf]  ;;  %v9767_v59 = vld [vmem:[%s13172_s6 + $0x190] sm:$0xff]  ;;  %1553 = vst.msk [vmem:[#allocation2 + $0xb0] sm:$0xff] %vm1530_vm5, %v13097_v6 }
  0x24   : > { %11009 = vmatprep.mubr.msk.f32.mxu1 %vm13096_vm1, %v13097_v6  ;;  %v9768_v60 = vld [vmem:[%s13172_s6 + $0x198] sm:$0xff]  ;;  %v9769_v61 = vld [vmem:[%s13172_s6 + $0x1a0] sm:$0xff]  ;;  %v9770_v62 = vld [vmem:[%s13172_s6 + $0x1a8] sm:$0xff]  ;;  %1554 = vst.msk [vmem:[#allocation2 + $0xb8] sm:$0xff] %vm1530_vm5, %v13097_v6 }
  0x25   : > { %v9771_v1 = vld [vmem:[%s13172_s6 + $0x1b0] sm:$0xff]  ;;  %v9773_v8 = vld [vmem:[%s13172_s6 + $0x1c0] sm:$0xff]  ;;  %v9774_v11 = vld [vmem:[%s13172_s6 + $0x1c8] sm:$0xff]  ;;  %1555 = vst.msk [vmem:[#allocation2 + $0xc0] sm:$0xff] %vm1530_vm5, %v13097_v6 }
  0x26   : > { %1556 = vst.msk [vmem:[#allocation2 + $0xc8] sm:$0xff] %vm1530_vm5, %v13097_v6  ;;  %1557 = vst.msk [vmem:[#allocation2 + $0xd0] sm:$0xff] %vm1530_vm5, %v13097_v6 }
  0x27   : > { %11010 = vmatmul.mubr.msk.f32.gmra.mrb[8].mxu1 %vm255_vm4, %v234_v13  ;;  %1558 = vst.msk [vmem:[#allocation2 + $0xd8] sm:$0xff] %vm1530_vm5, %v13097_v6  ;;  %1559 = vst.msk [vmem:[#allocation2 + $0xe0] sm:$0xff] %vm1530_vm5, %v13097_v6 }
  0x28   : > { %11012 = vmatprep.mubr.msk.f32.mxu1 %vm13096_vm1, %v13097_v6  ;;  %1560 = vst.msk [vmem:[#allocation2 + $0xe8] sm:$0xff] %vm1530_vm5, %v13097_v6  ;;  %1561 = vst.msk [vmem:[#allocation2 + $0xf0] sm:$0xff] %vm1530_vm5, %v13097_v6 }
  0x29   : > { %1562 = vst.msk [vmem:[#allocation2 + $0xf8] sm:$0xff] %vm1530_vm5, %v13097_v6  ;;  %1563 = vst.msk [vmem:[#allocation2 + $0x100] sm:$0xff] %vm1530_vm5, %v13097_v6 }
  0x2a   : > { %1564 = vst.msk [vmem:[#allocation2 + $0x108] sm:$0xff] %vm1530_vm5, %v13097_v6  ;;  %1565 = vst.msk [vmem:[#allocation2 + $0x110] sm:$0xff] %vm1530_vm5, %v13097_v6 }
  0x2b   : > { %11013 = vmatmul.mubr.msk.f32.gmra.mrb[10].mxu1 %vm255_vm4, %v235_v14  ;;  %v9775_v14 = vld [vmem:[%s13172_s6 + $0x1d0] sm:$0xff]  ;;  %1566 = vst.msk [vmem:[#allocation2 + $0x118] sm:$0xff] %vm1530_vm5, %v13097_v6  ;;  %1567 = vst.msk [vmem:[#allocation2 + $0x120] sm:$0xff] %vm1530_vm5, %v13097_v6 }
  0x2c   : > { %11015 = vmatprep.mubr.msk.f32.mxu1 %vm13096_vm1, %v13097_v6  ;;  %1568 = vst.msk [vmem:[#allocation2 + $0x128] sm:$0xff] %vm1530_vm5, %v13097_v6  ;;  %1569 = vst.msk [vmem:[#allocation2 + $0x130] sm:$0xff] %vm1530_vm5, %v13097_v6 }
  0x2d   : > { %1570 = vst.msk [vmem:[#allocation2 + $0x138] sm:$0xff] %vm1530_vm5, %v13097_v6  ;;  %1571 = vst.msk [vmem:[#allocation2 + $0x140] sm:$0xff] %vm1530_vm5, %v13097_v6 }
  0x2e   : > { %1572 = vst.msk [vmem:[#allocation2 + $0x148] sm:$0xff] %vm1530_vm5, %v13097_v6 }
  0x2f   : > { %11016 = vmatmul.mubr.msk.f32.gmra.mrb[12].mxu1 %vm255_vm4, %v236_v15 }
  0x30   : > { %11018 = vmatprep.mubr.msk.f32.mxu1 %vm13096_vm1, %v13097_v6 }
  0x33   : > { %11019 = vmatmul.mubr.msk.f32.gmra.mrb[14].mxu1 %vm255_vm4, %v237_v16 }
  0x34   : > { %11021 = vmatprep.mubr.msk.f32.mxu1 %vm13096_vm1, %v13097_v6 }
  0x37   : > { %11022 = vmatmul.mubr.msk.f32.gmra.mrb[16].mxu1 %vm255_vm4, %v238_v17  ;;  %v9776_v17 = vld [vmem:[%s13172_s6 + $0x1d8] sm:$0xff] }
  0x38   : > { %11024 = vmatprep.mubr.msk.f32.mxu1 %vm13096_vm1, %v13097_v6 }
  0x3b   : > { %11025 = vmatmul.mubr.msk.f32.gmra.mrb[18].mxu1 %vm255_vm4, %v239_v18 }
  0x3c   : > { %11027 = vmatprep.mubr.msk.f32.mxu1 %vm13096_vm1, %v13097_v6 }
  0x3f   : > { %11028 = vmatmul.mubr.msk.f32.gmra.mrb[20].mxu1 %vm255_vm4, %v240_v19 }
  0x40   : > { %11030 = vmatprep.mubr.msk.f32.mxu1 %vm13096_vm1, %v13097_v6 }
  0x43   : > { %11031 = vmatmul.mubr.msk.f32.gmra.mrb[22].mxu1 %vm255_vm4, %v241_v20  ;;  %v9777_v20 = vld [vmem:[%s13172_s6 + $0x1e0] sm:$0xff] }
  0x44   : > { %11033 = vmatprep.mubr.msk.f32.mxu1 %vm13096_vm1, %v13097_v6 }
  0x47   : > { %11034 = vmatmul.mubr.msk.f32.gmra.mrb[24].mxu1 %vm255_vm4, %v242_v21 }
  0x48   : > { %11036 = vmatprep.mubr.msk.f32.mxu1 %vm13096_vm1, %v13097_v6 }
  0x4b   : > { %11037 = vmatmul.mubr.msk.f32.gmra.mrb[26].mxu1 %vm255_vm4, %v243_v22 }
  0x4c   : > { %11039 = vmatprep.mubr.msk.f32.mxu1 %vm13096_vm1, %v13097_v6 }
  0x4f   : > { %11040 = vmatmul.mubr.msk.f32.gmra.mrb[28].mxu1 %vm255_vm4, %v244_v23  ;;  %v9778_v23 = vld [vmem:[%s13172_s6 + $0x1e8] sm:$0xff] }
  0x50   : > { %11042 = vmatprep.mubr.msk.f32.mxu1 %vm13096_vm1, %v13097_v6 }
  0x53   : > { %11043 = vmatmul.mubr.msk.f32.gmra.mrb[30].mxu1 %vm255_vm4, %v245_v24 }
  0x54   : > { %11045 = vmatprep.mubr.msk.f32.mxu1 %vm13096_vm1, %v13097_v6 }
  0x57   : > { %11046 = vmatmul.mubr.msk.f32.gmra.mrb[32].mxu1 %vm255_vm4, %v246_v25 }
  0x58   : > { %11048 = vmatprep.mubr.msk.f32.mxu1 %vm13096_vm1, %v13097_v6 }
  0x5b   : > { %11049 = vmatmul.mubr.msk.f32.gmra.mrb[34].mxu1 %vm255_vm4, %v247_v26  ;;  %v9779_v26 = vld [vmem:[%s13172_s6 + $0x1f0] sm:$0xff] }
  0x5c   : > { %11051 = vmatprep.mubr.msk.f32.mxu1 %vm13096_vm1, %v13097_v6 }
  0x5f   : > { %11052 = vmatmul.mubr.msk.f32.gmra.mrb[36].mxu1 %vm255_vm4, %v248_v27 }
  0x60   : > { %11054 = vmatprep.mubr.msk.f32.mxu1 %vm13096_vm1, %v13097_v6 }
  0x63   : > { %11055 = vmatmul.mubr.msk.f32.gmra.mrb[38].mxu1 %vm255_vm4, %v249_v28 }
  0x64   : > { %11057 = vmatprep.mubr.msk.f32.mxu1 %vm13096_vm1, %v13097_v6 }
  0x67   : > { %11058 = vmatmul.mubr.msk.f32.gmra.mrb[40].mxu1 %vm255_vm4, %v250_v29  ;;  %v9780_v29 = vld [vmem:[%s13172_s6 + $0x1f8] sm:$0xff] }
  0x68   : > { %11060 = vmatprep.mubr.msk.f32.mxu1 %vm13096_vm1, %v13097_v6 }
  0x6b   : > { %11061 = vmatmul.mubr.msk.f32.gmra.mrb[42].mxu1 %vm255_vm4, %v251_v30 }
  0x6c   : > { %11063 = vmatprep.mubr.msk.f32.mxu1 %vm13096_vm1, %v13097_v6 }
  0x6f   : > { %11064 = vmatmul.mubr.msk.f32.gmra.mrb[44].mxu1 %vm255_vm4, %v252_v31 }
  0x70   : > { %11066 = vmatprep.mubr.msk.f32.mxu1 %vm13096_vm1, %v13097_v6 }
  0x73   : > { %11067 = vmatmul.mubr.msk.f32.gmra.mrb[46].mxu1 %vm255_vm4, %v253_v32  ;;  %v9781_v32 = vld [vmem:[%s13172_s6 + $0x200] sm:$0xff] }
  0x74   : > { %11069 = vmatprep.mubr.msk.f32.mxu1 %vm13096_vm1, %v13097_v6 }
  0x77   : > { %11070 = vmatmul.mubr.msk.f32.gmra.mrb[48].mxu1 %vm255_vm4, %v254_v33 }
  0x78   : > { %11080 = vmatprep.mubr.msk.f32.mxu1 %vm13096_vm1, %v13097_v6 }
  0x7b   : > { %11081 = vmatmul.mubr.msk.f32.vlgmr.msra.gmra.mrb[50].mxu1 %vm255_vm4, %v9716_v34 }
  0x7c   : > { %12237 = vmatpush3.bf16.msra.mxu1 %v13148_v4  ;;  %11083 = vmatprep.mubr.msk.f32.mxu1 %vm13096_vm1, %v13097_v6 }
  0x7d   : > { %12238 = vmatprep.subr.bf16.mxu1 %v13095_v3 }
  0x7f   : > { %11084 = vmatmul.mubr.msk.f32.gmra.mrb[52].mxu1 %vm255_vm4, %v9717_v35  ;;  %v9782_v35 = vld [vmem:[%s13172_s6 + $0x208] sm:$0xff] }
  0x80   : > { %11086 = vmatprep.mubr.msk.f32.mxu1 %vm13096_vm1, %v13097_v6  ;;  %12241 = vmatpush3.bf16.msk.msra.mxu1 %vm13158_vm3, %v13156_v7 }
  0x81   : > { %12242 = vmatprep.subr.bf16.mxu1 %v13095_v3 }
  0x83   : > { %11087 = vmatmul.mubr.msk.f32.gmra.mrb[54].mxu1 %vm255_vm4, %v9718_v36 }
  0x84   : > { %11089 = vmatprep.mubr.msk.f32.mxu1 %vm13096_vm1, %v13097_v6 }
  0x87   : > { %11090 = vmatmul.mubr.msk.f32.gmra.mrb[56].mxu1 %vm255_vm4, %v9719_v37 }
  0x88   : > { %11092 = vmatprep.mubr.msk.f32.mxu1 %vm13096_vm1, %v13097_v6 }
  0x8b   : > { %11093 = vmatmul.mubr.msk.f32.gmra.mrb[58].mxu1 %vm255_vm4, %v9720_v38  ;;  %v9783_v38 = vld [vmem:[%s13172_s6 + $0x210] sm:$0xff] }
  0x8c   : > { %11095 = vmatprep.mubr.msk.f32.mxu1 %vm13096_vm1, %v13097_v6 }
  0x8f   : > { %11096 = vmatmul.mubr.msk.f32.gmra.mrb[60].mxu1 %vm255_vm4, %v9721_v39 }
  0x90   : > { %11098 = vmatprep.mubr.msk.f32.mxu1 %vm13096_vm1, %v13097_v6 }
  0x93   : > { %11099 = vmatmul.mubr.msk.f32.gmra.mrb[62].mxu1 %vm255_vm4, %v9722_v40 }
  0x94   : > { %11101 = vmatprep.mubr.msk.f32.mxu1 %vm13096_vm1, %v13097_v6 }
  0x97   : > { %11102 = vmatmul.mubr.msk.f32.gmra.mrb[64].mxu1 %vm255_vm4, %v9723_v41  ;;  %v9784_v41 = vld [vmem:[%s13172_s6 + $0x218] sm:$0xff] }
  0x98   : > { %11104 = vmatprep.mubr.msk.f32.mxu1 %vm13096_vm1, %v13097_v6 }
  0x9b   : > { %11105 = vmatmul.mubr.msk.f32.gmra.mrb[66].mxu1 %vm255_vm4, %v9724_v42 }
  0x9c   : > { %11107 = vmatprep.mubr.msk.f32.mxu1 %vm13096_vm1, %v13097_v6 }
  0x9f   : > { %11108 = vmatmul.mubr.msk.f32.gmra.mrb[68].mxu1 %vm255_vm4, %v9725_v43 }
  0xa0   : > { %11110 = vmatprep.mubr.msk.f32.mxu1 %vm13096_vm1, %v13097_v6 }
  0xa3   : > { %11111 = vmatmul.mubr.msk.f32.gmra.mrb[70].mxu1 %vm255_vm4, %v9726_v44  ;;  %v9785_v44 = vld [vmem:[%s13172_s6 + $0x220] sm:$0xff] }
  0xa4   : > { %11113 = vmatprep.mubr.msk.f32.mxu1 %vm13096_vm1, %v13097_v6 }
  0xa7   : > { %11114 = vmatmul.mubr.msk.f32.gmra.mrb[72].mxu1 %vm255_vm4, %v9727_v45 }
  0xa8   : > { %11116 = vmatprep.mubr.msk.f32.mxu1 %vm13096_vm1, %v13097_v6 }
  0xab   : > { %11117 = vmatmul.mubr.msk.f32.gmra.mrb[74].mxu1 %vm255_vm4, %v9728_v46 }
  0xac   : > { %11119 = vmatprep.mubr.msk.f32.mxu1 %vm13096_vm1, %v13097_v6 }
  0xaf   : > { %11120 = vmatmul.mubr.msk.f32.gmra.mrb[76].mxu1 %vm255_vm4, %v9729_v47  ;;  %v9786_v47 = vld [vmem:[%s13172_s6 + $0x228] sm:$0xff] }
  0xb0   : > { %11122 = vmatprep.mubr.msk.f32.mxu1 %vm13096_vm1, %v13097_v6 }
  0xb3   : > { %11123 = vmatmul.mubr.msk.f32.gmra.mrb[78].mxu1 %vm255_vm4, %v9730_v48 }
  0xb4   : > { %11125 = vmatprep.mubr.msk.f32.mxu1 %vm13096_vm1, %v13097_v6 }
  0xb7   : > { %11126 = vmatmul.mubr.msk.f32.gmra.mrb[80].mxu1 %vm255_vm4, %v9731_v49 }
  0xb8   : > { %11128 = vmatprep.mubr.msk.f32.mxu1 %vm13096_vm1, %v13097_v6 }
  0xbb   : > { %11129 = vmatmul.mubr.msk.f32.gmra.mrb[82].mxu1 %vm255_vm4, %v9732_v50  ;;  %v9787_v50 = vld [vmem:[%s13172_s6 + $0x230] sm:$0xff] }
  0xbc   : > { %11131 = vmatprep.mubr.msk.f32.mxu1 %vm13096_vm1, %v13097_v6 }
  0xbf   : > { %11132 = vmatmul.mubr.msk.f32.gmra.mrb[84].mxu1 %vm255_vm4, %v9733_v51 }
  0xc0   : > { %11134 = vmatprep.mubr.msk.f32.mxu1 %vm13096_vm1, %v13097_v6 }
  0xc3   : > { %11135 = vmatmul.mubr.msk.f32.gmra.mrb[86].mxu1 %vm255_vm4, %v9734_v52 }
  0xc4   : > { %11137 = vmatprep.mubr.msk.f32.mxu1 %vm13096_vm1, %v13097_v6 }
  0xc7   : > { %11138 = vmatmul.mubr.msk.f32.gmra.mrb[88].mxu1 %vm255_vm4, %v9735_v53  ;;  %v9788_v53 = vld [vmem:[%s13172_s6 + $0x238] sm:$0xff] }
  0xc8   : > { %11140 = vmatprep.mubr.msk.f32.mxu1 %vm13096_vm1, %v13097_v6 }
  0xcb   : > { %11141 = vmatmul.mubr.msk.f32.gmra.mrb[90].mxu1 %vm255_vm4, %v9736_v54 }
  0xcc   : > { %11143 = vmatprep.mubr.msk.f32.mxu1 %vm13096_vm1, %v13097_v6 }
  0xcf   : > { %11144 = vmatmul.mubr.msk.f32.gmra.mrb[92].mxu1 %vm255_vm4, %v9737_v55 }
  0xd0   : > { %11146 = vmatprep.mubr.msk.f32.mxu1 %vm13096_vm1, %v13097_v6 }
  0xd3   : > { %11147 = vmatmul.mubr.msk.f32.gmra.mrb[94].mxu1 %vm255_vm4, %v9738_v56  ;;  %v9789_v56 = vld [vmem:[%s13172_s6 + $0x240] sm:$0xff] }
  0xd4   : > { %11149 = vmatprep.mubr.msk.f32.mxu1 %vm13096_vm1, %v13097_v6 }
  0xd7   : > { %11150 = vmatmul.mubr.msk.f32.gmra.mrb[96].mxu1 %vm255_vm4, %v9739_v57 }
  0xd8   : > { %11152 = vmatprep.mubr.msk.f32.mxu1 %vm13096_vm1, %v13097_v6 }
  0xdb   : > { %11153 = vmatmul.mubr.msk.f32.gmra.mrb[98].mxu1 %vm255_vm4, %v9740_v58 }
  0xdc   : > { %11163 = vmatprep.mubr.msk.f32.mxu1 %vm13096_vm1, %v13097_v6 }
  0xdf   : > { %11164 = vmatmul.mubr.msk.f32.vlgmr.msra.gmra.mrb[100].mxu1 %vm255_vm4, %v9767_v59  ;;  %v9790_v59 = vld [vmem:[%s13172_s6 + $0x248] sm:$0xff] }
  0xe0   : > { %12244 = vmatpush3.bf16.msra.mxu1 %v13148_v4  ;;  %11166 = vmatprep.mubr.msk.f32.mxu1 %vm13096_vm1, %v13097_v6  ;;  %v9772_v4 = vld [vmem:[%s13172_s6 + $0x1b8] sm:$0xff] }
  0xe1   : > { %12245 = vmatprep.subr.bf16.mxu1 %v13095_v3 }
  0xe3   : > { %11167 = vmatmul.mubr.msk.f32.gmra.mrb[102].mxu1 %vm255_vm4, %v9768_v60 }
  0xe4   : > { %11169 = vmatprep.mubr.msk.f32.mxu1 %vm13096_vm1, %v13097_v6  ;;  %12248 = vmatpush3.bf16.msk.msra.mxu1 %vm13158_vm3, %v13156_v7  ;;  %vm15491_vm3 = vmand %vm9611_vm15, %vm9612_vm0 }
  0xe7   : > { %11170 = vmatmul.mubr.msk.f32.gmra.mrb[104].mxu1 %vm255_vm4, %v9769_v61 }
  0xe8   : > { %11172 = vmatprep.mubr.msk.f32.mxu1 %vm13096_vm1, %v13097_v6 }
  0xea   : > { %v13405_v63 = vpop.f32.mrb[0].mxu1 }
  0xeb   : > { %v10999_v0 = vpop.f32.mrb[1].mxu1  ;;  %11173 = vmatmul.mubr.msk.f32.gmra.mrb[106].mxu1 %vm255_vm4, %v9770_v62  ;;  %v9791_v62 = vld [vmem:[%s13172_s6 + $0x250] sm:$0xf] }
  0xec   : > { %11175 = vmatprep.mubr.msk.f32.mxu1 %vm13096_vm1, %v13097_v6 }
  0xee   : > { %v13411_v2 = vpop.f32.mrb[2].mxu1 }
  0xef   : > { %v11002_v3 = vpop.f32.mrb[3].mxu1  ;;  %11176 = vmatmul.mubr.msk.f32.gmra.mrb[108].mxu1 %vm255_vm4, %v9771_v1 }
  0xf0   : > { %11178 = vmatprep.mubr.msk.f32.mxu1 %vm13096_vm1, %v13097_v6  ;;  %v9818_v3 = vld [vmem:[%s13172_s6 + $0x258] sm:$0xff] }
  0xf2   : > { %v13417_v5 = vpop.f32.mrb[4].mxu1 }
  0xf3   : > { %v11005_v7 = vpop.f32.mrb[5].mxu1  ;;  %11179 = vmatmul.mubr.msk.f32.gmra.mrb[110].mxu1 %vm255_vm4, %v9772_v4 }
  0xf4   : > { %11181 = vmatprep.mubr.msk.f32.mxu1 %vm13096_vm1, %v13097_v6 }
  0xf6   : > { %v13423_v9 = vpop.f32.mrb[6].mxu1 }
  0xf7   : > { %v11008_v10 = vpop.f32.mrb[7].mxu1  ;;  %11182 = vmatmul.mubr.msk.f32.gmra.mrb[112].mxu1 %vm255_vm4, %v9773_v8  ;;  %v9819_v8 = vld [vmem:[%s13172_s6 + $0x260] sm:$0xff] }
  0xf8   : > { %11184 = vmatprep.mubr.msk.f32.mxu1 %vm13096_vm1, %v13097_v6 }
  0xfa   : > { %v13429_v12 = vpop.f32.mrb[8].mxu1 }
  0xfb   : > { %v11011_v13 = vpop.f32.mrb[9].mxu1  ;;  %11185 = vmatmul.mubr.msk.f32.gmra.mrb[114].mxu1 %vm255_vm4, %v9774_v11 }
  0xfc   : > { %11187 = vmatprep.mubr.msk.f32.mxu1 %vm13096_vm1, %v13097_v6  ;;  %v9820_v13 = vld [vmem:[%s13172_s6 + $0x268] sm:$0xff] }
  0xfe   : > { %v13435_v15 = vpop.f32.mrb[10].mxu1 }
  0xff   : > { %v11014_v16 = vpop.f32.mrb[11].mxu1  ;;  %11188 = vmatmul.mubr.msk.f32.gmra.mrb[116].mxu1 %vm255_vm4, %v9775_v14 }
 0x100   : > { %11190 = vmatprep.mubr.msk.f32.mxu1 %vm13096_vm1, %v13097_v6 }
 0x102   : > { %v13441_v18 = vpop.f32.mrb[12].mxu1 }
 0x103   : > { %v11017_v19 = vpop.f32.mrb[13].mxu1  ;;  %11191 = vmatmul.mubr.msk.f32.gmra.mrb[118].mxu1 %vm255_vm4, %v9776_v17  ;;  %v9821_v17 = vld [vmem:[%s13172_s6 + $0x270] sm:$0xff] }
 0x104   : > { %11193 = vmatprep.mubr.msk.f32.mxu1 %vm13096_vm1, %v13097_v6 }
 0x106   : > { %v13447_v21 = vpop.f32.mrb[14].mxu1 }
 0x107   : > { %v11020_v22 = vpop.f32.mrb[15].mxu1  ;;  %11194 = vmatmul.mubr.msk.f32.gmra.mrb[120].mxu1 %vm255_vm4, %v9777_v20 }
 0x108   : > { %11196 = vmatprep.mubr.msk.f32.mxu1 %vm13096_vm1, %v13097_v6 }
 0x10a   : > { %v13453_v24 = vpop.f32.mrb[16].mxu1 }
 0x10b   : > { %v11023_v25 = vpop.f32.mrb[17].mxu1  ;;  %11197 = vmatmul.mubr.msk.f32.gmra.mrb[122].mxu1 %vm255_vm4, %v9778_v23  ;;  %v9822_v23 = vld [vmem:[%s13172_s6 + $0x278] sm:$0xff] }
 0x10c   : > { %11199 = vmatprep.mubr.msk.f32.mxu1 %vm13096_vm1, %v13097_v6 }
 0x10e   : > { %v13459_v27 = vpop.f32.mrb[18].mxu1 }
 0x10f   : > { %v11026_v28 = vpop.f32.mrb[19].mxu1  ;;  %11200 = vmatmul.mubr.msk.f32.gmra.mrb[124].mxu1 %vm255_vm4, %v9779_v26 }
 0x110   : > { %11202 = vmatprep.mubr.msk.f32.mxu1 %vm13096_vm1, %v13097_v6 }
 0x112   : > { %v13465_v30 = vpop.f32.mrb[20].mxu1 }
 0x113   : > { %v11029_v31 = vpop.f32.mrb[21].mxu1  ;;  %11203 = vmatmul.mubr.msk.f32.gmra.mrb[126].mxu1 %vm255_vm4, %v9780_v29  ;;  %v9823_v29 = vld [vmem:[%s13172_s6 + $0x280] sm:$0xff] }
 0x114   : > { %11205 = vmatprep.mubr.msk.f32.mxu1 %vm13096_vm1, %v13097_v6 }
 0x116   : > { %v13471_v33 = vpop.f32.mrb[22].mxu1 }
 0x117   : > { %v11032_v34 = vpop.f32.mrb[23].mxu1  ;;  %11206 = vmatmul.mubr.msk.f32.gmra.mrb[128].mxu1 %vm255_vm4, %v9781_v32 }
 0x118   : > { %11208 = vmatprep.mubr.msk.f32.mxu1 %vm13096_vm1, %v13097_v6 }
 0x11a   : > { %v13477_v36 = vpop.f32.mrb[24].mxu1 }
 0x11b   : > { %v11035_v37 = vpop.f32.mrb[25].mxu1  ;;  %11209 = vmatmul.mubr.msk.f32.gmra.mrb[130].mxu1 %vm255_vm4, %v9782_v35  ;;  %v9824_v35 = vld [vmem:[%s13172_s6 + $0x288] sm:$0xff] }
 0x11c   : > { %11211 = vmatprep.mubr.msk.f32.mxu1 %vm13096_vm1, %v13097_v6 }
 0x11e   : > { %v13483_v39 = vpop.f32.mrb[26].mxu1 }
 0x11f   : > { %v11038_v40 = vpop.f32.mrb[27].mxu1  ;;  %11212 = vmatmul.mubr.msk.f32.gmra.mrb[132].mxu1 %vm255_vm4, %v9783_v38 }
 0x120   : > { %11214 = vmatprep.mubr.msk.f32.mxu1 %vm13096_vm1, %v13097_v6 }
 0x122   : > { %v13489_v42 = vpop.f32.mrb[28].mxu1 }
 0x123   : > { %v11041_v43 = vpop.f32.mrb[29].mxu1  ;;  %11215 = vmatmul.mubr.msk.f32.gmra.mrb[134].mxu1 %vm255_vm4, %v9784_v41  ;;  %v9825_v41 = vld [vmem:[%s13172_s6 + $0x290] sm:$0xff] }
 0x124   : > { %11217 = vmatprep.mubr.msk.f32.mxu1 %vm13096_vm1, %v13097_v6 }
 0x126   : > { %v13495_v45 = vpop.f32.mrb[30].mxu1 }
 0x127   : > { %v11044_v46 = vpop.f32.mrb[31].mxu1  ;;  %11218 = vmatmul.mubr.msk.f32.gmra.mrb[136].mxu1 %vm255_vm4, %v9785_v44 }
 0x128   : > { %11220 = vmatprep.mubr.msk.f32.mxu1 %vm13096_vm1, %v13097_v6 }
 0x12a   : > { %v13501_v48 = vpop.f32.mrb[32].mxu1 }
 0x12b   : > { %v11047_v49 = vpop.f32.mrb[33].mxu1  ;;  %11221 = vmatmul.mubr.msk.f32.gmra.mrb[138].mxu1 %vm255_vm4, %v9786_v47  ;;  %v9826_v47 = vld [vmem:[%s13172_s6 + $0x298] sm:$0xff] }
 0x12c   : > { %11223 = vmatprep.mubr.msk.f32.mxu1 %vm13096_vm1, %v13097_v6 }
 0x12e   : > { %v13507_v51 = vpop.f32.mrb[34].mxu1 }
 0x12f   : > { %v11050_v52 = vpop.f32.mrb[35].mxu1  ;;  %11224 = vmatmul.mubr.msk.f32.gmra.mrb[140].mxu1 %vm255_vm4, %v9787_v50  ;;  %v13038_v50 = vld [vmem:[%s15512_s3 + $0x98] sm:$0xff]  }
 0x130   : > { %11226 = vmatprep.mubr.msk.f32.mxu1 %vm13096_vm1, %v13097_v6 }
 0x132   : > { %v13513_v54 = vpop.f32.mrb[36].mxu1 }
 0x133   : > { %v11053_v55 = vpop.f32.mrb[37].mxu1  ;;  %11227 = vmatmul.mubr.msk.f32.gmra.mrb[142].mxu1 %vm255_vm4, %v9788_v53  ;;  %v9827_v53 = vld [vmem:[%s13172_s6 + $0x2a0] sm:$0xff] }
 0x134   : > { %11229 = vmatprep.mubr.msk.f32.mxu1 %vm13096_vm1, %v13097_v6 }
 0x136   : > { %v13519_v57 = vpop.f32.mrb[38].mxu1 }
 0x137   : > { %v11056_v58 = vpop.f32.mrb[39].mxu1  ;;  %11230 = vmatmul.mubr.msk.f32.gmra.mrb[144].mxu1 %vm255_vm4, %v9789_v56 }
 0x138   : > { %11232 = vmatprep.mubr.msk.f32.mxu1 %vm13096_vm1, %v13097_v6 }
 0x13a   : > { %v13525_v60 = vpop.f32.mrb[40].mxu1 }
 0x13b   : > { %v11059_v61 = vpop.f32.mrb[41].mxu1  ;;  %11233 = vmatmul.mubr.msk.f32.gmra.mrb[146].mxu1 %vm255_vm4, %v9790_v59  ;;  %v9828_v59 = vld [vmem:[%s13172_s6 + $0x2a8] sm:$0xff] }
 0x13c   : > { %11235 = vmatprep.mubr.msk.f32.mxu1 %vm13096_vm1, %v13097_v6 }
 0x13e   : > { %v13531_v0 = vpop.f32.mrb[42].mxu1 }
 0x13f   : > { %v11062_v1 = vpop.f32.mrb[43].mxu1  ;;  %11236 = vmatmul.mubr.msk.f32.gmra.mrb[148].mxu1 %vm255_vm4, %v9791_v62  ;;  %v1669_v62 = vld [vmem:[#allocation2 + $0x19] sm:$0xff] }
 0x140   : > { %11246 = vmatprep.mubr.msk.f32.mxu1 %vm13096_vm1, %v13097_v6 }
 0x142   : > { %v13537_v4 = vpop.f32.mrb[44].mxu1 }
 0x143   : > { %v11065_v7 = vpop.f32.mrb[45].mxu1  ;;  %11247 = vmatmul.mubr.msk.f32.vlgmr.msra.gmra.mrb[150].mxu1 %vm255_vm4, %v9818_v3  ;;  %v9829_v3 = vld [vmem:[%s13172_s6 + $0x2b0] sm:$0xff] }
 0x144   : > { %11249 = vmatprep.mubr.msk.f32.mxu1 %vm13096_vm1, %v13097_v6 }
 0x146   : > { %v13543_v10 = vpop.f32.mrb[46].mxu1 }
 0x147   : > { %v11068_v11 = vpop.f32.mrb[47].mxu1  ;;  %11250 = vmatmul.mubr.msk.f32.gmra.mrb[152].mxu1 %vm255_vm4, %v9819_v8  ;;  %v1668_v8 = vld [vmem:[#allocation2 + $0x11] sm:$0xff] }
 0x148   : > { %11252 = vmatprep.mubr.msk.f32.mxu1 %vm13096_vm1, %v13097_v6  ;;  %v1699_v56 = vpack.c.bf16 %v1669_v62, %v1668_v8 }
 0x14a   : > { %v13549_v14 = vpop.f32.mrb[48].mxu1 }
 0x14b   : > { %v11071_v16 = vpop.f32.mrb[49].mxu1  ;;  %11253 = vmatmul.mubr.msk.f32.gmra.mrb[154].mxu1 %vm255_vm4, %v9820_v13  ;;  %v9830_v13 = vld [vmem:[%s13172_s6 + $0x2b8] sm:$0xff] }
 0x14c   : > { %11255 = vmatprep.mubr.msk.f32.mxu1 %vm13096_vm1, %v13097_v6 }
 0x14e   : > { %v13555_v19 = vpop.f32.mrb[50].mxu1 }
 0x14f   : > { %v816_v20 = vmax.f32 %v13405_v63, %v13555_v19  ;;  %v11082_v22 = vpop.f32.mrb[51].mxu1  ;;  %11256 = vmatmul.mubr.msk.f32.gmra.mrb[156].mxu1 %vm255_vm4, %v9821_v17 }
 0x150   : > { %11258 = vmatprep.mubr.msk.f32.mxu1 %vm13096_vm1, %v13097_v6 }
 0x152   : > { %v13563_v25 = vpop.f32.mrb[52].mxu1 }
 0x153   : > { %v817_v26 = vmax.f32 %v13411_v2, %v13563_v25  ;;  %v11085_v28 = vpop.f32.mrb[53].mxu1  ;;  %11259 = vmatmul.mubr.msk.f32.gmra.mrb[158].mxu1 %vm255_vm4, %v9822_v23  ;;  %v9831_v23 = vld [vmem:[%s13172_s6 + $0x2c0] sm:$0xff] }
 0x154   : > { %11261 = vmatprep.mubr.msk.f32.mxu1 %vm13096_vm1, %v13097_v6  ;;  %v13862_v2 = vld [vmem:[%s15512_s3 + $0xa0] sm:$0xff]  }
 0x156   : > { %v13571_v31 = vpop.f32.mrb[54].mxu1 }
 0x157   : > { %v818_v32 = vmax.f32 %v13417_v5, %v13571_v31  ;;  %v11088_v34 = vpop.f32.mrb[55].mxu1  ;;  %11262 = vmatmul.mubr.msk.f32.gmra.mrb[160].mxu1 %vm255_vm4, %v9823_v29  ;;  %v13037_v29 = vld [vmem:[%s15512_s3 + $0x90] sm:$0xff]  }
 0x158   : > { %11264 = vmatprep.mubr.msk.f32.mxu1 %vm13096_vm1, %v13097_v6  ;;  %11645 = vmatprep.subr.bf16.mxu0 %v13037_v29 }
 0x159   : > { %11646 = vmatpush3.bf16.msra.mxu0 %v13037_v29 }
 0x15a   : > { %v13579_v37 = vpop.f32.mrb[56].mxu1  ;;  %11647 = vmatprep.subr.bf16.mxu0 %v13038_v50 }
 0x15b   : > { %v819_v38 = vmax.f32 %v13423_v9, %v13579_v37  ;;  %v11091_v40 = vpop.f32.mrb[57].mxu1  ;;  %11265 = vmatmul.mubr.msk.f32.gmra.mrb[162].mxu1 %vm255_vm4, %v9824_v35  ;;  %v9832_v35 = vld [vmem:[%s13172_s6 + $0x2c8] sm:$0xff] }
 0x15c   : > { %11267 = vmatprep.mubr.msk.f32.mxu1 %vm13096_vm1, %v13097_v6 }
 0x15d   : > { %11648 = vmatpush3.bf16.msra.mxu0 %v13038_v50 }
 0x15e   : > { %v13587_v43 = vpop.f32.mrb[58].mxu1  ;;  %11681 = vmatprep.subr.bf16.mxu0 %v13862_v2 }
 0x15f   : > { %v11094_v46 = vpop.f32.mrb[59].mxu1  ;;  %11268 = vmatmul.mubr.msk.f32.gmra.mrb[164].mxu1 %vm255_vm4, %v9825_v41  ;;  %v13036_v41 = vld [vmem:[%s15512_s3 + $0x18] sm:$0xff]   ;;  %v15550_v25 = vmax.f32 %v13429_v12, %v13587_v43 }
 0x160   : > { %11270 = vmatprep.mubr.msk.f32.mxu1 %vm13096_vm1, %v13097_v6 }
 0x162   : > { %v13595_v49 = vpop.f32.mrb[60].mxu1 }
 0x163   : > { %v11097_v52 = vpop.f32.mrb[61].mxu1  ;;  %11271 = vmatmul.mubr.msk.f32.gmra.mrb[166].mxu1 %vm255_vm4, %v9826_v47  ;;  %v9833_v47 = vld [vmem:[%s13172_s6 + $0x2d0] sm:$0xff]  ;;  %v15551_v9 = vmax.f32 %v13435_v15, %v13595_v49 }
 0x164   : > { %11273 = vmatprep.mubr.msk.f32.mxu1 %vm13096_vm1, %v13097_v6 }
 0x166   : > { %v13603_v55 = vpop.f32.mrb[62].mxu1 }
 0x167   : > { %v11100_v58 = vpop.f32.mrb[63].mxu1  ;;  %11274 = vmatmul.mubr.msk.f32.gmra.mrb[168].mxu1 %vm255_vm4, %v9827_v53 }
 0x168   : > { %11276 = vmatprep.mubr.msk.f32.mxu1 %vm13096_vm1, %v13097_v6 }
 0x16a   : > { %v13611_v61 = vpop.f32.mrb[64].mxu1 }
 0x16b   : > { %v11103_v1 = vpop.f32.mrb[65].mxu1  ;;  %11277 = vmatmul.mubr.msk.f32.gmra.mrb[170].mxu1 %vm255_vm4, %v9828_v59  ;;  %v9834_v59 = vld [vmem:[%s13172_s6 + $0x2d8] sm:$0xff]  ;;  %v15553_v43 = vmax.f32 %v13447_v21, %v13611_v61 }
 0x16c   : > { %11279 = vmatprep.mubr.msk.f32.mxu1 %vm13096_vm1, %v13097_v6 }
 0x16e   : > { %v13619_v7 = vpop.f32.mrb[66].mxu1 }
 0x16f   : > { %v11106_v11 = vpop.f32.mrb[67].mxu1  ;;  %11280 = vmatmul.mubr.msk.f32.gmra.mrb[172].mxu1 %vm255_vm4, %v9829_v3  ;;  %v15554_v15 = vmax.f32 %v13453_v24, %v13619_v7 }
 0x170   : > { %11282 = vmatprep.mubr.msk.f32.mxu1 %vm13096_vm1, %v13097_v6 }
 0x172   : > { %v13627_v16 = vpop.f32.mrb[68].mxu1 }
 0x173   : > { %v11109_v22 = vpop.f32.mrb[69].mxu1  ;;  %11283 = vmatmul.mubr.msk.f32.gmra.mrb[174].mxu1 %vm255_vm4, %v9830_v13  ;;  %v9835_v13 = vld [vmem:[%s13172_s6 + $0x2e0] sm:$0xff] }
 0x174   : > { %11285 = vmatprep.mubr.msk.f32.mxu1 %vm13096_vm1, %v13097_v6 }
 0x176   : > { %v13635_v28 = vpop.f32.mrb[70].mxu1 }
 0x177   : > { %v11112_v34 = vpop.f32.mrb[71].mxu1  ;;  %11286 = vmatmul.mubr.msk.f32.gmra.mrb[176].mxu1 %vm255_vm4, %v9831_v23  ;;  %v15556_v21 = vmax.f32 %v13465_v30, %v13635_v28 }
 0x178   : > { %11288 = vmatprep.mubr.msk.f32.mxu1 %vm13096_vm1, %v13097_v6 }
 0x17a   : > { %v13643_v40 = vpop.f32.mrb[72].mxu1 }
 0x17b   : > { %v11115_v46 = vpop.f32.mrb[73].mxu1  ;;  %11289 = vmatmul.mubr.msk.f32.gmra.mrb[178].mxu1 %vm255_vm4, %v9832_v35  ;;  %v9836_v35 = vld [vmem:[%s13172_s6 + $0x2e8] sm:$0xff]  ;;  %v15557_v24 = vmax.f32 %v13471_v33, %v13643_v40 }
 0x17c   : > { %11291 = vmatprep.mubr.msk.f32.mxu1 %vm13096_vm1, %v13097_v6 }
 0x17e   : > { %v13651_v52 = vpop.f32.mrb[74].mxu1 }
 0x17f   : > { %v11118_v58 = vpop.f32.mrb[75].mxu1  ;;  %11292 = vmatmul.mubr.msk.f32.gmra.mrb[180].mxu1 %vm255_vm4, %v9833_v47  ;;  %v9838_v47 = vld [vmem:[%s13172_s6 + $0x2f8] sm:$0xff] }
 0x180   : > { %11294 = vmatprep.mubr.msk.f32.mxu1 %vm13096_vm1, %v13097_v6 }
 0x182   : > { %v13659_v1 = vpop.f32.mrb[76].mxu1 }
 0x183   : > { %v11121_v11 = vpop.f32.mrb[77].mxu1  ;;  %11295 = vmatmul.mubr.msk.f32.gmra.mrb[182].mxu1 %vm255_vm4, %v9834_v59  ;;  %v9837_v59 = vld [vmem:[%s13172_s6 + $0x2f0] sm:$0xff]  ;;  %v15559_v30 = vmax.f32 %v13483_v39, %v13659_v1 }
 0x184   : > { %11297 = vmatprep.mubr.msk.f32.mxu1 %vm13096_vm1, %v13097_v6 }
 0x186   : > { %v13667_v22 = vpop.f32.mrb[78].mxu1 }
 0x187   : > { %v11124_v34 = vpop.f32.mrb[79].mxu1  ;;  %11298 = vmatmul.mubr.msk.f32.gmra.mrb[184].mxu1 %vm255_vm4, %v9835_v13  ;;  %v9839_v13 = vld [vmem:[%s13172_s6 + $0x300] sm:$0xff]  ;;  %v15560_v33 = vmax.f32 %v13489_v42, %v13667_v22 }
 0x188   : > { %11300 = vmatprep.mubr.msk.f32.mxu1 %vm13096_vm1, %v13097_v6 }
 0x18a   : > { %v13675_v46 = vpop.f32.mrb[80].mxu1 }
 0x18b   : > { %v11127_v58 = vpop.f32.mrb[81].mxu1  ;;  %11301 = vmatmul.mubr.msk.f32.gmra.mrb[186].mxu1 %vm255_vm4, %v9836_v35  ;;  %v9840_v35 = vld [vmem:[%s13172_s6 + $0x308] sm:$0xff] }
 0x18c   : > { %11303 = vmatprep.mubr.msk.f32.mxu1 %vm13096_vm1, %v13097_v6 }
 0x18e   : > { %v13683_v11 = vpop.f32.mrb[82].mxu1 }
 0x18f   : > { %v11130_v34 = vpop.f32.mrb[83].mxu1  ;;  %11304 = vmatmul.mubr.msk.f32.gmra.mrb[188].mxu1 %vm255_vm4, %v9837_v59  ;;  %v9841_v59 = vld [vmem:[%s13172_s6 + $0x310] sm:$0xff]  ;;  %v15562_v39 = vmax.f32 %v13501_v48, %v13683_v11 }
 0x190   : > { %11306 = vmatprep.mubr.msk.f32.mxu1 %vm13096_vm1, %v13097_v6 }
 0x192   : > { %v13691_v58 = vpop.f32.mrb[84].mxu1 }
 0x193   : > { %v11133_v23 = vpop.f32.mrb[85].mxu1  ;;  %11307 = vmatmul.mubr.msk.f32.gmra.mrb[190].mxu1 %vm255_vm4, %v9838_v47  ;;  %v9842_v47 = vld [vmem:[%s13172_s6 + $0x318] sm:$0xf]  ;;  %v15563_v42 = vmax.f32 %v13507_v51, %v13691_v58  ;;  %v13043_v51 = vld [vmem:[%s15512_s3 + $0x8] sm:$0xff]  }
 0x194   : > { %11309 = vmatprep.mubr.msk.f32.mxu1 %vm13096_vm1, %v13097_v6 }
 0x196   : > { %v13699_v34 = vpop.f32.mrb[86].mxu1 }
 0x197   : > { %v11136_v3 = vpop.f32.mrb[87].mxu1  ;;  %11310 = vmatmul.mubr.msk.f32.gmra.mrb[192].mxu1 %vm255_vm4, %v9839_v13  ;;  %v1667_v13 = vld [vmem:[#allocation2 + $0x9] sm:$0xff] }
 0x198   : > { %11312 = vmatprep.mubr.msk.f32.mxu1 %vm13096_vm1, %v13097_v6 }
 0x19a   : > { %v13707_v23 = vpop.f32.mrb[88].mxu1 }
 0x19b   : > { %v11139_v53 = vpop.f32.mrb[89].mxu1  ;;  %11313 = vmatmul.mubr.msk.f32.gmra.mrb[194].mxu1 %vm255_vm4, %v9840_v35  ;;  %v15565_v58 = vmax.f32 %v13519_v57, %v13707_v23 }
 0x19c   : > { %11315 = vmatprep.mubr.msk.f32.mxu1 %vm13096_vm1, %v13097_v6  ;;  %v13035_v53 = vld [vmem:[%s15512_s3 + $0x10] sm:$0xff]  }
 0x19d   : > { %11321 = vmatprep.subr.bf16.mxu1 %v13035_v53 }
 0x19e   : > { %v13802_v3 = vpop.f32.mrb[90].mxu1  ;;  %11322 = vmatpush3.bf16.msra.mxu1 %v13035_v53 }
 0x19f   : > { %v11142_v35 = vpop.f32.mrb[91].mxu1  ;;  %11316 = vmatmul.mubr.msk.f32.gmra.mrb[196].mxu1 %vm255_vm4, %v9841_v59  ;;  %11323 = vmatprep.subr.bf16.mxu1 %v13036_v41 }
 0x1a0   : > { %11318 = vmatprep.mubr.msk.f32.mxu1 %vm13096_vm1, %v13097_v6  ;;  %v1666_v6 = vld [vmem:[#allocation2 + $0x1] sm:$0xff]  ;;  %vm9614_vm1 = vcmask 1047556  }
 0x1a1   : > { %v1698_v53 = vpack.c.bf16 %v1667_v13, %v1666_v6  ;;  %v4304_v13 = vld [vmem:[#allocation2 + $0x1e] sm:$0xff] }
 0x1a2   : > { %v13816_v17 = vpop.f32.mrb[92].mxu1  ;;  %11324 = vmatpush3.bf16.msra.mxu1 %v13036_v41  ;;  %v4303_v41 = vld [vmem:[#allocation2 + $0x16] sm:$0xff] }
 0x1a3   : > { %v11145_v59 = vpop.f32.mrb[93].mxu1  ;;  %11319 = vmatmul.mubr.msk.f32.gmra.mrb[198].mxu1 %vm255_vm4, %v9842_v47  ;;  %v4335_v6 = vpack.c.bf16 %v4304_v13, %v4303_v41  ;;  %vm9616_vm4 = vmand %vm9614_vm1, %vm9615_vm2 }
 0x1a4   : > { %11325 = vmatprep.mubr.msk.bf16.mxu1 %vm1530_vm5, %v1698_v53 }
 0x1a5   : > { %11649 = vmatprep.mubr.msk.bf16.mxu0 %vm1530_vm5, %v4335_v6 }
 0x1a6   : > { %v13824_v44 = vpop.f32.mrb[94].mxu1 }
 0x1a7   : > { %v11148_v59 = vpop.f32.mrb[95].mxu1  ;;  %11326 = vmatmul.mubr.msk.bf16.vlgmr.msra.gmra.mrb[200].mxu1 %vm1530_vm5, %v1699_v56  ;;  %v15568_v23 = vmax.f32 %v13537_v4, %v13824_v44  ;;  %v13979_v4 = vld [vmem:[%s15511_s2] ss:$0 sm:$0xff] }
 0x1aa   : > { %v13830_v62 = vpop.f32.mrb[96].mxu1 }
 0x1ab   : > { %v11151_v29 = vpop.f32.mrb[97].mxu1 }
 0x1ae   : > { %v13835_v53 = vpop.f32.mrb[98].mxu1 }
 0x1af   : > { %v11154_v47 = vpop.f32.mrb[99].mxu1 }
 0x1b2   : > { %v1008_v56 = vpop.f32.mrb[100].mxu1 }
 0x1b3   : > { %v13842_v41 = vmax.f32 %v816_v20, %v1008_v56  ;;  %v11165_v50 = vpop.f32.mrb[101].mxu1 }
 0x1b6   : > { %v1013_v13 = vpop.f32.mrb[102].mxu1 }
 0x1b7   : > { %v13847_v6 = vmax.f32 %v817_v26, %v1013_v13  ;;  %v11168_v29 = vpop.f32.mrb[103].mxu1 }
 0x1ba   : > { %v1018_v8 = vpop.f32.mrb[104].mxu1 }
 0x1bb   : > { %v13852_v59 = vmax.f32 %v818_v32, %v1018_v8  ;;  %v11171_v47 = vpop.f32.mrb[105].mxu1 }
 0x1be   : > { %v1023_v35 = vpop.f32.mrb[106].mxu1 }
 0x1bf   : > { %v13857_v63 = vmax.f32 %v819_v38, %v1023_v35  ;;  %v11174_v19 = vpop.f32.mrb[107].mxu1  ;;  %v15552_v35 = vmax.f32 %v13441_v18, %v13603_v55  ;;  %v15555_v18 = vmax.f32 %v13459_v27, %v13627_v16  ;;  %v15558_v27 = vmax.f32 %v13477_v36, %v13651_v52 }
 0x1c0   : > { %v15561_v36 = vmax.f32 %v13495_v45, %v13675_v46  ;;  %v13042_v45 = vld [vmem:[%s15512_s3] sm:$0xff]   ;;  %v15564_v46 = vmax.f32 %v13513_v54, %v13699_v34  ;;  %v15566_v54 = vmax.f32 %v13525_v60, %v13802_v3  ;;  %v15569_v60 = vmax.f32 %v13543_v10, %v13830_v62 }
 0x1c1   : > { %11357 = vmatprep.subr.bf16.mxu1 %v13042_v45 }
 0x1c2   : > { %v1028_v20 = vpop.f32.mrb[108].mxu1  ;;  %11358 = vmatpush3.bf16.msra.mxu1 %v13042_v45 }
 0x1c3   : > { %v13867_v5 = vmax.f32 %v15550_v25, %v1028_v20  ;;  %v11177_v26 = vpop.f32.mrb[109].mxu1  ;;  %11359 = vmatprep.subr.bf16.mxu1 %v13043_v51 }
 0x1c6   : > { %v1033_v31 = vpop.f32.mrb[110].mxu1  ;;  %11360 = vmatpush3.bf16.msra.mxu1 %v13043_v51 }
 0x1c7   : > { %v13873_v32 = vmax.f32 %v15551_v9, %v1033_v31  ;;  %v11180_v37 = vpop.f32.mrb[111].mxu1 }
 0x1ca   : > { %v1038_v38 = vpop.f32.mrb[112].mxu1 }
 0x1cb   : > { %v13878_v8 = vmax.f32 %v15552_v35, %v1038_v38  ;;  %v11183_v56 = vpop.f32.mrb[113].mxu1 }
 0x1ce   : > { %v1043_v12 = vpop.f32.mrb[114].mxu1 }
 0x1cf   : > { %v13883_v50 = vmax.f32 %v15553_v43, %v1043_v12  ;;  %v11186_v13 = vpop.f32.mrb[115].mxu1 }
 0x1d2   : > { %v1048_v29 = vpop.f32.mrb[116].mxu1 }
 0x1d3   : > { %v13888_v49 = vmax.f32 %v15554_v15, %v1048_v29  ;;  %v11189_v47 = vpop.f32.mrb[117].mxu1 }
 0x1d6   : > { %v1053_v19 = vpop.f32.mrb[118].mxu1 }
 0x1d7   : > { %v13893_v55 = vmax.f32 %v15555_v18, %v1053_v19  ;;  %v11192_v20 = vpop.f32.mrb[119].mxu1 }
 0x1da   : > { %v1058_v25 = vpop.f32.mrb[120].mxu1 }
 0x1db   : > { %v13898_v61 = vmax.f32 %v15556_v21, %v1058_v25  ;;  %v11195_v26 = vpop.f32.mrb[121].mxu1 }
 0x1de   : > { %v1063_v31 = vpop.f32.mrb[122].mxu1 }
 0x1df   : > { %v13903_v7 = vmax.f32 %v15557_v24, %v1063_v31  ;;  %v11198_v9 = vpop.f32.mrb[123].mxu1 }
 0x1e2   : > { %v1068_v37 = vpop.f32.mrb[124].mxu1 }
 0x1e3   : > { %v13908_v16 = vmax.f32 %v15558_v27, %v1068_v37  ;;  %v11201_v38 = vpop.f32.mrb[125].mxu1  ;;  %v15567_v37 = vmax.f32 %v13531_v0, %v13816_v17  ;;  %v15570_v0 = vmax.f32 %v13549_v14, %v13835_v53 }
 0x1e6   : > { %v1073_v35 = vpop.f32.mrb[126].mxu1 }
 0x1e7   : > { %v13913_v28 = vmax.f32 %v15559_v30, %v1073_v35  ;;  %v11204_v56 = vpop.f32.mrb[127].mxu1 }
 0x1ea   : > { %v1078_v12 = vpop.f32.mrb[128].mxu1 }
 0x1eb   : > { %v13918_v40 = vmax.f32 %v15560_v33, %v1078_v12  ;;  %v11207_v43 = vpop.f32.mrb[129].mxu1 }
 0x1ee   : > { %v1083_v13 = vpop.f32.mrb[130].mxu1 }
 0x1ef   : > { %v13923_v52 = vmax.f32 %v15561_v36, %v1083_v13  ;;  %v11210_v29 = vpop.f32.mrb[131].mxu1 }
 0x1f2   : > { %v1088_v15 = vpop.f32.mrb[132].mxu1 }
 0x1f3   : > { %v13928_v1 = vmax.f32 %v15562_v39, %v1088_v15  ;;  %v11213_v47 = vpop.f32.mrb[133].mxu1 }
 0x1f6   : > { %v1093_v19 = vpop.f32.mrb[134].mxu1 }
 0x1f7   : > { %v13933_v22 = vmax.f32 %v15563_v42, %v1093_v19  ;;  %v11216_v18 = vpop.f32.mrb[135].mxu1 }
 0x1fa   : > { %v1098_v20 = vpop.f32.mrb[136].mxu1 }
 0x1fb   : > { %v13941_v25 = vmax.f32 %v15564_v46, %v1098_v20  ;;  %v11219_v48 = vpop.f32.mrb[137].mxu1 }
 0x1fe   : > { %v1103_v11 = vpop.f32.mrb[138].mxu1 }
 0x1ff   : > { %v13949_v21 = vmax.f32 %v15565_v58, %v1103_v11  ;;  %v11222_v26 = vpop.f32.mrb[139].mxu1 }
 0x202   : > { %v1108_v31 = vpop.f32.mrb[140].mxu1 }
 0x203   : > { %v13954_v34 = vmax.f32 %v15566_v54, %v1108_v31  ;;  %v11225_v24 = vpop.f32.mrb[141].mxu1 }
 0x206   : > { %v1113_v9 = vpop.f32.mrb[142].mxu1 }
 0x207   : > { %v13959_v27 = vmax.f32 %v15567_v37, %v1113_v9  ;;  %v11228_v38 = vpop.f32.mrb[143].mxu1  ;;  %v13040_v37 = vld [vmem:[%s15512_s3 + $0xa8] sm:$0xff]  }
 0x20a   : > { %v1118_v57 = vpop.f32.mrb[144].mxu1 }
 0x20b   : > { %v13964_v35 = vmax.f32 %v15568_v23, %v1118_v57  ;;  %v11231_v30 = vpop.f32.mrb[145].mxu1 }
 0x20e   : > { %v1123_v56 = vpop.f32.mrb[146].mxu1 }
 0x20f   : > { %v13969_v3 = vmax.f32 %v15569_v60, %v1123_v56  ;;  %v11234_v12 = vpop.f32.mrb[147].mxu1 }
 0x212   : > { %v1128_v33 = vpop.f32.mrb[148].mxu1 }
 0x213   : > { %v13974_v17 = vmax.f32 %v15570_v0, %v1128_v33  ;;  %v11237_v43 = vpop.f32.mrb[149].mxu1 }
 0x216   : > { %v1324_v13 = vpop.f32.mrb[150].mxu1 }
 0x217   : > { %v1448_v44 = vmax.f32 %v13842_v41, %v1324_v13  ;;  %v11248_v36 = vpop.f32.mrb[151].mxu1 }
 0x219   : > { %v1480_v10 = vadd.f32 %v13979_v4, %v1448_v44 }
 0x21a   : > { %v1329_v62 = vpop.f32.mrb[152].mxu1 }
 0x21b   : > { %v1505_v29 = vmax.f32 %v1480_v10, 0.0  ;;  %v1449_v15 = vmax.f32 %v13847_v6, %v1329_v62  ;;  %v11251_v39 = vpop.f32.mrb[153].mxu1 }
 0x21d   : > { %1573 = vst.msk [vmem:[#allocation2 + $0x26] sm:$0xff] %vm1530_vm5, %v1505_v29  ;;  %v1481_v14 = vadd.f32 %v13979_v4, %v1449_v15 }
 0x21e   : > { %v1334_v53 = vpop.f32.mrb[154].mxu1 }
 0x21f   : > { %v1506_v47 = vmax.f32 %v1481_v14, 0.0  ;;  %v1450_v19 = vmax.f32 %v13852_v59, %v1334_v53  ;;  %v11254_v42 = vpop.f32.mrb[155].mxu1 }
 0x221   : > { %1575 = vst.msk [vmem:[#allocation2 + $0x2e] sm:$0x3f] %vm1574_vm6, %v1506_v47  ;;  %v1482_v41 = vadd.f32 %v13979_v4, %v1450_v19 }
 0x222   : > { %1577 = vst.msk [vmem:[#allocation2 + $0x32] sm:$0xc0] %vm1576_vm7, %v1506_v47  ;;  %v1339_v18 = vpop.f32.mrb[156].mxu1 }
 0x223   : > { %v1507_v6 = vmax.f32 %v1482_v41, 0.0  ;;  %v1451_v20 = vmax.f32 %v13857_v63, %v1339_v18  ;;  %v11257_v45 = vpop.f32.mrb[157].mxu1 }
 0x224   : > { %v1670_v58 = vld [vmem:[#allocation2 + $0x21] sm:$0xff] }
 0x225   : > { %1578 = vst.msk [vmem:[#allocation2 + $0x3a] sm:$0xff] %vm1530_vm5, %v1507_v6  ;;  %v1483_v46 = vadd.f32 %v13979_v4, %v1451_v20  ;;  %v4305_v31 = vld [vmem:[#allocation2 + $0x26] sm:$0xff] }
 0x226   : > { %v1344_v48 = vpop.f32.mrb[158].mxu1 }
 0x227   : > { %v1508_v59 = vmax.f32 %v1483_v46, 0.0  ;;  %v1452_v51 = vmax.f32 %v13867_v5, %v1344_v48  ;;  %v11260_v11 = vpop.f32.mrb[159].mxu1 }
 0x228   : > { %v1671_v26 = vld [vmem:[#allocation2 + $0x29] sm:$0xff] }
 0x229   : > { %v4306_v54 = vld [vmem:[#allocation2 + $0x2e] sm:$0xff]  ;;  %1580 = vst.msk [vmem:[#allocation2 + $0x42] sm:$0xf] %vm1579_vm8, %v1508_v59  ;;  %v1484_v63 = vadd.f32 %v13979_v4, %v1452_v51  ;;  %v1700_v24 = vpack.c.bf16 %v1671_v26, %v1670_v58 }
 0x22a   : > { %1582 = vst.msk [vmem:[#allocation2 + $0x46] sm:$0xf0] %vm1581_vm9, %v1508_v59  ;;  %v13997_v9 = vpack.c.bf16 %v4306_v54, %v4305_v31  ;;  %v14002_v38 = vld [vmem:[#allocation2 + $0x28] sm:$0xff]  ;;  %v14004_v5 = vld [vmem:[#allocation2 + $0x30] sm:$0xff]  ;;  %v1349_v57 = vpop.f32.mrb[160].mxu1 }
 0x22b   : > { %v1509_v30 = vmax.f32 %v1484_v63, 0.0  ;;  %v1453_v56 = vmax.f32 %v13873_v32, %v1349_v57  ;;  %v11263_v60 = vpop.f32.mrb[161].mxu1  ;;  %11329 = vmatprep.mubr.msk.bf16.mxu1 %vm1530_vm5, %v1700_v24  ;;  %v1672_v12 = vld [vmem:[#allocation2 + $0x31] sm:$0xff] }
 0x22c   : > { %11650 = vmatmul.mubr.msk.bf16.vlgmr.msra.gmra.mrb[0].mxu0 %vm1530_vm5, %v13997_v9  ;;  %v1673_v33 = vld [vmem:[#allocation2 + $0x39] sm:$0xff]  ;;  %v14018_v32 = vld [vmem:[%s15512_s3 + $0xb0] sm:$0xff]  }
 0x22d   : > { %11682 = vmatpush3.bf16.msra.mxu0 %v13862_v2  ;;  %1583 = vst.msk [vmem:[#allocation2 + $0x4e] sm:$0xff] %vm1530_vm5, %v1509_v30  ;;  %v1485_v0 = vadd.f32 %v13979_v4, %v1453_v56  ;;  %v1701_v43 = vpack.c.bf16 %v1673_v33, %v1672_v12  ;;  %v4307_v2 = vld [vmem:[#allocation2 + $0x36] sm:$0xff]  ;;  %v14058_v60 = vld [vmem:[%s15512_s3 + $0x20] sm:$0xff]  }
 0x22e   : > { %11683 = vmatprep.subr.bf16.mxu0 %v13040_v37  ;;  %v1354_v13 = vpop.f32.mrb[162].mxu1  ;;  %v14028_v39 = vld [vmem:[#allocation2 + $0x38] sm:$0xff]  ;;  %11393 = vmatprep.subr.bf16.mxu1 %v14058_v60 }
 0x22f   : > { %v1510_v44 = vmax.f32 %v1485_v0, 0.0  ;;  %v1454_v36 = vmax.f32 %v13878_v8, %v1354_v13  ;;  %v11266_v10 = vpop.f32.mrb[163].mxu1  ;;  %11330 = vmatmul.mubr.msk.bf16.gmra.mrb[204].mxu1 %vm1530_vm5, %v1701_v43 }
 0x230   : > { %v4308_v62 = vld [vmem:[#allocation2 + $0x3e] sm:$0xff] }
 0x231   : > { %11684 = vmatpush3.bf16.msra.mxu0 %v13040_v37  ;;  %1585 = vst.msk [vmem:[#allocation2 + $0x56] sm:$0x3] %vm1584_vm10, %v1510_v44  ;;  %v1486_v29 = vadd.f32 %v13979_v4, %v1454_v36  ;;  %v14025_v15 = vpack.c.bf16 %v4308_v62, %v4307_v2  ;;  %v14030_v14 = vld [vmem:[#allocation2 + $0x40] sm:$0xff] }
 0x232   : > { %1587 = vst.msk [vmem:[#allocation2 + $0x5a] sm:$0xfc] %vm1586_vm11, %v1510_v44  ;;  %11717 = vmatprep.subr.bf16.mxu0 %v14018_v32  ;;  %v1359_v8 = vpop.f32.mrb[164].mxu1  ;;  %v1674_v41 = vld [vmem:[#allocation2 + $0x41] sm:$0xff] }
 0x233   : > { %v1511_v47 = vmax.f32 %v1486_v29, 0.0  ;;  %v1455_v19 = vmax.f32 %v13883_v50, %v1359_v8  ;;  %v11269_v42 = vpop.f32.mrb[165].mxu1  ;;  %11653 = vmatprep.mubr.msk.bf16.mxu0 %vm1530_vm5, %v14025_v15  ;;  %v4309_v6 = vld [vmem:[#allocation2 + $0x46] sm:$0xff] }
 0x234   : > { %v1675_v18 = vld [vmem:[#allocation2 + $0x49] sm:$0xff] }
 0x235   : > { %v4310_v20 = vld [vmem:[#allocation2 + $0x4e] sm:$0xff]  ;;  %1588 = vst.msk [vmem:[#allocation2 + $0x62] sm:$0xff] %vm1530_vm5, %v1511_v47  ;;  %v1487_v45 = vadd.f32 %v13979_v4, %v1455_v19  ;;  %v1702_v46 = vpack.c.bf16 %v1675_v18, %v1674_v41 }
 0x236   : > { %v14039_v48 = vpack.c.bf16 %v4310_v20, %v4309_v6  ;;  %v1364_v59 = vpop.f32.mrb[166].mxu1  ;;  %v14047_v63 = vld [vmem:[#allocation2 + $0x48] sm:$0xff] }
 0x237   : > { %v1512_v51 = vmax.f32 %v1487_v45, 0.0  ;;  %v1456_v11 = vmax.f32 %v13888_v49, %v1364_v59  ;;  %v11272_v50 = vpop.f32.mrb[167].mxu1  ;;  %11333 = vmatprep.mubr.msk.bf16.mxu1 %vm1530_vm5, %v1702_v46 }
 0x238   : > { %11654 = vmatmul.mubr.msk.bf16.gmra.mrb[4].mxu0 %vm1530_vm5, %v14039_v48  ;;  %v1676_v58 = vld [vmem:[#allocation2 + $0x51] sm:$0xff] }
 0x239   : > { %v1677_v26 = vld [vmem:[#allocation2 + $0x59] sm:$0xff]  ;;  %1589 = vst.msk [vmem:[#allocation2 + $0x6e] sm:$0xff] %vm1530_vm5, %v1512_v51  ;;  %v1488_v31 = vadd.f32 %v13979_v4, %v1456_v11  ;;  %v14049_v24 = vld [vmem:[#allocation2 + $0x50] sm:$0xff] }
 0x23a   : > { %v1703_v54 = vpack.c.bf16 %v1677_v26, %v1676_v58  ;;  %v1369_v37 = vpop.f32.mrb[168].mxu1  ;;  %v4311_v12 = vld [vmem:[#allocation2 + $0x56] sm:$0xff] }
 0x23b   : > { %v1513_v57 = vmax.f32 %v1488_v31, 0.0  ;;  %v1457_v30 = vmax.f32 %v13893_v55, %v1369_v37  ;;  %v11275_v56 = vpop.f32.mrb[169].mxu1  ;;  %v14065_v13 = vld [vmem:[#allocation2 + $0x58] sm:$0xff] }
 0x23c   : > { %11334 = vmatmul.mubr.msk.bf16.gmra.mrb[208].mxu1 %vm1530_vm5, %v1703_v54  ;;  %v4312_v33 = vld [vmem:[#allocation2 + $0x5e] sm:$0xff]  ;;  %v4313_v47 = vld [vmem:[#allocation2 + $0x66] sm:$0xff] }
 0x23d   : > { %1590 = vst.msk [vmem:[#allocation2 + $0x76] sm:$0x3f] %vm1574_vm6, %v1513_v57  ;;  %v1489_v0 = vadd.f32 %v13979_v4, %v1457_v30  ;;  %v14063_v43 = vpack.c.bf16 %v4312_v33, %v4311_v12  ;;  %v14067_v55 = vld [vmem:[#allocation2 + $0x60] sm:$0xff] }
 0x23e   : > { %1591 = vst.msk [vmem:[#allocation2 + $0x7a] sm:$0xc0] %vm1576_vm7, %v1513_v57  ;;  %v1374_v44 = vpop.f32.mrb[170].mxu1  ;;  %v1678_v29 = vld [vmem:[#allocation2 + $0x61] sm:$0xff] }
 0x23f   : > { %v1514_v10 = vmax.f32 %v1489_v0, 0.0  ;;  %v1458_v2 = vmax.f32 %v13898_v61, %v1374_v44  ;;  %v11278_v62 = vpop.f32.mrb[171].mxu1  ;;  %11657 = vmatprep.mubr.msk.bf16.mxu0 %vm1530_vm5, %v14063_v43 }
 0x240   : > { %v1679_v8 = vld [vmem:[#allocation2 + $0x69] sm:$0xff] }
 0x241   : > { %v4314_v19 = vld [vmem:[#allocation2 + $0x6e] sm:$0xff]  ;;  %1592 = vst.msk [vmem:[#allocation2 + $0x82] sm:$0xff] %vm1530_vm5, %v1514_v10  ;;  %v1490_v42 = vadd.f32 %v13979_v4, %v1458_v2  ;;  %v1704_v41 = vpack.c.bf16 %v1679_v8, %v1678_v29 }
 0x242   : > { %v14077_v18 = vpack.c.bf16 %v4314_v19, %v4313_v47  ;;  %v1379_v6 = vpop.f32.mrb[172].mxu1  ;;  %v14086_v50 = vld [vmem:[#allocation2 + $0x68] sm:$0xff] }
 0x243   : > { %v1515_v20 = vmax.f32 %v1490_v42, 0.0  ;;  %v1459_v45 = vmax.f32 %v13903_v7, %v1379_v6  ;;  %v11281_v61 = vpop.f32.mrb[173].mxu1  ;;  %11337 = vmatprep.mubr.msk.bf16.mxu1 %vm1530_vm5, %v1704_v41 }
 0x244   : > { %11658 = vmatmul.mubr.msk.bf16.gmra.mrb[8].mxu0 %vm1530_vm5, %v14077_v18  ;;  %v1680_v46 = vld [vmem:[#allocation2 + $0x71] sm:$0xff] }
 0x245   : > { %v1681_v59 = vld [vmem:[#allocation2 + $0x79] sm:$0xff]  ;;  %1593 = vst.msk [vmem:[#allocation2 + $0x8a] sm:$0xf] %vm1579_vm8, %v1515_v20  ;;  %v1491_v51 = vadd.f32 %v13979_v4, %v1459_v45  ;;  %v14088_v58 = vld [vmem:[#allocation2 + $0x70] sm:$0xff] }
 0x246   : > { %1594 = vst.msk [vmem:[#allocation2 + $0x8e] sm:$0xf0] %vm1581_vm9, %v1515_v20  ;;  %v1705_v11 = vpack.c.bf16 %v1681_v59, %v1680_v46  ;;  %v1384_v7 = vpop.f32.mrb[174].mxu1  ;;  %v4315_v57 = vld [vmem:[#allocation2 + $0x76] sm:$0xff] }
 0x247   : > { %v1516_v31 = vmax.f32 %v1491_v51, 0.0  ;;  %v1460_v54 = vmax.f32 %v13908_v16, %v1384_v7  ;;  %v11284_v37 = vpop.f32.mrb[175].mxu1  ;;  %v14098_v33 = vld [vmem:[#allocation2 + $0x78] sm:$0xff] }
 0x248   : > { %11338 = vmatmul.mubr.msk.bf16.gmra.mrb[212].mxu1 %vm1530_vm5, %v1705_v11  ;;  %v4316_v30 = vld [vmem:[#allocation2 + $0x7e] sm:$0xff] }
 0x249   : > { %1595 = vst.msk [vmem:[#allocation2 + $0x96] sm:$0xff] %vm1530_vm5, %v1516_v31  ;;  %v1492_v56 = vadd.f32 %v13979_v4, %v1460_v54  ;;  %v14096_v12 = vpack.c.bf16 %v4316_v30, %v4315_v57  ;;  %v14100_v0 = vld [vmem:[#allocation2 + $0x80] sm:$0xff] }
 0x24a   : > { %v1389_v44 = vpop.f32.mrb[176].mxu1  ;;  %v1682_v29 = vld [vmem:[#allocation2 + $0x81] sm:$0xff] }
 0x24b   : > { %v1517_v16 = vmax.f32 %v1492_v56, 0.0  ;;  %v1461_v2 = vmax.f32 %v13913_v28, %v1389_v44  ;;  %v11287_v62 = vpop.f32.mrb[177].mxu1  ;;  %11661 = vmatprep.mubr.msk.bf16.mxu0 %vm1530_vm5, %v14096_v12 }
 0x24c   : > { %v1683_v8 = vld [vmem:[#allocation2 + $0x89] sm:$0xff] }
 0x24d   : > { %v4317_v47 = vld [vmem:[#allocation2 + $0x86] sm:$0xff]  ;;  %v4318_v19 = vld [vmem:[#allocation2 + $0x8e] sm:$0xff]  ;;  %1596 = vst.msk [vmem:[#allocation2 + $0x9e] sm:$0x3] %vm1584_vm10, %v1517_v16  ;;  %v1493_v42 = vadd.f32 %v13979_v4, %v1461_v2  ;;  %v1706_v41 = vpack.c.bf16 %v1683_v8, %v1682_v29 }
 0x24e   : > { %1597 = vst.msk [vmem:[#allocation2 + $0xa2] sm:$0xfc] %vm1586_vm11, %v1517_v16  ;;  %v14110_v6 = vpack.c.bf16 %v4318_v19, %v4317_v47  ;;  %v1394_v20 = vpop.f32.mrb[178].mxu1  ;;  %v14118_v59 = vld [vmem:[#allocation2 + $0x88] sm:$0xff] }
 0x24f   : > { %v1518_v45 = vmax.f32 %v1493_v42, 0.0  ;;  %v1462_v28 = vmax.f32 %v13918_v40, %v1394_v20  ;;  %11341 = vmatprep.mubr.msk.bf16.mxu1 %vm1530_vm5, %v1706_v41  ;;  %v11290_v61 = vpop.f32.mrb[179].mxu1  ;;  %v4610_v20 = vld [vmem:[#allocation2 + $0x2c] sm:$0xff] }
 0x250   : > { %11662 = vmatmul.mubr.msk.bf16.gmra.mrb[12].mxu0 %vm1530_vm5, %v14110_v6  ;;  %v14120_v51 = vld [vmem:[#allocation2 + $0x90] sm:$0xff] }
 0x251   : > { %1598 = vst.msk [vmem:[#allocation2 + $0xaa] sm:$0xff] %vm1530_vm5, %v1518_v45  ;;  %v1494_v46 = vadd.f32 %v13979_v4, %v1462_v28  ;;  %v1684_v37 = vld [vmem:[#allocation2 + $0x91] sm:$0xff] }
 0x252   : > { %v1399_v11 = vpop.f32.mrb[180].mxu1  ;;  %v4319_v30 = vld [vmem:[#allocation2 + $0x96] sm:$0xff] }
 0x253   : > { %v1519_v31 = vmax.f32 %v1494_v46, 0.0  ;;  %v1463_v40 = vmax.f32 %v13923_v52, %v1399_v11  ;;  %v11293_v54 = vpop.f32.mrb[181].mxu1 }
 0x254   : > { %v1685_v57 = vld [vmem:[#allocation2 + $0x99] sm:$0xff] }
 0x255   : > { %v4320_v56 = vld [vmem:[#allocation2 + $0x9e] sm:$0xff]  ;;  %1599 = vst.msk [vmem:[#allocation2 + $0xb6] sm:$0xff] %vm1530_vm5, %v1519_v31  ;;  %v1495_v44 = vadd.f32 %v13979_v4, %v1463_v40  ;;  %v1707_v16 = vpack.c.bf16 %v1685_v57, %v1684_v37 }
 0x256   : > { %v14127_v2 = vpack.c.bf16 %v4320_v56, %v4319_v30  ;;  %v14129_v62 = vld [vmem:[#allocation2 + $0x98] sm:$0xff]  ;;  %v14131_v29 = vld [vmem:[#allocation2 + $0xa0] sm:$0xff]  ;;  %v1404_v8 = vpop.f32.mrb[182].mxu1 }
 0x257   : > { %v1520_v47 = vmax.f32 %v1495_v44, 0.0  ;;  %v1464_v19 = vmax.f32 %v13928_v1, %v1404_v8  ;;  %11342 = vmatmul.mubr.msk.bf16.gmra.mrb[216].mxu1 %vm1530_vm5, %v1707_v16  ;;  %v11296_v42 = vpop.f32.mrb[183].mxu1  ;;  %v1686_v41 = vld [vmem:[#allocation2 + $0xa1] sm:$0xff] }
 0x258   : > { %11665 = vmatprep.mubr.msk.bf16.mxu0 %vm1530_vm5, %v14127_v2  ;;  %v1687_v45 = vld [vmem:[#allocation2 + $0xa9] sm:$0xff] }
 0x259   : > { %v4321_v28 = vld [vmem:[#allocation2 + $0xa6] sm:$0xff]  ;;  %v4322_v61 = vld [vmem:[#allocation2 + $0xae] sm:$0xff]  ;;  %1600 = vst.msk [vmem:[#allocation2 + $0xbe] sm:$0x3f] %vm1574_vm6, %v1520_v47  ;;  %v1496_v46 = vadd.f32 %v13979_v4, %v1464_v19  ;;  %v1708_v11 = vpack.c.bf16 %v1687_v45, %v1686_v41  ;;  %v13044_v45 = vld [vmem:[%s15512_s3 + $0xb8] sm:$0xff]  }
 0x25a   : > { %1601 = vst.msk [vmem:[#allocation2 + $0xc2] sm:$0xc0] %vm1576_vm7, %v1520_v47  ;;  %v14142_v31 = vpack.c.bf16 %v4322_v61, %v4321_v28  ;;  %v4609_v1 = vld [vmem:[#allocation2 + $0x24] sm:$0xff]  ;;  %v1409_v40 = vpop.f32.mrb[184].mxu1  ;;  %v4612_v47 = vld [vmem:[#allocation2 + $0x3c] sm:$0xff] }
 0x25b   : > { %v4641_v54 = vpack.c.bf16 %v4610_v20, %v4609_v1  ;;  %v1521_v37 = vmax.f32 %v1496_v46, 0.0  ;;  %v1465_v57 = vmax.f32 %v13933_v22, %v1409_v40  ;;  %11345 = vmatprep.mubr.msk.bf16.mxu1 %vm1530_vm5, %v1708_v11  ;;  %v11299_v30 = vpop.f32.mrb[185].mxu1  ;;  %v14149_v56 = vld [vmem:[#allocation2 + $0xa8] sm:$0xff]  ;;  %v4611_v46 = vld [vmem:[#allocation2 + $0x34] sm:$0xff] }
 0x25c   : > { %11666 = vmatmul.mubr.msk.bf16.gmra.mrb[16].mxu0 %vm1530_vm5, %v14142_v31  ;;  %v14151_v44 = vld [vmem:[#allocation2 + $0xb0] sm:$0xff]  ;;  %v4642_v40 = vpack.c.bf16 %v4612_v47, %v4611_v46  ;;  %v4616_v46 = vld [vmem:[#allocation2 + $0x5c] sm:$0xff] }
 0x25d   : > { %11685 = vmatprep.mubr.msk.bf16.mxu0 %vm1530_vm5, %v4641_v54  ;;  %1602 = vst.msk [vmem:[#allocation2 + $0xca] sm:$0xff] %vm1530_vm5, %v1521_v37  ;;  %v1497_v16 = vadd.f32 %v13979_v4, %v1465_v57  ;;  %v4614_v20 = vld [vmem:[#allocation2 + $0x4c] sm:$0xff]  ;;  %v4613_v54 = vld [vmem:[#allocation2 + $0x44] sm:$0xff] }
 0x25e   : > { %v1414_v22 = vpop.f32.mrb[186].mxu1  ;;  %v1688_v28 = vld [vmem:[#allocation2 + $0xb1] sm:$0xff]  ;;  %v4643_v30 = vpack.c.bf16 %v4614_v20, %v4613_v54 }
 0x25f   : > { %v1522_v19 = vmax.f32 %v1497_v16, 0.0  ;;  %v1466_v42 = vmax.f32 %v13941_v25, %v1414_v22  ;;  %v11302_v41 = vpop.f32.mrb[187].mxu1  ;;  %v4615_v54 = vld [vmem:[#allocation2 + $0x54] sm:$0xff] }
 0x260   : > { %v1689_v61 = vld [vmem:[#allocation2 + $0xb9] sm:$0xff] }
 0x261   : > { %1603 = vst.msk [vmem:[#allocation2 + $0xd2] sm:$0xf] %vm1579_vm8, %v1522_v19  ;;  %v1498_v11 = vadd.f32 %v13979_v4, %v1466_v42  ;;  %v1709_v1 = vpack.c.bf16 %v1689_v61, %v1688_v28  ;;  %v14164_v37 = vld [vmem:[#allocation2 + $0xb8] sm:$0xff]  ;;  %v14166_v25 = vld [vmem:[#allocation2 + $0xc0] sm:$0xff] }
 0x262   : > { %1604 = vst.msk [vmem:[#allocation2 + $0xd6] sm:$0xf0] %vm1581_vm9, %v1522_v19  ;;  %v1419_v57 = vpop.f32.mrb[188].mxu1  ;;  %v1690_v47 = vld [vmem:[#allocation2 + $0xc1] sm:$0xff] }
 0x263   : > { %v1523_v22 = vmax.f32 %v1498_v11, 0.0  ;;  %v1467_v41 = vmax.f32 %v13949_v21, %v1419_v57  ;;  %11346 = vmatmul.mubr.msk.bf16.gmra.mrb[220].mxu1 %vm1530_vm5, %v1709_v1  ;;  %v11305_v19 = vpop.f32.mrb[189].mxu1  ;;  %v14180_v21 = vld [vmem:[%s15512_s3 + $0xc0] sm:$0xff]  }
 0x264   : > { %11686 = vmatmul.mubr.msk.bf16.vlgmr.msra.gmra.mrb[0].mxu0 %vm1530_vm5, %v4642_v40  ;;  %v1691_v42 = vld [vmem:[#allocation2 + $0xc9] sm:$0xff] }
 0x265   : > { %11689 = vmatprep.mubr.msk.bf16.mxu0 %vm1530_vm5, %v4643_v30  ;;  %11718 = vmatpush3.bf16.msra.mxu0 %v14018_v32  ;;  %1605 = vst.msk [vmem:[#allocation2 + $0xde] sm:$0xff] %vm1530_vm5, %v1523_v22  ;;  %v1499_v20 = vadd.f32 %v13979_v4, %v1467_v41  ;;  %v1710_v28 = vpack.c.bf16 %v1691_v42, %v1690_v47  ;;  %v4618_v40 = vld [vmem:[#allocation2 + $0x6c] sm:$0xff]  ;;  %v4617_v22 = vld [vmem:[#allocation2 + $0x64] sm:$0xff] }
 0x266   : > { %11719 = vmatprep.subr.bf16.mxu0 %v13044_v45  ;;  %v1424_v61 = vpop.f32.mrb[190].mxu1  ;;  %v4644_v30 = vpack.c.bf16 %v4616_v46, %v4615_v54  ;;  %v14188_v41 = vld [vmem:[#allocation2 + $0xc8] sm:$0xff]  ;;  %v4645_v47 = vpack.c.bf16 %v4618_v40, %v4617_v22  ;;  %v4620_v40 = vld [vmem:[#allocation2 + $0x7c] sm:$0xff] }
 0x267   : > { %v1524_v11 = vmax.f32 %v1499_v20, 0.0  ;;  %v1468_v1 = vmax.f32 %v13954_v34, %v1424_v61  ;;  %11349 = vmatprep.mubr.msk.bf16.mxu1 %vm1530_vm5, %v1710_v28  ;;  %v11308_v32 = vpop.f32.mrb[191].mxu1 }
 0x268   : > { %v14190_v19 = vld [vmem:[#allocation2 + $0xd0] sm:$0xff] }
 0x269   : > { %11720 = vmatpush3.bf16.msra.mxu0 %v13044_v45  ;;  %1606 = vst.msk [vmem:[#allocation2 + $0xe6] sm:$0x3] %vm1584_vm10, %v1524_v11  ;;  %v1500_v57 = vadd.f32 %v13979_v4, %v1468_v1  ;;  %v1692_v61 = vld [vmem:[#allocation2 + $0xd1] sm:$0xff] }
 0x26a   : > { %1607 = vst.msk [vmem:[#allocation2 + $0xea] sm:$0xfc] %vm1586_vm11, %v1524_v11  ;;  %11753 = vmatprep.subr.bf16.mxu0 %v14180_v21  ;;  %v1429_v34 = vpop.f32.mrb[192].mxu1 }
 0x26b   : > { %v1525_v45 = vmax.f32 %v1500_v57, 0.0  ;;  %v1469_v20 = vmax.f32 %v13959_v27, %v1429_v34  ;;  %v11311_v28 = vpop.f32.mrb[193].mxu1  ;;  %v4621_v57 = vld [vmem:[#allocation2 + $0x84] sm:$0xff] }
 0x26c   : > { %11690 = vmatmul.mubr.msk.bf16.gmra.mrb[4].mxu0 %vm1530_vm5, %v4644_v30  ;;  %v1693_v46 = vld [vmem:[#allocation2 + $0xd9] sm:$0xff]  ;;  %v4622_v30 = vld [vmem:[#allocation2 + $0x8c] sm:$0xff] }
 0x26d   : > { %11693 = vmatprep.mubr.msk.bf16.mxu0 %vm1530_vm5, %v4645_v47  ;;  %1608 = vst.msk [vmem:[#allocation2 + $0xf2] sm:$0xff] %vm1530_vm5, %v1525_v45  ;;  %v1501_v11 = vadd.f32 %v13979_v4, %v1469_v20  ;;  %v1711_v1 = vpack.c.bf16 %v1693_v46, %v1692_v61  ;;  %v4619_v47 = vld [vmem:[#allocation2 + $0x74] sm:$0xff] }
 0x26e   : > { %v1434_v32 = vpop.f32.mrb[194].mxu1  ;;  %v4646_v20 = vpack.c.bf16 %v4620_v40, %v4619_v47  ;;  %v14203_v61 = vld [vmem:[#allocation2 + $0xd8] sm:$0xff]  ;;  %v1614_v40 = vld [vmem:[#allocation2] sm:$0xff] }
 0x26f   : > { %v1526_v54 = vmax.f32 %v1501_v11, 0.0  ;;  %v1470_v22 = vmax.f32 %v13964_v35, %v1434_v32  ;;  %11350 = vmatmul.mubr.msk.bf16.gmra.mrb[224].mxu1 %vm1530_vm5, %v1711_v1  ;;  %v11314_v27 = vpop.f32.mrb[195].mxu1  ;;  %v4647_v35 = vpack.c.bf16 %v4622_v30, %v4621_v57  ;;  %v1615_v57 = vld [vmem:[#allocation2 + $0x8] sm:$0xff]  ;;  %v4623_v1 = vld [vmem:[#allocation2 + $0x94] sm:$0xff] }
 0x270   : > { %v1694_v34 = vld [vmem:[#allocation2 + $0xe1] sm:$0xff] }
 0x271   : > { %v1695_v28 = vld [vmem:[#allocation2 + $0xe9] sm:$0xff]  ;;  %1609 = vst.msk [vmem:[#allocation2 + $0xfe] sm:$0xff] %vm1530_vm5, %v1526_v54  ;;  %v1502_v45 = vadd.f32 %v13979_v4, %v1470_v22  ;;  %v14205_v46 = vld [vmem:[#allocation2 + $0xe0] sm:$0xff] }
 0x272   : > { %v1712_v42 = vpack.c.bf16 %v1695_v28, %v1694_v34  ;;  %v1439_v11 = vpop.f32.mrb[196].mxu1  ;;  %v14216_v30 = vld [vmem:[#allocation2 + $0xe8] sm:$0xff]  ;;  %v4624_v28 = vld [vmem:[#allocation2 + $0x9c] sm:$0xff] }
 0x273   : > { %v1527_v32 = vmax.f32 %v1502_v45, 0.0  ;;  %v1471_v27 = vmax.f32 %v13969_v3, %v1439_v11  ;;  %v11317_v54 = vpop.f32.mrb[197].mxu1  ;;  %v4626_v11 = vld [vmem:[#allocation2 + $0xac] sm:$0xff]  ;;  %v4648_v52 = vpack.c.bf16 %v4624_v28, %v4623_v1  ;;  %v1618_v1 = vld [vmem:[#allocation2 + $0x20] sm:$0xff] }
 0x274   : > { %11353 = vmatprep.mubr.msk.bf16.mxu1 %vm1530_vm5, %v1712_v42  ;;  %11694 = vmatmul.mubr.msk.bf16.gmra.mrb[8].mxu0 %vm1530_vm5, %v4646_v20  ;;  %v14218_v34 = vld [vmem:[#allocation2 + $0xf0] sm:$0xff]  ;;  %v4625_v20 = vld [vmem:[#allocation2 + $0xa4] sm:$0xff] }
 0x275   : > { %11697 = vmatprep.mubr.msk.bf16.mxu0 %vm1530_vm5, %v4647_v35  ;;  %1610 = vst.msk [vmem:[#allocation2 + $0x106] sm:$0x3f] %vm1574_vm6, %v1527_v32  ;;  %v1503_v22 = vadd.f32 %v13979_v4, %v1471_v27  ;;  %v1696_v54 = vld [vmem:[#allocation2 + $0xf1] sm:$0xff]  ;;  %v1646_v27 = vpack.c.bf16 %v1615_v57, %v1614_v40  ;;  %v4649_v7 = vpack.c.bf16 %v4626_v11, %v4625_v20  ;;  %v4628_v40 = vld [vmem:[#allocation2 + $0xbc] sm:$0xff]  ;;  %v4629_v28 = vld [vmem:[#allocation2 + $0xc4] sm:$0xff]  ;;  %vm9621_vm6 = vcmask 523268  }
 0x276   : > { %1611 = vst.msk [vmem:[#allocation2 + $0x10a] sm:$0xc0] %vm1576_vm7, %v1527_v32  ;;  %v1444_v3 = vpop.f32.mrb[198].mxu1  ;;  %v4631_v20 = vld [vmem:[#allocation2 + $0xd4] sm:$0xff]  ;;  %v1649_v11 = vpack.c.bf16 %v14028_v39, %v14004_v5  ;;  %v2475_v42 = vld [vmem:[#allocation2 + $0x43] sm:$0xff]  ;;  %vm9622_vm7 = vmand %vm9621_vm6, %vm9615_vm2 }
 0x277   : > { %v1528_v47 = vmax.f32 %v1503_v22, 0.0  ;;  %v1472_v45 = vmax.f32 %v13974_v17, %v1444_v3  ;;  %v11320_v35 = vpop.f32.mrb[199].mxu1  ;;  %v1616_v17 = vld [vmem:[#allocation2 + $0x10] sm:$0xff]  ;;  %v1617_v22 = vld [vmem:[#allocation2 + $0x18] sm:$0xff]  ;;  %v5245_v26 = vld [vmem:[#allocation2 + $0xe6] sm:$0xff] }
 0x278   : > { %v1697_v32 = vld [vmem:[#allocation2 + $0xf9] sm:$0xff]  ;;  %v1647_v57 = vpack.c.bf16 %v1617_v22, %v1616_v17  ;;  %v4630_v3 = vld [vmem:[#allocation2 + $0xcc] sm:$0xff] }
 0x279   : > { %1612 = vst.msk [vmem:[#allocation2 + $0x112] sm:$0xff] %vm1530_vm5, %v1528_v47  ;;  %v1504_v16 = vadd.f32 %v13979_v4, %v1472_v45  ;;  %v1713_v8 = vpack.c.bf16 %v1697_v32, %v1696_v54  ;;  %v4627_v4 = vld [vmem:[#allocation2 + $0xb4] sm:$0xff]  ;;  %v4634_v45 = vld [vmem:[#allocation2 + $0xec] sm:$0xff]  ;;  %v4633_v54 = vld [vmem:[#allocation2 + $0xe4] sm:$0xff]  ;;  %v1650_v32 = vpack.c.bf16 %v14047_v63, %v14030_v14 }
 0x27a   : > { %v4650_v47 = vpack.c.bf16 %v4628_v40, %v4627_v4  ;;  %v4635_v22 = vld [vmem:[#allocation2 + $0xf4] sm:$0xff]  ;;  %v1651_v40 = vpack.c.bf16 %v14065_v13, %v14049_v24  ;;  %v1652_v4 = vpack.c.bf16 %v14086_v50, %v14067_v55 }
 0x27b   : > { %v1529_v10 = vmax.f32 %v1504_v16, 0.0  ;;  %11354 = vmatmul.mubr.msk.bf16.gmra.mrb[228].mxu1 %vm1530_vm5, %v1713_v8  ;;  %v1648_v16 = vpack.c.bf16 %v14002_v38, %v1618_v1  ;;  %v4651_v8 = vpack.c.bf16 %v4630_v3, %v4629_v28 }
 0x27c   : > { %11698 = vmatmul.mubr.msk.bf16.gmra.mrb[12].mxu0 %vm1530_vm5, %v4648_v52  ;;  %11361 = vmatprep.mubr.msk.bf16.mxu1 %vm1530_vm5, %v1646_v27  ;;  %v14242_v52 = vld [vmem:[%s15512_s3 + $0x30] sm:$0xff]   ;;  %v4653_v27 = vpack.c.bf16 %v4634_v45, %v4633_v54  ;;  %v4637_v3 = vld [vmem:[#allocation2 + $0x104] sm:$0xff]  ;;  %v1654_v45 = vpack.c.bf16 %v14118_v59, %v14100_v0 }
 0x27d   : > { %11701 = vmatprep.mubr.msk.bf16.mxu0 %vm1530_vm5, %v4649_v7  ;;  %1613 = vst.msk [vmem:[#allocation2 + $0x11a] sm:$0xf] %vm1579_vm8, %v1529_v10  ;;  %v13047_v7 = vld [vmem:[%s15512_s3 + $0x28] sm:$0xff]   ;;  %v4632_v10 = vld [vmem:[#allocation2 + $0xdc] sm:$0xff]  ;;  %vm9623_vm8 = vmor %vm9622_vm7, %vm15491_vm3 }
 0x27e   : > { %v4652_v35 = vpack.c.bf16 %v4632_v10, %v4631_v20  ;;  %v4915_v10 = vld [vmem:[#allocation2 + $0x25] sm:$0xff]  ;;  %v4917_v54 = vld [vmem:[#allocation2 + $0x35] sm:$0xff] }
 0x27f   : > { %v5249_v49 = vld [vmem:[#allocation2 + $0x106] sm:$0xff] }
 0x280   : > { %v4638_v17 = vld [vmem:[#allocation2 + $0x10c] sm:$0xff] }
 0x283   : > { %11362 = vmatmul.mubr.msk.bf16.vlgmr.msra.gmra.mrb[200].mxu1 %vm1530_vm5, %v1647_v57 }
 0x284   : > { %11702 = vmatmul.mubr.msk.bf16.gmra.mrb[16].mxu0 %vm1530_vm5, %v4650_v47  ;;  %11365 = vmatprep.mubr.msk.bf16.mxu1 %vm1530_vm5, %v1648_v16  ;;  %v4655_v47 = vpack.c.bf16 %v4638_v17, %v4637_v3  ;;  %v4639_v1 = vld [vmem:[#allocation2 + $0x114] sm:$0xff]  ;;  %v4640_v28 = vld [vmem:[#allocation2 + $0x11c] sm:$0xff]  ;;  %v1656_v17 = vpack.c.bf16 %v14149_v56, %v14131_v29 }
 0x285   : > { %11705 = vmatprep.mubr.msk.bf16.mxu0 %vm1530_vm5, %v4651_v8  ;;  %11394 = vmatpush3.bf16.msra.mxu1 %v14058_v60  ;;  %v4636_v60 = vld [vmem:[#allocation2 + $0xfc] sm:$0xff]  ;;  %v4916_v16 = vld [vmem:[#allocation2 + $0x2d] sm:$0xff]  ;;  %v1653_v8 = vpack.c.bf16 %v14098_v33, %v14088_v58 }
 0x286   : > { %11395 = vmatprep.subr.bf16.mxu1 %v13047_v7  ;;  %v4654_v57 = vpack.c.bf16 %v4636_v60, %v4635_v22  ;;  %v4947_v20 = vpack.c.bf16 %v4916_v16, %v4915_v10  ;;  %v4919_v60 = vld [vmem:[#allocation2 + $0x45] sm:$0xff]  ;;  %v14284_v3 = vld [vmem:[%s15512_s3 + $0xd0] sm:$0xff]  }
 0x287   : > { %v4923_v16 = vld [vmem:[#allocation2 + $0x65] sm:$0xff] }
 0x288   : > { %v4927_v10 = vld [vmem:[#allocation2 + $0x85] sm:$0xff] }
 0x289   : > { %11396 = vmatpush3.bf16.msra.mxu1 %v13047_v7  ;;  %v4656_v7 = vpack.c.bf16 %v4640_v28, %v4639_v1  ;;  %v1657_v1 = vpack.c.bf16 %v14164_v37, %v14151_v44 }
 0x28a   : > { %11429 = vmatprep.subr.bf16.mxu1 %v14242_v52 }
 0x28b   : > { %11366 = vmatmul.mubr.msk.bf16.gmra.mrb[204].mxu1 %vm1530_vm5, %v1649_v11  ;;  %v4918_v11 = vld [vmem:[#allocation2 + $0x3d] sm:$0xff] }
 0x28c   : > { %11706 = vmatmul.mubr.msk.bf16.gmra.mrb[20].mxu0 %vm1530_vm5, %v4652_v35  ;;  %11369 = vmatprep.mubr.msk.bf16.mxu1 %vm1530_vm5, %v1650_v32  ;;  %v4920_v35 = vld [vmem:[#allocation2 + $0x4d] sm:$0xff]  ;;  %v1655_v32 = vpack.c.bf16 %v14129_v62, %v14120_v51 }
 0x28d   : > { %11709 = vmatprep.mubr.msk.bf16.mxu0 %vm1530_vm5, %v4653_v27  ;;  %v4948_v27 = vpack.c.bf16 %v4918_v11, %v4917_v54  ;;  %v4949_v22 = vpack.c.bf16 %v4920_v35, %v4919_v60  ;;  %v1659_v11 = vpack.c.bf16 %v14203_v61, %v14190_v19  ;;  %v1660_v54 = vpack.c.bf16 %v14216_v30, %v14205_v46  ;;  %v2162_v60 = vld [vmem:[#allocation2 + $0xa] sm:$0xff] }
 0x293   : > { %11370 = vmatmul.mubr.msk.bf16.gmra.mrb[208].mxu1 %vm1530_vm5, %v1651_v40  ;;  %v13048_v40 = vld [vmem:[%s15512_s3 + $0xc8] sm:$0xff]  }
 0x294   : > { %11710 = vmatmul.mubr.msk.bf16.gmra.mrb[24].mxu0 %vm1530_vm5, %v4654_v57  ;;  %11373 = vmatprep.mubr.msk.bf16.mxu1 %vm1530_vm5, %v1652_v4  ;;  %v4922_v57 = vld [vmem:[#allocation2 + $0x5d] sm:$0xff]  ;;  %v4924_v4 = vld [vmem:[#allocation2 + $0x6d] sm:$0xff] }
 0x295   : > { %11713 = vmatprep.mubr.msk.bf16.mxu0 %vm1530_vm5, %v4655_v47  ;;  %v4921_v47 = vld [vmem:[#allocation2 + $0x55] sm:$0xff] }
 0x296   : > { %v4950_v28 = vpack.c.bf16 %v4922_v57, %v4921_v47  ;;  %v4932_v57 = vld [vmem:[#allocation2 + $0xad] sm:$0xff] }
 0x29b   : > { %11374 = vmatmul.mubr.msk.bf16.gmra.mrb[212].mxu1 %vm1530_vm5, %v1653_v8  ;;  %v1658_v8 = vpack.c.bf16 %v14188_v41, %v14166_v25 }
 0x29c   : > { %11714 = vmatmul.mubr.msk.bf16.gmra.mrb[28].mxu0 %vm1530_vm5, %v4656_v7  ;;  %11377 = vmatprep.mubr.msk.bf16.mxu1 %vm1530_vm5, %v1654_v45  ;;  %v4951_v7 = vpack.c.bf16 %v4924_v4, %v4923_v16  ;;  %v4928_v45 = vld [vmem:[#allocation2 + $0x8d] sm:$0xff]  ;;  %v4929_v4 = vld [vmem:[#allocation2 + $0x95] sm:$0xff] }
 0x29d   : > { %11721 = vmatprep.mubr.msk.bf16.mxu0 %vm1530_vm5, %v4947_v20  ;;  %v4925_v20 = vld [vmem:[#allocation2 + $0x75] sm:$0xff] }
 0x2a3   : > { %11378 = vmatmul.mubr.msk.bf16.gmra.mrb[216].mxu1 %vm1530_vm5, %v1655_v32  ;;  %v4953_v32 = vpack.c.bf16 %v4928_v45, %v4927_v10  ;;  %v2166_v45 = vld [vmem:[#allocation2 + $0x2a] sm:$0xff] }
 0x2a4   : > { %11722 = vmatmul.mubr.msk.bf16.vlgmr.msra.gmra.mrb[0].mxu0 %vm1530_vm5, %v4948_v27  ;;  %11381 = vmatprep.mubr.msk.bf16.mxu1 %vm1530_vm5, %v1656_v17  ;;  %v2161_v27 = vld [vmem:[#allocation2 + $0x2] sm:$0xff]  ;;  %v14303_v17 = vld [vmem:[#allocation2 + $0xf8] sm:$0xff] }
 0x2a5   : > { %11725 = vmatprep.mubr.msk.bf16.mxu0 %vm1530_vm5, %v4949_v22  ;;  %11754 = vmatpush3.bf16.msra.mxu0 %v14180_v21  ;;  %v4926_v21 = vld [vmem:[#allocation2 + $0x7d] sm:$0xff]  ;;  %v2193_v47 = vpack.c.bf16 %v2162_v60, %v2161_v27 }
 0x2a6   : > { %11755 = vmatprep.subr.bf16.mxu0 %v13048_v40  ;;  %v4952_v35 = vpack.c.bf16 %v4926_v21, %v4925_v20  ;;  %v4930_v22 = vld [vmem:[#allocation2 + $0x9d] sm:$0xff]  ;;  %v4936_v20 = vld [vmem:[#allocation2 + $0xcd] sm:$0xff] }
 0x2a7   : > { %v4934_v21 = vld [vmem:[#allocation2 + $0xbd] sm:$0xff] }
 0x2a9   : > { %11756 = vmatpush3.bf16.msra.mxu0 %v13048_v40  ;;  %v4931_v40 = vld [vmem:[#allocation2 + $0xa5] sm:$0xff] }
 0x2aa   : > { %11789 = vmatprep.subr.bf16.mxu0 %v14284_v3  ;;  %v4955_v16 = vpack.c.bf16 %v4932_v57, %v4931_v40  ;;  %v2168_v40 = vld [vmem:[#allocation2 + $0x3a] sm:$0xff] }
 0x2ab   : > { %11382 = vmatmul.mubr.msk.bf16.gmra.mrb[220].mxu1 %vm1530_vm5, %v1657_v1  ;;  %v1661_v1 = vpack.c.bf16 %v14303_v17, %v14218_v34  ;;  %v4938_v57 = vld [vmem:[#allocation2 + $0xdd] sm:$0xff] }
 0x2ac   : > { %11726 = vmatmul.mubr.msk.bf16.gmra.mrb[4].mxu0 %vm1530_vm5, %v4950_v28  ;;  %11385 = vmatprep.mubr.msk.bf16.mxu1 %vm1530_vm5, %v1658_v8  ;;  %v4954_v28 = vpack.c.bf16 %v4930_v22, %v4929_v4  ;;  %v2163_v8 = vld [vmem:[#allocation2 + $0x12] sm:$0xff]  ;;  %v14328_v4 = vld [vmem:[%s15512_s3 + $0x40] sm:$0xff]  }
 0x2ad   : > { %11729 = vmatprep.mubr.msk.bf16.mxu0 %vm1530_vm5, %v4951_v7  ;;  %v2164_v7 = vld [vmem:[#allocation2 + $0x1a] sm:$0xff] }
 0x2ae   : > { %v14311_v10 = vpack.c.bf16 %v2164_v7, %v2163_v8  ;;  %v13051_v22 = vld [vmem:[%s15512_s3 + $0x38] sm:$0xff]  }
 0x2b3   : > { %11386 = vmatmul.mubr.msk.bf16.gmra.mrb[224].mxu1 %vm1530_vm5, %v1659_v11  ;;  %v4933_v11 = vld [vmem:[#allocation2 + $0xb5] sm:$0xff] }
 0x2b4   : > { %11730 = vmatmul.mubr.msk.bf16.gmra.mrb[8].mxu0 %vm1530_vm5, %v4952_v35  ;;  %11389 = vmatprep.mubr.msk.bf16.mxu1 %vm1530_vm5, %v1660_v54  ;;  %v4956_v35 = vpack.c.bf16 %v4934_v21, %v4933_v11  ;;  %v2165_v54 = vld [vmem:[#allocation2 + $0x22] sm:$0xff]  ;;  %v2171_v11 = vld [vmem:[#allocation2 + $0x52] sm:$0xff] }
 0x2b5   : > { %11733 = vmatprep.mubr.msk.bf16.mxu0 %vm1530_vm5, %v4953_v32  ;;  %v4935_v32 = vld [vmem:[#allocation2 + $0xc5] sm:$0xff]  ;;  %v14313_v27 = vpack.c.bf16 %v2166_v45, %v2165_v54  ;;  %v4942_v54 = vld [vmem:[#allocation2 + $0xfd] sm:$0xff] }
 0x2b6   : > { %v4957_v60 = vpack.c.bf16 %v4936_v20, %v4935_v32  ;;  %v2169_v21 = vld [vmem:[#allocation2 + $0x42] sm:$0xff]  ;;  %v2174_v32 = vld [vmem:[#allocation2 + $0x6a] sm:$0xff] }
 0x2b7   : > { %v4939_v45 = vld [vmem:[#allocation2 + $0xe5] sm:$0xff] }
 0x2bb   : > { %11390 = vmatmul.mubr.msk.bf16.gmra.mrb[228].mxu1 %vm1530_vm5, %v1661_v1  ;;  %v4940_v1 = vld [vmem:[#allocation2 + $0xed] sm:$0xff] }
 0x2bc   : > { %11734 = vmatmul.mubr.msk.bf16.gmra.mrb[12].mxu0 %vm1530_vm5, %v4954_v28  ;;  %11397 = vmatprep.mubr.msk.bf16.mxu1 %vm1530_vm5, %v2193_v47  ;;  %v2170_v47 = vld [vmem:[#allocation2 + $0x4a] sm:$0xff]  ;;  %v2167_v28 = vld [vmem:[#allocation2 + $0x32] sm:$0xff] }
 0x2bd   : > { %11737 = vmatprep.mubr.msk.bf16.mxu0 %vm1530_vm5, %v4955_v16  ;;  %v4937_v16 = vld [vmem:[#allocation2 + $0xd5] sm:$0xff]  ;;  %v14330_v8 = vpack.c.bf16 %v2168_v40, %v2167_v28  ;;  %v14332_v20 = vpack.c.bf16 %v2170_v47, %v2169_v21  ;;  %v2173_v47 = vld [vmem:[#allocation2 + $0x62] sm:$0xff] }
 0x2be   : > { %v4958_v7 = vpack.c.bf16 %v4938_v57, %v4937_v16  ;;  %v14343_v28 = vpack.c.bf16 %v2174_v32, %v2173_v47  ;;  %v2176_v21 = vld [vmem:[#allocation2 + $0x7a] sm:$0xff]  ;;  %v2177_v32 = vld [vmem:[#allocation2 + $0x82] sm:$0xff]  ;;  %v2179_v47 = vld [vmem:[#allocation2 + $0x92] sm:$0xff] }
 0x2c3   : > { %11398 = vmatmul.mubr.msk.bf16.vlgmr.msra.gmra.mrb[200].mxu1 %vm1530_vm5, %v14311_v10 }
 0x2c4   : > { %11738 = vmatmul.mubr.msk.bf16.gmra.mrb[16].mxu0 %vm1530_vm5, %v4956_v35  ;;  %11401 = vmatprep.mubr.msk.bf16.mxu1 %vm1530_vm5, %v14313_v27  ;;  %v2172_v35 = vld [vmem:[#allocation2 + $0x5a] sm:$0xff] }
 0x2c5   : > { %11741 = vmatprep.mubr.msk.bf16.mxu0 %vm1530_vm5, %v4957_v60  ;;  %11430 = vmatpush3.bf16.msra.mxu1 %v14242_v52  ;;  %v4959_v52 = vpack.c.bf16 %v4940_v1, %v4939_v45  ;;  %v4944_v60 = vld [vmem:[#allocation2 + $0x10d] sm:$0xff]  ;;  %v14341_v40 = vpack.c.bf16 %v2172_v35, %v2171_v11  ;;  %v4943_v1 = vld [vmem:[#allocation2 + $0x105] sm:$0xff]  ;;  %v4945_v45 = vld [vmem:[#allocation2 + $0x115] sm:$0xff] }
 0x2c6   : > { %11431 = vmatprep.subr.bf16.mxu1 %v13051_v22  ;;  %v4961_v16 = vpack.c.bf16 %v4944_v60, %v4943_v1  ;;  %v2178_v11 = vld [vmem:[#allocation2 + $0x8a] sm:$0xff] }
 0x2c7   : > { %v14353_v60 = vpack.c.bf16 %v2178_v11, %v2177_v32  ;;  %v2183_v11 = vld [vmem:[#allocation2 + $0xb2] sm:$0xff] }
 0x2c9   : > { %11432 = vmatpush3.bf16.msra.mxu1 %v13051_v22  ;;  %v4941_v22 = vld [vmem:[#allocation2 + $0xf5] sm:$0xff] }
 0x2ca   : > { %11465 = vmatprep.subr.bf16.mxu1 %v14328_v4  ;;  %v4960_v57 = vpack.c.bf16 %v4942_v54, %v4941_v22  ;;  %v2180_v22 = vld [vmem:[#allocation2 + $0x9a] sm:$0xff] }
 0x2cb   : > { %11402 = vmatmul.mubr.msk.bf16.gmra.mrb[204].mxu1 %vm1530_vm5, %v14330_v8  ;;  %v14362_v1 = vpack.c.bf16 %v2180_v22, %v2179_v47  ;;  %v2190_v22 = vld [vmem:[#allocation2 + $0xea] sm:$0xff] }
 0x2cc   : > { %11742 = vmatmul.mubr.msk.bf16.gmra.mrb[20].mxu0 %vm1530_vm5, %v4958_v7  ;;  %11405 = vmatprep.mubr.msk.bf16.mxu1 %vm1530_vm5, %v14332_v20  ;;  %v2175_v7 = vld [vmem:[#allocation2 + $0x72] sm:$0xff] }
 0x2cd   : > { %11745 = vmatprep.mubr.msk.bf16.mxu0 %vm1530_vm5, %v4959_v52  ;;  %v4946_v52 = vld [vmem:[#allocation2 + $0x11d] sm:$0xff]  ;;  %v14351_v35 = vpack.c.bf16 %v2176_v21, %v2175_v7 }
 0x2ce   : > { %v4962_v54 = vpack.c.bf16 %v4946_v52, %v4945_v45  ;;  %v13052_v21 = vld [vmem:[%s15512_s3 + $0xd8] sm:$0xff]   ;;  %v14381_v45 = vld [vmem:[%s15512_s3 + $0xe0] sm:$0xff]   ;;  %v2186_v52 = vld [vmem:[#allocation2 + $0xca] sm:$0xff] }
 0x2d3   : > { %11406 = vmatmul.mubr.msk.bf16.gmra.mrb[208].mxu1 %vm1530_vm5, %v14341_v40 }
 0x2d4   : > { %11746 = vmatmul.mubr.msk.bf16.gmra.mrb[24].mxu0 %vm1530_vm5, %v4960_v57  ;;  %11409 = vmatprep.mubr.msk.bf16.mxu1 %vm1530_vm5, %v14343_v28  ;;  %v2182_v57 = vld [vmem:[#allocation2 + $0xaa] sm:$0xff] }
 0x2d5   : > { %11749 = vmatprep.mubr.msk.bf16.mxu0 %vm1530_vm5, %v4961_v16  ;;  %v2181_v16 = vld [vmem:[#allocation2 + $0xa2] sm:$0xff] }
 0x2d6   : > { %v14364_v7 = vpack.c.bf16 %v2182_v57, %v2181_v16  ;;  %v2187_v57 = vld [vmem:[#allocation2 + $0xd2] sm:$0xff] }
 0x2db   : > { %11410 = vmatmul.mubr.msk.bf16.gmra.mrb[212].mxu1 %vm1530_vm5, %v14351_v35 }
 0x2dc   : > { %11750 = vmatmul.mubr.msk.bf16.gmra.mrb[28].mxu0 %vm1530_vm5, %v4962_v54  ;;  %11413 = vmatprep.mubr.msk.bf16.mxu1 %vm1530_vm5, %v14353_v60 }
 0x2dd   : > { %11757 = vmatprep.mubr.msk.bf16.mxu0 %vm1530_vm5, %v13997_v9  ;;  %v2184_v9 = vld [vmem:[#allocation2 + $0xba] sm:$0xff] }
 0x2de   : > { %v14383_v54 = vpack.c.bf16 %v2184_v9, %v2183_v11  ;;  %v2191_v9 = vld [vmem:[#allocation2 + $0xf2] sm:$0xff] }
 0x2e3   : > { %11414 = vmatmul.mubr.msk.bf16.gmra.mrb[216].mxu1 %vm1530_vm5, %v14362_v1 }
 0x2e4   : > { %11758 = vmatmul.mubr.msk.bf16.vlgmr.msra.gmra.mrb[0].mxu0 %vm1530_vm5, %v14025_v15  ;;  %11417 = vmatprep.mubr.msk.bf16.mxu1 %vm1530_vm5, %v14364_v7  ;;  %v2185_v15 = vld [vmem:[#allocation2 + $0xc2] sm:$0xff] }
 0x2e5   : > { %11761 = vmatprep.mubr.msk.bf16.mxu0 %vm1530_vm5, %v14039_v48  ;;  %11790 = vmatpush3.bf16.msra.mxu0 %v14284_v3  ;;  %v14385_v32 = vpack.c.bf16 %v2186_v52, %v2185_v15  ;;  %v2188_v48 = vld [vmem:[#allocation2 + $0xda] sm:$0xff]  ;;  %v2189_v3 = vld [vmem:[#allocation2 + $0xe2] sm:$0xff] }
 0x2e6   : > { %11791 = vmatprep.subr.bf16.mxu0 %v13052_v21  ;;  %v14396_v47 = vpack.c.bf16 %v2188_v48, %v2187_v57  ;;  %v14398_v16 = vpack.c.bf16 %v2190_v22, %v2189_v3  ;;  %v5240_v15 = vld [vmem:[#allocation2 + $0xbe] sm:$0xff]  ;;  %v2472_v3 = vld [vmem:[#allocation2 + $0x2b] sm:$0xff]  ;;  %v5239_v57 = vld [vmem:[#allocation2 + $0xb6] sm:$0xff] }
 0x2e7   : > { %v5242_v22 = vld [vmem:[#allocation2 + $0xce] sm:$0xff] }
 0x2e9   : > { %11792 = vmatpush3.bf16.msra.mxu0 %v13052_v21  ;;  %v2192_v21 = vld [vmem:[#allocation2 + $0xfa] sm:$0xff] }
 0x2ea   : > { %11825 = vmatprep.subr.bf16.mxu0 %v14381_v45  ;;  %v14408_v11 = vpack.c.bf16 %v2192_v21, %v2191_v9  ;;  %v5241_v21 = vld [vmem:[#allocation2 + $0xc6] sm:$0xff] }
 0x2eb   : > { %11418 = vmatmul.mubr.msk.bf16.gmra.mrb[220].mxu1 %vm1530_vm5, %v14383_v54 }
 0x2ec   : > { %11762 = vmatmul.mubr.msk.bf16.gmra.mrb[4].mxu0 %vm1530_vm5, %v14063_v43  ;;  %11421 = vmatprep.mubr.msk.bf16.mxu1 %vm1530_vm5, %v14385_v32  ;;  %v2467_v43 = vld [vmem:[#allocation2 + $0x3] sm:$0xff] }
 0x2ed   : > { %11765 = vmatprep.mubr.msk.bf16.mxu0 %vm1530_vm5, %v14077_v18  ;;  %v2468_v18 = vld [vmem:[#allocation2 + $0xb] sm:$0xff] }
 0x2ee   : > { %v2499_v52 = vpack.c.bf16 %v2468_v18, %v2467_v43  ;;  %v14419_v43 = vpack.c.bf16 %v5240_v15, %v5239_v57  ;;  %v2471_v18 = vld [vmem:[#allocation2 + $0x23] sm:$0xff]  ;;  %v2476_v15 = vld [vmem:[#allocation2 + $0x4b] sm:$0xff]  ;;  %v5243_v57 = vld [vmem:[#allocation2 + $0xd6] sm:$0xff] }
 0x2ef   : > { %v14421_v9 = vpack.c.bf16 %v2472_v3, %v2471_v18  ;;  %v5246_v3 = vld [vmem:[#allocation2 + $0xee] sm:$0xff] }
 0x2f0   : > { %v14448_v36 = vpack.c.bf16 %v5246_v3, %v5245_v26  ;;  %v2477_v26 = vld [vmem:[#allocation2 + $0x53] sm:$0xff] }
 0x2f2   : > { %15572 = vst [vmem:[#allocation5_spill] sm:$0xff] %v14448_v36 }
 0x2f3   : > { %11422 = vmatmul.mubr.msk.bf16.gmra.mrb[224].mxu1 %vm1530_vm5, %v14396_v47 }
 0x2f4   : > { %11766 = vmatmul.mubr.msk.bf16.gmra.mrb[8].mxu0 %vm1530_vm5, %v14096_v12  ;;  %11425 = vmatprep.mubr.msk.bf16.mxu1 %vm1530_vm5, %v14398_v16  ;;  %v2469_v12 = vld [vmem:[#allocation2 + $0x13] sm:$0xff] }
 0x2f5   : > { %11769 = vmatprep.mubr.msk.bf16.mxu0 %vm1530_vm5, %v14110_v6  ;;  %v2470_v6 = vld [vmem:[#allocation2 + $0x1b] sm:$0xff] }
 0x2f6   : > { %v14417_v48 = vpack.c.bf16 %v2470_v6, %v2469_v12  ;;  %v5244_v12 = vld [vmem:[#allocation2 + $0xde] sm:$0xff]  ;;  %v14440_v6 = vld [vmem:[%s15512_s3 + $0x50] sm:$0xff]  }
 0x2fb   : > { %11426 = vmatmul.mubr.msk.bf16.gmra.mrb[228].mxu1 %vm1530_vm5, %v14408_v11 }
 0x2fc   : > { %11770 = vmatmul.mubr.msk.bf16.gmra.mrb[12].mxu0 %vm1530_vm5, %v14127_v2  ;;  %11433 = vmatprep.mubr.msk.bf16.mxu1 %vm1530_vm5, %v2499_v52  ;;  %v14423_v2 = vpack.c.bf16 %v5242_v22, %v5241_v21  ;;  %v2474_v52 = vld [vmem:[#allocation2 + $0x3b] sm:$0xff]  ;;  %v2473_v22 = vld [vmem:[#allocation2 + $0x33] sm:$0xff]  ;;  %v14444_v21 = vpack.c.bf16 %v5244_v12, %v5243_v57  ;;  %v2479_v57 = vld [vmem:[#allocation2 + $0x63] sm:$0xff] }
 0x2fd   : > { %11773 = vmatprep.mubr.msk.bf16.mxu0 %vm1530_vm5, %v14142_v31  ;;  %v13055_v31 = vld [vmem:[%s15512_s3 + $0x48] sm:$0xff]   ;;  %v14442_v18 = vpack.c.bf16 %v2474_v52, %v2473_v22  ;;  %v2478_v52 = vld [vmem:[#allocation2 + $0x5b] sm:$0xff] }
 0x2fe   : > { %v5250_v12 = vld [vmem:[#allocation2 + $0x10e] sm:$0xff]  ;;  %v14459_v3 = vpack.c.bf16 %v2478_v52, %v2477_v26  ;;  %v5252_v52 = vld [vmem:[#allocation2 + $0x11e] sm:$0xff]  ;;  %v5251_v26 = vld [vmem:[#allocation2 + $0x116] sm:$0xff] }
 0x2ff   : > { %v14465_v23 = vpack.c.bf16 %v5250_v12, %v5249_v49  ;;  %v5528_v49 = vld [vmem:[#allocation2 + $0x2f] sm:$0xff] }
 0x300   : > { %15573 = vst [vmem:[#allocation6_spill] sm:$0xff] %v14459_v3  ;;  %v2481_v12 = vld [vmem:[#allocation2 + $0x73] sm:$0xff] }
 0x301   : > { %15576 = vst [vmem:[#allocation9_spill] sm:$0xff] %v14465_v23 }
 0x303   : > { %11434 = vmatmul.mubr.msk.bf16.vlgmr.msra.gmra.mrb[200].mxu1 %vm1530_vm5, %v14417_v48 }
 0x304   : > { %11774 = vmatmul.mubr.msk.bf16.gmra.mrb[16].mxu0 %vm1530_vm5, %v14419_v43  ;;  %11437 = vmatprep.mubr.msk.bf16.mxu1 %vm1530_vm5, %v14421_v9 }
 0x305   : > { %11777 = vmatprep.mubr.msk.bf16.mxu0 %vm1530_vm5, %v14423_v2  ;;  %11466 = vmatpush3.bf16.msra.mxu1 %v14328_v4  ;;  %v14446_v4 = vpack.c.bf16 %v2476_v15, %v2475_v42  ;;  %v2480_v42 = vld [vmem:[#allocation2 + $0x6b] sm:$0xff]  ;;  %v5247_v15 = vld [vmem:[#allocation2 + $0xf6] sm:$0xff] }
 0x306   : > { %11467 = vmatprep.subr.bf16.mxu1 %v13055_v31  ;;  %v14463_v53 = vpack.c.bf16 %v2480_v42, %v2479_v57  ;;  %v2483_v42 = vld [vmem:[#allocation2 + $0x83] sm:$0xff]  ;;  %v2484_v57 = vld [vmem:[#allocation2 + $0x8b] sm:$0xff] }
 0x307   : > { %15571 = vst [vmem:[#allocation4_spill] sm:$0xff] %v14446_v4 }
 0x308   : > { %15575 = vst [vmem:[#allocation8_spill] sm:$0xff] %v14463_v53 }
 0x309   : > { %11468 = vmatpush3.bf16.msra.mxu1 %v13055_v31  ;;  %v5248_v31 = vld [vmem:[#allocation2 + $0xfe] sm:$0xff] }
 0x30a   : > { %11501 = vmatprep.subr.bf16.mxu1 %v14440_v6  ;;  %v14461_v22 = vpack.c.bf16 %v5248_v31, %v5247_v15  ;;  %v2482_v31 = vld [vmem:[#allocation2 + $0x7b] sm:$0xff]  ;;  %v5527_v15 = vld [vmem:[#allocation2 + $0x27] sm:$0xff] }
 0x30b   : > { %11438 = vmatmul.mubr.msk.bf16.gmra.mrb[204].mxu1 %vm1530_vm5, %v14442_v18 }
 0x30c   : > { %11778 = vmatmul.mubr.msk.bf16.gmra.mrb[20].mxu0 %vm1530_vm5, %v14444_v21  ;;  %11441 = vmatprep.mubr.msk.bf16.mxu1 %vm1530_vm5, %v14446_v4  ;;  %15574 = vst [vmem:[#allocation7_spill] sm:$0xff] %v14461_v22  ;;  %v14479_v4 = vpack.c.bf16 %v2484_v57, %v2483_v42  ;;  %v5529_v42 = vld [vmem:[#allocation2 + $0x37] sm:$0xff] }
 0x30d   : > { %11781 = vmatprep.mubr.msk.bf16.mxu0 %vm1530_vm5, %v14448_v36  ;;  %v14475_v36 = vpack.c.bf16 %v2482_v31, %v2481_v12  ;;  %v2487_v31 = vld [vmem:[#allocation2 + $0xa3] sm:$0xff]  ;;  %v2488_v12 = vld [vmem:[#allocation2 + $0xab] sm:$0xff] }
 0x30e   : > { %15579 = vst [vmem:[#allocation12_spill] sm:$0xff] %v14479_v4 }
 0x30f   : > { %15577 = vst [vmem:[#allocation10_spill] sm:$0xff] %v14475_v36 }
 0x313   : > { %11442 = vmatmul.mubr.msk.bf16.gmra.mrb[208].mxu1 %vm1530_vm5, %v14459_v3  ;;  %v14477_v3 = vpack.c.bf16 %v5252_v52, %v5251_v26  ;;  %v5532_v52 = vld [vmem:[#allocation2 + $0x4f] sm:$0xff] }
 0x314   : > { %11782 = vmatmul.mubr.msk.bf16.gmra.mrb[24].mxu0 %vm1530_vm5, %v14461_v22  ;;  %11445 = vmatprep.mubr.msk.bf16.mxu1 %vm1530_vm5, %v14463_v53  ;;  %v5559_v22 = vpack.c.bf16 %v5528_v49, %v5527_v15  ;;  %v5530_v53 = vld [vmem:[#allocation2 + $0x3f] sm:$0xff]  ;;  %v2485_v26 = vld [vmem:[#allocation2 + $0x93] sm:$0xff]  ;;  %v5531_v49 = vld [vmem:[#allocation2 + $0x47] sm:$0xff] }
 0x315   : > { %11785 = vmatprep.mubr.msk.bf16.mxu0 %vm1530_vm5, %v14465_v23  ;;  %15578 = vst [vmem:[#allocation11_spill] sm:$0xff] %v14477_v3  ;;  %v2486_v23 = vld [vmem:[#allocation2 + $0x9b] sm:$0xff]  ;;  %v14490_v15 = vpack.c.bf16 %v5530_v53, %v5529_v42 }
 0x316   : > { %v14488_v57 = vpack.c.bf16 %v2486_v23, %v2485_v26  ;;  %v2490_v23 = vld [vmem:[#allocation2 + $0xbb] sm:$0xff]  ;;  %v2489_v26 = vld [vmem:[#allocation2 + $0xb3] sm:$0xff] }
 0x317   : > { %15581 = vst [vmem:[#allocation14_spill] sm:$0xff] %v14490_v15  ;;  %v5534_v53 = vld [vmem:[#allocation2 + $0x5f] sm:$0xff]  ;;  %v5533_v42 = vld [vmem:[#allocation2 + $0x57] sm:$0xff] }
 0x318   : > { %15580 = vst [vmem:[#allocation13_spill] sm:$0xff] %v14488_v57 }
 0x31b   : > { %11446 = vmatmul.mubr.msk.bf16.gmra.mrb[212].mxu1 %vm1530_vm5, %v14475_v36  ;;  %v14492_v36 = vpack.c.bf16 %v2488_v12, %v2487_v31  ;;  %v14511_v31 = vld [vmem:[%s15512_s3 + $0xf0] sm:$0xff]  }
 0x31c   : > { %11786 = vmatmul.mubr.msk.bf16.gmra.mrb[28].mxu0 %vm1530_vm5, %v14477_v3  ;;  %11449 = vmatprep.mubr.msk.bf16.mxu1 %vm1530_vm5, %v14479_v4  ;;  %v14494_v3 = vpack.c.bf16 %v5532_v52, %v5531_v49  ;;  %v2492_v12 = vld [vmem:[#allocation2 + $0xcb] sm:$0xff]  ;;  %v14513_v49 = vpack.c.bf16 %v2490_v23, %v2489_v26  ;;  %v2494_v23 = vld [vmem:[#allocation2 + $0xdb] sm:$0xff] }
 0x31d   : > { %11793 = vmatprep.mubr.msk.bf16.mxu0 %vm1530_vm5, %v5559_v22  ;;  %15582 = vst [vmem:[#allocation15_spill] sm:$0xff] %v14492_v36  ;;  %v13056_v22 = vld [vmem:[%s15512_s3 + $0xe8] sm:$0xff]  }
 0x31e   : > { %15583 = vst [vmem:[#allocation16_spill] sm:$0xff] %v14494_v3  ;;  %v5536_v52 = vld [vmem:[#allocation2 + $0x6f] sm:$0xff]  ;;  %15584 = vst [vmem:[#allocation17_spill] sm:$0xff] %v14513_v49 }
 0x323   : > { %11450 = vmatmul.mubr.msk.bf16.gmra.mrb[216].mxu1 %vm1530_vm5, %v14488_v57 }
 0x324   : > { %11794 = vmatmul.mubr.msk.bf16.vlgmr.msra.gmra.mrb[0].mxu0 %vm1530_vm5, %v14490_v15  ;;  %11453 = vmatprep.mubr.msk.bf16.mxu1 %vm1530_vm5, %v14492_v36  ;;  %v14515_v36 = vpack.c.bf16 %v5534_v53, %v5533_v42  ;;  %v2491_v15 = vld [vmem:[#allocation2 + $0xc3] sm:$0xff]  ;;  %v5540_v53 = vld [vmem:[#allocation2 + $0x8f] sm:$0xff] }
 0x325   : > { %11797 = vmatprep.mubr.msk.bf16.mxu0 %vm1530_vm5, %v14494_v3  ;;  %11826 = vmatpush3.bf16.msra.mxu0 %v14381_v45  ;;  %v5535_v3 = vld [vmem:[#allocation2 + $0x67] sm:$0xff]  ;;  %v14517_v45 = vpack.c.bf16 %v2492_v12, %v2491_v15  ;;  %v5537_v12 = vld [vmem:[#allocation2 + $0x77] sm:$0xff] }
 0x326   : > { %11827 = vmatprep.subr.bf16.mxu0 %v13056_v22  ;;  %15585 = vst [vmem:[#allocation18_spill] sm:$0xff] %v14515_v36  ;;  %v14519_v57 = vpack.c.bf16 %v5536_v52, %v5535_v3  ;;  %v2496_v15 = vld [vmem:[#allocation2 + $0xeb] sm:$0xff]  ;;  %v2493_v3 = vld [vmem:[#allocation2 + $0xd3] sm:$0xff]  ;;  %v2495_v42 = vld [vmem:[#allocation2 + $0xe3] sm:$0xff] }
 0x327   : > { %15586 = vst [vmem:[#allocation19_spill] sm:$0xff] %v14517_v45  ;;  %v14530_v52 = vpack.c.bf16 %v2494_v23, %v2493_v3  ;;  %v14534_v4 = vpack.c.bf16 %v2496_v15, %v2495_v42  ;;  %v2773_v23 = vld [vmem:[#allocation2 + $0x4] sm:$0xff]  ;;  %v2498_v3 = vld [vmem:[#allocation2 + $0xfb] sm:$0xff]  ;;  %v5544_v42 = vld [vmem:[#allocation2 + $0xaf] sm:$0xff] }
 0x328   : > { %15587 = vst [vmem:[#allocation20_spill] sm:$0xff] %v14519_v57  ;;  %v5542_v15 = vld [vmem:[#allocation2 + $0x9f] sm:$0xff] }
 0x329   : > { %11828 = vmatpush3.bf16.msra.mxu0 %v13056_v22  ;;  %v5538_v22 = vld [vmem:[#allocation2 + $0x7f] sm:$0xff]  ;;  %15588 = vst [vmem:[#allocation21_spill] sm:$0xff] %v14530_v52  ;;  %15590 = vst [vmem:[#allocation23_spill] sm:$0xff] %v14534_v4 }
 0x32a   : > { %11861 = vmatprep.subr.bf16.mxu0 %v14511_v31  ;;  %v14532_v26 = vpack.c.bf16 %v5538_v22, %v5537_v12  ;;  %v2774_v22 = vld [vmem:[#allocation2 + $0xc] sm:$0xff]  ;;  %v5541_v12 = vld [vmem:[#allocation2 + $0x97] sm:$0xff] }
 0x32b   : > { %11454 = vmatmul.mubr.msk.bf16.gmra.mrb[220].mxu1 %vm1530_vm5, %v14513_v49  ;;  %v5539_v49 = vld [vmem:[#allocation2 + $0x87] sm:$0xff] }
 0x32c   : > { %11798 = vmatmul.mubr.msk.bf16.gmra.mrb[4].mxu0 %vm1530_vm5, %v14515_v36  ;;  %11457 = vmatprep.mubr.msk.bf16.mxu1 %vm1530_vm5, %v14517_v45  ;;  %15589 = vst [vmem:[#allocation22_spill] sm:$0xff] %v14532_v26  ;;  %v14536_v36 = vpack.c.bf16 %v5540_v53, %v5539_v49  ;;  %v2497_v49 = vld [vmem:[#allocation2 + $0xf3] sm:$0xff]  ;;  %v2805_v53 = vpack.c.bf16 %v2774_v22, %v2773_v23  ;;  %v5543_v45 = vld [vmem:[#allocation2 + $0xa7] sm:$0xff]  ;;  %v2776_v23 = vld [vmem:[#allocation2 + $0x1c] sm:$0xff] }
 0x32d   : > { %11801 = vmatprep.mubr.msk.bf16.mxu0 %vm1530_vm5, %v14519_v57  ;;  %v14546_v57 = vpack.c.bf16 %v2498_v3, %v2497_v49  ;;  %v5545_v22 = vld [vmem:[#allocation2 + $0xb7] sm:$0xff]  ;;  %v5546_v3 = vld [vmem:[#allocation2 + $0xbf] sm:$0xff] }
 0x32e   : > { %15591 = vst [vmem:[#allocation24_spill] sm:$0xff] %v14536_v36  ;;  %v2777_v49 = vld [vmem:[#allocation2 + $0x24] sm:$0xff] }
 0x32f   : > { %15592 = vst [vmem:[#allocation25_spill] sm:$0xff] %v14546_v57 }
 0x333   : > { %11458 = vmatmul.mubr.msk.bf16.gmra.mrb[224].mxu1 %vm1530_vm5, %v14530_v52  ;;  %v14548_v52 = vpack.c.bf16 %v5542_v15, %v5541_v12  ;;  %v2778_v15 = vld [vmem:[#allocation2 + $0x2c] sm:$0xff] }
 0x334   : > { %11802 = vmatmul.mubr.msk.bf16.gmra.mrb[8].mxu0 %vm1530_vm5, %v14532_v26  ;;  %11461 = vmatprep.mubr.msk.bf16.mxu1 %vm1530_vm5, %v14534_v4  ;;  %v14550_v26 = vpack.c.bf16 %v5544_v42, %v5543_v45  ;;  %v5548_v45 = vld [vmem:[#allocation2 + $0xcf] sm:$0xff]  ;;  %v14561_v42 = vpack.c.bf16 %v5546_v3, %v5545_v22  ;;  %v14563_v4 = vpack.c.bf16 %v2778_v15, %v2777_v49 }
 0x335   : > { %11805 = vmatprep.mubr.msk.bf16.mxu0 %vm1530_vm5, %v14536_v36  ;;  %15593 = vst [vmem:[#allocation26_spill] sm:$0xff] %v14548_v52  ;;  %v2775_v36 = vld [vmem:[#allocation2 + $0x14] sm:$0xff]  ;;  %v2782_v22 = vld [vmem:[#allocation2 + $0x4c] sm:$0xff] }
 0x336   : > { %15594 = vst [vmem:[#allocation27_spill] sm:$0xff] %v14550_v26  ;;  %v14559_v12 = vpack.c.bf16 %v2776_v23, %v2775_v36  ;;  %15596 = vst [vmem:[#allocation29_spill] sm:$0xff] %v14561_v42  ;;  %v2780_v36 = vld [vmem:[#allocation2 + $0x3c] sm:$0xff]  ;;  %v5552_v3 = vld [vmem:[#allocation2 + $0xef] sm:$0xff] }
 0x337   : > { %15597 = vst [vmem:[#allocation30_spill] sm:$0xff] %v14563_v4  ;;  %v14582_v23 = vld [vmem:[%s15512_s3 + $0x60] sm:$0xff]   ;;  %v2779_v15 = vld [vmem:[#allocation2 + $0x34] sm:$0xff] }
 0x338   : > { %15595 = vst [vmem:[#allocation28_spill] sm:$0xff] %v14559_v12  ;;  %v14584_v49 = vpack.c.bf16 %v2780_v36, %v2779_v15  ;;  %v2784_v36 = vld [vmem:[#allocation2 + $0x5c] sm:$0xff] }
 0x33a   : > { %15599 = vst [vmem:[#allocation32_spill] sm:$0xff] %v14584_v49 }
 0x33b   : > { %11462 = vmatmul.mubr.msk.bf16.gmra.mrb[228].mxu1 %vm1530_vm5, %v14546_v57  ;;  %v5547_v57 = vld [vmem:[#allocation2 + $0xc7] sm:$0xff] }
 0x33c   : > { %11806 = vmatmul.mubr.msk.bf16.gmra.mrb[12].mxu0 %vm1530_vm5, %v14548_v52  ;;  %11469 = vmatprep.mubr.msk.bf16.mxu1 %vm1530_vm5, %v2805_v53  ;;  %v14565_v52 = vpack.c.bf16 %v5548_v45, %v5547_v57  ;;  %v13059_v53 = vld [vmem:[%s15512_s3 + $0x58] sm:$0xff]  }
 0x33d   : > { %11809 = vmatprep.mubr.msk.bf16.mxu0 %vm1530_vm5, %v14550_v26  ;;  %v5550_v57 = vld [vmem:[#allocation2 + $0xdf] sm:$0xff]  ;;  %v5549_v45 = vld [vmem:[#allocation2 + $0xd7] sm:$0xff] }
 0x33e   : > { %15598 = vst [vmem:[#allocation31_spill] sm:$0xff] %v14565_v52 }
 0x343   : > { %11470 = vmatmul.mubr.msk.bf16.vlgmr.msra.gmra.mrb[200].mxu1 %vm1530_vm5, %v14559_v12  ;;  %v2781_v12 = vld [vmem:[#allocation2 + $0x44] sm:$0xff] }
 0x344   : > { %11810 = vmatmul.mubr.msk.bf16.gmra.mrb[16].mxu0 %vm1530_vm5, %v14561_v42  ;;  %11473 = vmatprep.mubr.msk.bf16.mxu1 %vm1530_vm5, %v14563_v4  ;;  %v14586_v4 = vpack.c.bf16 %v5550_v57, %v5549_v45  ;;  %v5556_v57 = vld [vmem:[#allocation2 + $0x10f] sm:$0xff]  ;;  %v2785_v45 = vld [vmem:[#allocation2 + $0x64] sm:$0xff] }
 0x345   : > { %11813 = vmatprep.mubr.msk.bf16.mxu0 %vm1530_vm5, %v14565_v52  ;;  %11502 = vmatpush3.bf16.msra.mxu1 %v14440_v6  ;;  %v5551_v52 = vld [vmem:[#allocation2 + $0xe7] sm:$0xff]  ;;  %v14588_v6 = vpack.c.bf16 %v2782_v22, %v2781_v12  ;;  %v5553_v22 = vld [vmem:[#allocation2 + $0xf7] sm:$0xff] }
 0x346   : > { %11503 = vmatprep.subr.bf16.mxu1 %v13059_v53  ;;  %15600 = vst [vmem:[#allocation33_spill] sm:$0xff] %v14586_v4  ;;  %v14590_v42 = vpack.c.bf16 %v5552_v3, %v5551_v52  ;;  %v2786_v12 = vld [vmem:[#allocation2 + $0x6c] sm:$0xff]  ;;  %v2783_v52 = vld [vmem:[#allocation2 + $0x54] sm:$0xff] }
 0x347   : > { %v14601_v3 = vpack.c.bf16 %v2784_v36, %v2783_v52  ;;  %v14605_v26 = vpack.c.bf16 %v2786_v12, %v2785_v45  ;;  %v2788_v36 = vld [vmem:[#allocation2 + $0x7c] sm:$0xff]  ;;  %v2790_v12 = vld [vmem:[#allocation2 + $0x8c] sm:$0xff]  ;;  %v2787_v45 = vld [vmem:[#allocation2 + $0x74] sm:$0xff] }
 0x348   : > { %v5558_v52 = vld [vmem:[#allocation2 + $0x11f] sm:$0xff] }
 0x349   : > { %11504 = vmatpush3.bf16.msra.mxu1 %v13059_v53  ;;  %v5554_v53 = vld [vmem:[#allocation2 + $0xff] sm:$0xff]  ;;  %15601 = vst [vmem:[#allocation34_spill] sm:$0xff] %v14601_v3 }
 0x34a   : > { %11537 = vmatprep.subr.bf16.mxu1 %v14582_v23  ;;  %v14603_v15 = vpack.c.bf16 %v5554_v53, %v5553_v22  ;;  %v5557_v53 = vld [vmem:[#allocation2 + $0x117] sm:$0xff]  ;;  %v2789_v22 = vld [vmem:[#allocation2 + $0x84] sm:$0xff] }
 0x34b   : > { %11474 = vmatmul.mubr.msk.bf16.gmra.mrb[204].mxu1 %vm1530_vm5, %v14584_v49  ;;  %v5555_v49 = vld [vmem:[#allocation2 + $0x107] sm:$0xff] }
 0x34c   : > { %11814 = vmatmul.mubr.msk.bf16.gmra.mrb[20].mxu0 %vm1530_vm5, %v14586_v4  ;;  %11477 = vmatprep.mubr.msk.bf16.mxu1 %vm1530_vm5, %v14588_v6  ;;  %v14607_v4 = vpack.c.bf16 %v5556_v57, %v5555_v49  ;;  %v14617_v49 = vpack.c.bf16 %v2788_v36, %v2787_v45  ;;  %v14619_v57 = vpack.c.bf16 %v5558_v52, %v5557_v53  ;;  %v2792_v36 = vld [vmem:[#allocation2 + $0x9c] sm:$0xff]  ;;  %v2793_v45 = vld [vmem:[#allocation2 + $0xa4] sm:$0xff]  ;;  %v2794_v53 = vld [vmem:[#allocation2 + $0xac] sm:$0xff] }
 0x34d   : > { %11817 = vmatprep.mubr.msk.bf16.mxu0 %vm1530_vm5, %v14590_v42  ;;  %v2791_v52 = vld [vmem:[#allocation2 + $0x94] sm:$0xff] }
 0x34e   : > { %15602 = vst [vmem:[#allocation35_spill] sm:$0xff] %v14607_v4  ;;  %15603 = vst [vmem:[#allocation36_spill] sm:$0xff] %v14619_v57 }
 0x353   : > { %11478 = vmatmul.mubr.msk.bf16.gmra.mrb[208].mxu1 %vm1530_vm5, %v14601_v3  ;;  %v14621_v3 = vpack.c.bf16 %v2790_v12, %v2789_v22  ;;  %v14633_v22 = vpack.c.bf16 %v2792_v36, %v2791_v52  ;;  %v14635_v12 = vpack.c.bf16 %v2794_v53, %v2793_v45  ;;  %v14656_v36 = vld [vmem:[%s15512_s3 + $0x100] sm:$0xff]  }
 0x354   : > { %11818 = vmatmul.mubr.msk.bf16.gmra.mrb[24].mxu0 %vm1530_vm5, %v14603_v15  ;;  %11481 = vmatprep.mubr.msk.bf16.mxu1 %vm1530_vm5, %v14605_v26  ;;  %v2797_v53 = vld [vmem:[#allocation2 + $0xc4] sm:$0xff] }
 0x355   : > { %11821 = vmatprep.mubr.msk.bf16.mxu0 %vm1530_vm5, %v14607_v4  ;;  %v15604_v4 = vpack.c.bf16 %v14004_v5, %v14002_v38  ;;  %v15605_v38 = vpack.c.bf16 %v14030_v14, %v14028_v39  ;;  %v15606_v5 = vpack.c.bf16 %v14049_v24, %v14047_v63  ;;  %v2798_v39 = vld [vmem:[#allocation2 + $0xcc] sm:$0xff]  ;;  %v2795_v14 = vld [vmem:[#allocation2 + $0xb4] sm:$0xff]  ;;  %v15607_v63 = vpack.c.bf16 %v14067_v55, %v14065_v13 }
 0x356   : > { %v14660_v52 = vpack.c.bf16 %v2798_v39, %v2797_v53  ;;  %v15608_v24 = vpack.c.bf16 %v14088_v58, %v14086_v50  ;;  %v15609_v13 = vpack.c.bf16 %v14100_v0, %v14098_v33  ;;  %v15610_v55 = vpack.c.bf16 %v14120_v51, %v14118_v59  ;;  %v2804_v50 = vld [vmem:[#allocation2 + $0xfc] sm:$0xff]  ;;  %v2803_v58 = vld [vmem:[#allocation2 + $0xf4] sm:$0xff]  ;;  %v13063_v59 = vld [vmem:[%s15512_s3 + $0x68] sm:$0xff]  }
 0x357   : > { %v15611_v33 = vpack.c.bf16 %v14131_v29, %v14129_v62  ;;  %v15612_v0 = vpack.c.bf16 %v14151_v44, %v14149_v56  ;;  %v15613_v51 = vpack.c.bf16 %v14166_v25, %v14164_v37  ;;  %v15614_v62 = vpack.c.bf16 %v14190_v19, %v14188_v41  ;;  %v14724_v29 = vld [vmem:[%s15512_s3 + $0x70] sm:$0xff]   ;;  %v14739_v37 = vld [vmem:[#allocation2 + $0x100] sm:$0xff]  ;;  %v5861_v19 = vld [vmem:[#allocation2 + $0x108] sm:$0xff] }
 0x358   : > { %v15615_v56 = vpack.c.bf16 %v14205_v46, %v14203_v61  ;;  %v15616_v44 = vpack.c.bf16 %v14218_v34, %v14216_v30  ;;  %v5862_v25 = vld [vmem:[#allocation2 + $0x110] sm:$0xff]  ;;  %v5878_v41 = vpack.c.bf16 %v14739_v37, %v14303_v17  ;;  %v5863_v61 = vld [vmem:[#allocation2 + $0x118] sm:$0xff]  ;;  %v5864_v46 = vld [vmem:[#allocation2 + $0x120] sm:$0xff] }
 0x359   : > { %v6140_v30 = vld [vmem:[#allocation2 + $0x3e] sm:$0xff]  ;;  %v14752_v34 = vpack.c.bf16 %v5864_v46, %v5863_v61  ;;  %v6139_v17 = vld [vmem:[#allocation2 + $0x36] sm:$0xff]  ;;  %v13064_v53 = vld [vmem:[%s15512_s3 + $0x108] sm:$0xff]  }
 0x35a   : > { %v15628_v61 = vld [vmem:[#allocation15_spill] sm:$0xff]  ;;  %v15629_v46 = vld [vmem:[#allocation16_spill] sm:$0xff] }
 0x35b   : > { %11482 = vmatmul.mubr.msk.bf16.gmra.mrb[212].mxu1 %vm1530_vm5, %v14617_v49 }
 0x35c   : > { %11822 = vmatmul.mubr.msk.bf16.gmra.mrb[28].mxu0 %vm1530_vm5, %v14619_v57  ;;  %11485 = vmatprep.mubr.msk.bf16.mxu1 %vm1530_vm5, %v14621_v3  ;;  %v13060_v57 = vld [vmem:[%s15512_s3 + $0xf8] sm:$0xff]  }
 0x35d   : > { %11829 = vmatprep.mubr.msk.bf16.mxu0 %vm1530_vm5, %v15604_v4  ;;  %v2796_v4 = vld [vmem:[#allocation2 + $0xbc] sm:$0xff] }
 0x35e   : > { %v14658_v45 = vpack.c.bf16 %v2796_v4, %v2795_v14  ;;  %v2801_v4 = vld [vmem:[#allocation2 + $0xe4] sm:$0xff]  ;;  %v14691_v14 = vpack.c.bf16 %v2804_v50, %v2803_v58  ;;  %v6154_v58 = vld [vmem:[#allocation2 + $0xae] sm:$0xff] }
 0x35f   : > { %v6153_v50 = vld [vmem:[#allocation2 + $0xa6] sm:$0xff] }
 0x363   : > { %11486 = vmatmul.mubr.msk.bf16.gmra.mrb[216].mxu1 %vm1530_vm5, %v14633_v22 }
 0x364   : > { %11830 = vmatmul.mubr.msk.bf16.vlgmr.msra.gmra.mrb[0].mxu0 %vm1530_vm5, %v15605_v38  ;;  %11489 = vmatprep.mubr.msk.bf16.mxu1 %vm1530_vm5, %v14635_v12  ;;  %v2799_v38 = vld [vmem:[#allocation2 + $0xd4] sm:$0xff] }
 0x365   : > { %11833 = vmatprep.mubr.msk.bf16.mxu0 %vm1530_vm5, %v15606_v5  ;;  %11862 = vmatpush3.bf16.msra.mxu0 %v14511_v31  ;;  %v2800_v31 = vld [vmem:[#allocation2 + $0xdc] sm:$0xff] }
 0x366   : > { %11863 = vmatprep.subr.bf16.mxu0 %v13060_v57  ;;  %v14675_v5 = vpack.c.bf16 %v2800_v31, %v2799_v38  ;;  %v6152_v38 = vld [vmem:[#allocation2 + $0x9e] sm:$0xff] }
 0x369   : > { %11864 = vmatpush3.bf16.msra.mxu0 %v13060_v57  ;;  %v2802_v57 = vld [vmem:[#allocation2 + $0xec] sm:$0xff] }
 0x36a   : > { %11897 = vmatprep.subr.bf16.mxu0 %v14656_v36  ;;  %v14677_v39 = vpack.c.bf16 %v2802_v57, %v2801_v4  ;;  %v6147_v57 = vld [vmem:[#allocation2 + $0x76] sm:$0xff] }
 0x36b   : > { %11490 = vmatmul.mubr.msk.bf16.gmra.mrb[220].mxu1 %vm1530_vm5, %v14658_v45 }
 0x36c   : > { %11834 = vmatmul.mubr.msk.bf16.gmra.mrb[4].mxu0 %vm1530_vm5, %v15607_v63  ;;  %11493 = vmatprep.mubr.msk.bf16.mxu1 %vm1530_vm5, %v14660_v52  ;;  %v6148_v63 = vld [vmem:[#allocation2 + $0x7e] sm:$0xff] }
 0x36d   : > { %11837 = vmatprep.mubr.msk.bf16.mxu0 %vm1530_vm5, %v15608_v24  ;;  %v6145_v24 = vld [vmem:[#allocation2 + $0x66] sm:$0xff] }
 0x373   : > { %11494 = vmatmul.mubr.msk.bf16.gmra.mrb[224].mxu1 %vm1530_vm5, %v14675_v5 }
 0x374   : > { %11838 = vmatmul.mubr.msk.bf16.gmra.mrb[8].mxu0 %vm1530_vm5, %v15609_v13  ;;  %11497 = vmatprep.mubr.msk.bf16.mxu1 %vm1530_vm5, %v14677_v39  ;;  %v6151_v13 = vld [vmem:[#allocation2 + $0x96] sm:$0xff] }
 0x375   : > { %11841 = vmatprep.mubr.msk.bf16.mxu0 %vm1530_vm5, %v15610_v55  ;;  %v6177_v55 = vpack.c.bf16 %v6152_v38, %v6151_v13  ;;  %v15644_v38 = vld [vmem:[#allocation31_spill] sm:$0xff]  ;;  %v15646_v13 = vld [vmem:[#allocation33_spill] sm:$0xff] }
 0x37b   : > { %11498 = vmatmul.mubr.msk.bf16.gmra.mrb[228].mxu1 %vm1530_vm5, %v14691_v14 }
 0x37c   : > { %11842 = vmatmul.mubr.msk.bf16.gmra.mrb[12].mxu0 %vm1530_vm5, %v15611_v33  ;;  %11505 = vmatprep.mubr.msk.bf16.mxu1 %vm1530_vm5, %v14311_v10  ;;  %v14743_v10 = vpack.c.bf16 %v5862_v25, %v5861_v19  ;;  %v15626_v25 = vld [vmem:[#allocation13_spill] sm:$0xff]  ;;  %v13068_v19 = vld [vmem:[%s15512_s3 + $0x118] sm:$0xff]  }
 0x37d   : > { %11845 = vmatprep.mubr.msk.bf16.mxu0 %vm1530_vm5, %v15612_v0  ;;  %v6178_v0 = vpack.c.bf16 %v6154_v58, %v6153_v50  ;;  %v15649_v50 = vld [vmem:[#allocation36_spill] sm:$0xff] }
 0x383   : > { %11506 = vmatmul.mubr.msk.bf16.vlgmr.msra.gmra.mrb[200].mxu1 %vm1530_vm5, %v14313_v27  ;;  %v6171_v27 = vpack.c.bf16 %v6140_v30, %v6139_v17  ;;  %v15630_v30 = vld [vmem:[#allocation17_spill] sm:$0xff]  ;;  %v15631_v17 = vld [vmem:[#allocation18_spill] sm:$0xff] }
 0x384   : > { %11846 = vmatmul.mubr.msk.bf16.gmra.mrb[16].mxu0 %vm1530_vm5, %v15613_v51  ;;  %11509 = vmatprep.mubr.msk.bf16.mxu1 %vm1530_vm5, %v14330_v8  ;;  %v6142_v8 = vld [vmem:[#allocation2 + $0x4e] sm:$0xff] }
 0x385   : > { %11849 = vmatprep.mubr.msk.bf16.mxu0 %vm1530_vm5, %v15614_v62  ;;  %11538 = vmatpush3.bf16.msra.mxu1 %v14582_v23  ;;  %v15624_v51 = vld [vmem:[#allocation11_spill] sm:$0xff]  ;;  %v6169_v62 = vld [vmem:[#allocation2 + $0x126] sm:$0xff] }
 0x386   : > { %11539 = vmatprep.subr.bf16.mxu1 %v13063_v59 }
 0x389   : > { %11540 = vmatpush3.bf16.msra.mxu1 %v13063_v59  ;;  %v15623_v59 = vld [vmem:[#allocation10_spill] sm:$0xff] }
 0x38a   : > { %11573 = vmatprep.subr.bf16.mxu1 %v14724_v29 }
 0x38b   : > { %11510 = vmatmul.mubr.msk.bf16.gmra.mrb[204].mxu1 %vm1530_vm5, %v14332_v20  ;;  %v6144_v20 = vld [vmem:[#allocation2 + $0x5e] sm:$0xff] }
 0x38c   : > { %11850 = vmatmul.mubr.msk.bf16.gmra.mrb[20].mxu0 %vm1530_vm5, %v15615_v56  ;;  %11513 = vmatprep.mubr.msk.bf16.mxu1 %vm1530_vm5, %v14341_v40  ;;  %v6141_v40 = vld [vmem:[#allocation2 + $0x46] sm:$0xff] }
 0x38d   : > { %11853 = vmatprep.mubr.msk.bf16.mxu0 %vm1530_vm5, %v15616_v44  ;;  %v15625_v44 = vld [vmem:[#allocation12_spill] sm:$0xff] }
 0x393   : > { %11514 = vmatmul.mubr.msk.bf16.gmra.mrb[208].mxu1 %vm1530_vm5, %v14343_v28  ;;  %v6172_v28 = vpack.c.bf16 %v6142_v8, %v6141_v40  ;;  %v15632_v8 = vld [vmem:[#allocation19_spill] sm:$0xff]  ;;  %v15634_v40 = vld [vmem:[#allocation21_spill] sm:$0xff] }
 0x394   : > { %11854 = vmatmul.mubr.msk.bf16.gmra.mrb[24].mxu0 %vm1530_vm5, %v5878_v41  ;;  %11517 = vmatprep.mubr.msk.bf16.mxu1 %vm1530_vm5, %v14351_v35  ;;  %v6143_v35 = vld [vmem:[#allocation2 + $0x56] sm:$0xff]  ;;  %v15627_v41 = vld [vmem:[#allocation14_spill] sm:$0xff] }
 0x395   : > { %11857 = vmatprep.mubr.msk.bf16.mxu0 %vm1530_vm5, %v14743_v10  ;;  %v6173_v23 = vpack.c.bf16 %v6144_v20, %v6143_v35  ;;  %v15633_v20 = vld [vmem:[#allocation20_spill] sm:$0xff]  ;;  %v15636_v35 = vld [vmem:[#allocation23_spill] sm:$0xff] }
 0x39b   : > { %11518 = vmatmul.mubr.msk.bf16.gmra.mrb[212].mxu1 %vm1530_vm5, %v14353_v60  ;;  %v6146_v60 = vld [vmem:[#allocation2 + $0x6e] sm:$0xff] }
 0x39c   : > { %11858 = vmatmul.mubr.msk.bf16.gmra.mrb[28].mxu0 %vm1530_vm5, %v14752_v34  ;;  %11521 = vmatprep.mubr.msk.bf16.mxu1 %vm1530_vm5, %v14362_v1  ;;  %v13065_v1 = vld [vmem:[%s15512_s3 + $0x110] sm:$0xff]   ;;  %v6174_v31 = vpack.c.bf16 %v6146_v60, %v6145_v24  ;;  %v15639_v60 = vld [vmem:[#allocation26_spill] sm:$0xff] }
 0x39d   : > { %11865 = vmatprep.mubr.msk.bf16.mxu0 %vm1530_vm5, %v6171_v27  ;;  %v13069_v27 = vld [vmem:[%s15512_s3 + $0x120] sm:$0xff]  }
 0x3a3   : > { %11522 = vmatmul.mubr.msk.bf16.gmra.mrb[216].mxu1 %vm1530_vm5, %v14364_v7  ;;  %v6175_v7 = vpack.c.bf16 %v6148_v63, %v6147_v57  ;;  %v3415_v63 = vld [vmem:[#allocation2 + $0x103] sm:$0xff] }
 0x3a4   : > { %11866 = vmatmul.mubr.msk.bf16.vlgmr.msra.gmra.mrb[0].mxu0 %vm1530_vm5, %v6172_v28  ;;  %11525 = vmatprep.mubr.msk.bf16.mxu1 %vm1530_vm5, %v14383_v54  ;;  %v6149_v54 = vld [vmem:[#allocation2 + $0x86] sm:$0xff] }
 0x3a5   : > { %11869 = vmatprep.mubr.msk.bf16.mxu0 %vm1530_vm5, %v6173_v23  ;;  %11898 = vmatpush3.bf16.msra.mxu0 %v14656_v36  ;;  %v6150_v36 = vld [vmem:[#allocation2 + $0x8e] sm:$0xff]  ;;  %v15637_v23 = vld [vmem:[#allocation24_spill] sm:$0xff]  ;;  %v15641_v57 = vld [vmem:[#allocation29_spill] sm:$0xff] }
 0x3a6   : > { %11899 = vmatprep.subr.bf16.mxu0 %v13064_v53  ;;  %v6176_v4 = vpack.c.bf16 %v6150_v36, %v6149_v54  ;;  %v15635_v28 = vld [vmem:[#allocation22_spill] sm:$0xff] }
 0x3a7   : > { %v13071_v54 = vld [vmem:[%s15512_s3 + $0x88] sm:$0xff]  }
 0x3a8   : > { %v15643_v36 = vld [vmem:[#allocation30_spill] sm:$0xff] }
 0x3a9   : > { %11900 = vmatpush3.bf16.msra.mxu0 %v13064_v53  ;;  %v15638_v53 = vld [vmem:[#allocation25_spill] sm:$0xff] }
 0x3aa   : > { %11933 = vmatprep.subr.bf16.mxu0 %v13065_v1 }
 0x3ab   : > { %11526 = vmatmul.mubr.msk.bf16.gmra.mrb[220].mxu1 %vm1530_vm5, %v14385_v32  ;;  %v3109_v32 = vld [vmem:[#allocation2 + $0x102] sm:$0xff] }
 0x3ac   : > { %11870 = vmatmul.mubr.msk.bf16.gmra.mrb[4].mxu0 %vm1530_vm5, %v6174_v31  ;;  %11529 = vmatprep.mubr.msk.bf16.mxu1 %vm1530_vm5, %v14396_v47  ;;  %v3110_v47 = vld [vmem:[#allocation2 + $0x10a] sm:$0xff] }
 0x3ad   : > { %11873 = vmatprep.mubr.msk.bf16.mxu0 %vm1530_vm5, %v6175_v7  ;;  %v3126_v33 = vpack.c.bf16 %v3110_v47, %v3109_v32  ;;  %v15640_v31 = vld [vmem:[#allocation27_spill] sm:$0xff]  ;;  %v15642_v7 = vld [vmem:[#allocation28_spill] sm:$0xff]  ;;  %v15647_v32 = vld [vmem:[#allocation34_spill] sm:$0xff] }
 0x3ae   : > { %v15648_v47 = vld [vmem:[#allocation35_spill] sm:$0xff] }
 0x3b3   : > { %11530 = vmatmul.mubr.msk.bf16.gmra.mrb[224].mxu1 %vm1530_vm5, %v14398_v16  ;;  %v13067_v16 = vld [vmem:[%s15512_s3 + $0x78] sm:$0xff]  }
 0x3b4   : > { %11874 = vmatmul.mubr.msk.bf16.gmra.mrb[8].mxu0 %vm1530_vm5, %v6176_v4  ;;  %11533 = vmatprep.mubr.msk.bf16.mxu1 %vm1530_vm5, %v14408_v11  ;;  %v13070_v11 = vld [vmem:[%s15512_s3 + $0x80] sm:$0xff]   ;;  %v15645_v4 = vld [vmem:[#allocation32_spill] sm:$0xff] }
 0x3b5   : > { %11877 = vmatprep.mubr.msk.bf16.mxu0 %vm1530_vm5, %v6177_v55  ;;  %v14881_v55 = vld [vmem:[%s15512_s3 + $0x90] sm:$0xff]  }
 0x3bb   : > { %11534 = vmatmul.mubr.msk.bf16.gmra.mrb[228].mxu1 %vm1530_vm5, %v3126_v33  ;;  %v6752_v33 = vld [vmem:[#allocation2 + $0x40] sm:$0xff] }
 0x3bc   : > { %11878 = vmatmul.mubr.msk.bf16.gmra.mrb[12].mxu0 %vm1530_vm5, %v6178_v0  ;;  %11541 = vmatprep.mubr.msk.bf16.mxu1 %vm1530_vm5, %v14417_v48  ;;  %v15617_v48 = vld [vmem:[#allocation4_spill] sm:$0xff] }
 0x3bd   : > { %11881 = vmatprep.mubr.msk.bf16.mxu0 %vm1530_vm5, %v14419_v43  ;;  %v15618_v43 = vld [vmem:[#allocation5_spill] sm:$0xff]  ;;  %v6751_v0 = vld [vmem:[#allocation2 + $0x38] sm:$0xff] }
 0x3c3   : > { %11542 = vmatmul.mubr.msk.bf16.vlgmr.msra.gmra.mrb[200].mxu1 %vm1530_vm5, %v14421_v9  ;;  %v15619_v9 = vld [vmem:[#allocation6_spill] sm:$0xff] }
 0x3c4   : > { %11882 = vmatmul.mubr.msk.bf16.gmra.mrb[16].mxu0 %vm1530_vm5, %v14423_v2  ;;  %11545 = vmatprep.mubr.msk.bf16.mxu1 %vm1530_vm5, %v14442_v18  ;;  %v15620_v2 = vld [vmem:[#allocation7_spill] sm:$0xff]  ;;  %v15621_v18 = vld [vmem:[#allocation8_spill] sm:$0xff] }
 0x3c5   : > { %11885 = vmatprep.mubr.msk.bf16.mxu0 %vm1530_vm5, %v14444_v21  ;;  %11574 = vmatpush3.bf16.msra.mxu1 %v14724_v29  ;;  %v15622_v21 = vld [vmem:[#allocation9_spill] sm:$0xff]  ;;  %v6170_v29 = vld [vmem:[#allocation2 + $0x12e] sm:$0xff] }
 0x3c6   : > { %11575 = vmatprep.subr.bf16.mxu1 %v13067_v16  ;;  %v6186_v56 = vpack.c.bf16 %v6170_v29, %v6169_v62  ;;  %v6764_v62 = vld [vmem:[#allocation2 + $0xa0] sm:$0xff]  ;;  %v6761_v29 = vld [vmem:[#allocation2 + $0x88] sm:$0xff] }
 0x3c9   : > { %11576 = vmatpush3.bf16.msra.mxu1 %v13067_v16  ;;  %v6783_v16 = vpack.c.bf16 %v6752_v33, %v6751_v0  ;;  %v4007_v33 = vld [vmem:[#allocation2 + $0x65] sm:$0xff] }
 0x3ca   : > { %11609 = vmatprep.subr.bf16.mxu1 %v13070_v11 }
 0x3cb   : > { %11546 = vmatmul.mubr.msk.bf16.gmra.mrb[204].mxu1 %vm1530_vm5, %v15617_v48  ;;  %v6755_v48 = vld [vmem:[#allocation2 + $0x58] sm:$0xff] }
 0x3cc   : > { %11886 = vmatmul.mubr.msk.bf16.gmra.mrb[20].mxu0 %vm1530_vm5, %v15618_v43  ;;  %11549 = vmatprep.mubr.msk.bf16.mxu1 %vm1530_vm5, %v15619_v9  ;;  %v13072_v9 = vld [vmem:[%s15512_s3 + $0x128] sm:$0xff]  }
 0x3cd   : > { %11889 = vmatprep.mubr.msk.bf16.mxu0 %vm1530_vm5, %v15620_v2  ;;  %v6760_v2 = vld [vmem:[#allocation2 + $0x80] sm:$0xff] }
 0x3d3   : > { %11550 = vmatmul.mubr.msk.bf16.gmra.mrb[208].mxu1 %vm1530_vm5, %v15621_v18  ;;  %v6757_v18 = vld [vmem:[#allocation2 + $0x68] sm:$0xff] }
 0x3d4   : > { %11890 = vmatmul.mubr.msk.bf16.gmra.mrb[24].mxu0 %vm1530_vm5, %v15622_v21  ;;  %11553 = vmatprep.mubr.msk.bf16.mxu1 %vm1530_vm5, %v15623_v59  ;;  %v6759_v21 = vld [vmem:[#allocation2 + $0x78] sm:$0xff] }
 0x3d5   : > { %11893 = vmatprep.mubr.msk.bf16.mxu0 %vm1530_vm5, %v15624_v51  ;;  %v14928_v59 = vpack.c.bf16 %v6760_v2, %v6759_v21  ;;  %v6763_v51 = vld [vmem:[#allocation2 + $0x98] sm:$0xff]  ;;  %v7058_v2 = vld [vmem:[#allocation2 + $0x41] sm:$0xff] }
 0x3d6   : > { %v4013_v21 = vld [vmem:[#allocation2 + $0x95] sm:$0xff] }
 0x3db   : > { %11554 = vmatmul.mubr.msk.bf16.gmra.mrb[212].mxu1 %vm1530_vm5, %v15625_v44  ;;  %v14941_v44 = vpack.c.bf16 %v6764_v62, %v6763_v51 }
 0x3dc   : > { %11894 = vmatmul.mubr.msk.bf16.gmra.mrb[28].mxu0 %vm1530_vm5, %v6186_v56  ;;  %11557 = vmatprep.mubr.msk.bf16.mxu1 %vm1530_vm5, %v15626_v25  ;;  %v3722_v25 = vld [vmem:[#allocation2 + $0x10c] sm:$0xff] }
 0x3dd   : > { %11901 = vmatprep.mubr.msk.bf16.mxu0 %vm1530_vm5, %v15627_v41  ;;  %v6766_v41 = vld [vmem:[#allocation2 + $0xb0] sm:$0xff] }
 0x3e3   : > { %11558 = vmatmul.mubr.msk.bf16.gmra.mrb[216].mxu1 %vm1530_vm5, %v15628_v61  ;;  %v6768_v61 = vld [vmem:[#allocation2 + $0xc0] sm:$0xff] }
 0x3e4   : > { %11902 = vmatmul.mubr.msk.bf16.vlgmr.msra.gmra.mrb[0].mxu0 %vm1530_vm5, %v15629_v46  ;;  %11561 = vmatprep.mubr.msk.bf16.mxu1 %vm1530_vm5, %v15630_v30  ;;  %v3721_v46 = vld [vmem:[#allocation2 + $0x104] sm:$0xff] }
 0x3e5   : > { %11905 = vmatprep.mubr.msk.bf16.mxu0 %vm1530_vm5, %v15631_v17  ;;  %11934 = vmatpush3.bf16.msra.mxu0 %v13065_v1  ;;  %v3416_v1 = vld [vmem:[#allocation2 + $0x10b] sm:$0xff] }
 0x3e6   : > { %11935 = vmatprep.subr.bf16.mxu0 %v13068_v19  ;;  %v3432_v24 = vpack.c.bf16 %v3416_v1, %v3415_v63  ;;  %v6765_v30 = vld [vmem:[#allocation2 + $0xa8] sm:$0xff]  ;;  %v4001_v1 = vld [vmem:[#allocation2 + $0x35] sm:$0xff] }
 0x3e7   : > { %v6771_v63 = vld [vmem:[#allocation2 + $0xd8] sm:$0xff] }
 0x3e9   : > { %11936 = vmatpush3.bf16.msra.mxu0 %v13068_v19  ;;  %v6767_v19 = vld [vmem:[#allocation2 + $0xb8] sm:$0xff] }
 0x3ea   : > { %11969 = vmatprep.subr.bf16.mxu0 %v13069_v27 }
 0x3eb   : > { %11562 = vmatmul.mubr.msk.bf16.gmra.mrb[220].mxu1 %vm1530_vm5, %v15632_v8  ;;  %v14953_v8 = vpack.c.bf16 %v6768_v61, %v6767_v19  ;;  %v4017_v61 = vld [vmem:[#allocation2 + $0xb5] sm:$0xff] }
 0x3ec   : > { %11906 = vmatmul.mubr.msk.bf16.gmra.mrb[4].mxu0 %vm1530_vm5, %v15633_v20  ;;  %11565 = vmatprep.mubr.msk.bf16.mxu1 %vm1530_vm5, %v15634_v40  ;;  %v6770_v20 = vld [vmem:[#allocation2 + $0xd0] sm:$0xff]  ;;  %v4002_v40 = vld [vmem:[#allocation2 + $0x3d] sm:$0xff] }
 0x3ed   : > { %11909 = vmatprep.mubr.msk.bf16.mxu0 %vm1530_vm5, %v15635_v28  ;;  %v6772_v28 = vld [vmem:[#allocation2 + $0xe0] sm:$0xff] }
 0x3f3   : > { %11566 = vmatmul.mubr.msk.bf16.gmra.mrb[224].mxu1 %vm1530_vm5, %v15636_v35  ;;  %v3999_v35 = vld [vmem:[#allocation2 + $0x25] sm:$0xff] }
 0x3f4   : > { %11910 = vmatmul.mubr.msk.bf16.gmra.mrb[8].mxu0 %vm1530_vm5, %v15637_v23  ;;  %11569 = vmatprep.mubr.msk.bf16.mxu1 %vm1530_vm5, %v15638_v53  ;;  %v6769_v23 = vld [vmem:[#allocation2 + $0xc8] sm:$0xff] }
 0x3f5   : > { %11913 = vmatprep.mubr.msk.bf16.mxu0 %vm1530_vm5, %v15639_v60  ;;  %v14961_v60 = vpack.c.bf16 %v6770_v20, %v6769_v23  ;;  %v7064_v20 = vld [vmem:[#allocation2 + $0x71] sm:$0xff]  ;;  %v4019_v23 = vld [vmem:[#allocation2 + $0xc5] sm:$0xff] }
 0x3fb   : > { %11570 = vmatmul.mubr.msk.bf16.gmra.mrb[228].mxu1 %vm1530_vm5, %v3432_v24  ;;  %v4031_v24 = vpack.c.bf16 %v4002_v40, %v4001_v1  ;;  %v15016_v40 = vld [vmem:[%s15512_s3 + $0x140] sm:$0xff]  }
 0x3fc   : > { %11914 = vmatmul.mubr.msk.bf16.gmra.mrb[12].mxu0 %vm1530_vm5, %v15640_v31  ;;  %11577 = vmatprep.mubr.msk.bf16.mxu1 %vm1530_vm5, %v15642_v7  ;;  %v14963_v31 = vpack.c.bf16 %v6772_v28, %v6771_v63  ;;  %v6774_v7 = vld [vmem:[#allocation2 + $0xf0] sm:$0xff]  ;;  %v4022_v28 = vld [vmem:[#allocation2 + $0xdd] sm:$0xff] }
 0x3fd   : > { %11917 = vmatprep.mubr.msk.bf16.mxu0 %vm1530_vm5, %v15641_v57  ;;  %v4004_v57 = vld [vmem:[#allocation2 + $0x4d] sm:$0xff] }
 0x403   : > { %11578 = vmatmul.mubr.msk.bf16.vlgmr.msra.gmra.mrb[200].mxu1 %vm1530_vm5, %v15643_v36  ;;  %v4006_v36 = vld [vmem:[#allocation2 + $0x5d] sm:$0xff] }
 0x404   : > { %11918 = vmatmul.mubr.msk.bf16.gmra.mrb[16].mxu0 %vm1530_vm5, %v15644_v38  ;;  %11581 = vmatprep.mubr.msk.bf16.mxu1 %vm1530_vm5, %v15645_v4  ;;  %v4003_v38 = vld [vmem:[#allocation2 + $0x45] sm:$0xff] }
 0x405   : > { %11921 = vmatprep.mubr.msk.bf16.mxu0 %vm1530_vm5, %v15646_v13  ;;  %11610 = vmatpush3.bf16.msra.mxu1 %v13070_v11  ;;  %v6773_v4 = vld [vmem:[#allocation2 + $0xe8] sm:$0xff]  ;;  %v4032_v13 = vpack.c.bf16 %v4004_v57, %v4003_v38  ;;  %v7065_v57 = vld [vmem:[#allocation2 + $0x79] sm:$0xff] }
 0x406   : > { %11611 = vmatprep.subr.bf16.mxu1 %v13071_v54  ;;  %v4026_v38 = vld [vmem:[#allocation2 + $0xfd] sm:$0xff] }
 0x409   : > { %11612 = vmatpush3.bf16.msra.mxu1 %v13071_v54  ;;  %v13086_v54 = vld [vmem:[%s15512_s3 + $0x98] sm:$0xff]  }
 0x40a   : > { %12249 = vmatprep.subr.bf16.mxu1 %v14881_v55 }
 0x40b   : > { %11582 = vmatmul.mubr.msk.bf16.gmra.mrb[204].mxu1 %vm1530_vm5, %v14588_v6  ;;  %v6475_v6 = vld [vmem:[#allocation2 + $0x127] sm:$0xff] }
 0x40c   : > { %11922 = vmatmul.mubr.msk.bf16.gmra.mrb[20].mxu0 %vm1530_vm5, %v14590_v42  ;;  %11585 = vmatprep.mubr.msk.bf16.mxu1 %vm1530_vm5, %v15647_v32  ;;  %v6476_v42 = vld [vmem:[#allocation2 + $0x12f] sm:$0xff]  ;;  %v14975_v32 = vpack.c.bf16 %v6774_v7, %v6773_v4  ;;  %v7069_v4 = vld [vmem:[#allocation2 + $0x99] sm:$0xff] }
 0x40d   : > { %11925 = vmatprep.mubr.msk.bf16.mxu0 %vm1530_vm5, %v14603_v15  ;;  %v6492_v58 = vpack.c.bf16 %v6476_v42, %v6475_v6  ;;  %v6756_v15 = vld [vmem:[#allocation2 + $0x60] sm:$0xff]  ;;  %v4008_v42 = vld [vmem:[#allocation2 + $0x6d] sm:$0xff] }
 0x40e   : > { %v14908_v43 = vpack.c.bf16 %v6756_v15, %v6755_v48  ;;  %v4034_v0 = vpack.c.bf16 %v4008_v42, %v4007_v33  ;;  %v6782_v15 = vld [vmem:[#allocation2 + $0x130] sm:$0xff] }
 0x40f   : > { %v4012_v48 = vld [vmem:[#allocation2 + $0x8d] sm:$0xff] }
 0x413   : > { %11586 = vmatmul.mubr.msk.bf16.gmra.mrb[208].mxu1 %vm1530_vm5, %v14605_v26  ;;  %v6754_v26 = vld [vmem:[#allocation2 + $0x50] sm:$0xff] }
 0x414   : > { %11926 = vmatmul.mubr.msk.bf16.gmra.mrb[24].mxu0 %vm1530_vm5, %v15648_v47  ;;  %11589 = vmatprep.mubr.msk.bf16.mxu1 %vm1530_vm5, %v14617_v49  ;;  %v6753_v49 = vld [vmem:[#allocation2 + $0x48] sm:$0xff]  ;;  %v4005_v47 = vld [vmem:[#allocation2 + $0x55] sm:$0xff] }
 0x415   : > { %11929 = vmatprep.mubr.msk.bf16.mxu0 %vm1530_vm5, %v15649_v50  ;;  %v14906_v11 = vpack.c.bf16 %v6754_v26, %v6753_v49  ;;  %v14977_v50 = vld [vmem:[#allocation2 + $0xf8] sm:$0xff]  ;;  %v4033_v6 = vpack.c.bf16 %v4006_v36, %v4005_v47  ;;  %v4011_v49 = vld [vmem:[#allocation2 + $0x85] sm:$0xff] }
 0x416   : > { %v7068_v36 = vld [vmem:[#allocation2 + $0x91] sm:$0xff]  ;;  %v4023_v47 = vld [vmem:[#allocation2 + $0xe5] sm:$0xff] }
 0x41b   : > { %11590 = vmatmul.mubr.msk.bf16.gmra.mrb[212].mxu1 %vm1530_vm5, %v14621_v3  ;;  %v6758_v3 = vld [vmem:[#allocation2 + $0x70] sm:$0xff] }
 0x41c   : > { %11930 = vmatmul.mubr.msk.bf16.gmra.mrb[28].mxu0 %vm1530_vm5, %v6492_v58  ;;  %11593 = vmatprep.mubr.msk.bf16.mxu1 %vm1530_vm5, %v14633_v22  ;;  %v14924_v22 = vld [vmem:[%s15512_s3 + $0x130] sm:$0xff]   ;;  %v4010_v58 = vld [vmem:[#allocation2 + $0x7d] sm:$0xff] }
 0x41d   : > { %11937 = vmatprep.mubr.msk.bf16.mxu0 %vm1530_vm5, %v6783_v16  ;;  %v4009_v16 = vld [vmem:[#allocation2 + $0x75] sm:$0xff] }
 0x41e   : > { %v4035_v26 = vpack.c.bf16 %v4010_v58, %v4009_v16  ;;  %v4025_v58 = vld [vmem:[#allocation2 + $0xf5] sm:$0xff]  ;;  %v4028_v16 = vld [vmem:[#allocation2 + $0x10d] sm:$0xff] }
 0x41f   : > { %v4043_v33 = vpack.c.bf16 %v4026_v38, %v4025_v58  ;;  %v4334_v38 = vld [vmem:[#allocation2 + $0x10e] sm:$0xff] }
 0x423   : > { %11594 = vmatmul.mubr.msk.bf16.gmra.mrb[216].mxu1 %vm1530_vm5, %v14635_v12  ;;  %v14926_v12 = vpack.c.bf16 %v6758_v3, %v6757_v18  ;;  %v4014_v3 = vld [vmem:[#allocation2 + $0x9d] sm:$0xff]  ;;  %v4036_v18 = vpack.c.bf16 %v4012_v48, %v4011_v49  ;;  %v4027_v48 = vld [vmem:[#allocation2 + $0x105] sm:$0xff] }
 0x424   : > { %11938 = vmatmul.mubr.msk.bf16.vlgmr.msra.gmra.mrb[0].mxu0 %vm1530_vm5, %v14906_v11  ;;  %11597 = vmatprep.mubr.msk.bf16.mxu1 %vm1530_vm5, %v14658_v45  ;;  %v6762_v45 = vld [vmem:[#allocation2 + $0x90] sm:$0xff]  ;;  %v4037_v51 = vpack.c.bf16 %v4014_v3, %v4013_v21  ;;  %v7074_v49 = vld [vmem:[#allocation2 + $0xc1] sm:$0xff] }
 0x425   : > { %11941 = vmatprep.mubr.msk.bf16.mxu0 %vm1530_vm5, %v14908_v43  ;;  %11970 = vmatpush3.bf16.msra.mxu0 %v13069_v27  ;;  %v14939_v56 = vpack.c.bf16 %v6762_v45, %v6761_v29  ;;  %v3738_v27 = vpack.c.bf16 %v3722_v25, %v3721_v46  ;;  %v7057_v45 = vld [vmem:[#allocation2 + $0x39] sm:$0xff]  ;;  %v7060_v29 = vld [vmem:[#allocation2 + $0x51] sm:$0xff]  ;;  %v7059_v25 = vld [vmem:[#allocation2 + $0x49] sm:$0xff] }
 0x426   : > { %11971 = vmatprep.subr.bf16.mxu0 %v13072_v9  ;;  %v7089_v62 = vpack.c.bf16 %v7058_v2, %v7057_v45  ;;  %v14999_v19 = vpack.c.bf16 %v7060_v29, %v7059_v25  ;;  %v7061_v46 = vld [vmem:[#allocation2 + $0x59] sm:$0xff]  ;;  %v7071_v3 = vld [vmem:[#allocation2 + $0xa9] sm:$0xff]  ;;  %v4044_v2 = vpack.c.bf16 %v4028_v16, %v4027_v48  ;;  %v7078_v29 = vld [vmem:[#allocation2 + $0xe1] sm:$0xff] }
 0x427   : > { %v4323_v21 = vld [vmem:[#allocation2 + $0xb6] sm:$0xff] }
 0x428   : > { %v7363_v48 = vld [vmem:[#allocation2 + $0x3a] sm:$0xff] }
 0x429   : > { %11972 = vmatpush3.bf16.msra.mxu0 %v13072_v9 }
 0x42a   : > { %12005 = vmatprep.subr.bf16.mxu0 %v14924_v22 }
 0x42b   : > { %11598 = vmatmul.mubr.msk.bf16.gmra.mrb[220].mxu1 %vm1530_vm5, %v14660_v52  ;;  %v3997_v52 = vld [vmem:[#allocation2 + $0x15] sm:$0xff] }
 0x42c   : > { %11942 = vmatmul.mubr.msk.bf16.gmra.mrb[4].mxu0 %vm1530_vm5, %v14926_v12  ;;  %11601 = vmatprep.mubr.msk.bf16.mxu1 %vm1530_vm5, %v14675_v5  ;;  %v3998_v5 = vld [vmem:[#allocation2 + $0x1d] sm:$0xff] }
 0x42d   : > { %11945 = vmatprep.mubr.msk.bf16.mxu0 %vm1530_vm5, %v14928_v59  ;;  %v4029_v17 = vpack.c.bf16 %v3998_v5, %v3997_v52  ;;  %v4018_v52 = vld [vmem:[#allocation2 + $0xbd] sm:$0xff] }
 0x42e   : > { %v7062_v5 = vld [vmem:[#allocation2 + $0x61] sm:$0xff] }
 0x433   : > { %11602 = vmatmul.mubr.msk.bf16.gmra.mrb[224].mxu1 %vm1530_vm5, %v14677_v39  ;;  %v14951_v39 = vpack.c.bf16 %v6766_v41, %v6765_v30  ;;  %v4039_v30 = vpack.c.bf16 %v4018_v52, %v4017_v61  ;;  %v4325_v52 = vld [vmem:[#allocation2 + $0xc6] sm:$0xff]  ;;  %v4327_v61 = vld [vmem:[#allocation2 + $0xd6] sm:$0xff] }
 0x434   : > { %11946 = vmatmul.mubr.msk.bf16.gmra.mrb[8].mxu0 %vm1530_vm5, %v14939_v56  ;;  %11605 = vmatprep.mubr.msk.bf16.mxu1 %vm1530_vm5, %v14691_v14  ;;  %v4000_v14 = vld [vmem:[#allocation2 + $0x2d] sm:$0xff] }
 0x435   : > { %11949 = vmatprep.mubr.msk.bf16.mxu0 %vm1530_vm5, %v14941_v44  ;;  %v4030_v53 = vpack.c.bf16 %v4000_v14, %v3999_v35  ;;  %v4020_v14 = vld [vmem:[#allocation2 + $0xcd] sm:$0xff]  ;;  %v7066_v35 = vld [vmem:[#allocation2 + $0x81] sm:$0xff] }
 0x436   : > { %v4040_v1 = vpack.c.bf16 %v4020_v14, %v4019_v23  ;;  %v4330_v14 = vld [vmem:[#allocation2 + $0xee] sm:$0xff]  ;;  %v4329_v23 = vld [vmem:[#allocation2 + $0xe6] sm:$0xff] }
 0x43b   : > { %11606 = vmatmul.mubr.msk.bf16.gmra.mrb[228].mxu1 %vm1530_vm5, %v3738_v27  ;;  %v13074_v27 = vld [vmem:[%s15512_s3 + $0x138] sm:$0xff]  }
 0x43c   : > { %11950 = vmatmul.mubr.msk.bf16.gmra.mrb[12].mxu0 %vm1530_vm5, %v14951_v39  ;;  %11613 = vmatprep.mubr.msk.bf16.mxu1 %vm1530_vm5, %v4029_v17  ;;  %v15001_v17 = vpack.c.bf16 %v7062_v5, %v7061_v46  ;;  %v7075_v5 = vld [vmem:[#allocation2 + $0xc9] sm:$0xff]  ;;  %v7077_v46 = vld [vmem:[#allocation2 + $0xd9] sm:$0xff] }
 0x43d   : > { %11953 = vmatprep.mubr.msk.bf16.mxu0 %vm1530_vm5, %v14953_v8 }
 0x443   : > { %11614 = vmatmul.mubr.msk.bf16.vlgmr.msra.gmra.mrb[200].mxu1 %vm1530_vm5, %v4030_v53  ;;  %v7063_v53 = vld [vmem:[#allocation2 + $0x69] sm:$0xff] }
 0x444   : > { %11954 = vmatmul.mubr.msk.bf16.gmra.mrb[16].mxu0 %vm1530_vm5, %v14961_v60  ;;  %11617 = vmatprep.mubr.msk.bf16.mxu1 %vm1530_vm5, %v4031_v24  ;;  %v15018_v63 = vpack.c.bf16 %v7064_v20, %v7063_v53  ;;  %v4021_v24 = vld [vmem:[#allocation2 + $0xd5] sm:$0xff]  ;;  %v7079_v53 = vld [vmem:[#allocation2 + $0xe9] sm:$0xff] }
 0x445   : > { %11957 = vmatprep.mubr.msk.bf16.mxu0 %vm1530_vm5, %v14963_v31  ;;  %12251 = vmatpush3.bf16.msra.mxu1 %v14881_v55  ;;  %v6795_v55 = vpack.c.bf16 %v14739_v37, %v14977_v50  ;;  %v6781_v37 = vld [vmem:[#allocation2 + $0x128] sm:$0xff]  ;;  %v4041_v7 = vpack.c.bf16 %v4022_v28, %v4021_v24  ;;  %v7080_v20 = vld [vmem:[#allocation2 + $0xf1] sm:$0xff]  ;;  %v4332_v28 = vld [vmem:[#allocation2 + $0xfe] sm:$0xff] }
 0x446   : > { %12250 = vmatprep.subr.bf16.mxu1 %v13086_v54  ;;  %v14992_v9 = vpack.c.bf16 %v6782_v15, %v6781_v37  ;;  %v4324_v37 = vld [vmem:[#allocation2 + $0xbe] sm:$0xff]  ;;  %v15059_v24 = vpack.c.bf16 %v7080_v20, %v7079_v53 }
 0x447   : > { %v7073_v15 = vld [vmem:[#allocation2 + $0xb9] sm:$0xff]  ;;  %v4345_v45 = vpack.c.bf16 %v4324_v37, %v4323_v21  ;;  %v7088_v37 = vld [vmem:[#allocation2 + $0x131] sm:$0xff]  ;;  %v7368_v21 = vld [vmem:[#allocation2 + $0x62] sm:$0xff] }
 0x448   : > { %v7375_v20 = vld [vmem:[#allocation2 + $0x9a] sm:$0xff] }
 0x449   : > { %12252 = vmatpush3.bf16.msra.mxu1 %v13086_v54  ;;  %v4024_v54 = vld [vmem:[#allocation2 + $0xed] sm:$0xff] }
 0x44b   : > { %11618 = vmatmul.mubr.msk.bf16.gmra.mrb[204].mxu1 %vm1530_vm5, %v4032_v13  ;;  %v7070_v13 = vld [vmem:[#allocation2 + $0xa1] sm:$0xff] }
 0x44c   : > { %11958 = vmatmul.mubr.msk.bf16.gmra.mrb[20].mxu0 %vm1530_vm5, %v14975_v32  ;;  %11621 = vmatprep.mubr.msk.bf16.mxu1 %vm1530_vm5, %v4033_v6  ;;  %v7067_v6 = vld [vmem:[#allocation2 + $0x89] sm:$0xff] }
 0x44d   : > { %11961 = vmatprep.mubr.msk.bf16.mxu0 %vm1530_vm5, %v6795_v55  ;;  %v4042_v55 = vpack.c.bf16 %v4024_v54, %v4023_v47  ;;  %v15029_v42 = vpack.c.bf16 %v7068_v36, %v7067_v6  ;;  %v7086_v47 = vld [vmem:[#allocation2 + $0x121] sm:$0xff] }
 0x44e   : > { %v4333_v6 = vld [vmem:[#allocation2 + $0x106] sm:$0xff] }
 0x44f   : > { %v4350_v58 = vpack.c.bf16 %v4334_v38, %v4333_v6  ;;  %v7381_v6 = vld [vmem:[#allocation2 + $0xca] sm:$0xff] }
 0x453   : > { %11622 = vmatmul.mubr.msk.bf16.gmra.mrb[208].mxu1 %vm1530_vm5, %v4034_v0  ;;  %v15031_v0 = vpack.c.bf16 %v7070_v13, %v7069_v4  ;;  %v7084_v4 = vld [vmem:[#allocation2 + $0x111] sm:$0xff]  ;;  %v7085_v13 = vld [vmem:[#allocation2 + $0x119] sm:$0xff] }
 0x454   : > { %11962 = vmatmul.mubr.msk.bf16.gmra.mrb[24].mxu0 %vm1530_vm5, %v14743_v10  ;;  %11625 = vmatprep.mubr.msk.bf16.mxu1 %vm1530_vm5, %v4035_v26  ;;  %v4015_v10 = vld [vmem:[#allocation2 + $0xa5] sm:$0xff]  ;;  %v7072_v26 = vld [vmem:[#allocation2 + $0xb1] sm:$0xff]  ;;  %v15071_v16 = vpack.c.bf16 %v7086_v47, %v7085_v13 }
 0x455   : > { %11965 = vmatprep.mubr.msk.bf16.mxu0 %vm1530_vm5, %v14752_v34  ;;  %v4016_v34 = vld [vmem:[#allocation2 + $0xad] sm:$0xff]  ;;  %v7384_v47 = vld [vmem:[#allocation2 + $0xe2] sm:$0xff] }
 0x456   : > { %v4038_v41 = vpack.c.bf16 %v4016_v34, %v4015_v10  ;;  %v7076_v10 = vld [vmem:[#allocation2 + $0xd1] sm:$0xff]  ;;  %v4328_v34 = vld [vmem:[#allocation2 + $0xde] sm:$0xff] }
 0x457   : > { %v7382_v13 = vld [vmem:[#allocation2 + $0xd2] sm:$0xff] }
 0x45b   : > { %11626 = vmatmul.mubr.msk.bf16.gmra.mrb[212].mxu1 %vm1530_vm5, %v4036_v18  ;;  %v15039_v18 = vpack.c.bf16 %v7072_v26, %v7071_v3  ;;  %v7087_v26 = vld [vmem:[#allocation2 + $0x129] sm:$0xff] }
 0x45c   : > { %11966 = vmatmul.mubr.msk.bf16.gmra.mrb[28].mxu0 %vm1530_vm5, %v14992_v9  ;;  %11629 = vmatprep.mubr.msk.bf16.mxu1 %vm1530_vm5, %v4037_v51  ;;  %v15041_v51 = vpack.c.bf16 %v7074_v49, %v7073_v15  ;;  %v15078_v15 = vpack.c.bf16 %v7088_v37, %v7087_v26  ;;  %v7364_v49 = vld [vmem:[#allocation2 + $0x42] sm:$0xff]  ;;  %v7386_v37 = vld [vmem:[#allocation2 + $0xf2] sm:$0xff] }
 0x45d   : > { %11973 = vmatprep.mubr.msk.bf16.mxu0 %vm1530_vm5, %v7089_v62  ;;  %v4326_v62 = vld [vmem:[#allocation2 + $0xce] sm:$0xff]  ;;  %v7395_v3 = vpack.c.bf16 %v7364_v49, %v7363_v48  ;;  %v7388_v49 = vld [vmem:[#allocation2 + $0x102] sm:$0xff] }
 0x45e   : > { %v4346_v25 = vpack.c.bf16 %v4326_v62, %v4325_v52  ;;  %v13077_v52 = vld [vmem:[%s15512_s3 + $0x150] sm:$0xff]  }
 0x45f   : > { %v7385_v48 = vld [vmem:[#allocation2 + $0xea] sm:$0xff] }
 0x463   : > { %11630 = vmatmul.mubr.msk.bf16.gmra.mrb[216].mxu1 %vm1530_vm5, %v4038_v41  ;;  %v15049_v41 = vpack.c.bf16 %v7076_v10, %v7075_v5  ;;  %v7367_v10 = vld [vmem:[#allocation2 + $0x5a] sm:$0xff]  ;;  %v7370_v5 = vld [vmem:[#allocation2 + $0x72] sm:$0xff] }
 0x464   : > { %11974 = vmatmul.mubr.msk.bf16.vlgmr.msra.gmra.mrb[0].mxu0 %vm1530_vm5, %v14999_v19  ;;  %11633 = vmatprep.mubr.msk.bf16.mxu1 %vm1530_vm5, %v4039_v30  ;;  %v4347_v30 = vpack.c.bf16 %v4328_v34, %v4327_v61  ;;  %v13076_v34 = vld [vmem:[%s15512_s3 + $0x148] sm:$0xff]  }
 0x465   : > { %11977 = vmatprep.mubr.msk.bf16.mxu0 %vm1530_vm5, %v15001_v17  ;;  %12006 = vmatpush3.bf16.msra.mxu0 %v14924_v22  ;;  %v15020_v22 = vpack.c.bf16 %v7066_v35, %v7065_v57  ;;  %v7082_v35 = vld [vmem:[#allocation2 + $0x101] sm:$0xff]  ;;  %v4331_v57 = vld [vmem:[#allocation2 + $0xf6] sm:$0xff]  ;;  %v7369_v61 = vld [vmem:[#allocation2 + $0x6a] sm:$0xff] }
 0x466   : > { %12007 = vmatprep.subr.bf16.mxu0 %v13074_v27  ;;  %v4349_v54 = vpack.c.bf16 %v4332_v28, %v4331_v57  ;;  %v7376_v28 = vld [vmem:[#allocation2 + $0xa2] sm:$0xff]  ;;  %v7379_v57 = vld [vmem:[#allocation2 + $0xba] sm:$0xff] }
 0x467   : > { %v15108_v53 = vpack.c.bf16 %v7376_v28, %v7375_v20  ;;  %v13078_v28 = vld [vmem:[%s15512_s3 + $0x158] sm:$0xff]  }
 0x469   : > { %12008 = vmatpush3.bf16.msra.mxu0 %v13074_v27  ;;  %v15051_v27 = vpack.c.bf16 %v7078_v29, %v7077_v46  ;;  %v15088_v29 = vpack.c.bf16 %v7368_v21, %v7367_v10  ;;  %v15098_v46 = vpack.c.bf16 %v7370_v5, %v7369_v61  ;;  %v7391_v10 = vld [vmem:[#allocation2 + $0x11a] sm:$0xff]  ;;  %v7389_v5 = vld [vmem:[#allocation2 + $0x10a] sm:$0xff] }
 0x46a   : > { %12041 = vmatprep.subr.bf16.mxu0 %v15016_v40 }
 0x46b   : > { %11634 = vmatmul.mubr.msk.bf16.gmra.mrb[220].mxu1 %vm1530_vm5, %v4040_v1  ;;  %v4348_v1 = vpack.c.bf16 %v4330_v14, %v4329_v23 }
 0x46c   : > { %11978 = vmatmul.mubr.msk.bf16.gmra.mrb[4].mxu0 %vm1530_vm5, %v15018_v63  ;;  %11637 = vmatprep.mubr.msk.bf16.mxu1 %vm1530_vm5, %v4041_v7  ;;  %v7081_v7 = vld [vmem:[#allocation2 + $0xf9] sm:$0xff] }
 0x46d   : > { %11981 = vmatprep.mubr.msk.bf16.mxu0 %vm1530_vm5, %v15020_v22  ;;  %v15061_v36 = vpack.c.bf16 %v7082_v35, %v7081_v7  ;;  %v7373_v35 = vld [vmem:[#allocation2 + $0x8a] sm:$0xff]  ;;  %v7380_v7 = vld [vmem:[#allocation2 + $0xc2] sm:$0xff] }
 0x473   : > { %11638 = vmatmul.mubr.msk.bf16.gmra.mrb[224].mxu1 %vm1530_vm5, %v4042_v55  ;;  %v7083_v55 = vld [vmem:[#allocation2 + $0x109] sm:$0xff] }
 0x474   : > { %11982 = vmatmul.mubr.msk.bf16.gmra.mrb[8].mxu0 %vm1530_vm5, %v15029_v42  ;;  %11641 = vmatprep.mubr.msk.bf16.mxu1 %vm1530_vm5, %v4043_v33  ;;  %v15069_v33 = vpack.c.bf16 %v7084_v4, %v7083_v55  ;;  %v15116_v4 = vpack.c.bf16 %v7380_v7, %v7379_v57  ;;  %v15122_v55 = vpack.c.bf16 %v7382_v13, %v7381_v6 }
 0x475   : > { %11985 = vmatprep.mubr.msk.bf16.mxu0 %vm1530_vm5, %v15031_v0 }
 0x47b   : > { %11642 = vmatmul.mubr.msk.bf16.gmra.mrb[228].mxu1 %vm1530_vm5, %v4044_v2  ;;  %v7366_v2 = vld [vmem:[#allocation2 + $0x52] sm:$0xff] }
 0x47c   : > { %11986 = vmatmul.mubr.msk.bf16.gmra.mrb[12].mxu0 %vm1530_vm5, %v15039_v18  ;;  %11669 = vmatprep.mubr.msk.bf16.mxu1 %vm1530_vm5, %v4345_v45  ;;  %v7365_v45 = vld [vmem:[#allocation2 + $0x4a] sm:$0xff] }
 0x47d   : > { %11989 = vmatprep.mubr.msk.bf16.mxu0 %vm1530_vm5, %v15041_v51  ;;  %v15083_v62 = vpack.c.bf16 %v7366_v2, %v7365_v45  ;;  %v7387_v2 = vld [vmem:[#allocation2 + $0xfa] sm:$0xff]  ;;  %v7390_v45 = vld [vmem:[#allocation2 + $0x112] sm:$0xff] }
 0x47e   : > { %v15132_v21 = vpack.c.bf16 %v7388_v49, %v7387_v2 }
 0x483   : > { %11670 = vmatmul.mubr.msk.bf16.vlgmr.msra.gmra.mrb[220].mxu1 %vm1530_vm5, %v4346_v25  ;;  %v7372_v25 = vld [vmem:[#allocation2 + $0x82] sm:$0xff] }
 0x484   : > { %11990 = vmatmul.mubr.msk.bf16.gmra.mrb[16].mxu0 %vm1530_vm5, %v15049_v41  ;;  %11673 = vmatprep.mubr.msk.bf16.mxu1 %vm1530_vm5, %v4347_v30  ;;  %v7371_v30 = vld [vmem:[#allocation2 + $0x7a] sm:$0xff] }
 0x485   : > { %11993 = vmatprep.mubr.msk.bf16.mxu0 %vm1530_vm5, %v15051_v27  ;;  %v15100_v14 = vpack.c.bf16 %v7372_v25, %v7371_v30  ;;  %v15138_v25 = vpack.c.bf16 %v7390_v45, %v7389_v5  ;;  %v7393_v30 = vld [vmem:[#allocation2 + $0x12a] sm:$0xff]  ;;  %v13082_v5 = vld [vmem:[%s15512_s3 + $0x178] sm:$0xff]  }
 0x48b   : > { %11674 = vmatmul.mubr.msk.bf16.gmra.mrb[224].mxu1 %vm1530_vm5, %v4348_v1  ;;  %v7378_v1 = vld [vmem:[#allocation2 + $0xb2] sm:$0xff] }
 0x48c   : > { %11994 = vmatmul.mubr.msk.bf16.gmra.mrb[20].mxu0 %vm1530_vm5, %v15059_v24  ;;  %11677 = vmatprep.mubr.msk.bf16.mxu1 %vm1530_vm5, %v4349_v54  ;;  %v7377_v54 = vld [vmem:[#allocation2 + $0xaa] sm:$0xff] }
 0x48d   : > { %11997 = vmatprep.mubr.msk.bf16.mxu0 %vm1530_vm5, %v15061_v36  ;;  %v15114_v38 = vpack.c.bf16 %v7378_v1, %v7377_v54 }
 0x493   : > { %11678 = vmatmul.mubr.msk.bf16.gmra.mrb[228].mxu1 %vm1530_vm5, %v4350_v58  ;;  %v7383_v58 = vld [vmem:[#allocation2 + $0xda] sm:$0xff] }
 0x494   : > { %11998 = vmatmul.mubr.msk.bf16.gmra.mrb[24].mxu0 %vm1530_vm5, %v15069_v33  ;;  %v15124_v26 = vpack.c.bf16 %v7384_v47, %v7383_v58  ;;  %v13080_v47 = vld [vmem:[%s15512_s3 + $0x168] sm:$0xff]  }
 0x495   : > { %12001 = vmatprep.mubr.msk.bf16.mxu0 %vm1530_vm5, %v15071_v16 }
 0x49c   : > { %12002 = vmatmul.mubr.msk.bf16.gmra.mrb[28].mxu0 %vm1530_vm5, %v15078_v15 }
 0x49d   : > { %12009 = vmatprep.mubr.msk.bf16.mxu0 %vm1530_vm5, %v7395_v3  ;;  %v15130_v3 = vpack.c.bf16 %v7386_v37, %v7385_v48 }
 0x4a4   : > { %12010 = vmatmul.mubr.msk.bf16.vlgmr.msra.gmra.mrb[0].mxu0 %vm1530_vm5, %v15083_v62 }
 0x4a5   : > { %12013 = vmatprep.mubr.msk.bf16.mxu0 %vm1530_vm5, %v15088_v29  ;;  %12042 = vmatpush3.bf16.msra.mxu0 %v15016_v40  ;;  %v7374_v40 = vld [vmem:[#allocation2 + $0x92] sm:$0xff] }
 0x4a6   : > { %12043 = vmatprep.subr.bf16.mxu0 %v13076_v34  ;;  %v15106_v23 = vpack.c.bf16 %v7374_v40, %v7373_v35  ;;  %v7394_v40 = vld [vmem:[#allocation2 + $0x132] sm:$0xff]  ;;  %v13079_v35 = vld [vmem:[%s15512_s3 + $0x160] sm:$0xff]  }
 0x4a7   : > { %v15146_v20 = vpack.c.bf16 %v7394_v40, %v7393_v30 }
 0x4a9   : > { %12044 = vmatpush3.bf16.msra.mxu0 %v13076_v34  ;;  %v7392_v34 = vld [vmem:[#allocation2 + $0x122] sm:$0xff] }
 0x4aa   : > { %12077 = vmatprep.subr.bf16.mxu0 %v13077_v52  ;;  %v15140_v61 = vpack.c.bf16 %v7392_v34, %v7391_v10 }
 0x4ac   : > { %12014 = vmatmul.mubr.msk.bf16.gmra.mrb[4].mxu0 %vm1530_vm5, %v15098_v46 }
 0x4ad   : > { %12017 = vmatprep.mubr.msk.bf16.mxu0 %vm1530_vm5, %v15100_v14 }
 0x4b4   : > { %12018 = vmatmul.mubr.msk.bf16.gmra.mrb[8].mxu0 %vm1530_vm5, %v15106_v23 }
 0x4b5   : > { %12021 = vmatprep.mubr.msk.bf16.mxu0 %vm1530_vm5, %v15108_v53 }
 0x4bc   : > { %12022 = vmatmul.mubr.msk.bf16.gmra.mrb[12].mxu0 %vm1530_vm5, %v15114_v38 }
 0x4bd   : > { %12025 = vmatprep.mubr.msk.bf16.mxu0 %vm1530_vm5, %v15116_v4 }
 0x4c4   : > { %12026 = vmatmul.mubr.msk.bf16.gmra.mrb[16].mxu0 %vm1530_vm5, %v15122_v55 }
 0x4c5   : > { %12029 = vmatprep.mubr.msk.bf16.mxu0 %vm1530_vm5, %v15124_v26 }
 0x4cc   : > { %12030 = vmatmul.mubr.msk.bf16.gmra.mrb[20].mxu0 %vm1530_vm5, %v15130_v3 }
 0x4cd   : > { %12033 = vmatprep.mubr.msk.bf16.mxu0 %vm1530_vm5, %v15132_v21 }
 0x4d4   : > { %12034 = vmatmul.mubr.msk.bf16.gmra.mrb[24].mxu0 %vm1530_vm5, %v15138_v25 }
 0x4d5   : > { %12037 = vmatprep.mubr.msk.bf16.mxu0 %vm1530_vm5, %v15140_v61 }
 0x4dc   : > { %12038 = vmatmul.mubr.msk.bf16.gmra.mrb[28].mxu0 %vm1530_vm5, %v15146_v20 }
 0x4dd   : > { %12045 = vmatprep.mubr.msk.bf16.mxu0 %vm1530_vm5, %v14906_v11  ;;  %v7692_v11 = vld [vmem:[#allocation2 + $0x100] sm:$0xff] }
 0x4e4   : > { %12046 = vmatmul.mubr.msk.bf16.vlgmr.msra.gmra.mrb[0].mxu0 %vm1530_vm5, %v14908_v43  ;;  %v7694_v43 = vld [vmem:[#allocation2 + $0x110] sm:$0xff] }
 0x4e5   : > { %12049 = vmatprep.mubr.msk.bf16.mxu0 %vm1530_vm5, %v14926_v12  ;;  %12078 = vmatpush3.bf16.msra.mxu0 %v13077_v52  ;;  %v7712_v12 = vpack.c.bf16 %v7692_v11, %v14977_v50  ;;  %v8596_v11 = vld [vmem:[#allocation2 + $0x93] sm:$0xff] }
 0x4e6   : > { %12079 = vmatprep.subr.bf16.mxu0 %v13078_v28 }
 0x4e9   : > { %12080 = vmatpush3.bf16.msra.mxu0 %v13078_v28 }
 0x4ea   : > { %12113 = vmatprep.subr.bf16.mxu0 %v13079_v35 }
 0x4ec   : > { %12050 = vmatmul.mubr.msk.bf16.gmra.mrb[4].mxu0 %vm1530_vm5, %v14928_v59  ;;  %v7693_v59 = vld [vmem:[#allocation2 + $0x108] sm:$0xff] }
 0x4ed   : > { %12053 = vmatprep.mubr.msk.bf16.mxu0 %vm1530_vm5, %v14939_v56  ;;  %v7713_v56 = vpack.c.bf16 %v7694_v43, %v7693_v59  ;;  %v8593_v43 = vld [vmem:[#allocation2 + $0x7b] sm:$0xff]  ;;  %v8595_v59 = vld [vmem:[#allocation2 + $0x8b] sm:$0xff] }
 0x4f4   : > { %12054 = vmatmul.mubr.msk.bf16.gmra.mrb[8].mxu0 %vm1530_vm5, %v14941_v44  ;;  %v7695_v44 = vld [vmem:[#allocation2 + $0x118] sm:$0xff] }
 0x4f5   : > { %12057 = vmatprep.mubr.msk.bf16.mxu0 %vm1530_vm5, %v14951_v39  ;;  %v7696_v39 = vld [vmem:[#allocation2 + $0x120] sm:$0xff] }
 0x4fc   : > { %12058 = vmatmul.mubr.msk.bf16.gmra.mrb[12].mxu0 %vm1530_vm5, %v14953_v8  ;;  %v7714_v8 = vpack.c.bf16 %v7696_v39, %v7695_v44  ;;  %v8598_v44 = vld [vmem:[#allocation2 + $0xa3] sm:$0xff]  ;;  %v8600_v39 = vld [vmem:[#allocation2 + $0xb3] sm:$0xff] }
 0x4fd   : > { %12061 = vmatprep.mubr.msk.bf16.mxu0 %vm1530_vm5, %v14961_v60  ;;  %v7699_v60 = vld [vmem:[#allocation2 + $0x138] sm:$0xff] }
 0x504   : > { %12062 = vmatmul.mubr.msk.bf16.gmra.mrb[16].mxu0 %vm1530_vm5, %v14963_v31  ;;  %v7700_v31 = vld [vmem:[#allocation2 + $0x140] sm:$0xff] }
 0x505   : > { %12065 = vmatprep.mubr.msk.bf16.mxu0 %vm1530_vm5, %v14975_v32  ;;  %v7716_v50 = vpack.c.bf16 %v7700_v31, %v7699_v60  ;;  %v8599_v31 = vld [vmem:[#allocation2 + $0xab] sm:$0xff] }
 0x50c   : > { %12066 = vmatmul.mubr.msk.bf16.gmra.mrb[20].mxu0 %vm1530_vm5, %v7712_v12 }
 0x50d   : > { %12069 = vmatprep.mubr.msk.bf16.mxu0 %vm1530_vm5, %v7713_v56  ;;  %v8623_v56 = vpack.c.bf16 %v8596_v11, %v8595_v59  ;;  %v8614_v11 = vld [vmem:[#allocation2 + $0x123] sm:$0xff]  ;;  %v8617_v59 = vld [vmem:[#allocation2 + $0x13b] sm:$0xff] }
 0x514   : > { %12070 = vmatmul.mubr.msk.bf16.gmra.mrb[24].mxu0 %vm1530_vm5, %v7714_v8  ;;  %v8597_v8 = vld [vmem:[#allocation2 + $0x9b] sm:$0xff] }
 0x515   : > { %12073 = vmatprep.mubr.msk.bf16.mxu0 %vm1530_vm5, %v14992_v9  ;;  %v8624_v60 = vpack.c.bf16 %v8598_v44, %v8597_v8  ;;  %v8893_v8 = vld [vmem:[#allocation2 + $0x4c] sm:$0xff] }
 0x516   : > { %v15184_v32 = vpop.f32.mrb[200].mxu1 }
 0x517   : > { %v15186_v52 = vpop.f32.mrb[201].mxu1 }
 0x518   : > { %v15188_v1 = vpop.f32.mrb[202].mxu1 }
 0x519   : > { %v15190_v57 = vpop.f32.mrb[203].mxu1 }
 0x51c   : > { %12074 = vmatmul.mubr.msk.bf16.gmra.mrb[28].mxu0 %vm1530_vm5, %v7716_v50  ;;  %v8625_v50 = vpack.c.bf16 %v8600_v39, %v8599_v31  ;;  %v8894_v39 = vld [vmem:[#allocation2 + $0x54] sm:$0xff]  ;;  %v8895_v31 = vld [vmem:[#allocation2 + $0x5c] sm:$0xff] }
 0x51d   : > { %12081 = vmatprep.mubr.msk.bf16.mxu0 %vm1530_vm5, %v14999_v19  ;;  %v13081_v19 = vld [vmem:[%s15512_s3 + $0x170] sm:$0xff]  }
 0x51e   : > { %v15195_v7 = vpop.f32.mrb[204].mxu1 }
 0x51f   : > { %v15197_v54 = vpop.f32.mrb[205].mxu1 }
 0x520   : > { %v15199_v9 = vpop.f32.mrb[206].mxu1 }
 0x521   : > { %v15201_v13 = vpop.f32.mrb[207].mxu1 }
 0x524   : > { %12082 = vmatmul.mubr.msk.bf16.vlgmr.msra.gmra.mrb[0].mxu0 %vm1530_vm5, %v15001_v17 }
 0x525   : > { %12085 = vmatprep.mubr.msk.bf16.mxu0 %vm1530_vm5, %v15018_v63  ;;  %12114 = vmatpush3.bf16.msra.mxu0 %v13079_v35 }
 0x526   : > { %12115 = vmatprep.subr.bf16.mxu0 %v13080_v47  ;;  %v15213_v6 = vpop.f32.mrb[208].mxu1 }
 0x527   : > { %v15215_v58 = vpop.f32.mrb[209].mxu1 }
 0x528   : > { %v15217_v37 = vpop.f32.mrb[210].mxu1 }
 0x529   : > { %12116 = vmatpush3.bf16.msra.mxu0 %v13080_v47  ;;  %v15219_v49 = vpop.f32.mrb[211].mxu1  ;;  %v8602_v47 = vld [vmem:[#allocation2 + $0xc3] sm:$0xff] }
 0x52a   : > { %12149 = vmatprep.subr.bf16.mxu0 %v13081_v19 }
 0x52c   : > { %12086 = vmatmul.mubr.msk.bf16.gmra.mrb[4].mxu0 %vm1530_vm5, %v15020_v22 }
 0x52d   : > { %12089 = vmatprep.mubr.msk.bf16.mxu0 %vm1530_vm5, %v15029_v42 }
 0x52e   : > { %v15225_v17 = vpop.f32.mrb[212].mxu1 }
 0x52f   : > { %v15227_v63 = vpop.f32.mrb[213].mxu1 }
 0x530   : > { %v15229_v48 = vpop.f32.mrb[214].mxu1 }
 0x531   : > { %v15231_v2 = vpop.f32.mrb[215].mxu1 }
 0x534   : > { %12090 = vmatmul.mubr.msk.bf16.gmra.mrb[8].mxu0 %vm1530_vm5, %v15031_v0  ;;  %v8005_v0 = vld [vmem:[#allocation2 + $0x139] sm:$0xff] }
 0x535   : > { %12093 = vmatprep.mubr.msk.bf16.mxu0 %vm1530_vm5, %v15039_v18  ;;  %v8006_v18 = vld [vmem:[#allocation2 + $0x141] sm:$0xff] }
 0x536   : > { %v15237_v45 = vpop.f32.mrb[216].mxu1 }
 0x537   : > { %v15239_v22 = vpop.f32.mrb[217].mxu1 }
 0x538   : > { %v15241_v10 = vpop.f32.mrb[218].mxu1 }
 0x539   : > { %v15243_v42 = vpop.f32.mrb[219].mxu1 }
 0x53c   : > { %12094 = vmatmul.mubr.msk.bf16.gmra.mrb[12].mxu0 %vm1530_vm5, %v15041_v51 }
 0x53d   : > { %12097 = vmatprep.mubr.msk.bf16.mxu0 %vm1530_vm5, %v15049_v41 }
 0x544   : > { %12098 = vmatmul.mubr.msk.bf16.gmra.mrb[16].mxu0 %vm1530_vm5, %v15051_v27  ;;  %v8022_v27 = vpack.c.bf16 %v8006_v18, %v8005_v0  ;;  %v8604_v0 = vld [vmem:[#allocation2 + $0xd3] sm:$0xff]  ;;  %v8601_v18 = vld [vmem:[#allocation2 + $0xbb] sm:$0xff] }
 0x545   : > { %12101 = vmatprep.mubr.msk.bf16.mxu0 %vm1530_vm5, %v15059_v24 }
 0x54c   : > { %12102 = vmatmul.mubr.msk.bf16.gmra.mrb[20].mxu0 %vm1530_vm5, %v15061_v36 }
 0x54d   : > { %12105 = vmatprep.mubr.msk.bf16.mxu0 %vm1530_vm5, %v15069_v33 }
 0x554   : > { %12106 = vmatmul.mubr.msk.bf16.gmra.mrb[24].mxu0 %vm1530_vm5, %v15071_v16 }
 0x555   : > { %12109 = vmatprep.mubr.msk.bf16.mxu0 %vm1530_vm5, %v15078_v15 }
 0x556   : > { %v15261_v51 = vpop.f32.mrb[220].mxu1 }
 0x557   : > { %v15263_v41 = vpop.f32.mrb[221].mxu1 }
 0x558   : > { %v15265_v24 = vpop.f32.mrb[222].mxu1 }
 0x559   : > { %v15267_v34 = vpop.f32.mrb[223].mxu1 }
 0x55c   : > { %12110 = vmatmul.mubr.msk.bf16.gmra.mrb[28].mxu0 %vm1530_vm5, %v8022_v27  ;;  %v8626_v27 = vpack.c.bf16 %v8602_v47, %v8601_v18  ;;  %v8898_v47 = vld [vmem:[#allocation2 + $0x74] sm:$0xff] }
 0x55d   : > { %12117 = vmatprep.mubr.msk.bf16.mxu0 %vm1530_vm5, %v15083_v62  ;;  %v13083_v62 = vld [vmem:[%s15512_s3 + $0x180] sm:$0xff]  }
 0x55e   : > { %v15272_v36 = vpop.f32.mrb[224].mxu1 }
 0x55f   : > { %v15274_v33 = vpop.f32.mrb[225].mxu1 }
 0x560   : > { %v15276_v16 = vpop.f32.mrb[226].mxu1 }
 0x561   : > { %v15278_v15 = vpop.f32.mrb[227].mxu1 }
 0x564   : > { %12118 = vmatmul.mubr.msk.bf16.vlgmr.msra.gmra.mrb[0].mxu0 %vm1530_vm5, %v15088_v29  ;;  %v8311_v29 = vld [vmem:[#allocation2 + $0x13a] sm:$0xff] }
 0x565   : > { %12121 = vmatprep.mubr.msk.bf16.mxu0 %vm1530_vm5, %v15098_v46  ;;  %12150 = vmatpush3.bf16.msra.mxu0 %v13081_v19  ;;  %v8312_v46 = vld [vmem:[#allocation2 + $0x142] sm:$0xff]  ;;  %v8603_v19 = vld [vmem:[#allocation2 + $0xcb] sm:$0xff] }
 0x566   : > { %12151 = vmatprep.subr.bf16.mxu0 %v13082_v5  ;;  %v15290_v30 = vpop.f32.mrb[228].mxu1 }
 0x567   : > { %v15292_v40 = vpop.f32.mrb[229].mxu1 }
 0x568   : > { %v15294_v28 = vpop.f32.mrb[230].mxu1 }
 0x569   : > { %12152 = vmatpush3.bf16.msra.mxu0 %v13082_v5  ;;  %v15296_v35 = vpop.f32.mrb[231].mxu1  ;;  %v8627_v5 = vpack.c.bf16 %v8604_v0, %v8603_v19  ;;  %v8897_v0 = vld [vmem:[#allocation2 + $0x6c] sm:$0xff] }
 0x56a   : > { %12185 = vmatprep.subr.bf16.mxu0 %v13083_v62  ;;  %v8927_v18 = vpack.c.bf16 %v8898_v47, %v8897_v0  ;;  %v8917_v47 = vld [vmem:[#allocation2 + $0x10c] sm:$0xff] }
 0x56b   : > { %v8921_v0 = vld [vmem:[#allocation2 + $0x12c] sm:$0xff] }
 0x56c   : > { %12122 = vmatmul.mubr.msk.bf16.gmra.mrb[4].mxu0 %vm1530_vm5, %v15100_v14  ;;  %v8328_v14 = vpack.c.bf16 %v8312_v46, %v8311_v29  ;;  %v8607_v29 = vld [vmem:[#allocation2 + $0xeb] sm:$0xff]  ;;  %v8608_v46 = vld [vmem:[#allocation2 + $0xf3] sm:$0xff] }
 0x56d   : > { %12125 = vmatprep.mubr.msk.bf16.mxu0 %vm1530_vm5, %v15106_v23  ;;  %v8588_v23 = vld [vmem:[#allocation2 + $0x53] sm:$0xff] }
 0x574   : > { %12126 = vmatmul.mubr.msk.bf16.gmra.mrb[8].mxu0 %vm1530_vm5, %v15108_v53  ;;  %v8587_v53 = vld [vmem:[#allocation2 + $0x4b] sm:$0xff] }
 0x575   : > { %12129 = vmatprep.mubr.msk.bf16.mxu0 %vm1530_vm5, %v15114_v38  ;;  %v8619_v38 = vpack.c.bf16 %v8588_v23, %v8587_v53  ;;  %v8629_v53 = vpack.c.bf16 %v8608_v46, %v8607_v29  ;;  %v8901_v46 = vld [vmem:[#allocation2 + $0x8c] sm:$0xff] }
 0x57c   : > { %12130 = vmatmul.mubr.msk.bf16.gmra.mrb[12].mxu0 %vm1530_vm5, %v15116_v4  ;;  %v8589_v4 = vld [vmem:[#allocation2 + $0x5b] sm:$0xff] }
 0x57d   : > { %12133 = vmatprep.mubr.msk.bf16.mxu0 %vm1530_vm5, %v15122_v55  ;;  %v8590_v55 = vld [vmem:[#allocation2 + $0x63] sm:$0xff] }
 0x584   : > { %12134 = vmatmul.mubr.msk.bf16.gmra.mrb[16].mxu0 %vm1530_vm5, %v15124_v26  ;;  %v8592_v26 = vld [vmem:[#allocation2 + $0x73] sm:$0xff] }
 0x585   : > { %12137 = vmatprep.mubr.msk.bf16.mxu0 %vm1530_vm5, %v15130_v3  ;;  %v8620_v3 = vpack.c.bf16 %v8590_v55, %v8589_v4  ;;  %v8612_v4 = vld [vmem:[#allocation2 + $0x113] sm:$0xff]  ;;  %v8609_v55 = vld [vmem:[#allocation2 + $0xfb] sm:$0xff] }
 0x58c   : > { %12138 = vmatmul.mubr.msk.bf16.gmra.mrb[20].mxu0 %vm1530_vm5, %v15132_v21  ;;  %v8591_v21 = vld [vmem:[#allocation2 + $0x6b] sm:$0xff] }
 0x58d   : > { %12141 = vmatprep.mubr.msk.bf16.mxu0 %vm1530_vm5, %v15138_v25  ;;  %v13084_v25 = vld [vmem:[%s15512_s3 + $0x188] sm:$0xff]  }
 0x594   : > { %12142 = vmatmul.mubr.msk.bf16.gmra.mrb[24].mxu0 %vm1530_vm5, %v15140_v61  ;;  %v8621_v61 = vpack.c.bf16 %v8592_v26, %v8591_v21 }
 0x595   : > { %12145 = vmatprep.mubr.msk.bf16.mxu0 %vm1530_vm5, %v15146_v20  ;;  %v8594_v20 = vld [vmem:[#allocation2 + $0x83] sm:$0xff] }
 0x596   : > { %v8622_v12 = vpack.c.bf16 %v8594_v20, %v8593_v43  ;;  %v8613_v20 = vld [vmem:[#allocation2 + $0x11b] sm:$0xff] }
 0x59c   : > { %12146 = vmatmul.mubr.msk.bf16.gmra.mrb[28].mxu0 %vm1530_vm5, %v8328_v14  ;;  %v8605_v14 = vld [vmem:[#allocation2 + $0xdb] sm:$0xff] }
 0x59d   : > { %12153 = vmatprep.mubr.msk.bf16.mxu0 %vm1530_vm5, %v8619_v38  ;;  %v8610_v38 = vld [vmem:[#allocation2 + $0x103] sm:$0xff] }
 0x59e   : > { %v8630_v26 = vpack.c.bf16 %v8610_v38, %v8609_v55  ;;  %v8903_v38 = vld [vmem:[#allocation2 + $0x9c] sm:$0xff]  ;;  %v8905_v55 = vld [vmem:[#allocation2 + $0xac] sm:$0xff] }
 0x5a4   : > { %12154 = vmatmul.mubr.msk.bf16.vlgmr.msra.gmra.mrb[0].mxu0 %vm1530_vm5, %v8620_v3  ;;  %v8611_v3 = vld [vmem:[#allocation2 + $0x10b] sm:$0xff] }
 0x5a5   : > { %12157 = vmatprep.mubr.msk.bf16.mxu0 %vm1530_vm5, %v8621_v61  ;;  %12186 = vmatpush3.bf16.msra.mxu0 %v13083_v62  ;;  %v8606_v62 = vld [vmem:[#allocation2 + $0xe3] sm:$0xff]  ;;  %v8631_v21 = vpack.c.bf16 %v8612_v4, %v8611_v3  ;;  %v8616_v61 = vld [vmem:[#allocation2 + $0x133] sm:$0xff] }
 0x5a6   : > { %12187 = vmatprep.subr.bf16.mxu0 %v13084_v25  ;;  %v8628_v23 = vpack.c.bf16 %v8606_v62, %v8605_v14  ;;  %v8899_v62 = vld [vmem:[#allocation2 + $0x7c] sm:$0xff]  ;;  %v8908_v3 = vld [vmem:[#allocation2 + $0xc4] sm:$0xff] }
 0x5a9   : > { %12188 = vmatpush3.bf16.msra.mxu0 %v13084_v25  ;;  %v8615_v25 = vld [vmem:[#allocation2 + $0x12b] sm:$0xff] }
 0x5aa   : > { %v8633_v43 = vpack.c.bf16 %v8616_v61, %v8615_v25  ;;  %v8910_v25 = vld [vmem:[#allocation2 + $0xd4] sm:$0xff]  ;;  %v8907_v61 = vld [vmem:[#allocation2 + $0xbc] sm:$0xff] }
 0x5ac   : > { %12158 = vmatmul.mubr.msk.bf16.gmra.mrb[4].mxu0 %vm1530_vm5, %v8622_v12  ;;  %v8632_v12 = vpack.c.bf16 %v8614_v11, %v8613_v20  ;;  %v8932_v20 = vpack.c.bf16 %v8908_v3, %v8907_v61 }
 0x5ad   : > { %12161 = vmatprep.mubr.msk.bf16.mxu0 %vm1530_vm5, %v8623_v56  ;;  %v8618_v56 = vld [vmem:[#allocation2 + $0x143] sm:$0xff] }
 0x5ae   : > { %v8634_v44 = vpack.c.bf16 %v8618_v56, %v8617_v59  ;;  %v8914_v59 = vld [vmem:[#allocation2 + $0xf4] sm:$0xff]  ;;  %v8911_v56 = vld [vmem:[#allocation2 + $0xdc] sm:$0xff] }
 0x5b4   : > { %12162 = vmatmul.mubr.msk.bf16.gmra.mrb[8].mxu0 %vm1530_vm5, %v8624_v60  ;;  %v8925_v60 = vpack.c.bf16 %v8894_v39, %v8893_v8  ;;  %v8916_v8 = vld [vmem:[#allocation2 + $0x104] sm:$0xff] }
 0x5b5   : > { %12165 = vmatprep.mubr.msk.bf16.mxu0 %vm1530_vm5, %v8625_v50  ;;  %v8896_v50 = vld [vmem:[#allocation2 + $0x64] sm:$0xff] }
 0x5b6   : > { %v8926_v19 = vpack.c.bf16 %v8896_v50, %v8895_v31  ;;  %v8915_v31 = vld [vmem:[#allocation2 + $0xfc] sm:$0xff] }
 0x5b7   : > { %v8936_v50 = vpack.c.bf16 %v8916_v8, %v8915_v31 }
 0x5bc   : > { %12166 = vmatmul.mubr.msk.bf16.gmra.mrb[12].mxu0 %vm1530_vm5, %v8626_v27  ;;  %v8900_v27 = vld [vmem:[#allocation2 + $0x84] sm:$0xff] }
 0x5bd   : > { %12169 = vmatprep.mubr.msk.bf16.mxu0 %vm1530_vm5, %v8627_v5  ;;  %v8902_v5 = vld [vmem:[#allocation2 + $0x94] sm:$0xff]  ;;  %v8928_v29 = vpack.c.bf16 %v8900_v27, %v8899_v62  ;;  %v8919_v27 = vld [vmem:[#allocation2 + $0x11c] sm:$0xff] }
 0x5be   : > { %v8929_v14 = vpack.c.bf16 %v8902_v5, %v8901_v46  ;;  %v8920_v5 = vld [vmem:[#allocation2 + $0x124] sm:$0xff]  ;;  %v8923_v46 = vld [vmem:[#allocation2 + $0x13c] sm:$0xff] }
 0x5c4   : > { %12170 = vmatmul.mubr.msk.bf16.gmra.mrb[16].mxu0 %vm1530_vm5, %v8628_v23  ;;  %v8904_v23 = vld [vmem:[#allocation2 + $0xa4] sm:$0xff] }
 0x5c5   : > { %12173 = vmatprep.mubr.msk.bf16.mxu0 %vm1530_vm5, %v8629_v53  ;;  %v8906_v53 = vld [vmem:[#allocation2 + $0xb4] sm:$0xff]  ;;  %v8930_v4 = vpack.c.bf16 %v8904_v23, %v8903_v38 }
 0x5cc   : > { %12174 = vmatmul.mubr.msk.bf16.gmra.mrb[20].mxu0 %vm1530_vm5, %v8630_v26  ;;  %v8931_v26 = vpack.c.bf16 %v8906_v53, %v8905_v55 }
 0x5cd   : > { %12177 = vmatprep.mubr.msk.bf16.mxu0 %vm1530_vm5, %v8631_v21  ;;  %v8909_v21 = vld [vmem:[#allocation2 + $0xcc] sm:$0xff] }
 0x5ce   : > { %v8933_v11 = vpack.c.bf16 %v8910_v25, %v8909_v21 }
 0x5d4   : > { %12178 = vmatmul.mubr.msk.bf16.gmra.mrb[24].mxu0 %vm1530_vm5, %v8632_v12  ;;  %v8913_v12 = vld [vmem:[#allocation2 + $0xec] sm:$0xff] }
 0x5d5   : > { %12181 = vmatprep.mubr.msk.bf16.mxu0 %vm1530_vm5, %v8633_v43  ;;  %v8912_v43 = vld [vmem:[#allocation2 + $0xe4] sm:$0xff]  ;;  %v8935_v39 = vpack.c.bf16 %v8914_v59, %v8913_v12 }
 0x5dc   : > { %12182 = vmatmul.mubr.msk.bf16.gmra.mrb[28].mxu0 %vm1530_vm5, %v8634_v44  ;;  %v8934_v44 = vpack.c.bf16 %v8912_v43, %v8911_v56 }
 0x5dd   : > { %12189 = vmatprep.mubr.msk.bf16.mxu0 %vm1530_vm5, %v8925_v60  ;;  %v8918_v60 = vld [vmem:[#allocation2 + $0x114] sm:$0xff] }
 0x5e4   : > { %12190 = vmatmul.mubr.msk.bf16.vlgmr.msra.gmra.mrb[0].mxu0 %vm1530_vm5, %v8926_v19  ;;  %v8937_v19 = vpack.c.bf16 %v8918_v60, %v8917_v47 }
 0x5e5   : > { %12193 = vmatprep.mubr.msk.bf16.mxu0 %vm1530_vm5, %v8927_v18  ;;  %v8922_v18 = vld [vmem:[#allocation2 + $0x134] sm:$0xff] }
 0x5e6   : > { %v8939_v62 = vpack.c.bf16 %v8922_v18, %v8921_v0 }
 0x5ec   : > { %12194 = vmatmul.mubr.msk.bf16.gmra.mrb[4].mxu0 %vm1530_vm5, %v8928_v29  ;;  %v8938_v29 = vpack.c.bf16 %v8920_v5, %v8919_v27 }
 0x5ed   : > { %12197 = vmatprep.mubr.msk.bf16.mxu0 %vm1530_vm5, %v8929_v14  ;;  %v8924_v14 = vld [vmem:[#allocation2 + $0x144] sm:$0xff] }
 0x5ee   : > { %v8940_v23 = vpack.c.bf16 %v8924_v14, %v8923_v46 }
 0x5f4   : > { %12198 = vmatmul.mubr.msk.bf16.gmra.mrb[8].mxu0 %vm1530_vm5, %v8930_v4 }
 0x5f5   : > { %12201 = vmatprep.mubr.msk.bf16.mxu0 %vm1530_vm5, %v8931_v26 }
 0x5fc   : > { %12202 = vmatmul.mubr.msk.bf16.gmra.mrb[12].mxu0 %vm1530_vm5, %v8932_v20 }
 0x5fd   : > { %12205 = vmatprep.mubr.msk.bf16.mxu0 %vm1530_vm5, %v8933_v11 }
 0x604   : > { %12206 = vmatmul.mubr.msk.bf16.gmra.mrb[16].mxu0 %vm1530_vm5, %v8934_v44 }
 0x605   : > { %12209 = vmatprep.mubr.msk.bf16.mxu0 %vm1530_vm5, %v8935_v39 }
 0x60c   : > { %12210 = vmatmul.mubr.msk.bf16.gmra.mrb[20].mxu0 %vm1530_vm5, %v8936_v50 }
 0x60d   : > { %12213 = vmatprep.mubr.msk.bf16.mxu0 %vm1530_vm5, %v8937_v19 }
 0x614   : > { %12214 = vmatmul.mubr.msk.bf16.gmra.mrb[24].mxu0 %vm1530_vm5, %v8938_v29 }
 0x615   : > { %12217 = vmatprep.mubr.msk.bf16.mxu0 %vm1530_vm5, %v8939_v62 }
 0x61c   : > { %12218 = vmatmul.mubr.msk.bf16.gmra.mrb[28].mxu0 %vm1530_vm5, %v8940_v23  ;;  %vm9617_vm5 = vmor %vm9616_vm4, %vm15491_vm3 }
 0x6b7   : > { %v12191_v53 = vpop.f32.mrb[0].mxu0 }
 0x6b8   : > { %v12253_v38 = vadd.f32 %v12191_v53, %v15184_v32  ;;  %v9040_v4 = vpop.f32.mrb[1].mxu0 }
 0x6b9   : > { %v12254_v55 = vadd.f32 %v9040_v4, %v15186_v52  ;;  %v12192_v26 = vpop.f32.mrb[2].mxu0 }
 0x6ba   : > { %v12255_v3 = vadd.f32 %v12192_v26, %v15188_v1  ;;  %v9043_v21 = vpop.f32.mrb[3].mxu0  ;;  %v9235_v61 = vrot.slane %v12253_v38, 1 }
 0x6bb   : > { %v12256_v25 = vadd.f32 %v9043_v21, %v15190_v57  ;;  %v9232_v11 = vrot.slane %v12254_v55, 1 }
 0x6bc   : > { %v9237_v20 = vrot.slane %v12255_v3, 1 }
 0x6bd   : > { %v9233_v43 = vrot.slane %v12256_v25, 1 }
 0x6be   : > { %v9238_v12 = vsel %vm9231_vm12, %v9235_v61, %v9237_v20 }
 0x6bf   : > { %v9329_v59 = vmax.f32 %v12253_v38, %v9238_v12  ;;  %v9234_v56 = vsel %vm9231_vm12, %v9232_v11, %v9233_v43  ;;  %v9236_v32 = vsel %vm9231_vm12, %v9233_v43, %v9235_v61  ;;  %v12195_v44 = vpop.f32.mrb[4].mxu0 }
 0x6c0   : > { %v9327_v52 = vmax.f32 %v12254_v55, %v9234_v56  ;;  %v9328_v39 = vmax.f32 %v12256_v25, %v9236_v32  ;;  %v12257_v1 = vadd.f32 %v12195_v44, %v15195_v7  ;;  %v9056_v8 = vpop.f32.mrb[5].mxu0 }
 0x6c1   : > { %v12258_v60 = vadd.f32 %v9056_v8, %v15197_v54  ;;  %v12196_v57 = vpop.f32.mrb[6].mxu0  ;;  %v9390_v29 = vrot.slane %v9329_v59, 2 }
 0x6c2   : > { %v12259_v31 = vadd.f32 %v12196_v57, %v15199_v9  ;;  %v9059_v50 = vpop.f32.mrb[7].mxu0  ;;  %v9243_v0 = vrot.slane %v12257_v1, 1 }
 0x6c3   : > { %v9239_v47 = vrot.slane %v12258_v60, 1  ;;  %v15369_v19 = vadd.f32 %v9059_v50, %v15201_v13 }
 0x6c4   : > { %v9245_v18 = vrot.slane %v12259_v31, 1 }
 0x6c5   : > { %v9240_v27 = vsel %vm9231_vm12, %v9237_v20, %v9239_v47  ;;  %v9241_v5 = vrot.slane %v15369_v19, 1 }
 0x6c6   : > { %v9330_v62 = vmax.f32 %v12255_v3, %v9240_v27  ;;  %v9246_v7 = vsel %vm9231_vm12, %v9243_v0, %v9245_v18 }
 0x6c7   : > { %v15374_v54 = vmax.f32 %v12257_v1, %v9246_v7  ;;  %v9242_v9 = vsel %vm9231_vm12, %v9239_v47, %v9241_v5  ;;  %v9244_v46 = vsel %vm9231_vm12, %v9241_v5, %v9243_v0  ;;  %v12199_v14 = vpop.f32.mrb[8].mxu0 }
 0x6c8   : > { %v9391_v13 = vrot.slane %v9330_v62, 2  ;;  %v9331_v23 = vmax.f32 %v12258_v60, %v9242_v9  ;;  %v9332_v53 = vmax.f32 %v15369_v19, %v9244_v46  ;;  %v15380_v38 = vadd.f32 %v12199_v14, %v15213_v6  ;;  %v9072_v4 = vpop.f32.mrb[9].mxu0 }
 0x6c9   : > { %v9397_v55 = vrot.slane %v15374_v54, 2  ;;  %v12262_v26 = vadd.f32 %v9072_v4, %v15215_v58  ;;  %v12200_v3 = vpop.f32.mrb[10].mxu0 }
 0x6ca   : > { %v9392_v21 = vsel %vm9389_vm13, %v9390_v29, %v9391_v13  ;;  %v9393_v25 = vrot.slane %v9331_v23, 2  ;;  %v9075_v61 = vpop.f32.mrb[11].mxu0  ;;  %v12263_v43 = vadd.f32 %v12200_v3, %v15217_v37  ;;  %v9251_v58 = vrot.slane %v15380_v38, 1 }
 0x6cb   : > { %v9478_v20 = vmax.f32 %v9327_v52, %v9392_v21  ;;  %v9247_v11 = vrot.slane %v12262_v26, 1  ;;  %v12264_v12 = vadd.f32 %v9075_v61, %v15219_v49 }
 0x6cc   : > { %v9394_v6 = vsel %vm9389_vm13, %v9391_v13, %v9393_v25  ;;  %v9253_v44 = vrot.slane %v12263_v43, 1 }
 0x6cd   : > { %9508 = vst.msk [vmem:[#allocation3] sm:$0xff] %vm9507_vm14, %v9478_v20  ;;  %v9479_v59 = vmax.f32 %v9328_v39, %v9394_v6  ;;  %v9248_v56 = vsel %vm9231_vm12, %v9245_v18, %v9247_v11  ;;  %v9249_v1 = vrot.slane %v12264_v12, 1 }
 0x6ce   : > { %v9334_v32 = vmax.f32 %v12259_v31, %v9248_v56  ;;  %v9254_v37 = vsel %vm9231_vm12, %v9251_v58, %v9253_v44 }
 0x6cf   : > { %9509 = vst.msk [vmem:[#allocation3 + $0x8] sm:$0xff] %vm9507_vm14, %v9479_v59  ;;  %v12203_v52 = vpop.f32.mrb[12].mxu0  ;;  %v9250_v49 = vsel %vm9231_vm12, %v9247_v11, %v9249_v1  ;;  %v9252_v60 = vsel %vm9231_vm12, %v9249_v1, %v9251_v58  ;;  %v9337_v39 = vmax.f32 %v15380_v38, %v9254_v37 }
 0x6d0   : > { %v9399_v8 = vrot.slane %v9334_v32, 2  ;;  %v9088_v57 = vpop.f32.mrb[13].mxu0  ;;  %v9335_v50 = vmax.f32 %v12262_v26, %v9250_v49  ;;  %v9336_v47 = vmax.f32 %v12264_v12, %v9252_v60  ;;  %v15397_v19 = vadd.f32 %v12203_v52, %v15225_v17 }
 0x6d1   : > { %v12204_v31 = vpop.f32.mrb[14].mxu0  ;;  %v12266_v18 = vadd.f32 %v9088_v57, %v15227_v63 }
 0x6d2   : > { %v9400_v0 = vsel %vm9389_vm13, %v9397_v55, %v9399_v8  ;;  %v12267_v27 = vadd.f32 %v12204_v31, %v15229_v48  ;;  %v9091_v5 = vpop.f32.mrb[15].mxu0  ;;  %v9401_v7 = vrot.slane %v9335_v50, 2  ;;  %v9403_v29 = vrot.slane %v9336_v47, 2 }
 0x6d3   : > { %v9482_v62 = vmax.f32 %v9331_v23, %v9400_v0  ;;  %v9255_v9 = vrot.slane %v12266_v18, 1  ;;  %v12268_v14 = vadd.f32 %v9091_v5, %v15231_v2  ;;  %v9259_v38 = vrot.slane %v15397_v19, 1 }
 0x6d4   : > { %v9261_v46 = vrot.slane %v12267_v27, 1  ;;  %v9402_v17 = vsel %vm9389_vm13, %v9399_v8, %v9401_v7  ;;  %v9404_v13 = vsel %vm9389_vm13, %v9401_v7, %v9403_v29 }
 0x6d5   : > { %9512 = vst.msk [vmem:[#allocation3 + $0x20] sm:$0xff] %vm9507_vm14, %v9482_v62  ;;  %v9483_v4 = vmax.f32 %v9332_v53, %v9402_v17  ;;  %v9484_v63 = vmax.f32 %v15374_v54, %v9404_v13  ;;  %v9256_v48 = vsel %vm9231_vm12, %v9253_v44, %v9255_v9  ;;  %v9257_v26 = vrot.slane %v12268_v14, 1 }
 0x6d6   : > { %v9338_v23 = vmax.f32 %v12263_v43, %v9256_v48  ;;  %v9262_v55 = vsel %vm9231_vm12, %v9259_v38, %v9261_v46 }
 0x6d7   : > { %v12207_v3 = vpop.f32.mrb[16].mxu0  ;;  %9513 = vst.msk [vmem:[#allocation3 + $0x28] sm:$0xff] %vm9507_vm14, %v9483_v4  ;;  %9514 = vst.msk [vmem:[#allocation3 + $0x30] sm:$0xff] %vm9507_vm14, %v9484_v63  ;;  %v9341_v2 = vmax.f32 %v15397_v19, %v9262_v55  ;;  %v9258_v53 = vsel %vm9231_vm12, %v9255_v9, %v9257_v26  ;;  %v9260_v54 = vsel %vm9231_vm12, %v9257_v26, %v9259_v38 }
 0x6d8   : > { %v12269_v21 = vadd.f32 %v12207_v3, %v15237_v45  ;;  %v9104_v25 = vpop.f32.mrb[17].mxu0  ;;  %v9407_v61 = vrot.slane %v9338_v23, 2  ;;  %v9339_v43 = vmax.f32 %v12266_v18, %v9258_v53  ;;  %v9340_v12 = vmax.f32 %v12268_v14, %v9260_v54 }
 0x6d9   : > { %v12270_v20 = vadd.f32 %v9104_v25, %v15239_v22  ;;  %v12208_v11 = vpop.f32.mrb[18].mxu0 }
 0x6da   : > { %v9107_v6 = vpop.f32.mrb[19].mxu0  ;;  %v15418_v56 = vadd.f32 %v12208_v11, %v15241_v10  ;;  %v9409_v32 = vrot.slane %v9339_v43, 2  ;;  %v9411_v45 = vrot.slane %v9340_v12, 2  ;;  %v9267_v44 = vrot.slane %v12269_v21, 1 }
 0x6db   : > { %v9263_v59 = vrot.slane %v12270_v20, 1  ;;  %v12272_v58 = vadd.f32 %v9107_v6, %v15243_v42 }
 0x6dc   : > { %v9269_v52 = vrot.slane %v15418_v56, 1  ;;  %v9410_v22 = vsel %vm9389_vm13, %v9407_v61, %v9409_v32  ;;  %v9412_v37 = vsel %vm9389_vm13, %v9409_v32, %v9411_v45 }
 0x6dd   : > { %v9264_v1 = vsel %vm9231_vm12, %v9261_v46, %v9263_v59  ;;  %v9265_v8 = vrot.slane %v12272_v58, 1  ;;  %v9487_v60 = vmax.f32 %v9336_v47, %v9410_v22  ;;  %v9488_v57 = vmax.f32 %v9337_v39, %v9412_v37 }
 0x6de   : > { %v9342_v49 = vmax.f32 %v12267_v27, %v9264_v1  ;;  %v9270_v10 = vsel %vm9231_vm12, %v9267_v44, %v9269_v52  ;;  %v9539_v19 = vld [vmem:[#allocation3 + $0x24] ss:$2 sm:$0x7f] }
 0x6df   : > { %v12211_v50 = vpop.f32.mrb[20].mxu0  ;;  %v15426_v31 = vmax.f32 %v12269_v21, %v9270_v10  ;;  %v9266_v0 = vsel %vm9231_vm12, %v9263_v59, %v9265_v8  ;;  %v9268_v18 = vsel %vm9231_vm12, %v9265_v8, %v9267_v44  ;;  %9551 = vrot.lane.b32.xlu0 %v9539_v19, %s13099_s23  ;;  %9517 = vst.msk [vmem:[#allocation3 + $0x48] sm:$0xff] %vm9507_vm14, %v9487_v60  ;;  %9518 = vst.msk [vmem:[#allocation3 + $0x50] sm:$0xff] %vm9507_vm14, %v9488_v57 }
 0x6e0   : > { %v9415_v42 = vrot.slane %v9342_v49, 2  ;;  %v9120_v5 = vpop.f32.mrb[21].mxu0  ;;  %v9343_v39 = vmax.f32 %v12270_v20, %v9266_v0  ;;  %v9344_v47 = vmax.f32 %v12272_v58, %v9268_v18  ;;  %v12273_v27 = vadd.f32 %v12211_v50, %v15261_v51 }
 0x6e1   : > { %v12274_v62 = vadd.f32 %v9120_v5, %v15263_v41  ;;  %v12212_v7 = vpop.f32.mrb[22].mxu0  ;;  %v9421_v29 = vrot.slane %v15426_v31, 2 }
 0x6e2   : > { %v15437_v9 = vadd.f32 %v12212_v7, %v15265_v24  ;;  %v9123_v46 = vpop.f32.mrb[23].mxu0  ;;  %v9417_v14 = vrot.slane %v9343_v39, 2  ;;  %v9419_v17 = vrot.slane %v9344_v47, 2  ;;  %v9275_v48 = vrot.slane %v12273_v27, 1 }
 0x6e3   : > { %v9271_v13 = vrot.slane %v12274_v62, 1  ;;  %v12276_v4 = vadd.f32 %v9123_v46, %v15267_v34 }
 0x6e4   : > { %v9277_v38 = vrot.slane %v15437_v9, 1  ;;  %v9418_v63 = vsel %vm9389_vm13, %v9415_v42, %v9417_v14  ;;  %v9420_v51 = vsel %vm9389_vm13, %v9417_v14, %v9419_v17  ;;  %v9422_v41 = vsel %vm9389_vm13, %v9419_v17, %v9421_v29 }
 0x6e5   : > { %v9491_v23 = vmax.f32 %v9340_v12, %v9418_v63  ;;  %v9492_v55 = vmax.f32 %v9341_v2, %v9420_v51  ;;  %v9493_v26 = vmax.f32 %v9342_v49, %v9422_v41  ;;  %v9272_v24 = vsel %vm9231_vm12, %v9269_v52, %v9271_v13 }
 0x6e6   : > { %v9346_v3 = vmax.f32 %v15418_v56, %v9272_v24  ;;  %v9278_v21 = vsel %vm9231_vm12, %v9275_v48, %v9277_v38  ;;  %v9273_v25 = vrot.slane %v12276_v4, 1 }
 0x6e7   : > { %v12215_v61 = vpop.f32.mrb[24].mxu0  ;;  %9521 = vst.msk [vmem:[#allocation3 + $0x68] sm:$0xff] %vm9507_vm14, %v9491_v23  ;;  %9522 = vst.msk [vmem:[#allocation3 + $0x70] sm:$0xff] %vm9507_vm14, %v9492_v55  ;;  %v9349_v34 = vmax.f32 %v12273_v27, %v9278_v21 }
 0x6e8   : > { %9523 = vst.msk [vmem:[#allocation3 + $0x78] sm:$0xff] %vm9507_vm14, %v9493_v26  ;;  %v12277_v53 = vadd.f32 %v12215_v61, %v15272_v36  ;;  %v9136_v54 = vpop.f32.mrb[25].mxu0  ;;  %v9274_v2 = vsel %vm9231_vm12, %v9271_v13, %v9273_v25  ;;  %v9276_v20 = vsel %vm9231_vm12, %v9273_v25, %v9275_v48 }
 0x6e9   : > { %v12278_v11 = vadd.f32 %v9136_v54, %v15274_v33  ;;  %v12216_v43 = vpop.f32.mrb[26].mxu0  ;;  %v9429_v12 = vrot.slane %v9349_v34, 2  ;;  %v9347_v6 = vmax.f32 %v12274_v62, %v9274_v2  ;;  %v9348_v59 = vmax.f32 %v12276_v4, %v9276_v20 }
 0x6ea   : > { %v9139_v56 = vpop.f32.mrb[27].mxu0  ;;  %v12279_v32 = vadd.f32 %v12216_v43, %v15276_v16  ;;  %v9283_v36 = vrot.slane %v12277_v53, 1 }
 0x6eb   : > { %v9279_v58 = vrot.slane %v12278_v11, 1  ;;  %v12280_v45 = vadd.f32 %v9139_v56, %v15278_v15  ;;  %v9425_v44 = vrot.slane %v9347_v6, 2  ;;  %v9427_v1 = vrot.slane %v9348_v59, 2 }
 0x6ec   : > { %v9285_v8 = vrot.slane %v12279_v32, 1 }
 0x6ed   : > { %v9280_v52 = vsel %vm9231_vm12, %v9277_v38, %v9279_v58  ;;  %v9281_v22 = vrot.slane %v12280_v45, 1  ;;  %v9428_v37 = vsel %vm9389_vm13, %v9425_v44, %v9427_v1  ;;  %v9430_v33 = vsel %vm9389_vm13, %v9427_v1, %v9429_v12 }
 0x6ee   : > { %v9350_v49 = vmax.f32 %v15437_v9, %v9280_v52  ;;  %v9496_v60 = vmax.f32 %v15426_v31, %v9428_v37  ;;  %v9497_v57 = vmax.f32 %v9346_v3, %v9430_v33  ;;  %v9286_v16 = vsel %vm9231_vm12, %v9283_v36, %v9285_v8 }
 0x6ef   : > { %v12219_v10 = vpop.f32.mrb[28].mxu0  ;;  %v9543_v15 = vld [vmem:[#allocation3 + $0x6c] ss:$2 sm:$0x7f]  ;;  %v9353_v50 = vmax.f32 %v12277_v53, %v9286_v16  ;;  %v9282_v19 = vsel %vm9231_vm12, %v9279_v58, %v9281_v22  ;;  %v9284_v42 = vsel %vm9231_vm12, %v9281_v22, %v9283_v36  ;;  %v9567_v12 = vlaneseq }
 0x6f0   : > { %9555 = vrot.lane.b32.xlu0 %v9543_v15, %s13099_s23  ;;  %v9152_v0 = vpop.f32.mrb[29].mxu0  ;;  %9526 = vst.msk [vmem:[#allocation3 + $0x90] sm:$0xff] %vm9507_vm14, %v9496_v60  ;;  %9527 = vst.msk [vmem:[#allocation3 + $0x98] sm:$0xff] %vm9507_vm14, %v9497_v57  ;;  %v9351_v18 = vmax.f32 %v12278_v11, %v9282_v19  ;;  %v9352_v5 = vmax.f32 %v12280_v45, %v9284_v42  ;;  %v12281_v31 = vadd.f32 %v12219_v10, %v15290_v30  ;;  %v9537_v45 = vld [vmem:[#allocation3] ss:$2 sm:$0x7f] }
 0x6f1   : > { %v12282_v39 = vadd.f32 %v9152_v0, %v15292_v40  ;;  %v12220_v47 = vpop.f32.mrb[30].mxu0  ;;  %v9437_v27 = vrot.slane %v9353_v50, 2  ;;  %v9568_v6 = vshrl.u32 %v9567_v12, 7  ;;  %v9618_v16 = vld [vmem:[%s224_s29] sm:$0xff] }
 0x6f2   : > { %v12283_v62 = vadd.f32 %v12220_v47, %v15294_v28  ;;  %v9155_v7 = vpop.f32.mrb[31].mxu0  ;;  %v9433_v29 = vrot.slane %v9351_v18, 2  ;;  %v9435_v9 = vrot.slane %v9352_v5, 2  ;;  %v9291_v4 = vrot.slane %v12281_v31, 1 }
 0x6f3   : > { %v9287_v46 = vrot.slane %v12282_v39, 1  ;;  %v12284_v17 = vadd.f32 %v9155_v7, %v15296_v35  ;;  %v9569_v59 = vsub.s32 0, %v9568_v6  ;;  %v9573_v58 = vsub.s32 1, %v9568_v6 }
 0x6f4   : > { %v9293_v14 = vrot.slane %v12283_v62, 1  ;;  %v9436_v13 = vsel %vm9389_vm13, %v9433_v29, %v9435_v9  ;;  %v9438_v38 = vsel %vm9389_vm13, %v9435_v9, %v9437_v27  ;;  %v9581_v50 = vsub.s32 3, %v9568_v6  ;;  %v9624_v29 = vld [vmem:[%s224_s29 + $0x8] sm:$0xff] }
 0x6f5   : > { %v9500_v63 = vmax.f32 %v9349_v34, %v9436_v13  ;;  %v9501_v30 = vmax.f32 %v9350_v49, %v9438_v38  ;;  %v9288_v40 = vsel %vm9231_vm12, %v9285_v8, %v9287_v46  ;;  %v9289_v48 = vrot.slane %v12284_v17, 1  ;;  %v9541_v8 = vld [vmem:[#allocation3 + $0x48] ss:$2 sm:$0x7f] }
 0x6f6   : > { %v9354_v51 = vmax.f32 %v12279_v32, %v9288_v40  ;;  %v9294_v41 = vsel %vm9231_vm12, %v9291_v4, %v9293_v14  ;;  %v9358_v28 = vmax.f32 %v12283_v62, %v9293_v14  ;;  %v9565_v32 = vld [vmem:[%s15513_s4] sm:$0xf]  ;;  %v9577_v19 = vsub.s32 2, %v9568_v6 }
 0x6f7   : > { %9530 = vst.msk [vmem:[#allocation3 + $0xb0] sm:$0xff] %vm9507_vm14, %v9500_v63  ;;  %9531 = vst.msk [vmem:[#allocation3 + $0xb8] sm:$0xff] %vm9507_vm14, %v9501_v30  ;;  %v9357_v23 = vmax.f32 %v12281_v31, %v9294_v41  ;;  %v9290_v26 = vsel %vm9231_vm12, %v9287_v46, %v9289_v48  ;;  %v9292_v24 = vsel %vm9231_vm12, %v9289_v48, %v9291_v4  ;;  %v9545_v5 = vld [vmem:[#allocation3 + $0x90] ss:$2 sm:$0x7f] }
 0x6f8   : > { %v9439_v35 = vrot.slane %v9354_v51, 2  ;;  %v9447_v55 = vrot.slane %v9358_v28, 2  ;;  %v9355_v21 = vmax.f32 %v12282_v39, %v9290_v26  ;;  %v9356_v25 = vmax.f32 %v12284_v17, %v9292_v24 }
 0x6f9   : > { %v9445_v3 = vrot.slane %v9357_v23, 2  ;;  %v9570_v44 = vrot.slane %v9565_v32, %v9569_v59  ;;  %v9574_v36 = vrot.slane %v9565_v32, %v9573_v58  ;;  %v9582_v42 = vrot.slane %v9565_v32, %v9581_v50 }
 0x6fa   : > { %v9440_v61 = vsel %vm9389_vm13, %v9437_v27, %v9439_v35  ;;  %v9443_v54 = vrot.slane %v9356_v25, 2 }
 0x6fb   : > { %v9502_v34 = vmax.f32 %v9351_v18, %v9440_v61  ;;  %v9448_v53 = vsel %vm9389_vm13, %v9445_v3, %v9447_v55  ;;  %v9578_v18 = vrot.slane %v9565_v32, %v9577_v19 }
 0x6fc   : > { %v9506_v2 = vmax.f32 %v9355_v21, %v9448_v53  ;;  %v9446_v20 = vsel %vm9389_vm13, %v9443_v54, %v9445_v3 }
 0x6fd   : > { %9532 = vst.msk [vmem:[#allocation3 + $0xc0] sm:$0xff] %vm9507_vm14, %v9502_v34  ;;  %v9505_v11 = vmax.f32 %v9354_v51, %v9446_v20 }
 0x6fe   : > { %9536 = vst.msk [vmem:[#allocation3 + $0xe0] sm:$0xff] %vm9507_vm14, %v9506_v2 }
 0x6ff   : > { %9535 = vst.msk [vmem:[#allocation3 + $0xd8] sm:$0xff] %vm9507_vm14, %v9505_v11 }
 0x704   : > { %v9547_v43 = vld [vmem:[#allocation3 + $0xb4] ss:$2 sm:$0x7f] }
 0x705   : > { %9559 = vrot.lane.b32.xlu1 %v9547_v43, %s13099_s23 }
 0x706   : > { %v9549_v0 = vld [vmem:[#allocation3 + $0xd8] ss:$2 sm:$0x7f] }
 0x707   : > { %v9590_v39 = vadd.f32 %v9582_v42, %v9549_v0 }
 0x709   : > { %v9594_v7 = vmax.f32 %v9590_v39, 0.0 }
 0x751   : > { %v9552_v56 = vpop.permute.xlu0 %9551 }
 0x752   : > { %v9562_v1 = vsel %vm9507_vm14, %v9537_v45, %v9552_v56 }
 0x753   : > { %v9587_v52 = vadd.f32 %v9570_v44, %v9562_v1 }
 0x755   : > { %v9591_v60 = vmax.f32 %v9587_v52, 0.0 }
 0x762   : > { %v9556_v22 = vpop.permute.xlu0 %9555 }
 0x763   : > { %v9563_v33 = vsel %vm9507_vm14, %v9541_v8, %v9556_v22 }
 0x764   : > { %v9588_v49 = vadd.f32 %v9574_v36, %v9563_v33 }
 0x766   : > { %v9592_v57 = vmax.f32 %v9588_v49, 0.0 }
 0x768   : > { %v10421_v10 = vpack.c.bf16 %v9592_v57, %v9591_v60 }
 0x76a   : > { %v9619_v15 = vsel %vm9617_vm5, %v10421_v10, %v9618_v16 }
 0x76b   : > { %9620 = vst [vmem:[%s224_s29] sm:$0xff] %v9619_v15 }
 0x777   : > { %v9560_v31 = vpop.permute.xlu1 %9559 }
 0x778   : > { %v9564_v47 = vsel %vm9507_vm14, %v9545_v5, %v9560_v31 }
 0x779   : > { %v9589_v27 = vadd.f32 %v9578_v18, %v9564_v47 }
 0x77b   : > { %v9593_v62 = vmax.f32 %v9589_v27, 0.0 }
 0x77d   : > { %v10422_v9 = vpack.c.bf16 %v9594_v7, %v9593_v62 }
 0x77f   : > { %v9625_v46 = vsel %vm9623_vm8, %v10422_v9, %v9624_v29 }
 0x780   : > { %9626 = vst [vmem:[%s224_s29 + $0x8] sm:$0xff] %v9625_v46 }
 0x781 PF: > { %s15_s18 = sadd.s32 1, %s13093_s18  }
 0x782   : > { %p12_p4 = scmp.ge.s32.totalorder %s15_s18, 4  }
 0x784   :  { %14 = sbr.rel (!%p12_p4) target bundleno = 1 (0x1), region = 103 }

</bundles_post_ra>
